<compile_context>
chip_gen: v5e
topology: v5e:2x2
jax: 0.10.0
libtpu: 0.0.40
codegen_flags: <defaults>
</compile_context>

<pallas_src>
import functools

import jax
import jax.numpy as jnp
from jax.experimental import pallas as pl
from jax.experimental.pallas import tpu as pltpu

HIDDEN = 3000  # fixed by the module


def _round_up(x, m):
    return ((x + m - 1) // m) * m


def _mlp_kernel(x_ref, w1_ref, b1_ref, w2_ref, b2_ref, out_ref, h_ref, acc_ref):
    """One (batch-tile, K-tile) grid step.

    x_ref  : (TM, TK)        bf16
    w1_ref : (TK, HP)        bf16   (weight-stationary across batch axis)
    b1_ref : (1, HP)         f32
    w2_ref : (HP, DOUT_P)    bf16   (weight-stationary)
    b2_ref : (1, DOUT_P)     f32
    out_ref: (TM, DOUT_P)    f32
    h_ref  : (TM, HP)        f32
    acc_ref: (TM, HP)        f32 scratch accumulator for matmul 1
    """
    k = pl.program_id(1)

    @pl.when(k == 0)
    def _():
        acc_ref[...] = jnp.zeros_like(acc_ref)

    # Matmul 1 partial sum: bf16 x bf16 -> f32 on the MXU.
    acc_ref[...] += jnp.dot(
        x_ref[...], w1_ref[...], preferred_element_type=jnp.float32
    )

    @pl.when(k == pl.num_programs(1) - 1)
    def _():
        pre = acc_ref[...] + b1_ref[...]
        # Sigmoid epilogue in f32 (exp on EUP); exact reciprocal keeps the
        # numerics tight — the kernel is weight-streaming bound, not VALU bound.
        h = 1.0 / (1.0 + jnp.exp(-pre))
        h_ref[...] = h
        # Matmul 2: cast h to bf16 for the MXU, f32 accumulation.
        out = jnp.dot(
            h.astype(jnp.bfloat16), w2_ref[...],
            preferred_element_type=jnp.float32,
        ) + b2_ref[...]
        out_ref[...] = out


@functools.partial(jax.jit, static_argnames=("tm", "tk"))
def target_model_forward(x, w1, b1, w2, b2, *, tm=256, tk=512):
    """x: [B, ...] (any trailing dims, flattened row-major like x.view(B, -1)).

    w1: [input_dim, 3000], b1: [3000], w2: [3000, output_dim], b2: [output_dim]
    Returns (output [B, output_dim] f32, h [B, 3000] f32).
    """
    batch = x.shape[0]
    x2d = x.reshape(batch, -1)
    d_in = x2d.shape[1]
    d_out = w2.shape[1]

    # ---- padded / tiled sizes ------------------------------------------------
    hp = _round_up(HIDDEN, 128)          # 3072: lane-dense hidden dim
    d_out_p = _round_up(d_out, 128)      # lane-dense output dim
    tm = min(tm, _round_up(batch, 8))    # batch tile (>= 8 sublanes)
    b_p = _round_up(batch, tm)
    d_in_p = _round_up(d_in, 128)
    tk = min(tk, d_in_p)                 # K tile (multiple of 128)
    d_in_p = _round_up(d_in_p, tk)

    # ---- zero-padded operands (padding contributes exactly zero) ------------
    x_p = jnp.zeros((b_p, d_in_p), jnp.bfloat16)
    x_p = x_p.at[:batch, :d_in].set(x2d.astype(jnp.bfloat16))
    w1_p = jnp.zeros((d_in_p, hp), jnp.bfloat16)
    w1_p = w1_p.at[:d_in, :HIDDEN].set(w1.astype(jnp.bfloat16))
    b1_p = jnp.zeros((1, hp), jnp.float32)
    b1_p = b1_p.at[0, :HIDDEN].set(b1.astype(jnp.float32))
    # Padded hidden lanes produce sigmoid(0)=0.5; padded w2 rows are zero so
    # they never leak into the output, and h is sliced back to 3000 below.
    w2_p = jnp.zeros((hp, d_out_p), jnp.bfloat16)
    w2_p = w2_p.at[:HIDDEN, :d_out].set(w2.astype(jnp.bfloat16))
    b2_p = jnp.zeros((1, d_out_p), jnp.float32)
    b2_p = b2_p.at[0, :d_out].set(b2.astype(jnp.float32))

    grid = (b_p // tm, d_in_p // tk)

    # ---- per-generation VMEM limit (v7x has only 64 MiB physical) -----------
    try:
        vmem_cap = pltpu.get_tpu_info().vmem_capacity_bytes
    except Exception:  # pragma: no cover - conservative fallback
        vmem_cap = 64 << 20
    vmem_limit = int(min((vmem_cap * 3) // 4, 100 << 20))

    out_p, h_p_arr = pl.pallas_call(
        _mlp_kernel,
        out_shape=(
            jax.ShapeDtypeStruct((b_p, d_out_p), jnp.float32),  # output
            jax.ShapeDtypeStruct((b_p, hp), jnp.float32),       # h
        ),
        grid_spec=pltpu.PrefetchScalarGridSpec(
            num_scalar_prefetch=0,
            grid=grid,
            in_specs=[
                pl.BlockSpec((tm, tk), lambda i, k: (i, k)),         # x tile
                pl.BlockSpec((tk, hp), lambda i, k: (k, 0)),         # w1 K-slab
                pl.BlockSpec((1, hp), lambda i, k: (0, 0)),          # b1
                pl.BlockSpec((hp, d_out_p), lambda i, k: (0, 0)),    # w2 (stationary)
                pl.BlockSpec((1, d_out_p), lambda i, k: (0, 0)),     # b2
            ],
            out_specs=[
                pl.BlockSpec((tm, d_out_p), lambda i, k: (i, 0)),    # output tile
                pl.BlockSpec((tm, hp), lambda i, k: (i, 0)),         # h tile
            ],
            scratch_shapes=[pltpu.VMEM((tm, hp), jnp.float32)],
        ),
        compiler_params=pltpu.CompilerParams(
            dimension_semantics=("parallel", "arbitrary"),
            vmem_limit_bytes=vmem_limit,
        ),
    )(x_p, w1_p, b1_p, w2_p, b2_p)

    return out_p[:batch, :d_out], h_p_arr[:batch, :HIDDEN]


def init_params(key, input_dim, output_dim):
    """Deterministic synthetic parameters (PyTorch Linear-style uniform init)."""
    k1, k2, k3, k4 = jax.random.split(key, 4)
    lim1 = 1.0 / jnp.sqrt(input_dim)
    lim2 = 1.0 / jnp.sqrt(HIDDEN)
    w1 = jax.random.uniform(k1, (input_dim, HIDDEN), jnp.float32, -lim1, lim1)
    b1 = jax.random.uniform(k2, (HIDDEN,), jnp.float32, -lim1, lim1)
    w2 = jax.random.uniform(k3, (HIDDEN, output_dim), jnp.float32, -lim2, lim2)
    b2 = jax.random.uniform(k4, (output_dim,), jnp.float32, -lim2, lim2)
    return w1, b1, w2, b2


if __name__ == "__main__":
    key = jax.random.PRNGKey(0)
    kx, kp = jax.random.split(key)

    # Small NCHW-style input: batch=2, channels=4, spatial=16x16 -> input_dim=1024
    B, C, H, W = 2, 4, 16, 16
    input_dim = C * H * W
    output_dim = 10

    x = jax.random.normal(kx, (B, C, H, W), jnp.float32)
    w1, b1, w2, b2 = init_params(kp, input_dim, output_dim)

    output, h = target_model_forward(x, w1, b1, w2, b2)
    jax.block_until_ready((output, h))

    # ---- correctness checks --------------------------------------------------
    x2d = x.reshape(B, -1)

    # Apples-to-apples reference: same bf16 inputs, f32 accumulation.
    h_ref_bf = 1.0 / (1.0 + jnp.exp(-(
        jnp.dot(x2d.astype(jnp.bfloat16), w1.astype(jnp.bfloat16),
                preferred_element_type=jnp.float32) + b1)))
    out_ref_bf = jnp.dot(h_ref_bf.astype(jnp.bfloat16), w2.astype(jnp.bfloat16),
                         preferred_element_type=jnp.float32) + b2
    assert jnp.allclose(h, h_ref_bf, atol=1e-4, rtol=1e-4), "hidden mismatch (bf16 ref)"
    assert jnp.allclose(output, out_ref_bf, atol=1e-4, rtol=1e-4), "output mismatch (bf16 ref)"

    # Loose check against the full-f32 PyTorch-equivalent reference.
    h_ref32 = 1.0 / (1.0 + jnp.exp(-(x2d @ w1 + b1)))
    out_ref32 = h_ref32 @ w2 + b2
    assert jnp.allclose(h, h_ref32, atol=2e-2), "hidden mismatch (f32 ref)"
    assert jnp.allclose(output, out_ref32, atol=2e-2), "output mismatch (f32 ref)"

    assert output.shape == (B, output_dim) and h.shape == (B, HIDDEN)
    print("KERNEL_OK")
</pallas_src>

<mosaic_0001>
module attributes {stable_mosaic.version = 11 : i64} {
  func.func @_mlp_kernel(%arg0: i32, %arg1: i32, %arg2: memref<8x512xbf16, #tpu.memory_space<vmem>>, %arg3: memref<512x3072xbf16, #tpu.memory_space<vmem>>, %arg4: memref<1x3072xf32, #tpu.memory_space<vmem>>, %arg5: memref<3072x128xbf16, #tpu.memory_space<vmem>>, %arg6: memref<1x128xf32, #tpu.memory_space<vmem>>, %arg7: memref<8x128xf32, #tpu.memory_space<vmem>>, %arg8: memref<8x3072xf32, #tpu.memory_space<vmem>>, %arg9: memref<8x3072xf32, #tpu.memory_space<vmem>>) attributes {dimension_semantics = [#tpu.dimension_semantics<parallel>, #tpu.dimension_semantics<arbitrary>], iteration_bounds = array<i64: 1, 2>, scalar_prefetch = 0 : i64, scratch_operands = 1 : i64, tpu.core_type = #tpu.core_type<tc>, window_params = [{transform_indices = @transform_0, window_bounds = array<i64: 8, 512>}, {transform_indices = @transform_1, window_bounds = array<i64: 512, 3072>}, {pipeline_mode = #tpu.pipeline_mode<synchronous>, transform_indices = @transform_2, window_bounds = array<i64: 1, 3072>}, {pipeline_mode = #tpu.pipeline_mode<synchronous>, transform_indices = @transform_3, window_bounds = array<i64: 3072, 128>}, {pipeline_mode = #tpu.pipeline_mode<synchronous>, transform_indices = @transform_4, window_bounds = array<i64: 1, 128>}, {transform_indices = @transform_5, window_bounds = array<i64: 8, 128>}, {transform_indices = @transform_6, window_bounds = array<i64: 8, 3072>}]} {
    %c0_i32 = arith.constant 0 : i32
    %0 = arith.cmpi eq, %arg1, %c0_i32 : i32
    %1 = arith.extui %0 : i1 to i32
    %c0_i32_0 = arith.constant 0 : i32
    %2 = arith.cmpi ne, %1, %c0_i32_0 : i32
    scf.if %2 {
      %cst_9 = arith.constant 0.000000e+00 : f32
      %12 = vector.broadcast %cst_9 : f32 to vector<8x3072xf32>
      %c0_10 = arith.constant 0 : index
      %c0_11 = arith.constant 0 : index
      %13 = vector.load %arg9[%c0_10, %c0_11] : memref<8x3072xf32, #tpu.memory_space<vmem>>, vector<8x3072xf32>
      tpu.vector_store %arg9[%c0_10, %c0_11], %12 {strides = array<i32>} : memref<8x3072xf32, #tpu.memory_space<vmem>>, vector<8x3072xf32>,
    } else {
    }
    %c0 = arith.constant 0 : index
    %c0_1 = arith.constant 0 : index
    %3 = vector.load %arg9[%c0, %c0_1] : memref<8x3072xf32, #tpu.memory_space<vmem>>, vector<8x3072xf32>
    %c0_2 = arith.constant 0 : index
    %c0_3 = arith.constant 0 : index
    %4 = vector.load %arg2[%c0_2, %c0_3] : memref<8x512xbf16, #tpu.memory_space<vmem>>, vector<8x512xbf16>
    %c0_4 = arith.constant 0 : index
    %c0_5 = arith.constant 0 : index
    %5 = vector.load %arg3[%c0_4, %c0_5] : memref<512x3072xbf16, #tpu.memory_space<vmem>>, vector<512x3072xbf16>
    %cst = arith.constant dense<0.000000e+00> : vector<8x3072xf32>
    %6 = tpu.matmul %4, %5, %cst {dimension_numbers = #tpu.dot_dimension_numbers<[1], [0], [0], [1], [0, 0, 1, 1], [], []>} : vector<8x512xbf16>, vector<512x3072xbf16>, vector<8x3072xf32> -> vector<8x3072xf32>
    %7 = arith.addf %3, %6 : vector<8x3072xf32>
    %c0_6 = arith.constant 0 : index
    %c0_7 = arith.constant 0 : index
    %8 = vector.load %arg9[%c0_6, %c0_7] : memref<8x3072xf32, #tpu.memory_space<vmem>>, vector<8x3072xf32>
    tpu.vector_store %arg9[%c0_6, %c0_7], %7 {strides = array<i32>} : memref<8x3072xf32, #tpu.memory_space<vmem>>, vector<8x3072xf32>,
    %c1_i32 = arith.constant 1 : i32
    %9 = arith.cmpi eq, %arg1, %c1_i32 : i32
    %10 = arith.extui %9 : i1 to i32
    %c0_i32_8 = arith.constant 0 : i32
    %11 = arith.cmpi ne, %10, %c0_i32_8 : i32
    scf.if %11 {
      %c0_9 = arith.constant 0 : index
      %c0_10 = arith.constant 0 : index
      %12 = vector.load %arg9[%c0_9, %c0_10] : memref<8x3072xf32, #tpu.memory_space<vmem>>, vector<8x3072xf32>
      %c0_11 = arith.constant 0 : index
      %c0_12 = arith.constant 0 : index
      %13 = vector.load %arg4[%c0_11, %c0_12] : memref<1x3072xf32, #tpu.memory_space<vmem>>, vector<1x3072xf32>
      %14 = vector.broadcast %13 : vector<1x3072xf32> to vector<8x3072xf32>
      %15 = arith.addf %12, %14 : vector<8x3072xf32>
      %cst_13 = arith.constant 0.000000e+00 : f32
      %16 = vector.broadcast %cst_13 : f32 to vector<8x3072xf32>
      %17 = arith.subf %16, %15 : vector<8x3072xf32>
      %18 = math.exp %17 : vector<8x3072xf32>
      %cst_14 = arith.constant 1.000000e+00 : f32
      %19 = vector.broadcast %cst_14 : f32 to vector<8x3072xf32>
      %20 = arith.addf %19, %18 : vector<8x3072xf32>
      %cst_15 = arith.constant 1.000000e+00 : f32
      %21 = vector.broadcast %cst_15 : f32 to vector<8x3072xf32>
      %22 = arith.divf %21, %20 : vector<8x3072xf32>
      %c0_16 = arith.constant 0 : index
      %c0_17 = arith.constant 0 : index
      %23 = vector.load %arg8[%c0_16, %c0_17] : memref<8x3072xf32, #tpu.memory_space<vmem>>, vector<8x3072xf32>
      tpu.vector_store %arg8[%c0_16, %c0_17], %22 {strides = array<i32>} : memref<8x3072xf32, #tpu.memory_space<vmem>>, vector<8x3072xf32>,
      %24 = arith.truncf %22 : vector<8x3072xf32> to vector<8x3072xbf16>
      %c0_18 = arith.constant 0 : index
      %c0_19 = arith.constant 0 : index
      %25 = vector.load %arg5[%c0_18, %c0_19] : memref<3072x128xbf16, #tpu.memory_space<vmem>>, vector<3072x128xbf16>
      %cst_20 = arith.constant dense<0.000000e+00> : vector<8x128xf32>
      %26 = tpu.matmul %24, %25, %cst_20 {dimension_numbers = #tpu.dot_dimension_numbers<[1], [0], [0], [1], [0, 0, 1, 1], [], []>} : vector<8x3072xbf16>, vector<3072x128xbf16>, vector<8x128xf32> -> vector<8x128xf32>
      %c0_21 = arith.constant 0 : index
      %c0_22 = arith.constant 0 : index
      %27 = vector.load %arg6[%c0_21, %c0_22] : memref<1x128xf32, #tpu.memory_space<vmem>>, vector<1x128xf32>
      %28 = vector.broadcast %27 : vector<1x128xf32> to vector<8x128xf32>
      %29 = arith.addf %26, %28 : vector<8x128xf32>
      %c0_23 = arith.constant 0 : index
      %c0_24 = arith.constant 0 : index
      %30 = vector.load %arg7[%c0_23, %c0_24] : memref<8x128xf32, #tpu.memory_space<vmem>>, vector<8x128xf32>
      tpu.vector_store %arg7[%c0_23, %c0_24], %29 {strides = array<i32>} : memref<8x128xf32, #tpu.memory_space<vmem>>, vector<8x128xf32>,
    } else {
    }
    return
  }
  func.func @transform_0(%arg0: i32, %arg1: i32) -> (i32, i32) {
    %c0_i32 = arith.constant 0 : i32
    return %arg0, %arg1 : i32, i32
  }
  func.func @transform_1(%arg0: i32, %arg1: i32) -> (i32, i32) {
    %c0_i32 = arith.constant 0 : i32
    %c0_i32_0 = arith.constant 0 : i32
    return %arg1, %c0_i32 : i32, i32
  }
  func.func @transform_2(%arg0: i32, %arg1: i32) -> (i32, i32) {
    %c0_i32 = arith.constant 0 : i32
    %c0_i32_0 = arith.constant 0 : i32
    %c0_i32_1 = arith.constant 0 : i32
    return %c0_i32, %c0_i32_0 : i32, i32
  }
  func.func @transform_3(%arg0: i32, %arg1: i32) -> (i32, i32) {
    %c0_i32 = arith.constant 0 : i32
    %c0_i32_0 = arith.constant 0 : i32
    %c0_i32_1 = arith.constant 0 : i32
    return %c0_i32, %c0_i32_0 : i32, i32
  }
  func.func @transform_4(%arg0: i32, %arg1: i32) -> (i32, i32) {
    %c0_i32 = arith.constant 0 : i32
    %c0_i32_0 = arith.constant 0 : i32
    %c0_i32_1 = arith.constant 0 : i32
    return %c0_i32, %c0_i32_0 : i32, i32
  }
  func.func @transform_5(%arg0: i32, %arg1: i32) -> (i32, i32) {
    %c0_i32 = arith.constant 0 : i32
    %c0_i32_0 = arith.constant 0 : i32
    return %arg0, %c0_i32 : i32, i32
  }
  func.func @transform_6(%arg0: i32, %arg1: i32) -> (i32, i32) {
    %c0_i32 = arith.constant 0 : i32
    %c0_i32_0 = arith.constant 0 : i32
    return %arg0, %c0_i32 : i32, i32
  }
}

</mosaic_0001>

<bundles_post_ra>
// kernel: target_model_forward.1
= control target key start
LH: loop header
LB: loop body
LE: loop exit
PB: predicated region body
PF: predicated region fallthrough
CT: control target
= control target key end

     0   :  { %s13855_s21 = smov 0   ;;  %s13857_s22 = smov 0   ;;  %s17034_s0 = inlined_call_operand.vmem [shape: bf16[8,1024], index: 0, kind: input, shape index: {}]   ;;  %s17035_s1 = inlined_call_operand.vmem [shape: bf16[1024,3072], index: 1, kind: input, shape index: {}]   ;;  %s17036_s2 = inlined_call_operand.vmem [shape: f32[1,3072], index: 2, kind: input, shape index: {}]   ;;  %s17037_s3 = inlined_call_operand.vmem [shape: bf16[3072,128], index: 3, kind: input, shape index: {}]   ;;  %s17038_s4 = inlined_call_operand.vmem [shape: f32[1,128], index: 4, kind: input, shape index: {}]   ;;  %s17039_s5 = inlined_call_operand.vmem [shape: f32[8,128], index: 5, kind: output, shape index: {0}]   ;;  %s17040_s6 = inlined_call_operand.vmem [shape: f32[8,3072], index: 6, kind: output, shape index: {1}]  }
   0x1   :  { %s13859_s23 = smov 0  }
   0x2 LB: > { %s26_s24 = sadd.s32 1, %s13813_s22  ;;  %p8861_p0 = scmp.ge.s32.totalorder %s13817_s23, 1  ;;  %s13817_s23 = sphi %s13859_s23, %s17_s23   ;;  %s13813_s22 = sphi %s13857_s22, %s17130_s22   ;;  %s13809_s21 = sphi %s13855_s21, %s17129_s21  }
   0x3   : > { %p27_p1 = scmp.ge.s32.totalorder %s26_s24, 2  ;;  %p246_p2 = scmp.lt.s32.totalorder %s13817_s23, 3 }
   0x5   : > { %s17132_s24 = smov (%p27_p1, %s26_s24), 0  ;;  %p247_p3 = pnand %p8861_p0, %p246_p2 }
   0x6   : > { %s8862_s25 = sshll.u32 (!%p247_p3), %s13809_s21, 2  ;;  %s8864_s26 = sshll.u32 (!%p247_p3), %s13809_s21, 6 }
   0x7   : > { %250 = sbr.rel (%p247_p3) target bundleno = 1338 (0x53a), region = 40  ;;  %p293_p4 = scmp.lt.s32.totalorder (!%p247_p3), %s8862_s25, 7 }
   0x8   : > { %p301_p5 = scmp.lt.s32.totalorder (!%p247_p3), %s8864_s26, 127  ;;  %p8866_p6 = scmp.ne.s32.totalorder (!%p247_p3), %s13809_s21, 0 }
   0xc   : > { %s17134_s25 = smov (!%p293_p4, %s8862_s25), 7  ;;  %s17136_s26 = smov (!%p301_p5, %s8864_s26), 127 }
   0xd   : > { %s8863_s27 = sshll.u32 %s17134_s25, 2  ;;  %s13672_s7 = smul.u32 96, %s17136_s26 }
   0xe   : > { %s13880_s30 = scalar_lea.vmem %s17034_s0, %s8863_s27  ;;  %319 = sbr.rel (%p8866_p6) target bundleno = 44 (0x2c), region = 44 }
   0xf   : > { %s13885_s10 = scalar_lea.vmem %s17035_s1, %s13672_s7 }
  0x13   : > { %v13819_v0 = vmov 0.0  }
  0x14   : > { %320 = vst [vmem:[#allocation2 + $0xb0] sm:$0xff] %v13819_v0 }
  0x15   : > { %321 = vst [vmem:[#allocation2] sm:$0xff] %v13819_v0 }
  0x16   : > { %322 = vst [vmem:[#allocation2 + $0x10] sm:$0xff] %v13819_v0 }
  0x17   : > { %323 = vst [vmem:[#allocation2 + $0x48] sm:$0xff] %v13819_v0 }
  0x18   : > { %324 = vst [vmem:[#allocation2 + $0x60] sm:$0xff] %v13819_v0 }
  0x19   : > { %325 = vst [vmem:[#allocation2 + $0x28] sm:$0xff] %v13819_v0 }
  0x1a   : > { %326 = vst [vmem:[#allocation2 + $0x40] sm:$0xff] %v13819_v0 }
  0x1b   : > { %327 = vst [vmem:[#allocation2 + $0x78] sm:$0xff] %v13819_v0 }
  0x1c   : > { %328 = vst [vmem:[#allocation2 + $0x88] sm:$0xff] %v13819_v0 }
  0x1d   : > { %329 = vst [vmem:[#allocation2 + $0x90] sm:$0xff] %v13819_v0 }
  0x1e   : > { %330 = vst [vmem:[#allocation2 + $0x18] sm:$0xff] %v13819_v0 }
  0x1f   : > { %331 = vst [vmem:[#allocation2 + $0x98] sm:$0xff] %v13819_v0 }
  0x20   : > { %332 = vst [vmem:[#allocation2 + $0x38] sm:$0xff] %v13819_v0 }
  0x21   : > { %333 = vst [vmem:[#allocation2 + $0x50] sm:$0xff] %v13819_v0 }
  0x22   : > { %334 = vst [vmem:[#allocation2 + $0x70] sm:$0xff] %v13819_v0 }
  0x23   : > { %335 = vst [vmem:[#allocation2 + $0xa0] sm:$0xff] %v13819_v0 }
  0x24   : > { %336 = vst [vmem:[#allocation2 + $0xa8] sm:$0xff] %v13819_v0 }
  0x25   : > { %337 = vst [vmem:[#allocation2 + $0x68] sm:$0xff] %v13819_v0 }
  0x26   : > { %338 = vst [vmem:[#allocation2 + $0x30] sm:$0xff] %v13819_v0 }
  0x27   : > { %339 = vst [vmem:[#allocation2 + $0x58] sm:$0xff] %v13819_v0 }
  0x28   : > { %340 = vst [vmem:[#allocation2 + $0x80] sm:$0xff] %v13819_v0 }
  0x29   : > { %341 = vst [vmem:[#allocation2 + $0xb8] sm:$0xff] %v13819_v0 }
  0x2a   : > { %342 = vst [vmem:[#allocation2 + $0x20] sm:$0xff] %v13819_v0 }
  0x2b   : > { %343 = vst [vmem:[#allocation2 + $0x8] sm:$0xff] %v13819_v0 }
  0x2c PF: > { %v9541_v1 = vld [vmem:[%s13885_s10 + $0x540] sm:$0xf]  ;;  %p11939_p7 = scmp.ne.s32.totalorder %s13809_s21, 1 }
  0x2d   : > { %v12892_v2 = vld [vmem:[%s13885_s10 + $0x59c] sm:$0xf0] }
  0x2e   : > { %v10309_v3 = vld [vmem:[%s13885_s10 + $0xb40] sm:$0xf]  ;;  %v9542_v4 = vor.u32 %v12892_v2, %v9541_v1 }
  0x2f   : > { %v13084_v5 = vld [vmem:[%s13885_s10 + $0xb9c] sm:$0xf0] }
  0x30   : > { %v11077_v6 = vld [vmem:[%s13885_s10 + $0x1140] sm:$0xf]  ;;  %v10310_v8 = vor.u32 %v13084_v5, %v10309_v3  ;;  %4992 = vmatpush.bf16.msra.mxu0 %v9542_v4 }
  0x31   : > { %v13276_v7 = vld [vmem:[%s13885_s10 + $0x119c] sm:$0xf0] }
  0x32   : > { %v11078_v9 = vor.u32 %v13276_v7, %v11077_v6  ;;  %v11845_v10 = vld [vmem:[%s13885_s10 + $0x1740] sm:$0xf]  ;;  %5005 = vmatpush.bf16.msra.mxu1 %v10310_v8 }
  0x33   : > { %v13468_v11 = vld [vmem:[%s13885_s10 + $0x179c] sm:$0xf0] }
  0x34   : > { %v9445_v12 = vld [vmem:[%s13885_s10 + $0x480] sm:$0xf]  ;;  %v11846_v13 = vor.u32 %v13468_v11, %v11845_v10  ;;  %5018 = vmatpush.bf16.msra.mxu2 %v11078_v9 }
  0x35   : > { %v12868_v14 = vld [vmem:[%s13885_s10 + $0x4dc] sm:$0xf0] }
  0x36   : > { %v10213_v15 = vld [vmem:[%s13885_s10 + $0xa80] sm:$0xf]  ;;  %v9446_v17 = vor.u32 %v12868_v14, %v9445_v12  ;;  %5031 = vmatpush.bf16.msra.mxu3 %v11846_v13 }
  0x37   : > { %v13060_v16 = vld [vmem:[%s13885_s10 + $0xadc] sm:$0xf0] }
  0x38   : > { %v10214_v18 = vor.u32 %v13060_v16, %v10213_v15  ;;  %v10981_v19 = vld [vmem:[%s13885_s10 + $0x1080] sm:$0xf]  ;;  %4993 = vmatpush.bf16.msra.mxu0 %v9446_v17 }
  0x39   : > { %v13252_v20 = vld [vmem:[%s13885_s10 + $0x10dc] sm:$0xf0] }
  0x3a   : > { %v11749_v21 = vld [vmem:[%s13885_s10 + $0x1680] sm:$0xf]  ;;  %v10982_v22 = vor.u32 %v13252_v20, %v10981_v19  ;;  %5006 = vmatpush.bf16.msra.mxu1 %v10214_v18 }
  0x3b   : > { %v13444_v23 = vld [vmem:[%s13885_s10 + $0x16dc] sm:$0xf0] }
  0x3c   : > { %v9349_v24 = vld [vmem:[%s13885_s10 + $0x3c0] sm:$0xf]  ;;  %v11750_v26 = vor.u32 %v13444_v23, %v11749_v21  ;;  %5019 = vmatpush.bf16.msra.mxu2 %v10982_v22 }
  0x3d   : > { %v12844_v25 = vld [vmem:[%s13885_s10 + $0x41c] sm:$0xf0] }
  0x3e   : > { %v10117_v27 = vld [vmem:[%s13885_s10 + $0x9c0] sm:$0xf]  ;;  %v9350_v30 = vor.u32 %v12844_v25, %v9349_v24  ;;  %5032 = vmatpush.bf16.msra.mxu3 %v11750_v26 }
  0x3f   : > { %v13036_v28 = vld [vmem:[%s13885_s10 + $0xa1c] sm:$0xf0] }
  0x40   : > { %v10885_v29 = vld [vmem:[%s13885_s10 + $0xfc0] sm:$0xf]  ;;  %v10118_v34 = vor.u32 %v13036_v28, %v10117_v27  ;;  %4994 = vmatpush.bf16.msra.mxu0 %v9350_v30  ;;  %v9543_v30 = vld [vmem:[%s13885_s10 + $0x5a0] sm:$0xf0] }
  0x41   : > { %v13228_v31 = vld [vmem:[%s13885_s10 + $0x101c] sm:$0xf0] }
  0x42   : > { %v11653_v32 = vld [vmem:[%s13885_s10 + $0x15c0] sm:$0xf]  ;;  %v10886_v35 = vor.u32 %v13228_v31, %v10885_v29  ;;  %5007 = vmatpush.bf16.msra.mxu1 %v10118_v34  ;;  %v12880_v29 = vld [vmem:[%s13885_s10 + $0x544] sm:$0xf] }
  0x43   : > { %v13420_v33 = vld [vmem:[%s13885_s10 + $0x161c] sm:$0xf0]  ;;  %v13072_v31 = vld [vmem:[%s13885_s10 + $0xb44] sm:$0xf] }
  0x44   : > { %v9253_v36 = vld [vmem:[%s13885_s10 + $0x300] sm:$0xf]  ;;  %v11654_v39 = vor.u32 %v13420_v33, %v11653_v32  ;;  %5020 = vmatpush.bf16.msra.mxu2 %v10886_v35  ;;  %v10311_v33 = vld [vmem:[%s13885_s10 + $0xba0] sm:$0xf0] }
  0x45   : > { %v12820_v37 = vld [vmem:[%s13885_s10 + $0x35c] sm:$0xf0]  ;;  %v13264_v34 = vld [vmem:[%s13885_s10 + $0x1144] sm:$0xf] }
  0x46   : > { %v10021_v38 = vld [vmem:[%s13885_s10 + $0x900] sm:$0xf]  ;;  %v9254_v45 = vor.u32 %v12820_v37, %v9253_v36  ;;  %5033 = vmatpush.bf16.msra.mxu3 %v11654_v39  ;;  %v11079_v35 = vld [vmem:[%s13885_s10 + $0x11a0] sm:$0xf0] }
  0x47   : > { %v13012_v40 = vld [vmem:[%s13885_s10 + $0x95c] sm:$0xf0]  ;;  %v11847_v39 = vld [vmem:[%s13885_s10 + $0x17a0] sm:$0xf0] }
  0x48   : > { %v10789_v41 = vld [vmem:[%s13885_s10 + $0xf00] sm:$0xf]  ;;  %v10022_v46 = vor.u32 %v13012_v40, %v10021_v38  ;;  %4995 = vmatpush.bf16.msra.mxu0 %v9254_v45  ;;  %v13456_v38 = vld [vmem:[%s13885_s10 + $0x1744] sm:$0xf] }
  0x49   : > { %v13204_v42 = vld [vmem:[%s13885_s10 + $0xf5c] sm:$0xf0]  ;;  %v9447_v45 = vld [vmem:[%s13885_s10 + $0x4e0] sm:$0xf0] }
  0x4a   : > { %v11557_v43 = vld [vmem:[%s13885_s10 + $0x1500] sm:$0xf]  ;;  %v10790_v47 = vor.u32 %v13204_v42, %v10789_v41  ;;  %5008 = vmatpush.bf16.msra.mxu1 %v10022_v46  ;;  %v9546_v41 = vor.u32 %v12880_v29, %v9543_v30  ;;  %v10314_v42 = vor.u32 %v13072_v31, %v10311_v33  ;;  %v13048_v46 = vld [vmem:[%s13885_s10 + $0xa84] sm:$0xf] }
  0x4b   : > { %v13396_v44 = vld [vmem:[%s13885_s10 + $0x155c] sm:$0xf0]  ;;  %v13168_v29 = vld [vmem:[%s13885_s10 + $0xe44] sm:$0xf] }
  0x4c   : > { %v9157_v48 = vld [vmem:[%s13885_s10 + $0x240] sm:$0xf]  ;;  %v11558_v51 = vor.u32 %v13396_v44, %v11557_v43  ;;  %5021 = vmatpush.bf16.msra.mxu2 %v10790_v47  ;;  %v11082_v43 = vor.u32 %v13264_v34, %v11079_v35  ;;  %v12856_v44 = vld [vmem:[%s13885_s10 + $0x484] sm:$0xf]  ;;  %v11850_v47 = vor.u32 %v13456_v38, %v11847_v39 }
  0x4d   : > { %v12796_v49 = vld [vmem:[%s13885_s10 + $0x29c] sm:$0xf0]  ;;  %v10695_v30 = vld [vmem:[%s13885_s10 + $0xea0] sm:$0xf0] }
  0x4e   : > { %v9925_v50 = vld [vmem:[%s13885_s10 + $0x840] sm:$0xf]  ;;  %v9158_v57 = vor.u32 %v12796_v49, %v9157_v48  ;;  %5034 = vmatpush.bf16.msra.mxu3 %v11558_v51  ;;  %v10215_v48 = vld [vmem:[%s13885_s10 + $0xae0] sm:$0xf0] }
  0x4f   : > { %v12988_v52 = vld [vmem:[%s13885_s10 + $0x89c] sm:$0xf0]  ;;  %v13240_v49 = vld [vmem:[%s13885_s10 + $0x1084] sm:$0xf] }
  0x50   : > { %v10693_v53 = vld [vmem:[%s13885_s10 + $0xe40] sm:$0xf]  ;;  %v9926_v58 = vor.u32 %v12988_v52, %v9925_v50  ;;  %4996 = vmatpush.bf16.msra.mxu0 %v9158_v57  ;;  %v10983_v50 = vld [vmem:[%s13885_s10 + $0x10e0] sm:$0xf0] }
  0x51   : > { %v13180_v54 = vld [vmem:[%s13885_s10 + $0xe9c] sm:$0xf0]  ;;  %v13432_v51 = vld [vmem:[%s13885_s10 + $0x1684] sm:$0xf] }
  0x52   : > { %v11461_v55 = vld [vmem:[%s13885_s10 + $0x1440] sm:$0xf]  ;;  %v10694_v59 = vor.u32 %v13180_v54, %v10693_v53  ;;  %5009 = vmatpush.bf16.msra.mxu1 %v9926_v58  ;;  %v11751_v52 = vld [vmem:[%s13885_s10 + $0x16e0] sm:$0xf0]  ;;  %v9450_v53 = vor.u32 %v12856_v44, %v9447_v45  ;;  %v10218_v54 = vor.u32 %v13048_v46, %v10215_v48 }
  0x53   : > { %v13372_v56 = vld [vmem:[%s13885_s10 + $0x149c] sm:$0xf0]  ;;  %v9351_v57 = vld [vmem:[%s13885_s10 + $0x420] sm:$0xf0] }
  0x54   : > { %v9061_v60 = vld [vmem:[%s13885_s10 + $0x180] sm:$0xf]  ;;  %v11462_v63 = vor.u32 %v13372_v56, %v11461_v55  ;;  %5022 = vmatpush.bf16.msra.mxu2 %v10694_v59  ;;  %v10986_v55 = vor.u32 %v13240_v49, %v10983_v50  ;;  %v12832_v56 = vld [vmem:[%s13885_s10 + $0x3c4] sm:$0xf]  ;;  %v11754_v59 = vor.u32 %v13432_v51, %v11751_v52 }
  0x55   : > { %v12772_v61 = vld [vmem:[%s13885_s10 + $0x1dc] sm:$0xf0]  ;;  %v13024_v58 = vld [vmem:[%s13885_s10 + $0x9c4] sm:$0xf] }
  0x56   : > { %v9829_v62 = vld [vmem:[%s13885_s10 + $0x780] sm:$0xf]  ;;  %v9062_v5 = vor.u32 %v12772_v61, %v9061_v60  ;;  %5035 = vmatpush.bf16.msra.mxu3 %v11462_v63  ;;  %v10119_v60 = vld [vmem:[%s13885_s10 + $0xa20] sm:$0xf0] }
  0x57   : > { %v12964_v0 = vld [vmem:[%s13885_s10 + $0x7dc] sm:$0xf0]  ;;  %v13216_v61 = vld [vmem:[%s13885_s10 + $0xfc4] sm:$0xf] }
  0x58   : > { %v10597_v1 = vld [vmem:[%s13885_s10 + $0xd80] sm:$0xf]  ;;  %v9830_v6 = vor.u32 %v12964_v0, %v9829_v62  ;;  %4997 = vmatpush.bf16.msra.mxu0 %v9062_v5  ;;  %v10887_v62 = vld [vmem:[%s13885_s10 + $0x1020] sm:$0xf0] }
  0x59   : > { %v13156_v2 = vld [vmem:[%s13885_s10 + $0xddc] sm:$0xf0]  ;;  %v13408_v63 = vld [vmem:[%s13885_s10 + $0x15c4] sm:$0xf] }
  0x5a   : > { %v11365_v3 = vld [vmem:[%s13885_s10 + $0x1380] sm:$0xf]  ;;  %v10598_v7 = vor.u32 %v13156_v2, %v10597_v1  ;;  %5010 = vmatpush.bf16.msra.mxu1 %v9830_v6  ;;  %v11655_v0 = vld [vmem:[%s13885_s10 + $0x1620] sm:$0xf0]  ;;  %v9354_v1 = vor.u32 %v12832_v56, %v9351_v57  ;;  %v369_v2 = vld [vmem:[%s13880_s30 + $0x8] sm:$0xff] }
  0x5b   : > { %v13348_v4 = vld [vmem:[%s13885_s10 + $0x13dc] sm:$0xf0]  ;;  %v12808_v5 = vld [vmem:[%s13885_s10 + $0x304] sm:$0xf] }
  0x5c   : > { %v8965_v8 = vld [vmem:[%s13885_s10 + $0xc0] sm:$0xf]  ;;  %v11366_v11 = vor.u32 %v13348_v4, %v11365_v3  ;;  %5023 = vmatpush.bf16.msra.mxu2 %v10598_v7  ;;  %v10122_v3 = vor.u32 %v13024_v58, %v10119_v60  ;;  %v10890_v4 = vor.u32 %v13216_v61, %v10887_v62  ;;  %v9255_v6 = vld [vmem:[%s13885_s10 + $0x360] sm:$0xf0] }
  0x5d   : > { %v12748_v9 = vld [vmem:[%s13885_s10 + $0x11c] sm:$0xf0]  ;;  %v13000_v7 = vld [vmem:[%s13885_s10 + $0x904] sm:$0xf] }
  0x5e   : > { %v9733_v10 = vld [vmem:[%s13885_s10 + $0x6c0] sm:$0xf]  ;;  %v8966_v17 = vor.u32 %v12748_v9, %v8965_v8  ;;  %5036 = vmatpush.bf16.msra.mxu3 %v11366_v11  ;;  %v1142_v8 = vunpack.c.l.b16 %v369_v2  ;;  %v1143_v9 = vunpack.c.h.b16 %v369_v2  ;;  %v10023_v11 = vld [vmem:[%s13885_s10 + $0x960] sm:$0xf0] }
  0x5f   : > { %v12940_v12 = vld [vmem:[%s13885_s10 + $0x71c] sm:$0xf0]  ;;  %v13360_v33 = vld [vmem:[%s13885_s10 + $0x1444] sm:$0xf] }
  0x60   : > { %v10501_v13 = vld [vmem:[%s13885_s10 + $0xcc0] sm:$0xf]  ;;  %v9734_v20 = vor.u32 %v12940_v12, %v9733_v10  ;;  %4998 = vmatpush.bf16.msra.mxu0 %v8966_v17  ;;  %v11658_v10 = vor.u32 %v13408_v63, %v11655_v0  ;;  %v13192_v12 = vld [vmem:[%s13885_s10 + $0xf04] sm:$0xf]  ;;  %v13987_v17 = vpack.c.b16 %v1143_v9, %v1143_v9  ;;  %v10317_v9 = vld [vmem:[%s13885_s10 + $0xb48] sm:$0xf] }
  0x61   : > { %v13132_v14 = vld [vmem:[%s13885_s10 + $0xd1c] sm:$0xf0]  ;;  %v11463_v34 = vld [vmem:[%s13885_s10 + $0x14a0] sm:$0xf0] }
  0x62   : > { %v11269_v15 = vld [vmem:[%s13885_s10 + $0x12c0] sm:$0xf]  ;;  %v10502_v21 = vor.u32 %v13132_v14, %v10501_v13  ;;  %5011 = vmatpush.bf16.msra.mxu1 %v9734_v20  ;;  %v10791_v13 = vld [vmem:[%s13885_s10 + $0xf60] sm:$0xf0] }
  0x63   : > { %v13324_v16 = vld [vmem:[%s13885_s10 + $0x131c] sm:$0xf0]  ;;  %v13384_v14 = vld [vmem:[%s13885_s10 + $0x1504] sm:$0xf] }
  0x64   : > { %v8869_v18 = vld [vmem:[%s13885_s10] sm:$0xf]  ;;  %v11270_v25 = vor.u32 %v13324_v16, %v11269_v15  ;;  %5024 = vmatpush.bf16.msra.mxu2 %v10502_v21  ;;  %v11559_v15 = vld [vmem:[%s13885_s10 + $0x1560] sm:$0xf0]  ;;  %v13985_v16 = vpack.c.b16 %v1142_v8, %v1142_v8  ;;  %v12893_v8 = vld [vmem:[%s13885_s10 + $0x5a4] sm:$0xf0] }
  0x65   : > { %v12724_v19 = vld [vmem:[%s13885_s10 + $0x5c] sm:$0xf0]  ;;  %v12760_v38 = vld [vmem:[%s13885_s10 + $0x184] sm:$0xf] }
  0x66   : > { %v9637_v22 = vld [vmem:[%s13885_s10 + $0x600] sm:$0xf]  ;;  %v8870_v32 = vor.u32 %v12724_v19, %v8869_v18  ;;  %5037 = vmatpush.bf16.msra.mxu3 %v11270_v25  ;;  %v9258_v19 = vor.u32 %v12808_v5, %v9255_v6  ;;  %v9159_v25 = vld [vmem:[%s13885_s10 + $0x2a0] sm:$0xf0] }
  0x67   : > { %v12916_v23 = vld [vmem:[%s13885_s10 + $0x65c] sm:$0xf0]  ;;  %v9063_v39 = vld [vmem:[%s13885_s10 + $0x1e0] sm:$0xf0] }
  0x68   : > { %v10405_v24 = vld [vmem:[%s13885_s10 + $0xc00] sm:$0xf]  ;;  %v9638_v36 = vor.u32 %v12916_v23, %v9637_v22  ;;  %4999 = vmatpush.bf16.msra.mxu0 %v8870_v32  ;;  %v10026_v22 = vor.u32 %v13000_v7, %v10023_v11  ;;  %v10794_v23 = vor.u32 %v13192_v12, %v10791_v13  ;;  %v10599_v44 = vld [vmem:[%s13885_s10 + $0xde0] sm:$0xf0]  ;;  %v9549_v7 = vld [vmem:[%s13885_s10 + $0x548] sm:$0xf] }
  0x69   : > { %v13108_v26 = vld [vmem:[%s13885_s10 + $0xc5c] sm:$0xf0]  ;;  %v13336_v45 = vld [vmem:[%s13885_s10 + $0x1384] sm:$0xf]  ;;  %v13085_v11 = vld [vmem:[%s13885_s10 + $0xba4] sm:$0xf0] }
  0x6a   : > { %v11173_v27 = vld [vmem:[%s13885_s10 + $0x1200] sm:$0xf]  ;;  %v10406_v37 = vor.u32 %v13108_v26, %v10405_v24  ;;  %5012 = vmatpush.bf16.msra.mxu1 %v9638_v36  ;;  %v12784_v24 = vld [vmem:[%s13885_s10 + $0x244] sm:$0xf]  ;;  %v11085_v12 = vld [vmem:[%s13885_s10 + $0x1148] sm:$0xf] }
  0x6b   : > { %v13300_v28 = vld [vmem:[%s13885_s10 + $0x125c] sm:$0xf0]  ;;  %v12976_v26 = vld [vmem:[%s13885_s10 + $0x844] sm:$0xf]  ;;  %v9162_v35 = vor.u32 %v12784_v24, %v9159_v25  ;;  %v13277_v13 = vld [vmem:[%s13885_s10 + $0x11a4] sm:$0xf0] }
  0x6c   : > { %v11174_v40 = vor.u32 %v13300_v28, %v11173_v27  ;;  %5025 = vmatpush.bf16.msra.mxu2 %v10406_v37  ;;  %5044 = vmatpush.bf16.msrb.mxu0 %v9546_v41  ;;  %v368_v18 = vld [vmem:[%s13880_s30] sm:$0xff]  ;;  %v11562_v27 = vor.u32 %v13384_v14, %v11559_v15  ;;  %v10698_v37 = vor.u32 %v13168_v29, %v10695_v30  ;;  %v9453_v24 = vld [vmem:[%s13885_s10 + $0x488] sm:$0xf] }
  0x6d   : > { %v1140_v20 = vunpack.c.l.b16 %v368_v18  ;;  %v1141_v21 = vunpack.c.h.b16 %v368_v18  ;;  %v9927_v28 = vld [vmem:[%s13885_s10 + $0x8a0] sm:$0xf0]  ;;  %v11466_v41 = vor.u32 %v13360_v33, %v11463_v34  ;;  %v11853_v18 = vld [vmem:[%s13885_s10 + $0x1748] sm:$0xf] }
  0x6e   : > { %5038 = vmatpush.bf16.msra.mxu3 %v11174_v40  ;;  %5057 = vmatpush.bf16.msrb.mxu1 %v10314_v42  ;;  %v9930_v36 = vor.u32 %v12976_v26, %v9927_v28  ;;  %v12952_v40 = vld [vmem:[%s13885_s10 + $0x784] sm:$0xf]  ;;  %v12869_v25 = vld [vmem:[%s13885_s10 + $0x4e4] sm:$0xf0] }
  0x6f   : > { %5026 = vmatmul.bf16.vlgmr.msra.gmra.mxu2 %v13985_v16  ;;  %v13997_v31 = vpack.c.b16 %v1140_v20, %v1140_v20  ;;  %v13999_v32 = vpack.c.b16 %v1141_v21, %v1141_v21  ;;  %v9831_v42 = vld [vmem:[%s13885_s10 + $0x7e0] sm:$0xf0]  ;;  %v9550_v21 = vor.u32 %v12893_v8, %v9549_v7  ;;  %v10221_v26 = vld [vmem:[%s13885_s10 + $0xa88] sm:$0xf] }
  0x70   : > { %5070 = vmatpush.bf16.msrb.mxu2 %v11082_v43  ;;  %5045 = vmatpush.bf16.msrb.mxu0 %v9450_v53  ;;  %v13144_v43 = vld [vmem:[%s13885_s10 + $0xd84] sm:$0xf]  ;;  %v9834_v48 = vor.u32 %v12952_v40, %v9831_v42  ;;  %v13061_v28 = vld [vmem:[%s13885_s10 + $0xae4] sm:$0xf0] }
  0x71   : > { %5039 = vmatmul.bf16.vlgmr.msra.gmra.mxu3 %v13987_v17  ;;  %5013 = vmatmul.bf16.vlgmr.msra.gmra.mxu1 %v13999_v32  ;;  %v11367_v46 = vld [vmem:[%s13885_s10 + $0x13e0] sm:$0xf0]  ;;  %v10602_v49 = vor.u32 %v13144_v43, %v10599_v44  ;;  %v10989_v29 = vld [vmem:[%s13885_s10 + $0x1088] sm:$0xf] }
  0x72   : > { %5083 = vmatpush.bf16.msrb.mxu3 %v11850_v47  ;;  %5058 = vmatpush.bf16.msrb.mxu1 %v10218_v54  ;;  %v9066_v47 = vor.u32 %v12760_v38, %v9063_v39  ;;  %v12736_v50 = vld [vmem:[%s13885_s10 + $0xc4] sm:$0xf]  ;;  %v11370_v53 = vor.u32 %v13336_v45, %v11367_v46  ;;  %v13253_v30 = vld [vmem:[%s13885_s10 + $0x10e4] sm:$0xf0] }
  0x73   : > { %5000 = vmatmul.bf16.vlgmr.msra.gmra.mxu0 %v13997_v31  ;;  %v8967_v51 = vld [vmem:[%s13885_s10 + $0x120] sm:$0xf0]  ;;  %v11757_v33 = vld [vmem:[%s13885_s10 + $0x1688] sm:$0xf] }
  0x74   : > { %5071 = vmatpush.bf16.msrb.mxu2 %v10986_v55  ;;  %5046 = vmatpush.bf16.msrb.mxu0 %v9354_v1  ;;  %v12928_v52 = vld [vmem:[%s13885_s10 + $0x6c4] sm:$0xf]  ;;  %v13445_v34 = vld [vmem:[%s13885_s10 + $0x16e4] sm:$0xf0] }
  0x75   : > { %v9735_v54 = vld [vmem:[%s13885_s10 + $0x720] sm:$0xf0]  ;;  %v9357_v38 = vld [vmem:[%s13885_s10 + $0x3c8] sm:$0xf] }
  0x76   : > { %5084 = vmatpush.bf16.msrb.mxu3 %v11754_v59  ;;  %5059 = vmatpush.bf16.msrb.mxu1 %v10122_v3  ;;  %v13120_v55 = vld [vmem:[%s13885_s10 + $0xcc4] sm:$0xf]  ;;  %v8970_v59 = vor.u32 %v12736_v50, %v8967_v51  ;;  %v9738_v62 = vor.u32 %v12928_v52, %v9735_v54  ;;  %v12845_v39 = vld [vmem:[%s13885_s10 + $0x424] sm:$0xf0] }
  0x77   : > { %v10503_v56 = vld [vmem:[%s13885_s10 + $0xd20] sm:$0xf0]  ;;  %v10125_v40 = vld [vmem:[%s13885_s10 + $0x9c8] sm:$0xf] }
  0x78   : > { %5072 = vmatpush.bf16.msrb.mxu2 %v10890_v4  ;;  %5047 = vmatpush.bf16.msrb.mxu0 %v9258_v19  ;;  %v13312_v57 = vld [vmem:[%s13885_s10 + $0x12c4] sm:$0xf]  ;;  %v10506_v63 = vor.u32 %v13120_v55, %v10503_v56  ;;  %v13469_v19 = vld [vmem:[%s13885_s10 + $0x17a4] sm:$0xf0] }
  0x79   : > { %v11271_v58 = vld [vmem:[%s13885_s10 + $0x1320] sm:$0xf0]  ;;  %v13037_v42 = vld [vmem:[%s13885_s10 + $0xa24] sm:$0xf0] }
  0x7a   : > { %5085 = vmatpush.bf16.msrb.mxu3 %v11658_v10  ;;  %5060 = vmatpush.bf16.msrb.mxu1 %v10026_v22  ;;  %v12712_v60 = vld [vmem:[%s13885_s10 + $0x4] sm:$0xf]  ;;  %v11274_v3 = vor.u32 %v13312_v57, %v11271_v58  ;;  %v10318_v22 = vor.u32 %v13085_v11, %v10317_v9  ;;  %v10893_v43 = vld [vmem:[%s13885_s10 + $0xfc8] sm:$0xf] }
  0x7b   : > { %v8871_v61 = vld [vmem:[%s13885_s10 + $0x60] sm:$0xf0]  ;;  %v13229_v44 = vld [vmem:[%s13885_s10 + $0x1024] sm:$0xf0] }
  0x7c   : > { %5073 = vmatpush.bf16.msrb.mxu2 %v10794_v23  ;;  %5048 = vmatpush.bf16.msrb.mxu0 %v9162_v35  ;;  %v12904_v0 = vld [vmem:[%s13885_s10 + $0x604] sm:$0xf]  ;;  %v8874_v10 = vor.u32 %v12712_v60, %v8871_v61  ;;  %v11086_v23 = vor.u32 %v13277_v13, %v11085_v12  ;;  %v9454_v35 = vor.u32 %v12869_v25, %v9453_v24  ;;  %v11661_v45 = vld [vmem:[%s13885_s10 + $0x15c8] sm:$0xf] }
  0x7d   : > { %v9639_v1 = vld [vmem:[%s13885_s10 + $0x660] sm:$0xf0]  ;;  %v13421_v46 = vld [vmem:[%s13885_s10 + $0x1624] sm:$0xf0] }
  0x7e   : > { %5086 = vmatpush.bf16.msrb.mxu3 %v11562_v27  ;;  %5061 = vmatpush.bf16.msrb.mxu1 %v9930_v36  ;;  %v13096_v2 = vld [vmem:[%s13885_s10 + $0xc04] sm:$0xf]  ;;  %v9642_v14 = vor.u32 %v12904_v0, %v9639_v1  ;;  %v11854_v27 = vor.u32 %v13469_v19, %v11853_v18  ;;  %v10222_v36 = vor.u32 %v13061_v28, %v10221_v26  ;;  %v9261_v50 = vld [vmem:[%s13885_s10 + $0x308] sm:$0xf] }
  0x7f   : > { %v10407_v4 = vld [vmem:[%s13885_s10 + $0xc60] sm:$0xf0]  ;;  %v12821_v51 = vld [vmem:[%s13885_s10 + $0x364] sm:$0xf0] }
  0x80   : > { %5074 = vmatpush.bf16.msrb.mxu2 %v10698_v37  ;;  %5049 = vmatpush.bf16.msrb.mxu0 %v9066_v47  ;;  %v13288_v5 = vld [vmem:[%s13885_s10 + $0x1204] sm:$0xf]  ;;  %v10410_v15 = vor.u32 %v13096_v2, %v10407_v4  ;;  %v10990_v37 = vor.u32 %v13253_v30, %v10989_v29  ;;  %v9358_v47 = vor.u32 %v12845_v39, %v9357_v38  ;;  %v10029_v52 = vld [vmem:[%s13885_s10 + $0x908] sm:$0xf] }
  0x81   : > { %v11175_v6 = vld [vmem:[%s13885_s10 + $0x1260] sm:$0xf0]  ;;  %v13013_v54 = vld [vmem:[%s13885_s10 + $0x964] sm:$0xf0] }
  0x82   : > { %5087 = vmatpush.bf16.msrb.mxu3 %v11466_v41  ;;  %5062 = vmatpush.bf16.msrb.mxu1 %v9834_v48  ;;  %v11178_v20 = vor.u32 %v13288_v5, %v11175_v6  ;;  %v11758_v41 = vor.u32 %v13445_v34, %v11757_v33  ;;  %v10126_v48 = vor.u32 %v13037_v42, %v10125_v40  ;;  %v10797_v55 = vld [vmem:[%s13885_s10 + $0xf08] sm:$0xf] }
  0x83   : > { %v13205_v56 = vld [vmem:[%s13885_s10 + $0xf64] sm:$0xf0]  ;;  %v10030_v60 = vor.u32 %v13013_v54, %v10029_v52  ;;  %v13265_v52 = vld [vmem:[%s13885_s10 + $0x114c] sm:$0xf] }
  0x84   : > { %5075 = vmatpush.bf16.msrb.mxu2 %v10602_v49  ;;  %5050 = vmatpush.bf16.msrb.mxu0 %v8970_v59  ;;  %v10894_v49 = vor.u32 %v13229_v44, %v10893_v43  ;;  %v11565_v57 = vld [vmem:[%s13885_s10 + $0x1508] sm:$0xf]  ;;  %v9262_v59 = vor.u32 %v12821_v51, %v9261_v50  ;;  %v10798_v61 = vor.u32 %v13205_v56, %v10797_v55  ;;  %v10319_v51 = vld [vmem:[%s13885_s10 + $0xba8] sm:$0xf0] }
  0x85   : > { %v13397_v58 = vld [vmem:[%s13885_s10 + $0x1564] sm:$0xf0]  ;;  %v13457_v56 = vld [vmem:[%s13885_s10 + $0x174c] sm:$0xf] }
  0x86   : > { %5088 = vmatpush.bf16.msrb.mxu3 %v11370_v53  ;;  %5063 = vmatpush.bf16.msrb.mxu1 %v9738_v62  ;;  %v11662_v53 = vor.u32 %v13421_v46, %v11661_v45  ;;  %v9165_v62 = vld [vmem:[%s13885_s10 + $0x248] sm:$0xf]  ;;  %v11566_v1 = vor.u32 %v13397_v58, %v11565_v57  ;;  %v11855_v57 = vld [vmem:[%s13885_s10 + $0x17a8] sm:$0xf0] }
  0x87   : > { %v9933_v0 = vld [vmem:[%s13885_s10 + $0x848] sm:$0xf] }
  0x88   : > { %5076 = vmatpush.bf16.msrb.mxu2 %v10506_v63  ;;  %5051 = vmatpush.bf16.msrb.mxu0 %v8874_v10  ;;  %v12797_v63 = vld [vmem:[%s13885_s10 + $0x2a4] sm:$0xf0] }
  0x89   : > { %v12989_v2 = vld [vmem:[%s13885_s10 + $0x8a4] sm:$0xf0]  ;;  %v9166_v7 = vor.u32 %v12797_v63, %v9165_v62  ;;  %v12857_v62 = vld [vmem:[%s13885_s10 + $0x48c] sm:$0xf] }
  0x8a   : > { %5089 = vmatpush.bf16.msrb.mxu3 %v11274_v3  ;;  %5064 = vmatpush.bf16.msrb.mxu1 %v9642_v14  ;;  %v10701_v3 = vld [vmem:[%s13885_s10 + $0xe48] sm:$0xf]  ;;  %v9934_v8 = vor.u32 %v12989_v2, %v9933_v0  ;;  %v9455_v63 = vld [vmem:[%s13885_s10 + $0x4e8] sm:$0xf0] }
  0x8b   : > { %5052 = vmatmul.bf16.vlgmr.msrb.gmra.mxu0 %v13997_v31  ;;  %v13181_v4 = vld [vmem:[%s13885_s10 + $0xea4] sm:$0xf0]  ;;  %v13049_v0 = vld [vmem:[%s13885_s10 + $0xa8c] sm:$0xf] }
  0x8c   : > { %5077 = vmatpush.bf16.msrb.mxu2 %v10410_v15  ;;  %5096 = vmatpush.bf16.msra.mxu0 %v9550_v21  ;;  %v11469_v5 = vld [vmem:[%s13885_s10 + $0x1448] sm:$0xf]  ;;  %v10702_v9 = vor.u32 %v13181_v4, %v10701_v3  ;;  %v10223_v2 = vld [vmem:[%s13885_s10 + $0xae8] sm:$0xf0] }
  0x8d   : > { %5065 = vmatmul.bf16.vlgmr.msrb.gmra.mxu1 %v13999_v32  ;;  %v13373_v6 = vld [vmem:[%s13885_s10 + $0x14a4] sm:$0xf0]  ;;  %v13241_v3 = vld [vmem:[%s13885_s10 + $0x108c] sm:$0xf] }
  0x8e   : > { %5090 = vmatpush.bf16.msrb.mxu3 %v11178_v20  ;;  %5109 = vmatpush.bf16.msra.mxu1 %v10318_v22  ;;  %v9069_v10 = vld [vmem:[%s13885_s10 + $0x188] sm:$0xf]  ;;  %v11470_v13 = vor.u32 %v13373_v6, %v11469_v5  ;;  %v10991_v4 = vld [vmem:[%s13885_s10 + $0x10e8] sm:$0xf0] }
  0x8f   : > { %5078 = vmatmul.bf16.vlgmr.msrb.gmra.mxu2 %v13985_v16  ;;  %v12773_v11 = vld [vmem:[%s13885_s10 + $0x1e4] sm:$0xf0]  ;;  %v13433_v5 = vld [vmem:[%s13885_s10 + $0x168c] sm:$0xf] }
  0x90   : > { %5122 = vmatpush.bf16.msra.mxu2 %v11086_v23  ;;  %5097 = vmatpush.bf16.msra.mxu0 %v9454_v35  ;;  %v9837_v12 = vld [vmem:[%s13885_s10 + $0x788] sm:$0xf]  ;;  %v9070_v21 = vor.u32 %v12773_v11, %v9069_v10  ;;  %v11759_v6 = vld [vmem:[%s13885_s10 + $0x16e8] sm:$0xf0] }
  0x91   : > { %5091 = vmatmul.bf16.vlgmr.msrb.gmra.mxu3 %v13987_v17  ;;  %v12965_v14 = vld [vmem:[%s13885_s10 + $0x7e4] sm:$0xf0]  ;;  %v12833_v10 = vld [vmem:[%s13885_s10 + $0x3cc] sm:$0xf] }
  0x92   : > { %5135 = vmatpush.bf16.msra.mxu3 %v11854_v27  ;;  %5110 = vmatpush.bf16.msra.mxu1 %v10222_v36  ;;  %v10605_v15 = vld [vmem:[%s13885_s10 + $0xd88] sm:$0xf]  ;;  %v9838_v22 = vor.u32 %v12965_v14, %v9837_v12  ;;  %v9359_v11 = vld [vmem:[%s13885_s10 + $0x428] sm:$0xf0] }
  0x93   : > { %v13157_v18 = vld [vmem:[%s13885_s10 + $0xde4] sm:$0xf0]  ;;  %v13025_v12 = vld [vmem:[%s13885_s10 + $0x9cc] sm:$0xf] }
  0x94   : > { %5123 = vmatpush.bf16.msra.mxu2 %v10990_v37  ;;  %5098 = vmatpush.bf16.msra.mxu0 %v9358_v47  ;;  %v11373_v19 = vld [vmem:[%s13885_s10 + $0x1388] sm:$0xf]  ;;  %v10606_v23 = vor.u32 %v13157_v18, %v10605_v15  ;;  %v12881_v47 = vld [vmem:[%s13885_s10 + $0x54c] sm:$0xf] }
  0x95   : > { %v13349_v20 = vld [vmem:[%s13885_s10 + $0x13e4] sm:$0xf0]  ;;  %v10127_v14 = vld [vmem:[%s13885_s10 + $0xa28] sm:$0xf0] }
  0x96   : > { %5136 = vmatpush.bf16.msra.mxu3 %v11758_v41  ;;  %5111 = vmatpush.bf16.msra.mxu1 %v10126_v48  ;;  %v8973_v24 = vld [vmem:[%s13885_s10 + $0xc8] sm:$0xf]  ;;  %v11374_v27 = vor.u32 %v13349_v20, %v11373_v19  ;;  %v9551_v48 = vld [vmem:[%s13885_s10 + $0x5a8] sm:$0xf0] }
  0x97   : > { %v12749_v25 = vld [vmem:[%s13885_s10 + $0x124] sm:$0xf0]  ;;  %v13217_v15 = vld [vmem:[%s13885_s10 + $0xfcc] sm:$0xf] }
  0x98   : > { %5124 = vmatpush.bf16.msra.mxu2 %v10894_v49  ;;  %5099 = vmatpush.bf16.msra.mxu0 %v9262_v59  ;;  %v9741_v26 = vld [vmem:[%s13885_s10 + $0x6c8] sm:$0xf]  ;;  %v8974_v35 = vor.u32 %v12749_v25, %v8973_v24  ;;  %v13073_v49 = vld [vmem:[%s13885_s10 + $0xb4c] sm:$0xf]  ;;  %v9554_v59 = vor.u32 %v12881_v47, %v9551_v48 }
  0x99   : > { %v12941_v28 = vld [vmem:[%s13885_s10 + $0x724] sm:$0xf0]  ;;  %v10895_v18 = vld [vmem:[%s13885_s10 + $0x1028] sm:$0xf0] }
  0x9a   : > { %5137 = vmatpush.bf16.msra.mxu3 %v11662_v53  ;;  %5112 = vmatpush.bf16.msra.mxu1 %v10030_v60  ;;  %v10509_v29 = vld [vmem:[%s13885_s10 + $0xcc8] sm:$0xf]  ;;  %v9742_v38 = vor.u32 %v12941_v28, %v9741_v26  ;;  %v11087_v53 = vld [vmem:[%s13885_s10 + $0x11a8] sm:$0xf0]  ;;  %v10322_v60 = vor.u32 %v13073_v49, %v10319_v51 }
  0x9b   : > { %v13133_v30 = vld [vmem:[%s13885_s10 + $0xd24] sm:$0xf0]  ;;  %v13409_v19 = vld [vmem:[%s13885_s10 + $0x15cc] sm:$0xf] }
  0x9c   : > { %5125 = vmatpush.bf16.msra.mxu2 %v10798_v61  ;;  %5100 = vmatpush.bf16.msra.mxu0 %v9166_v7  ;;  %v11277_v33 = vld [vmem:[%s13885_s10 + $0x12c8] sm:$0xf]  ;;  %v10510_v39 = vor.u32 %v13133_v30, %v10509_v29  ;;  %v11090_v61 = vor.u32 %v13265_v52, %v11087_v53  ;;  %v9458_v7 = vor.u32 %v12857_v62, %v9455_v63  ;;  %v11663_v20 = vld [vmem:[%s13885_s10 + $0x1628] sm:$0xf0] }
  0x9d   : > { %v13325_v34 = vld [vmem:[%s13885_s10 + $0x1324] sm:$0xf0]  ;;  %v12809_v24 = vld [vmem:[%s13885_s10 + $0x30c] sm:$0xf] }
  0x9e   : > { %5138 = vmatpush.bf16.msra.mxu3 %v11566_v1  ;;  %5113 = vmatpush.bf16.msra.mxu1 %v9934_v8  ;;  %v8877_v36 = vld [vmem:[%s13885_s10 + $0x8] sm:$0xf]  ;;  %v11278_v43 = vor.u32 %v13325_v34, %v11277_v33  ;;  %v11858_v1 = vor.u32 %v13457_v56, %v11855_v57  ;;  %v10226_v8 = vor.u32 %v13049_v0, %v10223_v2  ;;  %v9263_v25 = vld [vmem:[%s13885_s10 + $0x368] sm:$0xf0] }
  0x9f   : > { %v12725_v37 = vld [vmem:[%s13885_s10 + $0x64] sm:$0xf0]  ;;  %v13001_v26 = vld [vmem:[%s13885_s10 + $0x90c] sm:$0xf] }
  0xa0   : > { %5126 = vmatpush.bf16.msra.mxu2 %v10702_v9  ;;  %5101 = vmatpush.bf16.msra.mxu0 %v9070_v21  ;;  %v9645_v40 = vld [vmem:[%s13885_s10 + $0x608] sm:$0xf]  ;;  %v8878_v50 = vor.u32 %v12725_v37, %v8877_v36  ;;  %v10994_v9 = vor.u32 %v13241_v3, %v10991_v4  ;;  %v9362_v21 = vor.u32 %v12833_v10, %v9359_v11  ;;  %v10031_v28 = vld [vmem:[%s13885_s10 + $0x968] sm:$0xf0] }
  0xa1   : > { %v12917_v41 = vld [vmem:[%s13885_s10 + $0x664] sm:$0xf0]  ;;  %v13193_v29 = vld [vmem:[%s13885_s10 + $0xf0c] sm:$0xf]  ;;  %v10034_v36 = vor.u32 %v13001_v26, %v10031_v28  ;;  %v11093_v26 = vld [vmem:[%s13885_s10 + $0x1150] sm:$0xf] }
  0xa2   : > { %5139 = vmatpush.bf16.msra.mxu3 %v11470_v13  ;;  %5114 = vmatpush.bf16.msra.mxu1 %v9838_v22  ;;  %v10413_v42 = vld [vmem:[%s13885_s10 + $0xc08] sm:$0xf]  ;;  %v9646_v54 = vor.u32 %v12917_v41, %v9645_v40  ;;  %v11762_v13 = vor.u32 %v13433_v5, %v11759_v6  ;;  %v10130_v22 = vor.u32 %v13025_v12, %v10127_v14  ;;  %v10799_v30 = vld [vmem:[%s13885_s10 + $0xf68] sm:$0xf0] }
  0xa3   : > { %v13109_v44 = vld [vmem:[%s13885_s10 + $0xc64] sm:$0xf0]  ;;  %v13385_v33 = vld [vmem:[%s13885_s10 + $0x150c] sm:$0xf]  ;;  %v10802_v37 = vor.u32 %v13193_v29, %v10799_v30  ;;  %v11861_v30 = vld [vmem:[%s13885_s10 + $0x1750] sm:$0xf] }
  0xa4   : > { %5127 = vmatpush.bf16.msra.mxu2 %v10606_v23  ;;  %v11181_v45 = vld [vmem:[%s13885_s10 + $0x1208] sm:$0xf]  ;;  %5102 = vmatpush.bf16.msra.mxu0 %v8974_v35  ;;  %v10414_v55 = vor.u32 %v13109_v44, %v10413_v42  ;;  %v10898_v23 = vor.u32 %v13217_v15, %v10895_v18  ;;  %v11567_v34 = vld [vmem:[%s13885_s10 + $0x1568] sm:$0xf0]  ;;  %v9266_v35 = vor.u32 %v12809_v24, %v9263_v25  ;;  %v13086_v25 = vld [vmem:[%s13885_s10 + $0xbac] sm:$0xf0] }
  0xa5   : > { %v13301_v46 = vld [vmem:[%s13885_s10 + $0x1264] sm:$0xf0]  ;;  %v12977_v40 = vld [vmem:[%s13885_s10 + $0x84c] sm:$0xf]  ;;  %v11570_v41 = vor.u32 %v13385_v33, %v11567_v34  ;;  %v13470_v33 = vld [vmem:[%s13885_s10 + $0x17ac] sm:$0xf0] }
  0xa6   : > { %5140 = vmatpush.bf16.msra.mxu3 %v11374_v27  ;;  %5115 = vmatpush.bf16.msra.mxu1 %v9742_v38  ;;  %v11182_v58 = vor.u32 %v13301_v46, %v11181_v45  ;;  %v11666_v27 = vor.u32 %v13409_v19, %v11663_v20  ;;  %v12785_v38 = vld [vmem:[%s13885_s10 + $0x24c] sm:$0xf] }
  0xa7   : > { %v9935_v42 = vld [vmem:[%s13885_s10 + $0x8a8] sm:$0xf0] }
  0xa8   : > { %5128 = vmatpush.bf16.msra.mxu2 %v10510_v39  ;;  %5103 = vmatpush.bf16.msra.mxu0 %v8878_v50  ;;  %v9167_v39 = vld [vmem:[%s13885_s10 + $0x2a8] sm:$0xf0]  ;;  %v9938_v48 = vor.u32 %v12977_v40, %v9935_v42  ;;  %v10229_v40 = vld [vmem:[%s13885_s10 + $0xa90] sm:$0xf] }
  0xa9   : > { %v10703_v44 = vld [vmem:[%s13885_s10 + $0xea8] sm:$0xf0]  ;;  %v9170_v47 = vor.u32 %v12785_v38, %v9167_v39  ;;  %v9461_v38 = vld [vmem:[%s13885_s10 + $0x490] sm:$0xf] }
  0xaa   : > { %5141 = vmatpush.bf16.msra.mxu3 %v11278_v43  ;;  %5116 = vmatpush.bf16.msra.mxu1 %v9646_v54  ;;  %v13169_v43 = vld [vmem:[%s13885_s10 + $0xe4c] sm:$0xf]  ;;  %v12870_v39 = vld [vmem:[%s13885_s10 + $0x4ec] sm:$0xf0] }
  0xab   : > { %5104 = vmatmul.bf16.vlgmr.msra.gmra.mxu0 %v13997_v31  ;;  %v13361_v45 = vld [vmem:[%s13885_s10 + $0x144c] sm:$0xf]  ;;  %v10706_v49 = vor.u32 %v13169_v43, %v10703_v44  ;;  %v13062_v42 = vld [vmem:[%s13885_s10 + $0xaec] sm:$0xf0] }
  0xac   : > { %5129 = vmatpush.bf16.msra.mxu2 %v10414_v55  ;;  %5148 = vmatpush.bf16.msrb.mxu0 %v9554_v59  ;;  %v11471_v46 = vld [vmem:[%s13885_s10 + $0x14a8] sm:$0xf0]  ;;  %v10997_v43 = vld [vmem:[%s13885_s10 + $0x1090] sm:$0xf] }
  0xad   : > { %5117 = vmatmul.bf16.vlgmr.msra.gmra.mxu1 %v13999_v32  ;;  %v12761_v50 = vld [vmem:[%s13885_s10 + $0x18c] sm:$0xf]  ;;  %v11474_v53 = vor.u32 %v13361_v45, %v11471_v46  ;;  %v13254_v44 = vld [vmem:[%s13885_s10 + $0x10ec] sm:$0xf0] }
  0xae   : > { %5142 = vmatpush.bf16.msra.mxu3 %v11182_v58  ;;  %5161 = vmatpush.bf16.msrb.mxu1 %v10322_v60  ;;  %v9071_v51 = vld [vmem:[%s13885_s10 + $0x1e8] sm:$0xf0]  ;;  %v11765_v45 = vld [vmem:[%s13885_s10 + $0x1690] sm:$0xf] }
  0xaf   : > { %5130 = vmatmul.bf16.vlgmr.msra.gmra.mxu2 %v13985_v16  ;;  %v12953_v52 = vld [vmem:[%s13885_s10 + $0x78c] sm:$0xf]  ;;  %v9074_v59 = vor.u32 %v12761_v50, %v9071_v51  ;;  %v13446_v46 = vld [vmem:[%s13885_s10 + $0x16ec] sm:$0xf0] }
  0xb0   : > { %5174 = vmatpush.bf16.msrb.mxu2 %v11090_v61  ;;  %5149 = vmatpush.bf16.msrb.mxu0 %v9458_v7  ;;  %v9839_v54 = vld [vmem:[%s13885_s10 + $0x7e8] sm:$0xf0]  ;;  %v9365_v50 = vld [vmem:[%s13885_s10 + $0x3d0] sm:$0xf] }
  0xb1   : > { %5143 = vmatmul.bf16.vlgmr.msra.gmra.mxu3 %v13987_v17  ;;  %v13145_v55 = vld [vmem:[%s13885_s10 + $0xd8c] sm:$0xf]  ;;  %v9842_v60 = vor.u32 %v12953_v52, %v9839_v54  ;;  %v12846_v51 = vld [vmem:[%s13885_s10 + $0x42c] sm:$0xf0] }
  0xb2   : > { %5187 = vmatpush.bf16.msrb.mxu3 %v11858_v1  ;;  %5162 = vmatpush.bf16.msrb.mxu1 %v10226_v8  ;;  %v10607_v56 = vld [vmem:[%s13885_s10 + $0xde8] sm:$0xf0]  ;;  %v10133_v52 = vld [vmem:[%s13885_s10 + $0x9d0] sm:$0xf] }
  0xb3   : > { %v13337_v57 = vld [vmem:[%s13885_s10 + $0x138c] sm:$0xf]  ;;  %v10610_v61 = vor.u32 %v13145_v55, %v10607_v56  ;;  %v13038_v54 = vld [vmem:[%s13885_s10 + $0xa2c] sm:$0xf0] }
  0xb4   : > { %5175 = vmatpush.bf16.msrb.mxu2 %v10994_v9  ;;  %5150 = vmatpush.bf16.msrb.mxu0 %v9362_v21  ;;  %v11375_v58 = vld [vmem:[%s13885_s10 + $0x13e8] sm:$0xf0]  ;;  %v9557_v21 = vld [vmem:[%s13885_s10 + $0x550] sm:$0xf] }
  0xb5   : > { %v12737_v62 = vld [vmem:[%s13885_s10 + $0xcc] sm:$0xf]  ;;  %v11378_v1 = vor.u32 %v13337_v57, %v11375_v58  ;;  %v10901_v55 = vld [vmem:[%s13885_s10 + $0xfd0] sm:$0xf] }
  0xb6   : > { %5188 = vmatpush.bf16.msrb.mxu3 %v11762_v13  ;;  %5163 = vmatpush.bf16.msrb.mxu1 %v10130_v22  ;;  %v8975_v63 = vld [vmem:[%s13885_s10 + $0x128] sm:$0xf0]  ;;  %v12894_v22 = vld [vmem:[%s13885_s10 + $0x5ac] sm:$0xf0] }
  0xb7   : > { %v12929_v0 = vld [vmem:[%s13885_s10 + $0x6cc] sm:$0xf]  ;;  %v8978_v7 = vor.u32 %v12737_v62, %v8975_v63  ;;  %v13230_v56 = vld [vmem:[%s13885_s10 + $0x102c] sm:$0xf0] }
  0xb8   : > { %5176 = vmatpush.bf16.msrb.mxu2 %v10898_v23  ;;  %5151 = vmatpush.bf16.msrb.mxu0 %v9266_v35  ;;  %v9743_v2 = vld [vmem:[%s13885_s10 + $0x728] sm:$0xf0]  ;;  %v10325_v23 = vld [vmem:[%s13885_s10 + $0xb50] sm:$0xf]  ;;  %v9558_v35 = vor.u32 %v12894_v22, %v9557_v21 }
  0xb9   : > { %v13121_v3 = vld [vmem:[%s13885_s10 + $0xccc] sm:$0xf]  ;;  %v9746_v10 = vor.u32 %v12929_v0, %v9743_v2  ;;  %v11669_v57 = vld [vmem:[%s13885_s10 + $0x15d0] sm:$0xf] }
  0xba   : > { %5189 = vmatpush.bf16.msrb.mxu3 %v11666_v27  ;;  %5164 = vmatpush.bf16.msrb.mxu1 %v10034_v36  ;;  %v10511_v4 = vld [vmem:[%s13885_s10 + $0xd28] sm:$0xf0]  ;;  %v13278_v27 = vld [vmem:[%s13885_s10 + $0x11ac] sm:$0xf0]  ;;  %v10326_v36 = vor.u32 %v13086_v25, %v10325_v23 }
  0xbb   : > { %v13313_v5 = vld [vmem:[%s13885_s10 + $0x12cc] sm:$0xf]  ;;  %v10514_v11 = vor.u32 %v13121_v3, %v10511_v4  ;;  %v13422_v58 = vld [vmem:[%s13885_s10 + $0x162c] sm:$0xf0] }
  0xbc   : > { %5177 = vmatpush.bf16.msrb.mxu2 %v10802_v37  ;;  %5152 = vmatpush.bf16.msrb.mxu0 %v9170_v47  ;;  %v11279_v6 = vld [vmem:[%s13885_s10 + $0x1328] sm:$0xf0]  ;;  %v11094_v37 = vor.u32 %v13278_v27, %v11093_v26  ;;  %v9462_v47 = vor.u32 %v12870_v39, %v9461_v38  ;;  %v9269_v62 = vld [vmem:[%s13885_s10 + $0x310] sm:$0xf] }
  0xbd   : > { %v12713_v8 = vld [vmem:[%s13885_s10 + $0xc] sm:$0xf]  ;;  %v11282_v15 = vor.u32 %v13313_v5, %v11279_v6  ;;  %v12822_v63 = vld [vmem:[%s13885_s10 + $0x36c] sm:$0xf0] }
  0xbe   : > { %5190 = vmatpush.bf16.msrb.mxu3 %v11570_v41  ;;  %5165 = vmatpush.bf16.msrb.mxu1 %v9938_v48  ;;  %v8879_v9 = vld [vmem:[%s13885_s10 + $0x68] sm:$0xf0]  ;;  %v11862_v41 = vor.u32 %v13470_v33, %v11861_v30  ;;  %v10230_v48 = vor.u32 %v13062_v42, %v10229_v40  ;;  %v10037_v0 = vld [vmem:[%s13885_s10 + $0x910] sm:$0xf] }
  0xbf   : > { %v12905_v12 = vld [vmem:[%s13885_s10 + $0x60c] sm:$0xf]  ;;  %v8882_v24 = vor.u32 %v12713_v8, %v8879_v9  ;;  %v13014_v2 = vld [vmem:[%s13885_s10 + $0x96c] sm:$0xf0] }
  0xc0   : > { %5178 = vmatpush.bf16.msrb.mxu2 %v10706_v49  ;;  %5153 = vmatpush.bf16.msrb.mxu0 %v9074_v59  ;;  %v9647_v13 = vld [vmem:[%s13885_s10 + $0x668] sm:$0xf0]  ;;  %v10998_v49 = vor.u32 %v13254_v44, %v10997_v43  ;;  %v9366_v59 = vor.u32 %v12846_v51, %v9365_v50  ;;  %v10805_v3 = vld [vmem:[%s13885_s10 + $0xf10] sm:$0xf]  ;;  %v10038_v8 = vor.u32 %v13014_v2, %v10037_v0  ;;  %v13266_v0 = vld [vmem:[%s13885_s10 + $0x1154] sm:$0xf] }
  0xc1   : > { %v13097_v14 = vld [vmem:[%s13885_s10 + $0xc0c] sm:$0xf]  ;;  %v9650_v28 = vor.u32 %v12905_v12, %v9647_v13  ;;  %v13206_v4 = vld [vmem:[%s13885_s10 + $0xf6c] sm:$0xf0] }
  0xc2   : > { %5191 = vmatpush.bf16.msrb.mxu3 %v11474_v53  ;;  %5166 = vmatpush.bf16.msrb.mxu1 %v9842_v60  ;;  %v10415_v18 = vld [vmem:[%s13885_s10 + $0xc68] sm:$0xf0]  ;;  %v11766_v53 = vor.u32 %v13446_v46, %v11765_v45  ;;  %v10134_v60 = vor.u32 %v13038_v54, %v10133_v52  ;;  %v11573_v5 = vld [vmem:[%s13885_s10 + $0x1510] sm:$0xf]  ;;  %v10806_v9 = vor.u32 %v13206_v4, %v10805_v3  ;;  %v13458_v4 = vld [vmem:[%s13885_s10 + $0x1754] sm:$0xf] }
  0xc3   : > { %v13289_v19 = vld [vmem:[%s13885_s10 + $0x120c] sm:$0xf]  ;;  %v10418_v29 = vor.u32 %v13097_v14, %v10415_v18  ;;  %v13398_v6 = vld [vmem:[%s13885_s10 + $0x156c] sm:$0xf0] }
  0xc4   : > { %5179 = vmatpush.bf16.msrb.mxu2 %v10610_v61  ;;  %v11183_v20 = vld [vmem:[%s13885_s10 + $0x1268] sm:$0xf0]  ;;  %5154 = vmatpush.bf16.msrb.mxu0 %v8978_v7  ;;  %v10902_v61 = vor.u32 %v13230_v56, %v10901_v55  ;;  %v9270_v7 = vor.u32 %v12822_v63, %v9269_v62  ;;  %v9941_v12 = vld [vmem:[%s13885_s10 + $0x850] sm:$0xf]  ;;  %v11574_v13 = vor.u32 %v13398_v6, %v11573_v5  ;;  %v10327_v63 = vld [vmem:[%s13885_s10 + $0xbb0] sm:$0xf0] }
  0xc5   : > { %v11186_v34 = vor.u32 %v13289_v19, %v11183_v20  ;;  %v12990_v14 = vld [vmem:[%s13885_s10 + $0x8ac] sm:$0xf0]  ;;  %v11863_v5 = vld [vmem:[%s13885_s10 + $0x17b0] sm:$0xf0] }
  0xc6   : > { %5192 = vmatpush.bf16.msrb.mxu3 %v11378_v1  ;;  %5167 = vmatpush.bf16.msrb.mxu1 %v9746_v10  ;;  %v11670_v1 = vor.u32 %v13422_v58, %v11669_v57  ;;  %v9173_v10 = vld [vmem:[%s13885_s10 + $0x250] sm:$0xf]  ;;  %v9942_v22 = vor.u32 %v12990_v14, %v9941_v12  ;;  %v13050_v12 = vld [vmem:[%s13885_s10 + $0xa94] sm:$0xf] }
  0xc7   : > { %v13182_v18 = vld [vmem:[%s13885_s10 + $0xeac] sm:$0xf0]  ;;  %v10231_v14 = vld [vmem:[%s13885_s10 + $0xaf0] sm:$0xf0] }
  0xc8   : > { %5180 = vmatpush.bf16.msrb.mxu2 %v10514_v11  ;;  %5155 = vmatpush.bf16.msrb.mxu0 %v8882_v24  ;;  %v12798_v11 = vld [vmem:[%s13885_s10 + $0x2ac] sm:$0xf0] }
  0xc9   : > { %v11477_v19 = vld [vmem:[%s13885_s10 + $0x1450] sm:$0xf]  ;;  %v9174_v21 = vor.u32 %v12798_v11, %v9173_v10  ;;  %v12858_v10 = vld [vmem:[%s13885_s10 + $0x494] sm:$0xf] }
  0xca   : > { %5193 = vmatpush.bf16.msrb.mxu3 %v11282_v15  ;;  %5168 = vmatpush.bf16.msrb.mxu1 %v9650_v28  ;;  %v10709_v15 = vld [vmem:[%s13885_s10 + $0xe50] sm:$0xf]  ;;  %v9463_v11 = vld [vmem:[%s13885_s10 + $0x4f0] sm:$0xf0] }
  0xcb   : > { %5156 = vmatmul.bf16.vlgmr.msrb.gmra.mxu0 %v13997_v31  ;;  %v13374_v20 = vld [vmem:[%s13885_s10 + $0x14ac] sm:$0xf0]  ;;  %v10710_v23 = vor.u32 %v13182_v18, %v10709_v15  ;;  %v13242_v15 = vld [vmem:[%s13885_s10 + $0x1094] sm:$0xf] }
  0xcc   : > { %5181 = vmatpush.bf16.msrb.mxu2 %v10418_v29  ;;  %5200 = vmatpush.bf16.msra.mxu0 %v9558_v35  ;;  %v9077_v24 = vld [vmem:[%s13885_s10 + $0x190] sm:$0xf]  ;;  %v11478_v27 = vor.u32 %v13374_v20, %v11477_v19  ;;  %v10999_v18 = vld [vmem:[%s13885_s10 + $0x10f0] sm:$0xf0] }
  0xcd   : > { %5169 = vmatmul.bf16.vlgmr.msrb.gmra.mxu1 %v13999_v32  ;;  %v12774_v25 = vld [vmem:[%s13885_s10 + $0x1ec] sm:$0xf0]  ;;  %v13434_v19 = vld [vmem:[%s13885_s10 + $0x1694] sm:$0xf] }
  0xce   : > { %5194 = vmatpush.bf16.msrb.mxu3 %v11186_v34  ;;  %5213 = vmatpush.bf16.msra.mxu1 %v10326_v36  ;;  %v9845_v26 = vld [vmem:[%s13885_s10 + $0x790] sm:$0xf]  ;;  %v9078_v35 = vor.u32 %v12774_v25, %v9077_v24  ;;  %v11767_v20 = vld [vmem:[%s13885_s10 + $0x16f0] sm:$0xf0] }
  0xcf   : > { %5182 = vmatmul.bf16.vlgmr.msrb.gmra.mxu2 %v13985_v16  ;;  %v12966_v28 = vld [vmem:[%s13885_s10 + $0x7ec] sm:$0xf0]  ;;  %v12834_v24 = vld [vmem:[%s13885_s10 + $0x3d4] sm:$0xf] }
  0xd0   : > { %5226 = vmatpush.bf16.msra.mxu2 %v11094_v37  ;;  %5201 = vmatpush.bf16.msra.mxu0 %v9462_v47  ;;  %v10613_v29 = vld [vmem:[%s13885_s10 + $0xd90] sm:$0xf]  ;;  %v9846_v36 = vor.u32 %v12966_v28, %v9845_v26  ;;  %v9367_v25 = vld [vmem:[%s13885_s10 + $0x430] sm:$0xf0] }
  0xd1   : > { %5195 = vmatmul.bf16.vlgmr.msrb.gmra.mxu3 %v13987_v17  ;;  %v13158_v30 = vld [vmem:[%s13885_s10 + $0xdec] sm:$0xf0]  ;;  %v13026_v26 = vld [vmem:[%s13885_s10 + $0x9d4] sm:$0xf] }
  0xd2   : > { %5239 = vmatpush.bf16.msra.mxu3 %v11862_v41  ;;  %5214 = vmatpush.bf16.msra.mxu1 %v10230_v48  ;;  %v11381_v33 = vld [vmem:[%s13885_s10 + $0x1390] sm:$0xf]  ;;  %v10614_v37 = vor.u32 %v13158_v30, %v10613_v29  ;;  %v10135_v28 = vld [vmem:[%s13885_s10 + $0xa30] sm:$0xf0] }
  0xd3   : > { %v13350_v34 = vld [vmem:[%s13885_s10 + $0x13ec] sm:$0xf0]  ;;  %v13218_v29 = vld [vmem:[%s13885_s10 + $0xfd4] sm:$0xf] }
  0xd4   : > { %5227 = vmatpush.bf16.msra.mxu2 %v10998_v49  ;;  %5202 = vmatpush.bf16.msra.mxu0 %v9366_v59  ;;  %v8981_v38 = vld [vmem:[%s13885_s10 + $0xd0] sm:$0xf]  ;;  %v11382_v41 = vor.u32 %v13350_v34, %v11381_v33  ;;  %v12882_v59 = vld [vmem:[%s13885_s10 + $0x554] sm:$0xf] }
  0xd5   : > { %v12750_v39 = vld [vmem:[%s13885_s10 + $0x12c] sm:$0xf0]  ;;  %v10903_v30 = vld [vmem:[%s13885_s10 + $0x1030] sm:$0xf0] }
  0xd6   : > { %5240 = vmatpush.bf16.msra.mxu3 %v11766_v53  ;;  %5215 = vmatpush.bf16.msra.mxu1 %v10134_v60  ;;  %v9749_v40 = vld [vmem:[%s13885_s10 + $0x6d0] sm:$0xf]  ;;  %v8982_v47 = vor.u32 %v12750_v39, %v8981_v38  ;;  %v9559_v60 = vld [vmem:[%s13885_s10 + $0x5b0] sm:$0xf0] }
  0xd7   : > { %v12942_v42 = vld [vmem:[%s13885_s10 + $0x72c] sm:$0xf0]  ;;  %v13410_v33 = vld [vmem:[%s13885_s10 + $0x15d4] sm:$0xf] }
  0xd8   : > { %5228 = vmatpush.bf16.msra.mxu2 %v10902_v61  ;;  %5203 = vmatpush.bf16.msra.mxu0 %v9270_v7  ;;  %v10517_v43 = vld [vmem:[%s13885_s10 + $0xcd0] sm:$0xf]  ;;  %v9750_v50 = vor.u32 %v12942_v42, %v9749_v40  ;;  %v13074_v61 = vld [vmem:[%s13885_s10 + $0xb54] sm:$0xf]  ;;  %v9562_v7 = vor.u32 %v12882_v59, %v9559_v60 }
  0xd9   : > { %v13134_v44 = vld [vmem:[%s13885_s10 + $0xd2c] sm:$0xf0]  ;;  %v11671_v34 = vld [vmem:[%s13885_s10 + $0x1630] sm:$0xf0] }
  0xda   : > { %5241 = vmatpush.bf16.msra.mxu3 %v11670_v1  ;;  %5216 = vmatpush.bf16.msra.mxu1 %v10038_v8  ;;  %v11285_v45 = vld [vmem:[%s13885_s10 + $0x12d0] sm:$0xf]  ;;  %v10518_v51 = vor.u32 %v13134_v44, %v10517_v43  ;;  %v11095_v1 = vld [vmem:[%s13885_s10 + $0x11b0] sm:$0xf0]  ;;  %v10330_v8 = vor.u32 %v13074_v61, %v10327_v63 }
  0xdb   : > { %v13326_v46 = vld [vmem:[%s13885_s10 + $0x132c] sm:$0xf0]  ;;  %v12810_v38 = vld [vmem:[%s13885_s10 + $0x314] sm:$0xf] }
  0xdc   : > { %5229 = vmatpush.bf16.msra.mxu2 %v10806_v9  ;;  %5204 = vmatpush.bf16.msra.mxu0 %v9174_v21  ;;  %v8885_v48 = vld [vmem:[%s13885_s10 + $0x10] sm:$0xf]  ;;  %v11286_v55 = vor.u32 %v13326_v46, %v11285_v45  ;;  %v11098_v9 = vor.u32 %v13266_v0, %v11095_v1  ;;  %v9466_v21 = vor.u32 %v12858_v10, %v9463_v11  ;;  %v9271_v39 = vld [vmem:[%s13885_s10 + $0x370] sm:$0xf0] }
  0xdd   : > { %v12726_v49 = vld [vmem:[%s13885_s10 + $0x6c] sm:$0xf0]  ;;  %v13002_v40 = vld [vmem:[%s13885_s10 + $0x914] sm:$0xf] }
  0xde   : > { %5242 = vmatpush.bf16.msra.mxu3 %v11574_v13  ;;  %5217 = vmatpush.bf16.msra.mxu1 %v9942_v22  ;;  %v9653_v52 = vld [vmem:[%s13885_s10 + $0x610] sm:$0xf]  ;;  %v8886_v62 = vor.u32 %v12726_v49, %v8885_v48  ;;  %v11866_v13 = vor.u32 %v13458_v4, %v11863_v5  ;;  %v10234_v22 = vor.u32 %v13050_v12, %v10231_v14  ;;  %v10039_v42 = vld [vmem:[%s13885_s10 + $0x970] sm:$0xf0] }
  0xdf   : > { %v12918_v53 = vld [vmem:[%s13885_s10 + $0x66c] sm:$0xf0]  ;;  %v13194_v43 = vld [vmem:[%s13885_s10 + $0xf14] sm:$0xf]  ;;  %v10042_v48 = vor.u32 %v13002_v40, %v10039_v42  ;;  %v12895_v42 = vld [vmem:[%s13885_s10 + $0x5b4] sm:$0xf0] }
  0xe0   : > { %5230 = vmatpush.bf16.msra.mxu2 %v10710_v23  ;;  %5205 = vmatpush.bf16.msra.mxu0 %v9078_v35  ;;  %v10421_v54 = vld [vmem:[%s13885_s10 + $0xc10] sm:$0xf]  ;;  %v9654_v2 = vor.u32 %v12918_v53, %v9653_v52  ;;  %v11002_v23 = vor.u32 %v13242_v15, %v10999_v18  ;;  %v9370_v35 = vor.u32 %v12834_v24, %v9367_v25  ;;  %v10807_v44 = vld [vmem:[%s13885_s10 + $0xf70] sm:$0xf0] }
  0xe1   : > { %v13110_v56 = vld [vmem:[%s13885_s10 + $0xc6c] sm:$0xf0]  ;;  %v13386_v45 = vld [vmem:[%s13885_s10 + $0x1514] sm:$0xf]  ;;  %v10810_v49 = vor.u32 %v13194_v43, %v10807_v44  ;;  %v10333_v43 = vld [vmem:[%s13885_s10 + $0xb58] sm:$0xf] }
  0xe2   : > { %5243 = vmatpush.bf16.msra.mxu3 %v11478_v27  ;;  %5218 = vmatpush.bf16.msra.mxu1 %v9846_v36  ;;  %v11189_v57 = vld [vmem:[%s13885_s10 + $0x1210] sm:$0xf]  ;;  %v10422_v3 = vor.u32 %v13110_v56, %v10421_v54  ;;  %v11770_v27 = vor.u32 %v13434_v19, %v11767_v20  ;;  %v10138_v36 = vor.u32 %v13026_v26, %v10135_v28  ;;  %v11575_v46 = vld [vmem:[%s13885_s10 + $0x1570] sm:$0xf0] }
  0xe3   : > { %v13302_v58 = vld [vmem:[%s13885_s10 + $0x126c] sm:$0xf0]  ;;  %v12978_v52 = vld [vmem:[%s13885_s10 + $0x854] sm:$0xf]  ;;  %v11578_v53 = vor.u32 %v13386_v45, %v11575_v46  ;;  %v13087_v46 = vld [vmem:[%s13885_s10 + $0xbb4] sm:$0xf0] }
  0xe4   : > { %5231 = vmatpush.bf16.msra.mxu2 %v10614_v37  ;;  %5206 = vmatpush.bf16.msra.mxu0 %v8982_v47  ;;  %v11190_v6 = vor.u32 %v13302_v58, %v11189_v57  ;;  %v10906_v37 = vor.u32 %v13218_v29, %v10903_v30  ;;  %v9274_v47 = vor.u32 %v12810_v38, %v9271_v39  ;;  %v9943_v54 = vld [vmem:[%s13885_s10 + $0x8b0] sm:$0xf0]  ;;  %v9565_v39 = vld [vmem:[%s13885_s10 + $0x558] sm:$0xf] }
  0xe5   : > { %v10711_v56 = vld [vmem:[%s13885_s10 + $0xeb0] sm:$0xf0]  ;;  %v9946_v60 = vor.u32 %v12978_v52, %v9943_v54  ;;  %v11869_v52 = vld [vmem:[%s13885_s10 + $0x1758] sm:$0xf] }
  0xe6   : > { %5244 = vmatpush.bf16.msra.mxu3 %v11382_v41  ;;  %5219 = vmatpush.bf16.msra.mxu1 %v9750_v50  ;;  %v11674_v41 = vor.u32 %v13410_v33, %v11671_v34  ;;  %v12786_v50 = vld [vmem:[%s13885_s10 + $0x254] sm:$0xf] }
  0xe7   : > { %v13362_v57 = vld [vmem:[%s13885_s10 + $0x1454] sm:$0xf] }
  0xe8   : > { %5232 = vmatpush.bf16.msra.mxu2 %v10518_v51  ;;  %5207 = vmatpush.bf16.msra.mxu0 %v8886_v62  ;;  %v9175_v51 = vld [vmem:[%s13885_s10 + $0x2b0] sm:$0xf0] }
  0xe9   : > { %v11479_v58 = vld [vmem:[%s13885_s10 + $0x14b0] sm:$0xf0]  ;;  %v9178_v59 = vor.u32 %v12786_v50, %v9175_v51 }
  0xea   : > { %5245 = vmatpush.bf16.msra.mxu3 %v11286_v55  ;;  %5220 = vmatpush.bf16.msra.mxu1 %v9654_v2  ;;  %v13170_v55 = vld [vmem:[%s13885_s10 + $0xe54] sm:$0xf]  ;;  %v11482_v1 = vor.u32 %v13362_v57, %v11479_v58  ;;  %v9469_v57 = vld [vmem:[%s13885_s10 + $0x498] sm:$0xf] }
  0xeb   : > { %5208 = vmatmul.bf16.vlgmr.msra.gmra.mxu0 %v13997_v31  ;;  %v10714_v61 = vor.u32 %v13170_v55, %v10711_v56  ;;  %v12762_v62 = vld [vmem:[%s13885_s10 + $0x194] sm:$0xf]  ;;  %v9566_v56 = vor.u32 %v12895_v42, %v9565_v39  ;;  %v9949_v42 = vld [vmem:[%s13885_s10 + $0x858] sm:$0xf] }
  0xec   : > { %5233 = vmatpush.bf16.msra.mxu2 %v10422_v3  ;;  %5252 = vmatpush.bf16.msrb.mxu0 %v9562_v7  ;;  %v9079_v63 = vld [vmem:[%s13885_s10 + $0x1f0] sm:$0xf0] }
  0xed   : > { %5221 = vmatmul.bf16.vlgmr.msra.gmra.mxu1 %v13999_v32  ;;  %v12954_v0 = vld [vmem:[%s13885_s10 + $0x794] sm:$0xf]  ;;  %v9082_v7 = vor.u32 %v12762_v62, %v9079_v63  ;;  %v10237_v62 = vld [vmem:[%s13885_s10 + $0xa98] sm:$0xf] }
  0xee   : > { %5246 = vmatpush.bf16.msra.mxu3 %v11190_v6  ;;  %5265 = vmatpush.bf16.msrb.mxu1 %v10330_v8  ;;  %v9847_v2 = vld [vmem:[%s13885_s10 + $0x7f0] sm:$0xf0]  ;;  %v13063_v63 = vld [vmem:[%s13885_s10 + $0xaf4] sm:$0xf0] }
  0xef   : > { %5234 = vmatmul.bf16.vlgmr.msra.gmra.mxu2 %v13985_v16  ;;  %v13146_v3 = vld [vmem:[%s13885_s10 + $0xd94] sm:$0xf]  ;;  %v9850_v8 = vor.u32 %v12954_v0, %v9847_v2  ;;  %v11005_v2 = vld [vmem:[%s13885_s10 + $0x1098] sm:$0xf] }
  0xf0   : > { %5278 = vmatpush.bf16.msrb.mxu2 %v11098_v9  ;;  %5253 = vmatpush.bf16.msrb.mxu0 %v9466_v21  ;;  %v10615_v4 = vld [vmem:[%s13885_s10 + $0xdf0] sm:$0xf0] }
  0xf1   : > { %5247 = vmatmul.bf16.vlgmr.msra.gmra.mxu3 %v13987_v17  ;;  %v13338_v5 = vld [vmem:[%s13885_s10 + $0x1394] sm:$0xf]  ;;  %v10618_v9 = vor.u32 %v13146_v3, %v10615_v4  ;;  %v13255_v3 = vld [vmem:[%s13885_s10 + $0x10f4] sm:$0xf0] }
  0xf2   : > { %5291 = vmatpush.bf16.msrb.mxu3 %v11866_v13  ;;  %5266 = vmatpush.bf16.msrb.mxu1 %v10234_v22  ;;  %v11383_v6 = vld [vmem:[%s13885_s10 + $0x13f0] sm:$0xf0]  ;;  %v5014_v13 = vpop.f32.mrf.mxu1  ;;  %v5001_v22 = vpop.f32.mrf.mxu0  ;;  %v11773_v4 = vld [vmem:[%s13885_s10 + $0x1698] sm:$0xf] }
  0xf3   : > { %v12738_v10 = vld [vmem:[%s13885_s10 + $0xd4] sm:$0xf]  ;;  %v11386_v14 = vor.u32 %v13338_v5, %v11383_v6  ;;  %v13447_v5 = vld [vmem:[%s13885_s10 + $0x16f4] sm:$0xf0] }
  0xf4   : > { %5279 = vmatpush.bf16.msrb.mxu2 %v11002_v23  ;;  %5254 = vmatpush.bf16.msrb.mxu0 %v9370_v35  ;;  %v8983_v11 = vld [vmem:[%s13885_s10 + $0x130] sm:$0xf0]  ;;  %v5027_v35 = vpop.f32.mrf.mxu2 }
  0xf5   : > { %v12930_v12 = vld [vmem:[%s13885_s10 + $0x6d4] sm:$0xf]  ;;  %v8986_v23 = vor.u32 %v12738_v10, %v8983_v11  ;;  %v11006_v10 = vor.u32 %v13255_v3, %v11005_v2  ;;  %v9373_v11 = vld [vmem:[%s13885_s10 + $0x3d8] sm:$0xf]  ;;  %v345_v2 = vld [vmem:[#allocation2] sm:$0xff] }
  0xf6   : > { %5292 = vmatpush.bf16.msrb.mxu3 %v11770_v27  ;;  %5267 = vmatpush.bf16.msrb.mxu1 %v10138_v36  ;;  %v9751_v15 = vld [vmem:[%s13885_s10 + $0x730] sm:$0xf0]  ;;  %v5015_v27 = vadd.f32 %v5014_v13, %v5001_v22  ;;  %v10141_v13 = vld [vmem:[%s13885_s10 + $0x9d8] sm:$0xf] }
  0xf7   : > { %v13122_v18 = vld [vmem:[%s13885_s10 + $0xcd4] sm:$0xf]  ;;  %v9754_v28 = vor.u32 %v12930_v12, %v9751_v15  ;;  %v12847_v12 = vld [vmem:[%s13885_s10 + $0x434] sm:$0xf0] }
  0xf8   : > { %5280 = vmatpush.bf16.msrb.mxu2 %v10906_v37  ;;  %5255 = vmatpush.bf16.msrb.mxu0 %v9274_v47  ;;  %v10519_v19 = vld [vmem:[%s13885_s10 + $0xd30] sm:$0xf0]  ;;  %v5028_v40 = vadd.f32 %v5027_v35, %v5015_v27  ;;  %v11101_v47 = vld [vmem:[%s13885_s10 + $0x1158] sm:$0xf]  ;;  %v9374_v22 = vor.u32 %v12847_v12, %v9373_v11 }
  0xf9   : > { %v13314_v20 = vld [vmem:[%s13885_s10 + $0x12d4] sm:$0xf]  ;;  %v10522_v29 = vor.u32 %v13122_v18, %v10519_v19  ;;  %v13039_v15 = vld [vmem:[%s13885_s10 + $0xa34] sm:$0xf0] }
  0xfa   : > { %5293 = vmatpush.bf16.msrb.mxu3 %v11674_v41  ;;  %5268 = vmatpush.bf16.msrb.mxu1 %v10042_v48  ;;  %v11287_v21 = vld [vmem:[%s13885_s10 + $0x1330] sm:$0xf0]  ;;  %v5040_v41 = vpop.f32.mrf.mxu3  ;;  %v13279_v48 = vld [vmem:[%s13885_s10 + $0x11b4] sm:$0xf0]  ;;  %v5016_v54 = vpop.f32.mrf.mxu1 }
  0xfb   : > { %v12714_v24 = vld [vmem:[%s13885_s10 + $0x14] sm:$0xf]  ;;  %v11290_v36 = vor.u32 %v13314_v20, %v11287_v21  ;;  %v5003_v0 = vpop.f32.mrf.mxu0  ;;  %v10909_v18 = vld [vmem:[%s13885_s10 + $0xfd8] sm:$0xf] }
  0xfc   : > { %5281 = vmatpush.bf16.msrb.mxu2 %v10810_v49  ;;  %5256 = vmatpush.bf16.msrb.mxu0 %v9178_v59  ;;  %v8887_v25 = vld [vmem:[%s13885_s10 + $0x70] sm:$0xf0]  ;;  %v5041_v49 = vadd.f32 %v5040_v41, %v5028_v40  ;;  %v10334_v59 = vor.u32 %v13087_v46, %v10333_v43  ;;  %v5029_v6 = vpop.f32.mrf.mxu2  ;;  %v13231_v19 = vld [vmem:[%s13885_s10 + $0x1034] sm:$0xf0] }
  0xfd   : > { %v12906_v26 = vld [vmem:[%s13885_s10 + $0x614] sm:$0xf]  ;;  %v8890_v45 = vor.u32 %v12714_v24, %v8887_v25  ;;  %v11677_v20 = vld [vmem:[%s13885_s10 + $0x15d8] sm:$0xf]  ;;  %v10910_v24 = vor.u32 %v13231_v19, %v10909_v18 }
  0xfe   : > { %5294 = vmatpush.bf16.msrb.mxu3 %v11578_v53  ;;  %5269 = vmatpush.bf16.msrb.mxu1 %v9946_v60  ;;  %v9655_v30 = vld [vmem:[%s13885_s10 + $0x670] sm:$0xf0]  ;;  %v13471_v53 = vld [vmem:[%s13885_s10 + $0x17b4] sm:$0xf0]  ;;  %v11102_v60 = vor.u32 %v13279_v48, %v11101_v47 }
  0xff   : > { %v13098_v33 = vld [vmem:[%s13885_s10 + $0xc14] sm:$0xf]  ;;  %v9658_v50 = vor.u32 %v12906_v26, %v9655_v30  ;;  %v13423_v21 = vld [vmem:[%s13885_s10 + $0x1634] sm:$0xf0] }
 0x100   : > { %5282 = vmatpush.bf16.msrb.mxu2 %v10714_v61  ;;  %5257 = vmatpush.bf16.msrb.mxu0 %v9082_v7  ;;  %v10423_v34 = vld [vmem:[%s13885_s10 + $0xc70] sm:$0xf0]  ;;  %v12871_v61 = vld [vmem:[%s13885_s10 + $0x4f4] sm:$0xf0] }
 0x101   : > { %v13290_v37 = vld [vmem:[%s13885_s10 + $0x1214] sm:$0xf]  ;;  %v10426_v51 = vor.u32 %v13098_v33, %v10423_v34  ;;  %v9470_v7 = vor.u32 %v12871_v61, %v9469_v57  ;;  %v9277_v25 = vld [vmem:[%s13885_s10 + $0x318] sm:$0xf] }
 0x102   : > { %5295 = vmatpush.bf16.msrb.mxu3 %v11482_v1  ;;  %5270 = vmatpush.bf16.msrb.mxu1 %v9850_v8  ;;  %v11191_v38 = vld [vmem:[%s13885_s10 + $0x1270] sm:$0xf0]  ;;  %v11870_v1 = vor.u32 %v13471_v53, %v11869_v52  ;;  %v5042_v8 = vpop.f32.mrf.mxu3  ;;  %v12823_v26 = vld [vmem:[%s13885_s10 + $0x374] sm:$0xf0] }
 0x103   : > { %v344_v44 = vld [vmem:[#allocation2 + $0xb0] sm:$0xff]  ;;  %v11194_v55 = vor.u32 %v13290_v37, %v11191_v38  ;;  %v10045_v27 = vld [vmem:[%s13885_s10 + $0x918] sm:$0xf] }
 0x104   : > { %5283 = vmatpush.bf16.msrb.mxu2 %v10618_v9  ;;  %5258 = vmatpush.bf16.msrb.mxu0 %v8986_v23  ;;  %v6240_v58 = vadd.f32 %v5041_v49, %v344_v44  ;;  %v10238_v9 = vor.u32 %v13063_v63, %v10237_v62  ;;  %v10142_v23 = vor.u32 %v13039_v15, %v10141_v13  ;;  %v10813_v30 = vld [vmem:[%s13885_s10 + $0xf18] sm:$0xf] }
 0x105   : > { %v13207_v33 = vld [vmem:[%s13885_s10 + $0xf74] sm:$0xf0] }
 0x106   : > { %5296 = vmatpush.bf16.msrb.mxu3 %v11386_v14  ;;  %5271 = vmatpush.bf16.msrb.mxu1 %v9754_v28  ;;  %6264 = vst [vmem:[#allocation2 + $0xb0] sm:$0xff] %v6240_v58  ;;  %v11774_v14 = vor.u32 %v13447_v5, %v11773_v4  ;;  %v11678_v28 = vor.u32 %v13423_v21, %v11677_v20  ;;  %v11581_v34 = vld [vmem:[%s13885_s10 + $0x1518] sm:$0xf] }
 0x107   : > { %v13399_v35 = vld [vmem:[%s13885_s10 + $0x1574] sm:$0xf0]  ;;  %v10814_v39 = vor.u32 %v13207_v33, %v10813_v30 }
 0x108   : > { %5284 = vmatpush.bf16.msrb.mxu2 %v10522_v29  ;;  %5259 = vmatpush.bf16.msrb.mxu0 %v8890_v45  ;;  %v13015_v29 = vld [vmem:[%s13885_s10 + $0x974] sm:$0xf0]  ;;  %v5053_v37 = vpop.f32.mrf.mxu0  ;;  %v11582_v44 = vor.u32 %v13399_v35, %v11581_v34 }
 0x109   : > { %v10046_v38 = vor.u32 %v13015_v29, %v10045_v27  ;;  %v9181_v40 = vld [vmem:[%s13885_s10 + $0x258] sm:$0xf] }
 0x10a   : > { %5297 = vmatpush.bf16.msrb.mxu3 %v11290_v36  ;;  %5272 = vmatpush.bf16.msrb.mxu1 %v9658_v50  ;;  %v9278_v36 = vor.u32 %v12823_v26, %v9277_v25  ;;  %v12799_v41 = vld [vmem:[%s13885_s10 + $0x2b4] sm:$0xf0]  ;;  %v5066_v43 = vpop.f32.mrf.mxu1 }
 0x10b   : > { %5260 = vmatmul.bf16.vlgmr.msrb.gmra.mxu0 %v13997_v31  ;;  %v12991_v45 = vld [vmem:[%s13885_s10 + $0x8b4] sm:$0xf0]  ;;  %v5067_v48 = vadd.f32 %v5066_v43, %v5053_v37  ;;  %v12883_v37 = vld [vmem:[%s13885_s10 + $0x55c] sm:$0xf] }
 0x10c   : > { %5285 = vmatpush.bf16.msrb.mxu2 %v10426_v51  ;;  %5304 = vmatpush.bf16.msra.mxu0 %v9566_v56  ;;  %v10717_v46 = vld [vmem:[%s13885_s10 + $0xe58] sm:$0xf]  ;;  %v9182_v51 = vor.u32 %v12799_v41, %v9181_v40  ;;  %v9950_v52 = vor.u32 %v12991_v45, %v9949_v42  ;;  %v10335_v41 = vld [vmem:[%s13885_s10 + $0xbb8] sm:$0xf0] }
 0x10d   : > { %5273 = vmatmul.bf16.vlgmr.msrb.gmra.mxu1 %v13999_v32  ;;  %v13183_v47 = vld [vmem:[%s13885_s10 + $0xeb4] sm:$0xf0]  ;;  %v13267_v42 = vld [vmem:[%s13885_s10 + $0x115c] sm:$0xf] }
 0x10e   : > { %5298 = vmatpush.bf16.msrb.mxu3 %v11194_v55  ;;  %5317 = vmatpush.bf16.msra.mxu1 %v10334_v59  ;;  %v11485_v49 = vld [vmem:[%s13885_s10 + $0x1458] sm:$0xf]  ;;  %v10718_v53 = vor.u32 %v13183_v47, %v10717_v46  ;;  %v11103_v43 = vld [vmem:[%s13885_s10 + $0x11b8] sm:$0xf0] }
 0x10f   : > { %5286 = vmatmul.bf16.vlgmr.msrb.gmra.mxu2 %v13985_v16  ;;  %v13375_v50 = vld [vmem:[%s13885_s10 + $0x14b4] sm:$0xf0]  ;;  %v13459_v46 = vld [vmem:[%s13885_s10 + $0x175c] sm:$0xf] }
 0x110   : > { %5330 = vmatpush.bf16.msra.mxu2 %v11102_v60  ;;  %5305 = vmatpush.bf16.msra.mxu0 %v9470_v7  ;;  %v9085_v54 = vld [vmem:[%s13885_s10 + $0x198] sm:$0xf]  ;;  %v11486_v58 = vor.u32 %v13375_v50, %v11485_v49  ;;  %v5055_v5 = vpop.f32.mrf.mxu0  ;;  %v11871_v47 = vld [vmem:[%s13885_s10 + $0x17b8] sm:$0xf0] }
 0x111   : > { %5299 = vmatmul.bf16.vlgmr.msrb.gmra.mxu3 %v13987_v17  ;;  %v12775_v55 = vld [vmem:[%s13885_s10 + $0x1f4] sm:$0xf0]  ;;  %v13219_v5 = vld [vmem:[%s13885_s10 + $0xfdc] sm:$0xf] }
 0x112   : > { %5343 = vmatpush.bf16.msra.mxu3 %v11870_v1  ;;  %5318 = vmatpush.bf16.msra.mxu1 %v10238_v9  ;;  %v9853_v56 = vld [vmem:[%s13885_s10 + $0x798] sm:$0xf]  ;;  %v5079_v57 = vpop.f32.mrf.mxu2  ;;  %v9086_v3 = vor.u32 %v12775_v55, %v9085_v54  ;;  %v5068_v11 = vpop.f32.mrf.mxu1  ;;  %v13051_v54 = vld [vmem:[%s13885_s10 + $0xa9c] sm:$0xf]  ;;  %v11874_v55 = vor.u32 %v13459_v46, %v11871_v47 }
 0x113   : > { %v12967_v59 = vld [vmem:[%s13885_s10 + $0x7f4] sm:$0xf0]  ;;  %v5080_v62 = vadd.f32 %v5079_v57, %v5067_v48  ;;  %v13243_v57 = vld [vmem:[%s13885_s10 + $0x109c] sm:$0xf] }
 0x114   : > { %5331 = vmatpush.bf16.msra.mxu2 %v11006_v10  ;;  %5306 = vmatpush.bf16.msra.mxu0 %v9374_v22  ;;  %v10621_v60 = vld [vmem:[%s13885_s10 + $0xd98] sm:$0xf]  ;;  %v5092_v63 = vpop.f32.mrf.mxu3  ;;  %v9854_v6 = vor.u32 %v12967_v59, %v9853_v56  ;;  %v10239_v56 = vld [vmem:[%s13885_s10 + $0xaf8] sm:$0xf0] }
 0x115   : > { %v13159_v61 = vld [vmem:[%s13885_s10 + $0xdf4] sm:$0xf0]  ;;  %v5093_v4 = vadd.f32 %v5092_v63, %v5080_v62  ;;  %v13435_v59 = vld [vmem:[%s13885_s10 + $0x169c] sm:$0xf]  ;;  %v10242_v62 = vor.u32 %v13051_v54, %v10239_v56 }
 0x116   : > { %5344 = vmatpush.bf16.msra.mxu3 %v11774_v14  ;;  %5319 = vmatpush.bf16.msra.mxu1 %v10142_v23  ;;  %v11389_v0 = vld [vmem:[%s13885_s10 + $0x1398] sm:$0xf]  ;;  %v10622_v7 = vor.u32 %v13159_v61, %v10621_v60  ;;  %v11775_v60 = vld [vmem:[%s13885_s10 + $0x16f8] sm:$0xf0] }
 0x117   : > { %v13351_v1 = vld [vmem:[%s13885_s10 + $0x13f4] sm:$0xf0]  ;;  %v6241_v18 = vadd.f32 %v5093_v4, %v345_v2  ;;  %v13027_v2 = vld [vmem:[%s13885_s10 + $0x9dc] sm:$0xf] }
 0x118   : > { %5332 = vmatpush.bf16.msra.mxu2 %v10910_v24  ;;  %5307 = vmatpush.bf16.msra.mxu0 %v9278_v36  ;;  %v8989_v8 = vld [vmem:[%s13885_s10 + $0xd8] sm:$0xf]  ;;  %v11390_v12 = vor.u32 %v13351_v1, %v11389_v0  ;;  %v12835_v0 = vld [vmem:[%s13885_s10 + $0x3dc] sm:$0xf] }
 0x119   : > { %v12751_v9 = vld [vmem:[%s13885_s10 + $0x134] sm:$0xf0]  ;;  %6265 = vst [vmem:[#allocation2] sm:$0xff] %v6241_v18  ;;  %v9375_v1 = vld [vmem:[%s13885_s10 + $0x438] sm:$0xf0] }
 0x11a   : > { %5345 = vmatpush.bf16.msra.mxu3 %v11678_v28  ;;  %5320 = vmatpush.bf16.msra.mxu1 %v10046_v38  ;;  %v9757_v10 = vld [vmem:[%s13885_s10 + $0x6d8] sm:$0xf]  ;;  %v8990_v21 = vor.u32 %v12751_v9, %v8989_v8  ;;  %v5081_v29 = vpop.f32.mrf.mxu2  ;;  %v9567_v38 = vld [vmem:[%s13885_s10 + $0x5b8] sm:$0xf0]  ;;  %v9378_v9 = vor.u32 %v12835_v0, %v9375_v1 }
 0x11b   : > { %v12943_v13 = vld [vmem:[%s13885_s10 + $0x734] sm:$0xf0]  ;;  %v9570_v49 = vor.u32 %v12883_v37, %v9567_v38  ;;  %v10143_v4 = vld [vmem:[%s13885_s10 + $0xa38] sm:$0xf0] }
 0x11c   : > { %5333 = vmatpush.bf16.msra.mxu2 %v10814_v39  ;;  %5308 = vmatpush.bf16.msra.mxu0 %v9182_v51  ;;  %v10525_v14 = vld [vmem:[%s13885_s10 + $0xcd8] sm:$0xf]  ;;  %v9758_v24 = vor.u32 %v12943_v13, %v9757_v10  ;;  %v5094_v36 = vpop.f32.mrf.mxu3  ;;  %v13075_v39 = vld [vmem:[%s13885_s10 + $0xb5c] sm:$0xf]  ;;  %v11106_v51 = vor.u32 %v13267_v42, %v11103_v43  ;;  %v10146_v10 = vor.u32 %v13027_v2, %v10143_v4 }
 0x11d   : > { %v13135_v15 = vld [vmem:[%s13885_s10 + $0xd34] sm:$0xf0]  ;;  %v10338_v50 = vor.u32 %v13075_v39, %v10335_v41  ;;  %v11679_v8 = vld [vmem:[%s13885_s10 + $0x1638] sm:$0xf0] }
 0x11e   : > { %5346 = vmatpush.bf16.msra.mxu3 %v11582_v44  ;;  %5321 = vmatpush.bf16.msra.mxu1 %v9950_v52  ;;  %v11293_v19 = vld [vmem:[%s13885_s10 + $0x12d8] sm:$0xf]  ;;  %v10526_v25 = vor.u32 %v13135_v15, %v10525_v14  ;;  %v12859_v52 = vld [vmem:[%s13885_s10 + $0x49c] sm:$0xf] }
 0x11f   : > { %v13327_v20 = vld [vmem:[%s13885_s10 + $0x1334] sm:$0xf0]  ;;  %v9279_v13 = vld [vmem:[%s13885_s10 + $0x378] sm:$0xf0] }
 0x120   : > { %5334 = vmatpush.bf16.msra.mxu2 %v10718_v53  ;;  %5309 = vmatpush.bf16.msra.mxu0 %v9086_v3  ;;  %v8893_v22 = vld [vmem:[%s13885_s10 + $0x18] sm:$0xf]  ;;  %v11294_v30 = vor.u32 %v13327_v20, %v11293_v19  ;;  %v9471_v53 = vld [vmem:[%s13885_s10 + $0x4f8] sm:$0xf0]  ;;  %v11778_v3 = vor.u32 %v13435_v59, %v11775_v60 }
 0x121   : > { %v12727_v23 = vld [vmem:[%s13885_s10 + $0x74] sm:$0xf0]  ;;  %v9474_v61 = vor.u32 %v12859_v52, %v9471_v53  ;;  %v13003_v14 = vld [vmem:[%s13885_s10 + $0x91c] sm:$0xf] }
 0x122   : > { %5347 = vmatpush.bf16.msra.mxu3 %v11486_v58  ;;  %5322 = vmatpush.bf16.msra.mxu1 %v9854_v6  ;;  %v9661_v26 = vld [vmem:[%s13885_s10 + $0x618] sm:$0xf]  ;;  %v8894_v40 = vor.u32 %v12727_v23, %v8893_v22  ;;  %v11007_v58 = vld [vmem:[%s13885_s10 + $0x10f8] sm:$0xf0] }
 0x123   : > { %v12919_v27 = vld [vmem:[%s13885_s10 + $0x674] sm:$0xf0]  ;;  %v11010_v63 = vor.u32 %v13243_v57, %v11007_v58  ;;  %v10911_v6 = vld [vmem:[%s13885_s10 + $0x1038] sm:$0xf0] }
 0x124   : > { %5335 = vmatpush.bf16.msra.mxu2 %v10622_v7  ;;  %v10429_v28 = vld [vmem:[%s13885_s10 + $0xc18] sm:$0xf]  ;;  %5310 = vmatpush.bf16.msra.mxu0 %v8990_v21  ;;  %v9662_v44 = vor.u32 %v12919_v27, %v9661_v26  ;;  %v13411_v7 = vld [vmem:[%s13885_s10 + $0x15dc] sm:$0xf]  ;;  %v10914_v11 = vor.u32 %v13219_v5, %v10911_v6 }
 0x125   : > { %v13111_v33 = vld [vmem:[%s13885_s10 + $0xc74] sm:$0xf0]  ;;  %v11682_v15 = vor.u32 %v13411_v7, %v11679_v8  ;;  %v10047_v18 = vld [vmem:[%s13885_s10 + $0x978] sm:$0xf0] }
 0x126   : > { %5348 = vmatpush.bf16.msra.mxu3 %v11390_v12  ;;  %v11197_v34 = vld [vmem:[%s13885_s10 + $0x1218] sm:$0xf]  ;;  %5323 = vmatpush.bf16.msra.mxu1 %v9758_v24  ;;  %v10430_v45 = vor.u32 %v13111_v33, %v10429_v28  ;;  %v12811_v12 = vld [vmem:[%s13885_s10 + $0x31c] sm:$0xf] }
 0x127   : > { %v13303_v35 = vld [vmem:[%s13885_s10 + $0x1274] sm:$0xf0]  ;;  %v13195_v19 = vld [vmem:[%s13885_s10 + $0xf1c] sm:$0xf]  ;;  %v9282_v23 = vor.u32 %v12811_v12, %v9279_v13 }
 0x128   : > { %5336 = vmatpush.bf16.msra.mxu2 %v10526_v25  ;;  %v11198_v48 = vor.u32 %v13303_v35, %v11197_v34  ;;  %5311 = vmatpush.bf16.msra.mxu0 %v8894_v40  ;;  %v10815_v20 = vld [vmem:[%s13885_s10 + $0xf78] sm:$0xf0]  ;;  %v5105_v24 = vpop.f32.mrf.mxu0  ;;  %v10050_v25 = vor.u32 %v13003_v14, %v10047_v18 }
 0x129   : > { %v13387_v21 = vld [vmem:[%s13885_s10 + $0x151c] sm:$0xf]  ;;  %v10818_v26 = vor.u32 %v13195_v19, %v10815_v20 }
 0x12a   : > { %5349 = vmatpush.bf16.msra.mxu3 %v11294_v30  ;;  %5324 = vmatpush.bf16.msra.mxu1 %v9662_v44  ;;  %v11583_v22 = vld [vmem:[%s13885_s10 + $0x1578] sm:$0xf0]  ;;  %v5118_v30 = vpop.f32.mrf.mxu1 }
 0x12b   : > { %5312 = vmatmul.bf16.vlgmr.msra.gmra.mxu0 %v13997_v31  ;;  %v12787_v27 = vld [vmem:[%s13885_s10 + $0x25c] sm:$0xf]  ;;  %v11586_v33 = vor.u32 %v13387_v21, %v11583_v22  ;;  %v5119_v37 = vadd.f32 %v5118_v30, %v5105_v24  ;;  %v9573_v24 = vld [vmem:[%s13885_s10 + $0x560] sm:$0xf] }
 0x12c   : > { %5337 = vmatpush.bf16.msra.mxu2 %v10430_v45  ;;  %5356 = vmatpush.bf16.msrb.mxu0 %v9570_v49  ;;  %v9183_v28 = vld [vmem:[%s13885_s10 + $0x2b8] sm:$0xf0]  ;;  %v13280_v30 = vld [vmem:[%s13885_s10 + $0x11bc] sm:$0xf0] }
 0x12d   : > { %5325 = vmatmul.bf16.vlgmr.msra.gmra.mxu1 %v13999_v32  ;;  %v12979_v29 = vld [vmem:[%s13885_s10 + $0x85c] sm:$0xf]  ;;  %v9186_v40 = vor.u32 %v12787_v27, %v9183_v28  ;;  %v13088_v28 = vld [vmem:[%s13885_s10 + $0xbbc] sm:$0xf0] }
 0x12e   : > { %5350 = vmatpush.bf16.msra.mxu3 %v11198_v48  ;;  %5369 = vmatpush.bf16.msrb.mxu1 %v10338_v50  ;;  %v9951_v34 = vld [vmem:[%s13885_s10 + $0x8b8] sm:$0xf0] }
 0x12f   : > { %5338 = vmatmul.bf16.vlgmr.msra.gmra.mxu2 %v13985_v16  ;;  %v13171_v35 = vld [vmem:[%s13885_s10 + $0xe5c] sm:$0xf]  ;;  %v9954_v41 = vor.u32 %v12979_v29, %v9951_v34  ;;  %v11109_v29 = vld [vmem:[%s13885_s10 + $0x1160] sm:$0xf] }
 0x130   : > { %5382 = vmatpush.bf16.msrb.mxu2 %v11106_v51  ;;  %5357 = vmatpush.bf16.msrb.mxu0 %v9474_v61  ;;  %v10719_v36 = vld [vmem:[%s13885_s10 + $0xeb8] sm:$0xf0]  ;;  %v5107_v58 = vpop.f32.mrf.mxu0 }
 0x131   : > { %5351 = vmatmul.bf16.vlgmr.msra.gmra.mxu3 %v13987_v17  ;;  %v13363_v38 = vld [vmem:[%s13885_s10 + $0x145c] sm:$0xf]  ;;  %v10722_v42 = vor.u32 %v13171_v35, %v10719_v36  ;;  %v11877_v35 = vld [vmem:[%s13885_s10 + $0x1760] sm:$0xf] }
 0x132   : > { %5395 = vmatpush.bf16.msrb.mxu3 %v11874_v55  ;;  %5370 = vmatpush.bf16.msrb.mxu1 %v10242_v62  ;;  %v11487_v39 = vld [vmem:[%s13885_s10 + $0x14b8] sm:$0xf0]  ;;  %v5131_v46 = vpop.f32.mrf.mxu2  ;;  %v346_v55 = vld [vmem:[#allocation2 + $0x10] sm:$0xff]  ;;  %v5120_v0 = vpop.f32.mrf.mxu1  ;;  %v13472_v36 = vld [vmem:[%s13885_s10 + $0x17bc] sm:$0xf0] }
 0x133   : > { %v12763_v43 = vld [vmem:[%s13885_s10 + $0x19c] sm:$0xf]  ;;  %v11490_v47 = vor.u32 %v13363_v38, %v11487_v39  ;;  %v5132_v51 = vadd.f32 %v5131_v46, %v5119_v37  ;;  %v11013_v46 = vld [vmem:[%s13885_s10 + $0x10a0] sm:$0xf] }
 0x134   : > { %5383 = vmatpush.bf16.msrb.mxu2 %v11010_v63  ;;  %5358 = vmatpush.bf16.msrb.mxu0 %v9378_v9  ;;  %v9087_v44 = vld [vmem:[%s13885_s10 + $0x1f8] sm:$0xf0]  ;;  %v5144_v52 = vpop.f32.mrf.mxu3  ;;  %v10917_v58 = vld [vmem:[%s13885_s10 + $0xfe0] sm:$0xf] }
 0x135   : > { %v12955_v45 = vld [vmem:[%s13885_s10 + $0x79c] sm:$0xf]  ;;  %v9090_v56 = vor.u32 %v12763_v43, %v9087_v44  ;;  %v5145_v57 = vadd.f32 %v5144_v52, %v5132_v51  ;;  %v10245_v43 = vld [vmem:[%s13885_s10 + $0xaa0] sm:$0xf]  ;;  %v11878_v44 = vor.u32 %v13472_v36, %v11877_v35 }
 0x136   : > { %5396 = vmatpush.bf16.msrb.mxu3 %v11778_v3  ;;  %5371 = vmatpush.bf16.msrb.mxu1 %v10146_v10  ;;  %v9855_v48 = vld [vmem:[%s13885_s10 + $0x7f8] sm:$0xf0] }
 0x137   : > { %v13147_v49 = vld [vmem:[%s13885_s10 + $0xd9c] sm:$0xf]  ;;  %v9858_v59 = vor.u32 %v12955_v45, %v9855_v48  ;;  %v6242_v5 = vadd.f32 %v5145_v57, %v346_v55  ;;  %v13064_v45 = vld [vmem:[%s13885_s10 + $0xafc] sm:$0xf0] }
 0x138   : > { %5384 = vmatpush.bf16.msrb.mxu2 %v10914_v11  ;;  %5359 = vmatpush.bf16.msrb.mxu0 %v9282_v23  ;;  %v10623_v50 = vld [vmem:[%s13885_s10 + $0xdf8] sm:$0xf0]  ;;  %v11781_v48 = vld [vmem:[%s13885_s10 + $0x16a0] sm:$0xf]  ;;  %v10246_v51 = vor.u32 %v13064_v45, %v10245_v43 }
 0x139   : > { %v13339_v53 = vld [vmem:[%s13885_s10 + $0x139c] sm:$0xf]  ;;  %v10626_v60 = vor.u32 %v13147_v49, %v10623_v50  ;;  %6266 = vst [vmem:[#allocation2 + $0x10] sm:$0xff] %v6242_v5  ;;  %v13448_v49 = vld [vmem:[%s13885_s10 + $0x16fc] sm:$0xf0] }
 0x13a   : > { %5397 = vmatpush.bf16.msrb.mxu3 %v11682_v15  ;;  %5372 = vmatpush.bf16.msrb.mxu1 %v10050_v25  ;;  %v11391_v54 = vld [vmem:[%s13885_s10 + $0x13f8] sm:$0xf0]  ;;  %v5133_v18 = vpop.f32.mrf.mxu2  ;;  %v12896_v25 = vld [vmem:[%s13885_s10 + $0x5bc] sm:$0xf0] }
 0x13b   : > { %v12739_v61 = vld [vmem:[%s13885_s10 + $0xdc] sm:$0xf]  ;;  %v11394_v1 = vor.u32 %v13339_v53, %v11391_v54  ;;  %v9574_v38 = vor.u32 %v12896_v25, %v9573_v24  ;;  %v9381_v53 = vld [vmem:[%s13885_s10 + $0x3e0] sm:$0xf] }
 0x13c   : > { %5385 = vmatpush.bf16.msrb.mxu2 %v10818_v26  ;;  %5360 = vmatpush.bf16.msrb.mxu0 %v9186_v40  ;;  %v8991_v62 = vld [vmem:[%s13885_s10 + $0x138] sm:$0xf0]  ;;  %v5146_v23 = vpop.f32.mrf.mxu3  ;;  %v10341_v26 = vld [vmem:[%s13885_s10 + $0xb60] sm:$0xf]  ;;  %v11110_v40 = vor.u32 %v13280_v30, %v11109_v29 }
 0x13d   : > { %v12931_v63 = vld [vmem:[%s13885_s10 + $0x6dc] sm:$0xf]  ;;  %v8994_v8 = vor.u32 %v12739_v61, %v8991_v62  ;;  %v10342_v39 = vor.u32 %v13088_v28, %v10341_v26  ;;  %v12848_v54 = vld [vmem:[%s13885_s10 + $0x43c] sm:$0xf0] }
 0x13e   : > { %5398 = vmatpush.bf16.msrb.mxu3 %v11586_v33  ;;  %5373 = vmatpush.bf16.msrb.mxu1 %v9954_v41  ;;  %v9759_v2 = vld [vmem:[%s13885_s10 + $0x738] sm:$0xf0]  ;;  %v9477_v41 = vld [vmem:[%s13885_s10 + $0x4a0] sm:$0xf]  ;;  %v9382_v62 = vor.u32 %v12848_v54, %v9381_v53 }
 0x13f   : > { %v13123_v3 = vld [vmem:[%s13885_s10 + $0xcdc] sm:$0xf]  ;;  %v9762_v11 = vor.u32 %v12931_v63, %v9759_v2  ;;  %v10149_v55 = vld [vmem:[%s13885_s10 + $0x9e0] sm:$0xf] }
 0x140   : > { %5386 = vmatpush.bf16.msrb.mxu2 %v10722_v42  ;;  %v10527_v4 = vld [vmem:[%s13885_s10 + $0xd38] sm:$0xf0]  ;;  %5361 = vmatpush.bf16.msrb.mxu0 %v9090_v56  ;;  %v12872_v42 = vld [vmem:[%s13885_s10 + $0x4fc] sm:$0xf0]  ;;  %v11782_v56 = vor.u32 %v13448_v49, %v11781_v48 }
 0x141   : > { %v13315_v6 = vld [vmem:[%s13885_s10 + $0x12dc] sm:$0xf]  ;;  %v10530_v12 = vor.u32 %v13123_v3, %v10527_v4  ;;  %v9478_v50 = vor.u32 %v12872_v42, %v9477_v41  ;;  %v13040_v57 = vld [vmem:[%s13885_s10 + $0xa3c] sm:$0xf0] }
 0x142   : > { %5399 = vmatpush.bf16.msrb.mxu3 %v11490_v47  ;;  %v11295_v7 = vld [vmem:[%s13885_s10 + $0x1338] sm:$0xf0]  ;;  %5374 = vmatpush.bf16.msrb.mxu1 %v9858_v59  ;;  %v13256_v47 = vld [vmem:[%s13885_s10 + $0x10fc] sm:$0xf0]  ;;  %v10150_v63 = vor.u32 %v13040_v57, %v10149_v55 }
 0x143   : > { %v12715_v9 = vld [vmem:[%s13885_s10 + $0x1c] sm:$0xf]  ;;  %v11298_v19 = vor.u32 %v13315_v6, %v11295_v7  ;;  %v11014_v52 = vor.u32 %v13256_v47, %v11013_v46  ;;  %v13232_v59 = vld [vmem:[%s13885_s10 + $0x103c] sm:$0xf0] }
 0x144   : > { %v8895_v10 = vld [vmem:[%s13885_s10 + $0x78] sm:$0xf0]  ;;  %5387 = vmatpush.bf16.msrb.mxu2 %v10626_v60  ;;  %5362 = vmatpush.bf16.msrb.mxu0 %v8994_v8  ;;  %v11685_v60 = vld [vmem:[%s13885_s10 + $0x15e0] sm:$0xf]  ;;  %v10918_v0 = vor.u32 %v13232_v59, %v10917_v58 }
 0x145   : > { %v12907_v13 = vld [vmem:[%s13885_s10 + $0x61c] sm:$0xf]  ;;  %v8898_v27 = vor.u32 %v12715_v9, %v8895_v10  ;;  %v13424_v61 = vld [vmem:[%s13885_s10 + $0x163c] sm:$0xf0] }
 0x146   : > { %v9663_v14 = vld [vmem:[%s13885_s10 + $0x678] sm:$0xf0]  ;;  %5400 = vmatpush.bf16.msrb.mxu3 %v11394_v1  ;;  %5375 = vmatpush.bf16.msrb.mxu1 %v9762_v11  ;;  %v9285_v1 = vld [vmem:[%s13885_s10 + $0x320] sm:$0xf]  ;;  %v11686_v4 = vor.u32 %v13424_v61, %v11685_v60 }
 0x147   : > { %v13099_v15 = vld [vmem:[%s13885_s10 + $0xc1c] sm:$0xf]  ;;  %v9666_v33 = vor.u32 %v12907_v13, %v9663_v14  ;;  %v12824_v2 = vld [vmem:[%s13885_s10 + $0x37c] sm:$0xf0] }
 0x148   : > { %v10431_v20 = vld [vmem:[%s13885_s10 + $0xc78] sm:$0xf0]  ;;  %5388 = vmatpush.bf16.msrb.mxu2 %v10530_v12  ;;  %5363 = vmatpush.bf16.msrb.mxu0 %v8898_v27  ;;  %v10053_v3 = vld [vmem:[%s13885_s10 + $0x920] sm:$0xf]  ;;  %v9286_v10 = vor.u32 %v12824_v2, %v9285_v1  ;;  %v5157_v11 = vpop.f32.mrf.mxu0 }
 0x149   : > { %v13291_v21 = vld [vmem:[%s13885_s10 + $0x121c] sm:$0xf]  ;;  %v10434_v34 = vor.u32 %v13099_v15, %v10431_v20  ;;  %v13016_v5 = vld [vmem:[%s13885_s10 + $0x97c] sm:$0xf0] }
 0x14a   : > { %v11199_v22 = vld [vmem:[%s13885_s10 + $0x1278] sm:$0xf0]  ;;  %5401 = vmatpush.bf16.msrb.mxu3 %v11298_v19  ;;  %5376 = vmatpush.bf16.msrb.mxu1 %v9666_v33  ;;  %v10821_v6 = vld [vmem:[%s13885_s10 + $0xf20] sm:$0xf]  ;;  %v10054_v12 = vor.u32 %v13016_v5, %v10053_v3  ;;  %v5170_v19 = vpop.f32.mrf.mxu1 }
 0x14b   : > { %v11202_v37 = vor.u32 %v13291_v21, %v11199_v22  ;;  %5364 = vmatmul.bf16.vlgmr.msrb.gmra.mxu0 %v13997_v31  ;;  %v13208_v7 = vld [vmem:[%s13885_s10 + $0xf7c] sm:$0xf0]  ;;  %v5171_v24 = vadd.f32 %v5170_v19, %v5157_v11  ;;  %v12884_v11 = vld [vmem:[%s13885_s10 + $0x564] sm:$0xf] }
 0x14c   : > { %5389 = vmatpush.bf16.msrb.mxu2 %v10434_v34  ;;  %5408 = vmatpush.bf16.msra.mxu0 %v9574_v38  ;;  %v11589_v8 = vld [vmem:[%s13885_s10 + $0x1520] sm:$0xf]  ;;  %v10822_v13 = vor.u32 %v13208_v7, %v10821_v6  ;;  %v11111_v19 = vld [vmem:[%s13885_s10 + $0x11c0] sm:$0xf0] }
 0x14d   : > { %5377 = vmatmul.bf16.vlgmr.msrb.gmra.mxu1 %v13999_v32  ;;  %v13400_v9 = vld [vmem:[%s13885_s10 + $0x157c] sm:$0xf0] }
 0x14e   : > { %5402 = vmatpush.bf16.msrb.mxu3 %v11202_v37  ;;  %5421 = vmatpush.bf16.msra.mxu1 %v10342_v39  ;;  %v9189_v14 = vld [vmem:[%s13885_s10 + $0x260] sm:$0xf]  ;;  %v11590_v20 = vor.u32 %v13400_v9, %v11589_v8 }
 0x14f   : > { %5390 = vmatmul.bf16.vlgmr.msrb.gmra.mxu2 %v13985_v16  ;;  %v12800_v15 = vld [vmem:[%s13885_s10 + $0x2bc] sm:$0xf0] }
 0x150   : > { %5434 = vmatpush.bf16.msra.mxu2 %v11110_v40  ;;  %5409 = vmatpush.bf16.msra.mxu0 %v9478_v50  ;;  %v9957_v18 = vld [vmem:[%s13885_s10 + $0x860] sm:$0xf]  ;;  %v9190_v27 = vor.u32 %v12800_v15, %v9189_v14  ;;  %v5159_v47 = vpop.f32.mrf.mxu0  ;;  %v10343_v15 = vld [vmem:[%s13885_s10 + $0xbc0] sm:$0xf0] }
 0x151   : > { %5403 = vmatmul.bf16.vlgmr.msrb.gmra.mxu3 %v13987_v17  ;;  %v12992_v21 = vld [vmem:[%s13885_s10 + $0x8bc] sm:$0xf0]  ;;  %v13220_v47 = vld [vmem:[%s13885_s10 + $0xfe4] sm:$0xf] }
 0x152   : > { %5447 = vmatpush.bf16.msra.mxu3 %v11878_v44  ;;  %5422 = vmatpush.bf16.msra.mxu1 %v10246_v51  ;;  %v10725_v22 = vld [vmem:[%s13885_s10 + $0xe60] sm:$0xf]  ;;  %v9958_v28 = vor.u32 %v12992_v21, %v9957_v18  ;;  %v5183_v35 = vpop.f32.mrf.mxu2  ;;  %v347_v44 = vld [vmem:[#allocation2 + $0x48] sm:$0xff]  ;;  %v5172_v53 = vpop.f32.mrf.mxu1  ;;  %v13268_v18 = vld [vmem:[%s13885_s10 + $0x1164] sm:$0xf] }
 0x153   : > { %v13184_v23 = vld [vmem:[%s13885_s10 + $0xebc] sm:$0xf0]  ;;  %v5184_v40 = vadd.f32 %v5183_v35, %v5171_v24  ;;  %v13244_v35 = vld [vmem:[%s13885_s10 + $0x10a4] sm:$0xf] }
 0x154   : > { %5435 = vmatpush.bf16.msra.mxu2 %v11014_v52  ;;  %5410 = vmatpush.bf16.msra.mxu0 %v9382_v62  ;;  %v11493_v25 = vld [vmem:[%s13885_s10 + $0x1460] sm:$0xf]  ;;  %v10726_v29 = vor.u32 %v13184_v23, %v10725_v22  ;;  %v5196_v41 = vpop.f32.mrf.mxu3  ;;  %v13460_v22 = vld [vmem:[%s13885_s10 + $0x1764] sm:$0xf] }
 0x155   : > { %v13376_v26 = vld [vmem:[%s13885_s10 + $0x14bc] sm:$0xf0]  ;;  %v5197_v46 = vadd.f32 %v5196_v41, %v5184_v40  ;;  %v11879_v23 = vld [vmem:[%s13885_s10 + $0x17c0] sm:$0xf0] }
 0x156   : > { %5448 = vmatpush.bf16.msra.mxu3 %v11782_v56  ;;  %5423 = vmatpush.bf16.msra.mxu1 %v10150_v63  ;;  %v9093_v30 = vld [vmem:[%s13885_s10 + $0x1a0] sm:$0xf]  ;;  %v11494_v36 = vor.u32 %v13376_v26, %v11493_v25 }
 0x157   : > { %v12776_v33 = vld [vmem:[%s13885_s10 + $0x1fc] sm:$0xf0]  ;;  %v6243_v58 = vadd.f32 %v5197_v46, %v347_v44  ;;  %v13028_v44 = vld [vmem:[%s13885_s10 + $0x9e4] sm:$0xf] }
 0x158   : > { %5436 = vmatpush.bf16.msra.mxu2 %v10918_v0  ;;  %5411 = vmatpush.bf16.msra.mxu0 %v9286_v10  ;;  %v9861_v34 = vld [vmem:[%s13885_s10 + $0x7a0] sm:$0xf]  ;;  %v9094_v45 = vor.u32 %v12776_v33, %v9093_v30  ;;  %v13052_v30 = vld [vmem:[%s13885_s10 + $0xaa4] sm:$0xf]  ;;  %v11882_v33 = vor.u32 %v13460_v22, %v11879_v23 }
 0x159   : > { %v12968_v37 = vld [vmem:[%s13885_s10 + $0x7fc] sm:$0xf0]  ;;  %6267 = vst [vmem:[#allocation2 + $0x48] sm:$0xff] %v6243_v58  ;;  %v10151_v46 = vld [vmem:[%s13885_s10 + $0xa40] sm:$0xf0] }
 0x15a   : > { %5449 = vmatpush.bf16.msra.mxu3 %v11686_v4  ;;  %5424 = vmatpush.bf16.msra.mxu1 %v10054_v12  ;;  %v10629_v38 = vld [vmem:[%s13885_s10 + $0xda0] sm:$0xf]  ;;  %v9862_v48 = vor.u32 %v12968_v37, %v9861_v34  ;;  %v5185_v5 = vpop.f32.mrf.mxu2  ;;  %v9575_v12 = vld [vmem:[%s13885_s10 + $0x5c0] sm:$0xf0] }
 0x15b   : > { %v13160_v39 = vld [vmem:[%s13885_s10 + $0xdfc] sm:$0xf0]  ;;  %v9578_v25 = vor.u32 %v12884_v11, %v9575_v12  ;;  %v10247_v34 = vld [vmem:[%s13885_s10 + $0xb00] sm:$0xf0] }
 0x15c   : > { %5437 = vmatpush.bf16.msra.mxu2 %v10822_v13  ;;  %v11397_v42 = vld [vmem:[%s13885_s10 + $0x13a0] sm:$0xf]  ;;  %5412 = vmatpush.bf16.msra.mxu0 %v9190_v27  ;;  %v10630_v49 = vor.u32 %v13160_v39, %v10629_v38  ;;  %v5198_v10 = vpop.f32.mrf.mxu3  ;;  %v13076_v13 = vld [vmem:[%s13885_s10 + $0xb64] sm:$0xf]  ;;  %v11114_v27 = vor.u32 %v13268_v18, %v11111_v19  ;;  %v10250_v40 = vor.u32 %v13052_v30, %v10247_v34 }
 0x15d   : > { %v13352_v43 = vld [vmem:[%s13885_s10 + $0x13fc] sm:$0xf0]  ;;  %v10346_v26 = vor.u32 %v13076_v13, %v10343_v15  ;;  %v13436_v37 = vld [vmem:[%s13885_s10 + $0x16a4] sm:$0xf] }
 0x15e   : > { %5450 = vmatpush.bf16.msra.mxu3 %v11590_v20  ;;  %5425 = vmatpush.bf16.msra.mxu1 %v9958_v28  ;;  %v8997_v50 = vld [vmem:[%s13885_s10 + $0xe0] sm:$0xf]  ;;  %v11398_v54 = vor.u32 %v13352_v43, %v11397_v42  ;;  %v12860_v28 = vld [vmem:[%s13885_s10 + $0x4a4] sm:$0xf] }
 0x15f   : > { %v12752_v51 = vld [vmem:[%s13885_s10 + $0x13c] sm:$0xf0]  ;;  %v11783_v38 = vld [vmem:[%s13885_s10 + $0x1700] sm:$0xf0] }
 0x160   : > { %5438 = vmatpush.bf16.msra.mxu2 %v10726_v29  ;;  %v9765_v52 = vld [vmem:[%s13885_s10 + $0x6e0] sm:$0xf]  ;;  %5413 = vmatpush.bf16.msra.mxu0 %v9094_v45  ;;  %v8998_v61 = vor.u32 %v12752_v51, %v8997_v50  ;;  %v9479_v29 = vld [vmem:[%s13885_s10 + $0x500] sm:$0xf0]  ;;  %v11786_v45 = vor.u32 %v13436_v37, %v11783_v38 }
 0x161   : > { %v12944_v55 = vld [vmem:[%s13885_s10 + $0x73c] sm:$0xf0]  ;;  %v9482_v39 = vor.u32 %v12860_v28, %v9479_v29  ;;  %v12836_v42 = vld [vmem:[%s13885_s10 + $0x3e4] sm:$0xf] }
 0x162   : > { %5451 = vmatpush.bf16.msra.mxu3 %v11494_v36  ;;  %v10533_v56 = vld [vmem:[%s13885_s10 + $0xce0] sm:$0xf]  ;;  %5426 = vmatpush.bf16.msra.mxu1 %v9862_v48  ;;  %v9766_v0 = vor.u32 %v12944_v55, %v9765_v52  ;;  %v11015_v36 = vld [vmem:[%s13885_s10 + $0x1100] sm:$0xf0]  ;;  %v10154_v52 = vor.u32 %v13028_v44, %v10151_v46 }
 0x163   : > { %v13136_v57 = vld [vmem:[%s13885_s10 + $0xd3c] sm:$0xf0]  ;;  %v11018_v41 = vor.u32 %v13244_v35, %v11015_v36  ;;  %v9383_v43 = vld [vmem:[%s13885_s10 + $0x440] sm:$0xf0] }
 0x164   : > { %v11301_v59 = vld [vmem:[%s13885_s10 + $0x12e0] sm:$0xf]  ;;  %5439 = vmatpush.bf16.msra.mxu2 %v10630_v49  ;;  %v10534_v1 = vor.u32 %v13136_v57, %v10533_v56  ;;  %5414 = vmatpush.bf16.msra.mxu0 %v8998_v61  ;;  %v10919_v48 = vld [vmem:[%s13885_s10 + $0x1040] sm:$0xf0]  ;;  %v9386_v51 = vor.u32 %v12836_v42, %v9383_v43 }
 0x165   : > { %v13328_v60 = vld [vmem:[%s13885_s10 + $0x133c] sm:$0xf0]  ;;  %v13412_v49 = vld [vmem:[%s13885_s10 + $0x15e4] sm:$0xf]  ;;  %v10922_v53 = vor.u32 %v13220_v47, %v10919_v48 }
 0x166   : > { %v8901_v62 = vld [vmem:[%s13885_s10 + $0x20] sm:$0xf]  ;;  %5452 = vmatpush.bf16.msra.mxu3 %v11398_v54  ;;  %v11302_v6 = vor.u32 %v13328_v60, %v11301_v59  ;;  %5427 = vmatpush.bf16.msra.mxu1 %v9766_v0  ;;  %v11687_v50 = vld [vmem:[%s13885_s10 + $0x1640] sm:$0xf0] }
 0x167   : > { %v12728_v63 = vld [vmem:[%s13885_s10 + $0x7c] sm:$0xf0]  ;;  %v12812_v54 = vld [vmem:[%s13885_s10 + $0x324] sm:$0xf]  ;;  %v11690_v57 = vor.u32 %v13412_v49, %v11687_v50 }
 0x168   : > { %v9669_v2 = vld [vmem:[%s13885_s10 + $0x620] sm:$0xf]  ;;  %v8902_v14 = vor.u32 %v12728_v63, %v8901_v62  ;;  %5440 = vmatpush.bf16.msra.mxu2 %v10534_v1  ;;  %v9287_v55 = vld [vmem:[%s13885_s10 + $0x380] sm:$0xf0]  ;;  %v5209_v0 = vpop.f32.mrf.mxu0 }
 0x169   : > { %v12920_v3 = vld [vmem:[%s13885_s10 + $0x67c] sm:$0xf0]  ;;  %v13004_v56 = vld [vmem:[%s13885_s10 + $0x924] sm:$0xf]  ;;  %v9290_v63 = vor.u32 %v12812_v54, %v9287_v55 }
 0x16a   : > { %v10437_v4 = vld [vmem:[%s13885_s10 + $0xc20] sm:$0xf]  ;;  %v9670_v20 = vor.u32 %v12920_v3, %v9669_v2  ;;  %5453 = vmatpush.bf16.msra.mxu3 %v11302_v6  ;;  %5415 = vmatpush.bf16.msra.mxu0 %v8902_v14  ;;  %v10055_v58 = vld [vmem:[%s13885_s10 + $0x980] sm:$0xf0]  ;;  %v5222_v6 = vpop.f32.mrf.mxu1 }
 0x16b   : > { %v13112_v7 = vld [vmem:[%s13885_s10 + $0xc7c] sm:$0xf0]  ;;  %v13196_v59 = vld [vmem:[%s13885_s10 + $0xf24] sm:$0xf]  ;;  %v10058_v1 = vor.u32 %v13004_v56, %v10055_v58  ;;  %v5223_v11 = vadd.f32 %v5222_v6, %v5209_v0  ;;  %v9581_v0 = vld [vmem:[%s13885_s10 + $0x568] sm:$0xf] }
 0x16c   : > { %v11205_v8 = vld [vmem:[%s13885_s10 + $0x1220] sm:$0xf]  ;;  %v10438_v21 = vor.u32 %v13112_v7, %v10437_v4  ;;  %5428 = vmatpush.bf16.msra.mxu1 %v9670_v20  ;;  %v10823_v60 = vld [vmem:[%s13885_s10 + $0xf80] sm:$0xf0]  ;;  %v13281_v6 = vld [vmem:[%s13885_s10 + $0x11c4] sm:$0xf0] }
 0x16d   : > { %v13304_v9 = vld [vmem:[%s13885_s10 + $0x127c] sm:$0xf0]  ;;  %5416 = vmatmul.bf16.vlgmr.msra.gmra.mxu0 %v13997_v31  ;;  %v13388_v61 = vld [vmem:[%s13885_s10 + $0x1524] sm:$0xf]  ;;  %v10826_v2 = vor.u32 %v13196_v59, %v10823_v60 }
 0x16e   : > { %v11206_v24 = vor.u32 %v13304_v9, %v11205_v8  ;;  %5441 = vmatpush.bf16.msra.mxu2 %v10438_v21  ;;  %5460 = vmatpush.bf16.msrb.mxu0 %v9578_v25  ;;  %v11591_v62 = vld [vmem:[%s13885_s10 + $0x1580] sm:$0xf0] }
 0x16f   : > { %5429 = vmatmul.bf16.vlgmr.msra.gmra.mxu1 %v13999_v32  ;;  %v12788_v3 = vld [vmem:[%s13885_s10 + $0x264] sm:$0xf]  ;;  %v11594_v7 = vor.u32 %v13388_v61, %v11591_v62 }
 0x170   : > { %5454 = vmatpush.bf16.msra.mxu3 %v11206_v24  ;;  %5473 = vmatpush.bf16.msrb.mxu1 %v10346_v26  ;;  %v9191_v4 = vld [vmem:[%s13885_s10 + $0x2c0] sm:$0xf0]  ;;  %v5211_v36 = vpop.f32.mrf.mxu0 }
 0x171   : > { %5442 = vmatmul.bf16.vlgmr.msra.gmra.mxu2 %v13985_v16  ;;  %v12980_v5 = vld [vmem:[%s13885_s10 + $0x864] sm:$0xf]  ;;  %v9194_v14 = vor.u32 %v12788_v3, %v9191_v4  ;;  %v13089_v4 = vld [vmem:[%s13885_s10 + $0xbc4] sm:$0xf0] }
 0x172   : > { %5486 = vmatpush.bf16.msrb.mxu2 %v11114_v27  ;;  %5461 = vmatpush.bf16.msrb.mxu0 %v9482_v39  ;;  %v9959_v8 = vld [vmem:[%s13885_s10 + $0x8c0] sm:$0xf0]  ;;  %v5235_v22 = vpop.f32.mrf.mxu2  ;;  %v5224_v42 = vpop.f32.mrf.mxu1  ;;  %v10925_v36 = vld [vmem:[%s13885_s10 + $0xfe8] sm:$0xf] }
 0x173   : > { %5455 = vmatmul.bf16.vlgmr.msra.gmra.mxu3 %v13987_v17  ;;  %v13172_v9 = vld [vmem:[%s13885_s10 + $0xe64] sm:$0xf]  ;;  %v9962_v15 = vor.u32 %v12980_v5, %v9959_v8  ;;  %v5236_v27 = vadd.f32 %v5235_v22, %v5223_v11  ;;  %v11117_v5 = vld [vmem:[%s13885_s10 + $0x1168] sm:$0xf] }
 0x174   : > { %5499 = vmatpush.bf16.msrb.mxu3 %v11882_v33  ;;  %5474 = vmatpush.bf16.msrb.mxu1 %v10250_v40  ;;  %v10727_v10 = vld [vmem:[%s13885_s10 + $0xec0] sm:$0xf0]  ;;  %v5248_v28 = vpop.f32.mrf.mxu3  ;;  %v11021_v22 = vld [vmem:[%s13885_s10 + $0x10a8] sm:$0xf] }
 0x175   : > { %v13364_v12 = vld [vmem:[%s13885_s10 + $0x1464] sm:$0xf]  ;;  %v10730_v18 = vor.u32 %v13172_v9, %v10727_v10  ;;  %v5249_v35 = vadd.f32 %v5248_v28, %v5236_v27  ;;  %v11885_v9 = vld [vmem:[%s13885_s10 + $0x1768] sm:$0xf] }
 0x176   : > { %5487 = vmatpush.bf16.msrb.mxu2 %v11018_v41  ;;  %5462 = vmatpush.bf16.msrb.mxu0 %v9386_v51  ;;  %v11495_v13 = vld [vmem:[%s13885_s10 + $0x14c0] sm:$0xf0]  ;;  %v13473_v10 = vld [vmem:[%s13885_s10 + $0x17c4] sm:$0xf0] }
 0x177   : > { %v12764_v19 = vld [vmem:[%s13885_s10 + $0x1a4] sm:$0xf]  ;;  %v11498_v23 = vor.u32 %v13364_v12, %v11495_v13 }
 0x178   : > { %5500 = vmatpush.bf16.msrb.mxu3 %v11786_v45  ;;  %5475 = vmatpush.bf16.msrb.mxu1 %v10154_v52  ;;  %v9095_v20 = vld [vmem:[%s13885_s10 + $0x200] sm:$0xf0] }
 0x179   : > { %v12956_v21 = vld [vmem:[%s13885_s10 + $0x7a4] sm:$0xf]  ;;  %v9098_v34 = vor.u32 %v12764_v19, %v9095_v20  ;;  %v10253_v19 = vld [vmem:[%s13885_s10 + $0xaa8] sm:$0xf]  ;;  %v11886_v20 = vor.u32 %v13473_v10, %v11885_v9 }
 0x17a   : > { %5488 = vmatpush.bf16.msrb.mxu2 %v10922_v53  ;;  %5463 = vmatpush.bf16.msrb.mxu0 %v9290_v63  ;;  %v9863_v24 = vld [vmem:[%s13885_s10 + $0x800] sm:$0xf0]  ;;  %v5237_v58 = vpop.f32.mrf.mxu2 }
 0x17b   : > { %v13148_v25 = vld [vmem:[%s13885_s10 + $0xda4] sm:$0xf]  ;;  %v9866_v37 = vor.u32 %v12956_v21, %v9863_v24  ;;  %v13065_v21 = vld [vmem:[%s13885_s10 + $0xb04] sm:$0xf0] }
 0x17c   : > { %5501 = vmatpush.bf16.msrb.mxu3 %v11690_v57  ;;  %5476 = vmatpush.bf16.msrb.mxu1 %v10058_v1  ;;  %v10631_v26 = vld [vmem:[%s13885_s10 + $0xe00] sm:$0xf0]  ;;  %v5250_v63 = vpop.f32.mrf.mxu3  ;;  %v12897_v1 = vld [vmem:[%s13885_s10 + $0x5c4] sm:$0xf0]  ;;  %v10254_v27 = vor.u32 %v13065_v21, %v10253_v19 }
 0x17d   : > { %v13340_v29 = vld [vmem:[%s13885_s10 + $0x13a4] sm:$0xf]  ;;  %v10634_v38 = vor.u32 %v13148_v25, %v10631_v26  ;;  %v9582_v12 = vor.u32 %v12897_v1, %v9581_v0  ;;  %v11789_v24 = vld [vmem:[%s13885_s10 + $0x16a8] sm:$0xf] }
 0x17e   : > { %5489 = vmatpush.bf16.msrb.mxu2 %v10826_v2  ;;  %v11399_v30 = vld [vmem:[%s13885_s10 + $0x1400] sm:$0xf0]  ;;  %5464 = vmatpush.bf16.msrb.mxu0 %v9194_v14  ;;  %v10349_v2 = vld [vmem:[%s13885_s10 + $0xb68] sm:$0xf]  ;;  %v11118_v14 = vor.u32 %v13281_v6, %v11117_v5 }
 0x17f   : > { %v348_v33 = vld [vmem:[#allocation2 + $0x60] sm:$0xff]  ;;  %v11402_v43 = vor.u32 %v13340_v29, %v11399_v30  ;;  %v10350_v13 = vor.u32 %v13089_v4, %v10349_v2  ;;  %v13449_v25 = vld [vmem:[%s13885_s10 + $0x1704] sm:$0xf0] }
 0x180   : > { %5502 = vmatpush.bf16.msrb.mxu3 %v11594_v7  ;;  %5477 = vmatpush.bf16.msrb.mxu1 %v9962_v15  ;;  %v12740_v39 = vld [vmem:[%s13885_s10 + $0xe4] sm:$0xf]  ;;  %v6244_v47 = vadd.f32 %v5249_v35, %v348_v33  ;;  %v9485_v15 = vld [vmem:[%s13885_s10 + $0x4a8] sm:$0xf] }
 0x181   : > { %v8999_v40 = vld [vmem:[%s13885_s10 + $0x140] sm:$0xf0]  ;;  %v9389_v29 = vld [vmem:[%s13885_s10 + $0x3e8] sm:$0xf] }
 0x182   : > { %5490 = vmatpush.bf16.msrb.mxu2 %v10730_v18  ;;  %v12932_v41 = vld [vmem:[%s13885_s10 + $0x6e4] sm:$0xf]  ;;  %5465 = vmatpush.bf16.msrb.mxu0 %v9098_v34  ;;  %v9002_v50 = vor.u32 %v12740_v39, %v8999_v40  ;;  %6268 = vst [vmem:[#allocation2 + $0x60] sm:$0xff] %v6244_v47  ;;  %v12873_v18 = vld [vmem:[%s13885_s10 + $0x504] sm:$0xf0]  ;;  %v11790_v34 = vor.u32 %v13449_v25, %v11789_v24 }
 0x183   : > { %v9767_v44 = vld [vmem:[%s13885_s10 + $0x740] sm:$0xf0]  ;;  %v9486_v26 = vor.u32 %v12873_v18, %v9485_v15  ;;  %v12849_v30 = vld [vmem:[%s13885_s10 + $0x444] sm:$0xf0] }
 0x184   : > { %5503 = vmatpush.bf16.msrb.mxu3 %v11498_v23  ;;  %v13124_v45 = vld [vmem:[%s13885_s10 + $0xce4] sm:$0xf]  ;;  %5478 = vmatpush.bf16.msrb.mxu1 %v9866_v37  ;;  %v9770_v53 = vor.u32 %v12932_v41, %v9767_v44  ;;  %v13257_v23 = vld [vmem:[%s13885_s10 + $0x1104] sm:$0xf0]  ;;  %v9390_v40 = vor.u32 %v12849_v30, %v9389_v29 }
 0x185   : > { %v10535_v46 = vld [vmem:[%s13885_s10 + $0xd40] sm:$0xf0]  ;;  %v11022_v28 = vor.u32 %v13257_v23, %v11021_v22  ;;  %v10157_v33 = vld [vmem:[%s13885_s10 + $0x9e8] sm:$0xf] }
 0x186   : > { %v13316_v48 = vld [vmem:[%s13885_s10 + $0x12e4] sm:$0xf]  ;;  %5491 = vmatpush.bf16.msrb.mxu2 %v10634_v38  ;;  %v10538_v54 = vor.u32 %v13124_v45, %v10535_v46  ;;  %5466 = vmatpush.bf16.msrb.mxu0 %v9002_v50  ;;  %v13041_v35 = vld [vmem:[%s13885_s10 + $0xa44] sm:$0xf0] }
 0x187   : > { %v11303_v49 = vld [vmem:[%s13885_s10 + $0x1340] sm:$0xf0]  ;;  %v13233_v37 = vld [vmem:[%s13885_s10 + $0x1044] sm:$0xf0]  ;;  %v10158_v41 = vor.u32 %v13041_v35, %v10157_v33 }
 0x188   : > { %v12716_v51 = vld [vmem:[%s13885_s10 + $0x24] sm:$0xf]  ;;  %5504 = vmatpush.bf16.msrb.mxu3 %v11402_v43  ;;  %v11306_v59 = vor.u32 %v13316_v48, %v11303_v49  ;;  %5479 = vmatpush.bf16.msrb.mxu1 %v9770_v53  ;;  %v11693_v38 = vld [vmem:[%s13885_s10 + $0x15e8] sm:$0xf]  ;;  %v10926_v42 = vor.u32 %v13233_v37, %v10925_v36  ;;  %v5261_v53 = vpop.f32.mrf.mxu0 }
 0x189   : > { %v8903_v52 = vld [vmem:[%s13885_s10 + $0x80] sm:$0xf0]  ;;  %v13425_v39 = vld [vmem:[%s13885_s10 + $0x1644] sm:$0xf0] }
 0x18a   : > { %v12908_v55 = vld [vmem:[%s13885_s10 + $0x624] sm:$0xf]  ;;  %v8906_v3 = vor.u32 %v12716_v51, %v8903_v52  ;;  %5492 = vmatpush.bf16.msrb.mxu2 %v10538_v54  ;;  %v9293_v43 = vld [vmem:[%s13885_s10 + $0x328] sm:$0xf]  ;;  %v11694_v46 = vor.u32 %v13425_v39, %v11693_v38 }
 0x18b   : > { %v9671_v56 = vld [vmem:[%s13885_s10 + $0x680] sm:$0xf0]  ;;  %v12825_v44 = vld [vmem:[%s13885_s10 + $0x384] sm:$0xf0] }
 0x18c   : > { %v13100_v57 = vld [vmem:[%s13885_s10 + $0xc24] sm:$0xf]  ;;  %v9674_v7 = vor.u32 %v12908_v55, %v9671_v56  ;;  %5505 = vmatpush.bf16.msrb.mxu3 %v11306_v59  ;;  %5467 = vmatpush.bf16.msrb.mxu0 %v8906_v3  ;;  %v10061_v45 = vld [vmem:[%s13885_s10 + $0x928] sm:$0xf]  ;;  %v9294_v52 = vor.u32 %v12825_v44, %v9293_v43  ;;  %v5274_v59 = vpop.f32.mrf.mxu1 }
 0x18d   : > { %v10439_v60 = vld [vmem:[%s13885_s10 + $0xc80] sm:$0xf0]  ;;  %v13017_v47 = vld [vmem:[%s13885_s10 + $0x984] sm:$0xf0]  ;;  %v5275_v0 = vadd.f32 %v5274_v59, %v5261_v53  ;;  %v12885_v53 = vld [vmem:[%s13885_s10 + $0x56c] sm:$0xf] }
 0x18e   : > { %v13292_v61 = vld [vmem:[%s13885_s10 + $0x1224] sm:$0xf]  ;;  %v10442_v8 = vor.u32 %v13100_v57, %v10439_v60  ;;  %5480 = vmatpush.bf16.msrb.mxu1 %v9674_v7  ;;  %v10829_v48 = vld [vmem:[%s13885_s10 + $0xf28] sm:$0xf]  ;;  %v10062_v54 = vor.u32 %v13017_v47, %v10061_v45  ;;  %v11119_v59 = vld [vmem:[%s13885_s10 + $0x11c8] sm:$0xf0] }
 0x18f   : > { %v11207_v62 = vld [vmem:[%s13885_s10 + $0x1280] sm:$0xf0]  ;;  %5468 = vmatmul.bf16.vlgmr.msrb.gmra.mxu0 %v13997_v31  ;;  %v13209_v49 = vld [vmem:[%s13885_s10 + $0xf84] sm:$0xf0] }
 0x190   : > { %v11210_v11 = vor.u32 %v13292_v61, %v11207_v62  ;;  %5493 = vmatpush.bf16.msrb.mxu2 %v10442_v8  ;;  %5512 = vmatpush.bf16.msra.mxu0 %v9582_v12  ;;  %v11597_v50 = vld [vmem:[%s13885_s10 + $0x1528] sm:$0xf]  ;;  %v10830_v55 = vor.u32 %v13209_v49, %v10829_v48  ;;  %v5263_v23 = vpop.f32.mrf.mxu0 }
 0x191   : > { %5481 = vmatmul.bf16.vlgmr.msrb.gmra.mxu1 %v13999_v32  ;;  %v13401_v51 = vld [vmem:[%s13885_s10 + $0x1584] sm:$0xf0]  ;;  %v13221_v23 = vld [vmem:[%s13885_s10 + $0xfec] sm:$0xf] }
 0x192   : > { %5506 = vmatpush.bf16.msrb.mxu3 %v11210_v11  ;;  %5525 = vmatpush.bf16.msra.mxu1 %v10350_v13  ;;  %v9197_v56 = vld [vmem:[%s13885_s10 + $0x268] sm:$0xf]  ;;  %v11598_v60 = vor.u32 %v13401_v51, %v11597_v50  ;;  %v5287_v9 = vpop.f32.mrf.mxu2 }
 0x193   : > { %5494 = vmatmul.bf16.vlgmr.msrb.gmra.mxu2 %v13985_v16  ;;  %v12801_v57 = vld [vmem:[%s13885_s10 + $0x2c4] sm:$0xf0] }
 0x194   : > { %5538 = vmatpush.bf16.msra.mxu2 %v11118_v14  ;;  %5513 = vmatpush.bf16.msra.mxu0 %v9486_v26  ;;  %v9965_v58 = vld [vmem:[%s13885_s10 + $0x868] sm:$0xf]  ;;  %v9198_v3 = vor.u32 %v12801_v57, %v9197_v56  ;;  %v5288_v14 = vadd.f32 %v5287_v9, %v5275_v0  ;;  %v5300_v15 = vpop.f32.mrf.mxu3  ;;  %v5276_v29 = vpop.f32.mrf.mxu1  ;;  %v10351_v57 = vld [vmem:[%s13885_s10 + $0xbc8] sm:$0xf0] }
 0x195   : > { %5507 = vmatmul.bf16.vlgmr.msrb.gmra.mxu3 %v13987_v17  ;;  %v12993_v61 = vld [vmem:[%s13885_s10 + $0x8c4] sm:$0xf0]  ;;  %v13245_v9 = vld [vmem:[%s13885_s10 + $0x10ac] sm:$0xf] }
 0x196   : > { %5551 = vmatpush.bf16.msra.mxu3 %v11886_v20  ;;  %5526 = vmatpush.bf16.msra.mxu1 %v10254_v27  ;;  %v10733_v62 = vld [vmem:[%s13885_s10 + $0xe68] sm:$0xf]  ;;  %v9966_v4 = vor.u32 %v12993_v61, %v9965_v58  ;;  %v5301_v22 = vadd.f32 %v5300_v15, %v5288_v14  ;;  %v13269_v58 = vld [vmem:[%s13885_s10 + $0x116c] sm:$0xf] }
 0x197   : > { %v13185_v63 = vld [vmem:[%s13885_s10 + $0xec4] sm:$0xf0] }
 0x198   : > { %5539 = vmatpush.bf16.msra.mxu2 %v11022_v28  ;;  %5514 = vmatpush.bf16.msra.mxu0 %v9390_v40  ;;  %v11501_v1 = vld [vmem:[%s13885_s10 + $0x1468] sm:$0xf]  ;;  %v10734_v5 = vor.u32 %v13185_v63, %v10733_v62  ;;  %v13461_v62 = vld [vmem:[%s13885_s10 + $0x176c] sm:$0xf] }
 0x199   : > { %v13377_v2 = vld [vmem:[%s13885_s10 + $0x14c4] sm:$0xf0]  ;;  %v11887_v63 = vld [vmem:[%s13885_s10 + $0x17c8] sm:$0xf0] }
 0x19a   : > { %5552 = vmatpush.bf16.msra.mxu3 %v11790_v34  ;;  %5527 = vmatpush.bf16.msra.mxu1 %v10158_v41  ;;  %v9101_v6 = vld [vmem:[%s13885_s10 + $0x1a8] sm:$0xf]  ;;  %v11502_v10 = vor.u32 %v13377_v2, %v11501_v1  ;;  %v5289_v47 = vpop.f32.mrf.mxu2 }
 0x19b   : > { %v12777_v7 = vld [vmem:[%s13885_s10 + $0x204] sm:$0xf0]  ;;  %v12981_v47 = vld [vmem:[%s13885_s10 + $0x86c] sm:$0xf] }
 0x19c   : > { %5540 = vmatpush.bf16.msra.mxu2 %v10926_v42  ;;  %5515 = vmatpush.bf16.msra.mxu0 %v9294_v52  ;;  %v9869_v8 = vld [vmem:[%s13885_s10 + $0x7a8] sm:$0xf]  ;;  %v9102_v21 = vor.u32 %v12777_v7, %v9101_v6  ;;  %v5302_v52 = vpop.f32.mrf.mxu3  ;;  %v13053_v6 = vld [vmem:[%s13885_s10 + $0xaac] sm:$0xf]  ;;  %v11890_v7 = vor.u32 %v13461_v62, %v11887_v63 }
 0x19d   : > { %v12969_v11 = vld [vmem:[%s13885_s10 + $0x804] sm:$0xf0]  ;;  %v10735_v52 = vld [vmem:[%s13885_s10 + $0xec8] sm:$0xf0] }
 0x19e   : > { %5553 = vmatpush.bf16.msra.mxu3 %v11694_v46  ;;  %5528 = vmatpush.bf16.msra.mxu1 %v10062_v54  ;;  %v10637_v12 = vld [vmem:[%s13885_s10 + $0xda8] sm:$0xf]  ;;  %v9870_v24 = vor.u32 %v12969_v11, %v9869_v8  ;;  %v9583_v54 = vld [vmem:[%s13885_s10 + $0x5c8] sm:$0xf0] }
 0x19f   : > { %v13161_v13 = vld [vmem:[%s13885_s10 + $0xe04] sm:$0xf0]  ;;  %v9586_v1 = vor.u32 %v12885_v53, %v9583_v54  ;;  %v10255_v8 = vld [vmem:[%s13885_s10 + $0xb08] sm:$0xf0] }
 0x1a0   : > { %5541 = vmatpush.bf16.msra.mxu2 %v10830_v55  ;;  %v11405_v18 = vld [vmem:[%s13885_s10 + $0x13a8] sm:$0xf]  ;;  %5516 = vmatpush.bf16.msra.mxu0 %v9198_v3  ;;  %v10638_v25 = vor.u32 %v13161_v13, %v10637_v12  ;;  %v13077_v55 = vld [vmem:[%s13885_s10 + $0xb6c] sm:$0xf]  ;;  %v11122_v3 = vor.u32 %v13269_v58, %v11119_v59  ;;  %v10258_v14 = vor.u32 %v13053_v6, %v10255_v8 }
 0x1a1   : > { %v13353_v19 = vld [vmem:[%s13885_s10 + $0x1404] sm:$0xf0]  ;;  %v10354_v2 = vor.u32 %v13077_v55, %v10351_v57  ;;  %v13437_v11 = vld [vmem:[%s13885_s10 + $0x16ac] sm:$0xf] }
 0x1a2   : > { %5554 = vmatpush.bf16.msra.mxu3 %v11598_v60  ;;  %v349_v20 = vld [vmem:[#allocation2 + $0x28] sm:$0xff]  ;;  %5529 = vmatpush.bf16.msra.mxu1 %v9966_v4  ;;  %v11406_v30 = vor.u32 %v13353_v19, %v11405_v18 }
 0x1a3   : > { %v9005_v26 = vld [vmem:[%s13885_s10 + $0xe8] sm:$0xf]  ;;  %v6245_v36 = vadd.f32 %v5301_v22, %v349_v20  ;;  %v12861_v4 = vld [vmem:[%s13885_s10 + $0x4ac] sm:$0xf] }
 0x1a4   : > { %5542 = vmatpush.bf16.msra.mxu2 %v10734_v5  ;;  %v12753_v27 = vld [vmem:[%s13885_s10 + $0x144] sm:$0xf0]  ;;  %5517 = vmatpush.bf16.msra.mxu0 %v9102_v21  ;;  %v9487_v5 = vld [vmem:[%s13885_s10 + $0x508] sm:$0xf0] }
 0x1a5   : > { %v9773_v28 = vld [vmem:[%s13885_s10 + $0x6e8] sm:$0xf]  ;;  %v9006_v39 = vor.u32 %v12753_v27, %v9005_v26  ;;  %6269 = vst [vmem:[#allocation2 + $0x28] sm:$0xff] %v6245_v36  ;;  %v11791_v12 = vld [vmem:[%s13885_s10 + $0x1708] sm:$0xf0]  ;;  %v9490_v13 = vor.u32 %v12861_v4, %v9487_v5 }
 0x1a6   : > { %5555 = vmatpush.bf16.msra.mxu3 %v11502_v10  ;;  %v12945_v33 = vld [vmem:[%s13885_s10 + $0x744] sm:$0xf0]  ;;  %5530 = vmatpush.bf16.msra.mxu1 %v9870_v24  ;;  %v11023_v10 = vld [vmem:[%s13885_s10 + $0x1108] sm:$0xf0]  ;;  %v11794_v21 = vor.u32 %v13437_v11, %v11791_v12 }
 0x1a7   : > { %v10541_v34 = vld [vmem:[%s13885_s10 + $0xce8] sm:$0xf]  ;;  %v9774_v42 = vor.u32 %v12945_v33, %v9773_v28  ;;  %v11026_v15 = vor.u32 %v13245_v9, %v11023_v10  ;;  %v12837_v18 = vld [vmem:[%s13885_s10 + $0x3ec] sm:$0xf] }
 0x1a8   : > { %v13137_v35 = vld [vmem:[%s13885_s10 + $0xd44] sm:$0xf0]  ;;  %5543 = vmatpush.bf16.msra.mxu2 %v10638_v25  ;;  %5518 = vmatpush.bf16.msra.mxu0 %v9006_v39  ;;  %v9391_v19 = vld [vmem:[%s13885_s10 + $0x448] sm:$0xf0] }
 0x1a9   : > { %v11309_v37 = vld [vmem:[%s13885_s10 + $0x12e8] sm:$0xf]  ;;  %v10542_v43 = vor.u32 %v13137_v35, %v10541_v34  ;;  %v13029_v20 = vld [vmem:[%s13885_s10 + $0x9ec] sm:$0xf]  ;;  %v9394_v27 = vor.u32 %v12837_v18, %v9391_v19 }
 0x1aa   : > { %v13329_v38 = vld [vmem:[%s13885_s10 + $0x1344] sm:$0xf0]  ;;  %5556 = vmatpush.bf16.msra.mxu3 %v11406_v30  ;;  %5531 = vmatpush.bf16.msra.mxu1 %v9774_v42  ;;  %v10159_v22 = vld [vmem:[%s13885_s10 + $0xa48] sm:$0xf0]  ;;  %v5313_v42 = vpop.f32.mrf.mxu0 }
 0x1ab   : > { %v8909_v40 = vld [vmem:[%s13885_s10 + $0x28] sm:$0xf]  ;;  %v11310_v48 = vor.u32 %v13329_v38, %v11309_v37  ;;  %v10927_v24 = vld [vmem:[%s13885_s10 + $0x1048] sm:$0xf0]  ;;  %v10162_v28 = vor.u32 %v13029_v20, %v10159_v22 }
 0x1ac   : > { %v12729_v41 = vld [vmem:[%s13885_s10 + $0x84] sm:$0xf0]  ;;  %5544 = vmatpush.bf16.msra.mxu2 %v10542_v43  ;;  %v13413_v25 = vld [vmem:[%s13885_s10 + $0x15ec] sm:$0xf]  ;;  %v10930_v29 = vor.u32 %v13221_v23, %v10927_v24 }
 0x1ad   : > { %v9677_v44 = vld [vmem:[%s13885_s10 + $0x628] sm:$0xf]  ;;  %v8910_v56 = vor.u32 %v12729_v41, %v8909_v40  ;;  %v11695_v26 = vld [vmem:[%s13885_s10 + $0x1648] sm:$0xf0] }
 0x1ae   : > { %v12921_v45 = vld [vmem:[%s13885_s10 + $0x684] sm:$0xf0]  ;;  %5557 = vmatpush.bf16.msra.mxu3 %v11310_v48  ;;  %v12813_v30 = vld [vmem:[%s13885_s10 + $0x32c] sm:$0xf]  ;;  %v11698_v35 = vor.u32 %v13413_v25, %v11695_v26  ;;  %v5326_v48 = vpop.f32.mrf.mxu1 }
 0x1af   : > { %v10445_v46 = vld [vmem:[%s13885_s10 + $0xc28] sm:$0xf]  ;;  %v9678_v60 = vor.u32 %v12921_v45, %v9677_v44  ;;  %5519 = vmatpush.bf16.msra.mxu0 %v8910_v56  ;;  %v9295_v33 = vld [vmem:[%s13885_s10 + $0x388] sm:$0xf0]  ;;  %v5327_v53 = vadd.f32 %v5326_v48, %v5313_v42  ;;  %v9589_v42 = vld [vmem:[%s13885_s10 + $0x570] sm:$0xf] }
 0x1b0   : > { %v13113_v49 = vld [vmem:[%s13885_s10 + $0xc84] sm:$0xf0]  ;;  %v13005_v34 = vld [vmem:[%s13885_s10 + $0x92c] sm:$0xf]  ;;  %v9298_v41 = vor.u32 %v12813_v30, %v9295_v33  ;;  %v13282_v48 = vld [vmem:[%s13885_s10 + $0x11cc] sm:$0xf0] }
 0x1b1   : > { %v11213_v50 = vld [vmem:[%s13885_s10 + $0x1228] sm:$0xf]  ;;  %v10446_v61 = vor.u32 %v13113_v49, %v10445_v46  ;;  %5532 = vmatpush.bf16.msra.mxu1 %v9678_v60  ;;  %v10063_v36 = vld [vmem:[%s13885_s10 + $0x988] sm:$0xf0] }
 0x1b2   : > { %v13305_v51 = vld [vmem:[%s13885_s10 + $0x1284] sm:$0xf0]  ;;  %5520 = vmatmul.bf16.vlgmr.msra.gmra.mxu0 %v13997_v31  ;;  %v13197_v37 = vld [vmem:[%s13885_s10 + $0xf2c] sm:$0xf]  ;;  %v10066_v43 = vor.u32 %v13005_v34, %v10063_v36  ;;  %v5339_v62 = vpop.f32.mrf.mxu2  ;;  %v5315_v10 = vpop.f32.mrf.mxu0 }
 0x1b3   : > { %v11214_v0 = vor.u32 %v13305_v51, %v11213_v50  ;;  %5545 = vmatpush.bf16.msra.mxu2 %v10446_v61  ;;  %5564 = vmatpush.bf16.msrb.mxu0 %v9586_v1  ;;  %v10831_v38 = vld [vmem:[%s13885_s10 + $0xf88] sm:$0xf0]  ;;  %v10933_v10 = vld [vmem:[%s13885_s10 + $0xff0] sm:$0xf] }
 0x1b4   : > { %5533 = vmatmul.bf16.vlgmr.msra.gmra.mxu1 %v13999_v32  ;;  %v13389_v39 = vld [vmem:[%s13885_s10 + $0x152c] sm:$0xf]  ;;  %v10834_v44 = vor.u32 %v13197_v37, %v10831_v38  ;;  %v5352_v4 = vpop.f32.mrf.mxu3 }
 0x1b5   : > { %5558 = vmatpush.bf16.msra.mxu3 %v11214_v0  ;;  %5577 = vmatpush.bf16.msrb.mxu1 %v10354_v2  ;;  %v11599_v40 = vld [vmem:[%s13885_s10 + $0x1588] sm:$0xf0] }
 0x1b6   : > { %5546 = vmatmul.bf16.vlgmr.msra.gmra.mxu2 %v13985_v16  ;;  %v12789_v45 = vld [vmem:[%s13885_s10 + $0x26c] sm:$0xf]  ;;  %v11602_v49 = vor.u32 %v13389_v39, %v11599_v40  ;;  %v5328_v18 = vpop.f32.mrf.mxu1 }
 0x1b7   : > { %5590 = vmatpush.bf16.msrb.mxu2 %v11122_v3  ;;  %5565 = vmatpush.bf16.msrb.mxu0 %v9490_v13  ;;  %v9199_v46 = vld [vmem:[%s13885_s10 + $0x2c8] sm:$0xf0]  ;;  %v5340_v3 = vadd.f32 %v5339_v62, %v5327_v53  ;;  %v11029_v62 = vld [vmem:[%s13885_s10 + $0x10b0] sm:$0xf] }
 0x1b8   : > { %5559 = vmatmul.bf16.vlgmr.msra.gmra.mxu3 %v13987_v17  ;;  %v9967_v50 = vld [vmem:[%s13885_s10 + $0x8c8] sm:$0xf0]  ;;  %v9202_v56 = vor.u32 %v12789_v45, %v9199_v46  ;;  %v13090_v46 = vld [vmem:[%s13885_s10 + $0xbcc] sm:$0xf0] }
 0x1b9   : > { %5603 = vmatpush.bf16.msrb.mxu3 %v11890_v7  ;;  %5578 = vmatpush.bf16.msrb.mxu1 %v10258_v14  ;;  %v13173_v51 = vld [vmem:[%s13885_s10 + $0xe6c] sm:$0xf]  ;;  %v9970_v57 = vor.u32 %v12981_v47, %v9967_v50  ;;  %v350_v7 = vld [vmem:[#allocation2 + $0x40] sm:$0xff]  ;;  %v5353_v9 = vadd.f32 %v5352_v4, %v5340_v3  ;;  %v11125_v47 = vld [vmem:[%s13885_s10 + $0x1170] sm:$0xf] }
 0x1ba   : > { %v13365_v54 = vld [vmem:[%s13885_s10 + $0x146c] sm:$0xf]  ;;  %v10738_v58 = vor.u32 %v13173_v51, %v10735_v52  ;;  %v5341_v36 = vpop.f32.mrf.mxu2  ;;  %v11893_v51 = vld [vmem:[%s13885_s10 + $0x1770] sm:$0xf] }
 0x1bb   : > { %5591 = vmatpush.bf16.msrb.mxu2 %v11026_v15  ;;  %5566 = vmatpush.bf16.msrb.mxu0 %v9394_v27  ;;  %v11503_v55 = vld [vmem:[%s13885_s10 + $0x14c8] sm:$0xf0]  ;;  %v6246_v23 = vadd.f32 %v5353_v9, %v350_v7  ;;  %v13474_v52 = vld [vmem:[%s13885_s10 + $0x17cc] sm:$0xf0] }
 0x1bc   : > { %v12765_v59 = vld [vmem:[%s13885_s10 + $0x1ac] sm:$0xf]  ;;  %v11506_v63 = vor.u32 %v13365_v54, %v11503_v55  ;;  %v10165_v7 = vld [vmem:[%s13885_s10 + $0x9f0] sm:$0xf] }
 0x1bd   : > { %5604 = vmatpush.bf16.msrb.mxu3 %v11794_v21  ;;  %5579 = vmatpush.bf16.msrb.mxu1 %v10162_v28  ;;  %v9103_v60 = vld [vmem:[%s13885_s10 + $0x208] sm:$0xf0]  ;;  %6270 = vst [vmem:[#allocation2 + $0x40] sm:$0xff] %v6246_v23  ;;  %v13042_v9 = vld [vmem:[%s13885_s10 + $0xa4c] sm:$0xf0] }
 0x1be   : > { %v12957_v61 = vld [vmem:[%s13885_s10 + $0x7ac] sm:$0xf]  ;;  %v9106_v8 = vor.u32 %v12765_v59, %v9103_v60  ;;  %v10261_v59 = vld [vmem:[%s13885_s10 + $0xab0] sm:$0xf]  ;;  %v11894_v60 = vor.u32 %v13474_v52, %v11893_v51 }
 0x1bf   : > { %5592 = vmatpush.bf16.msrb.mxu2 %v10930_v29  ;;  %5567 = vmatpush.bf16.msrb.mxu0 %v9298_v41  ;;  %v9871_v0 = vld [vmem:[%s13885_s10 + $0x808] sm:$0xf0]  ;;  %v5354_v41 = vpop.f32.mrf.mxu3  ;;  %v13018_v23 = vld [vmem:[%s13885_s10 + $0x98c] sm:$0xf0] }
 0x1c0   : > { %v13149_v1 = vld [vmem:[%s13885_s10 + $0xdac] sm:$0xf]  ;;  %v9874_v11 = vor.u32 %v12957_v61, %v9871_v0  ;;  %v13066_v61 = vld [vmem:[%s13885_s10 + $0xb0c] sm:$0xf0] }
 0x1c1   : > { %5605 = vmatpush.bf16.msrb.mxu3 %v11698_v35  ;;  %5580 = vmatpush.bf16.msrb.mxu1 %v10066_v43  ;;  %v10639_v2 = vld [vmem:[%s13885_s10 + $0xe08] sm:$0xf0]  ;;  %v12898_v43 = vld [vmem:[%s13885_s10 + $0x5cc] sm:$0xf0]  ;;  %v10262_v3 = vor.u32 %v13066_v61, %v10261_v59 }
 0x1c2   : > { %v13341_v5 = vld [vmem:[%s13885_s10 + $0x13ac] sm:$0xf]  ;;  %v10642_v12 = vor.u32 %v13149_v1, %v10639_v2  ;;  %v9590_v54 = vor.u32 %v12898_v43, %v9589_v42  ;;  %v11797_v0 = vld [vmem:[%s13885_s10 + $0x16b0] sm:$0xf] }
 0x1c3   : > { %5593 = vmatpush.bf16.msrb.mxu2 %v10834_v44  ;;  %v11407_v6 = vld [vmem:[%s13885_s10 + $0x1408] sm:$0xf0]  ;;  %5568 = vmatpush.bf16.msrb.mxu0 %v9202_v56  ;;  %v10357_v44 = vld [vmem:[%s13885_s10 + $0xb70] sm:$0xf]  ;;  %v11126_v56 = vor.u32 %v13282_v48, %v11125_v47 }
 0x1c4   : > { %v12741_v13 = vld [vmem:[%s13885_s10 + $0xec] sm:$0xf]  ;;  %v11410_v19 = vor.u32 %v13341_v5, %v11407_v6  ;;  %v10358_v55 = vor.u32 %v13090_v46, %v10357_v44  ;;  %v13450_v1 = vld [vmem:[%s13885_s10 + $0x170c] sm:$0xf0] }
 0x1c5   : > { %5606 = vmatpush.bf16.msrb.mxu3 %v11602_v49  ;;  %5581 = vmatpush.bf16.msrb.mxu1 %v9970_v57  ;;  %v9007_v14 = vld [vmem:[%s13885_s10 + $0x148] sm:$0xf0]  ;;  %v9493_v57 = vld [vmem:[%s13885_s10 + $0x4b0] sm:$0xf] }
 0x1c6   : > { %v12933_v15 = vld [vmem:[%s13885_s10 + $0x6ec] sm:$0xf]  ;;  %v9010_v26 = vor.u32 %v12741_v13, %v9007_v14  ;;  %v9397_v5 = vld [vmem:[%s13885_s10 + $0x3f0] sm:$0xf] }
 0x1c7   : > { %5594 = vmatpush.bf16.msrb.mxu2 %v10738_v58  ;;  %v9775_v20 = vld [vmem:[%s13885_s10 + $0x748] sm:$0xf0]  ;;  %5569 = vmatpush.bf16.msrb.mxu0 %v9106_v8  ;;  %v12874_v58 = vld [vmem:[%s13885_s10 + $0x50c] sm:$0xf0]  ;;  %v11798_v8 = vor.u32 %v13450_v1, %v11797_v0 }
 0x1c8   : > { %v13125_v21 = vld [vmem:[%s13885_s10 + $0xcec] sm:$0xf]  ;;  %v9778_v29 = vor.u32 %v12933_v15, %v9775_v20  ;;  %v9494_v2 = vor.u32 %v12874_v58, %v9493_v57  ;;  %v12850_v6 = vld [vmem:[%s13885_s10 + $0x44c] sm:$0xf0]  ;;  %v10166_v15 = vor.u32 %v13042_v9, %v10165_v7 }
 0x1c9   : > { %5607 = vmatpush.bf16.msrb.mxu3 %v11506_v63  ;;  %v10543_v22 = vld [vmem:[%s13885_s10 + $0xd48] sm:$0xf0]  ;;  %5582 = vmatpush.bf16.msrb.mxu1 %v9874_v11  ;;  %v13258_v63 = vld [vmem:[%s13885_s10 + $0x110c] sm:$0xf0]  ;;  %v9398_v14 = vor.u32 %v12850_v6, %v9397_v5 }
 0x1ca   : > { %v13317_v24 = vld [vmem:[%s13885_s10 + $0x12ec] sm:$0xf]  ;;  %v10546_v30 = vor.u32 %v13125_v21, %v10543_v22  ;;  %v11030_v4 = vor.u32 %v13258_v63, %v11029_v62  ;;  %v13234_v11 = vld [vmem:[%s13885_s10 + $0x104c] sm:$0xf0] }
 0x1cb   : > { %v11311_v25 = vld [vmem:[%s13885_s10 + $0x1348] sm:$0xf0]  ;;  %5595 = vmatpush.bf16.msrb.mxu2 %v10642_v12  ;;  %5570 = vmatpush.bf16.msrb.mxu0 %v9010_v26  ;;  %v11701_v12 = vld [vmem:[%s13885_s10 + $0x15f0] sm:$0xf]  ;;  %v10934_v18 = vor.u32 %v13234_v11, %v10933_v10 }
 0x1cc   : > { %v12717_v27 = vld [vmem:[%s13885_s10 + $0x2c] sm:$0xf]  ;;  %v11314_v37 = vor.u32 %v13317_v24, %v11311_v25  ;;  %v13426_v13 = vld [vmem:[%s13885_s10 + $0x164c] sm:$0xf0] }
 0x1cd   : > { %v8911_v28 = vld [vmem:[%s13885_s10 + $0x88] sm:$0xf0]  ;;  %5608 = vmatpush.bf16.msrb.mxu3 %v11410_v19  ;;  %5583 = vmatpush.bf16.msrb.mxu1 %v9778_v29  ;;  %v9301_v19 = vld [vmem:[%s13885_s10 + $0x330] sm:$0xf]  ;;  %v11702_v22 = vor.u32 %v13426_v13, %v11701_v12  ;;  %v5365_v29 = vpop.f32.mrf.mxu0 }
 0x1ce   : > { %v12909_v33 = vld [vmem:[%s13885_s10 + $0x62c] sm:$0xf]  ;;  %v8914_v45 = vor.u32 %v12717_v27, %v8911_v28  ;;  %v12826_v20 = vld [vmem:[%s13885_s10 + $0x38c] sm:$0xf0] }
 0x1cf   : > { %v9679_v34 = vld [vmem:[%s13885_s10 + $0x688] sm:$0xf0]  ;;  %5596 = vmatpush.bf16.msrb.mxu2 %v10546_v30  ;;  %v10069_v21 = vld [vmem:[%s13885_s10 + $0x930] sm:$0xf]  ;;  %v9302_v28 = vor.u32 %v12826_v20, %v9301_v19 }
 0x1d0   : > { %v13101_v35 = vld [vmem:[%s13885_s10 + $0xc2c] sm:$0xf]  ;;  %v9682_v49 = vor.u32 %v12909_v33, %v9679_v34  ;;  %5571 = vmatpush.bf16.msrb.mxu0 %v8914_v45  ;;  %v10837_v24 = vld [vmem:[%s13885_s10 + $0xf30] sm:$0xf]  ;;  %v10070_v30 = vor.u32 %v13018_v23, %v10069_v21 }
 0x1d1   : > { %v10447_v38 = vld [vmem:[%s13885_s10 + $0xc88] sm:$0xf0]  ;;  %5609 = vmatpush.bf16.msrb.mxu3 %v11314_v37  ;;  %v13210_v25 = vld [vmem:[%s13885_s10 + $0xf8c] sm:$0xf0]  ;;  %v5378_v37 = vpop.f32.mrf.mxu1 }
 0x1d2   : > { %v13293_v39 = vld [vmem:[%s13885_s10 + $0x122c] sm:$0xf]  ;;  %v10450_v50 = vor.u32 %v13101_v35, %v10447_v38  ;;  %5584 = vmatpush.bf16.msrb.mxu1 %v9682_v49  ;;  %v11605_v26 = vld [vmem:[%s13885_s10 + $0x1530] sm:$0xf]  ;;  %v10838_v33 = vor.u32 %v13210_v25, %v10837_v24  ;;  %v5379_v42 = vadd.f32 %v5378_v37, %v5365_v29  ;;  %v5391_v51 = vpop.f32.mrf.mxu2  ;;  %v12886_v29 = vld [vmem:[%s13885_s10 + $0x574] sm:$0xf] }
 0x1d3   : > { %v11215_v40 = vld [vmem:[%s13885_s10 + $0x1288] sm:$0xf0]  ;;  %5572 = vmatmul.bf16.vlgmr.msrb.gmra.mxu0 %v13997_v31  ;;  %v13402_v27 = vld [vmem:[%s13885_s10 + $0x158c] sm:$0xf0]  ;;  %v11127_v37 = vld [vmem:[%s13885_s10 + $0x11d0] sm:$0xf0] }
 0x1d4   : > { %v11218_v53 = vor.u32 %v13293_v39, %v11215_v40  ;;  %5597 = vmatpush.bf16.msrb.mxu2 %v10450_v50  ;;  %5616 = vmatpush.bf16.msra.mxu0 %v9590_v54  ;;  %v9205_v34 = vld [vmem:[%s13885_s10 + $0x270] sm:$0xf]  ;;  %v11606_v38 = vor.u32 %v13402_v27, %v11605_v26  ;;  %v5404_v57 = vpop.f32.mrf.mxu3 }
 0x1d5   : > { %5585 = vmatmul.bf16.vlgmr.msrb.gmra.mxu1 %v13999_v32  ;;  %v12802_v35 = vld [vmem:[%s13885_s10 + $0x2cc] sm:$0xf0]  ;;  %v5367_v63 = vpop.f32.mrf.mxu0 }
 0x1d6   : > { %5610 = vmatpush.bf16.msrb.mxu3 %v11218_v53  ;;  %5629 = vmatpush.bf16.msra.mxu1 %v10358_v55  ;;  %v9973_v36 = vld [vmem:[%s13885_s10 + $0x870] sm:$0xf]  ;;  %v9206_v45 = vor.u32 %v12802_v35, %v9205_v34  ;;  %v10359_v35 = vld [vmem:[%s13885_s10 + $0xbd0] sm:$0xf0] }
 0x1d7   : > { %5598 = vmatmul.bf16.vlgmr.msrb.gmra.mxu2 %v13985_v16  ;;  %v12994_v39 = vld [vmem:[%s13885_s10 + $0x8cc] sm:$0xf0]  ;;  %v13222_v63 = vld [vmem:[%s13885_s10 + $0xff4] sm:$0xf] }
 0x1d8   : > { %5642 = vmatpush.bf16.msra.mxu2 %v11126_v56  ;;  %5617 = vmatpush.bf16.msra.mxu0 %v9494_v2  ;;  %v10741_v40 = vld [vmem:[%s13885_s10 + $0xe70] sm:$0xf]  ;;  %v9974_v46 = vor.u32 %v12994_v39, %v9973_v36  ;;  %v5392_v56 = vadd.f32 %v5391_v51, %v5379_v42  ;;  %v13270_v36 = vld [vmem:[%s13885_s10 + $0x1174] sm:$0xf] }
 0x1d9   : > { %5611 = vmatmul.bf16.vlgmr.msrb.gmra.mxu3 %v13987_v17  ;;  %v13186_v41 = vld [vmem:[%s13885_s10 + $0xecc] sm:$0xf0]  ;;  %v5380_v5 = vpop.f32.mrf.mxu1  ;;  %v13246_v51 = vld [vmem:[%s13885_s10 + $0x10b4] sm:$0xf] }
 0x1da   : > { %5655 = vmatpush.bf16.msra.mxu3 %v11894_v60  ;;  %5630 = vmatpush.bf16.msra.mxu1 %v10262_v3  ;;  %v11509_v43 = vld [vmem:[%s13885_s10 + $0x1470] sm:$0xf]  ;;  %v10742_v47 = vor.u32 %v13186_v41, %v10741_v40  ;;  %v351_v60 = vld [vmem:[#allocation2 + $0x78] sm:$0xff]  ;;  %v5405_v62 = vadd.f32 %v5404_v57, %v5392_v56  ;;  %v5393_v23 = vpop.f32.mrf.mxu2  ;;  %v13462_v40 = vld [vmem:[%s13885_s10 + $0x1774] sm:$0xf] }
 0x1db   : > { %v13378_v44 = vld [vmem:[%s13885_s10 + $0x14cc] sm:$0xf0]  ;;  %v11895_v41 = vld [vmem:[%s13885_s10 + $0x17d0] sm:$0xf0] }
 0x1dc   : > { %5643 = vmatpush.bf16.msra.mxu2 %v11030_v4  ;;  %5618 = vmatpush.bf16.msra.mxu0 %v9398_v14  ;;  %v9109_v48 = vld [vmem:[%s13885_s10 + $0x1b0] sm:$0xf]  ;;  %v11510_v52 = vor.u32 %v13378_v44, %v11509_v43  ;;  %v6247_v10 = vadd.f32 %v5405_v62, %v351_v60  ;;  %v13030_v60 = vld [vmem:[%s13885_s10 + $0x9f4] sm:$0xf] }
 0x1dd   : > { %v12778_v49 = vld [vmem:[%s13885_s10 + $0x20c] sm:$0xf0]  ;;  %v10167_v62 = vld [vmem:[%s13885_s10 + $0xa50] sm:$0xf0] }
 0x1de   : > { %5656 = vmatpush.bf16.msra.mxu3 %v11798_v8  ;;  %5631 = vmatpush.bf16.msra.mxu1 %v10166_v15  ;;  %v9877_v50 = vld [vmem:[%s13885_s10 + $0x7b0] sm:$0xf]  ;;  %v9110_v61 = vor.u32 %v12778_v49, %v9109_v48  ;;  %6271 = vst [vmem:[#allocation2 + $0x78] sm:$0xff] %v6247_v10  ;;  %v13054_v48 = vld [vmem:[%s13885_s10 + $0xab4] sm:$0xf]  ;;  %v11898_v49 = vor.u32 %v13462_v40, %v11895_v41 }
 0x1df   : > { %v12970_v53 = vld [vmem:[%s13885_s10 + $0x80c] sm:$0xf0]  ;;  %v10071_v10 = vld [vmem:[%s13885_s10 + $0x990] sm:$0xf0] }
 0x1e0   : > { %5644 = vmatpush.bf16.msra.mxu2 %v10934_v18  ;;  %5619 = vmatpush.bf16.msra.mxu0 %v9302_v28  ;;  %v10645_v54 = vld [vmem:[%s13885_s10 + $0xdb0] sm:$0xf]  ;;  %v9878_v0 = vor.u32 %v12970_v53, %v9877_v50  ;;  %v5406_v28 = vpop.f32.mrf.mxu3  ;;  %v10263_v50 = vld [vmem:[%s13885_s10 + $0xb10] sm:$0xf0] }
 0x1e1   : > { %v13162_v55 = vld [vmem:[%s13885_s10 + $0xe0c] sm:$0xf0]  ;;  %v13438_v53 = vld [vmem:[%s13885_s10 + $0x16b4] sm:$0xf]  ;;  %v10266_v56 = vor.u32 %v13054_v48, %v10263_v50 }
 0x1e2   : > { %5657 = vmatpush.bf16.msra.mxu3 %v11702_v22  ;;  %5632 = vmatpush.bf16.msra.mxu1 %v10070_v30  ;;  %v11413_v58 = vld [vmem:[%s13885_s10 + $0x13b0] sm:$0xf]  ;;  %v10646_v1 = vor.u32 %v13162_v55, %v10645_v54  ;;  %v9591_v30 = vld [vmem:[%s13885_s10 + $0x5d0] sm:$0xf0] }
 0x1e3   : > { %v13354_v59 = vld [vmem:[%s13885_s10 + $0x140c] sm:$0xf0]  ;;  %v9594_v43 = vor.u32 %v12886_v29, %v9591_v30  ;;  %v11799_v54 = vld [vmem:[%s13885_s10 + $0x1710] sm:$0xf0] }
 0x1e4   : > { %5645 = vmatpush.bf16.msra.mxu2 %v10838_v33  ;;  %5620 = vmatpush.bf16.msra.mxu0 %v9206_v45  ;;  %v9013_v2 = vld [vmem:[%s13885_s10 + $0xf0] sm:$0xf]  ;;  %v11414_v6 = vor.u32 %v13354_v59, %v11413_v58  ;;  %v13078_v33 = vld [vmem:[%s13885_s10 + $0xb74] sm:$0xf]  ;;  %v11130_v45 = vor.u32 %v13270_v36, %v11127_v37 }
 0x1e5   : > { %v12754_v3 = vld [vmem:[%s13885_s10 + $0x14c] sm:$0xf0]  ;;  %v10362_v44 = vor.u32 %v13078_v33, %v10359_v35  ;;  %v12838_v58 = vld [vmem:[%s13885_s10 + $0x3f4] sm:$0xf] }
 0x1e6   : > { %5658 = vmatpush.bf16.msra.mxu3 %v11606_v38  ;;  %5633 = vmatpush.bf16.msra.mxu1 %v9974_v46  ;;  %v9781_v4 = vld [vmem:[%s13885_s10 + $0x6f0] sm:$0xf]  ;;  %v9014_v13 = vor.u32 %v12754_v3, %v9013_v2  ;;  %v12862_v46 = vld [vmem:[%s13885_s10 + $0x4b4] sm:$0xf] }
 0x1e7   : > { %v12946_v7 = vld [vmem:[%s13885_s10 + $0x74c] sm:$0xf0]  ;;  %v9399_v59 = vld [vmem:[%s13885_s10 + $0x450] sm:$0xf0] }
 0x1e8   : > { %5646 = vmatpush.bf16.msra.mxu2 %v10742_v47  ;;  %v10549_v8 = vld [vmem:[%s13885_s10 + $0xcf0] sm:$0xf]  ;;  %5621 = vmatpush.bf16.msra.mxu0 %v9110_v61  ;;  %v9782_v18 = vor.u32 %v12946_v7, %v9781_v4  ;;  %v9495_v47 = vld [vmem:[%s13885_s10 + $0x510] sm:$0xf0]  ;;  %v11802_v61 = vor.u32 %v13438_v53, %v11799_v54  ;;  %v9402_v3 = vor.u32 %v12838_v58, %v9399_v59 }
 0x1e9   : > { %v13138_v9 = vld [vmem:[%s13885_s10 + $0xd4c] sm:$0xf0]  ;;  %v9498_v55 = vor.u32 %v12862_v46, %v9495_v47  ;;  %v11703_v2 = vld [vmem:[%s13885_s10 + $0x1650] sm:$0xf0]  ;;  %v10170_v4 = vor.u32 %v13030_v60, %v10167_v62 }
 0x1ea   : > { %5659 = vmatpush.bf16.msra.mxu3 %v11510_v52  ;;  %v11317_v11 = vld [vmem:[%s13885_s10 + $0x12f0] sm:$0xf]  ;;  %5634 = vmatpush.bf16.msra.mxu1 %v9878_v0  ;;  %v10550_v19 = vor.u32 %v13138_v9, %v10549_v8  ;;  %v11031_v52 = vld [vmem:[%s13885_s10 + $0x1110] sm:$0xf0] }
 0x1eb   : > { %v13330_v12 = vld [vmem:[%s13885_s10 + $0x134c] sm:$0xf0]  ;;  %v11034_v57 = vor.u32 %v13246_v51, %v11031_v52  ;;  %v10935_v0 = vld [vmem:[%s13885_s10 + $0x1050] sm:$0xf0] }
 0x1ec   : > { %v8917_v14 = vld [vmem:[%s13885_s10 + $0x30] sm:$0xf]  ;;  %5647 = vmatpush.bf16.msra.mxu2 %v10646_v1  ;;  %v11318_v24 = vor.u32 %v13330_v12, %v11317_v11  ;;  %5622 = vmatpush.bf16.msra.mxu0 %v9014_v13  ;;  %v13414_v1 = vld [vmem:[%s13885_s10 + $0x15f4] sm:$0xf]  ;;  %v10938_v5 = vor.u32 %v13222_v63, %v10935_v0 }
 0x1ed   : > { %v12730_v15 = vld [vmem:[%s13885_s10 + $0x8c] sm:$0xf0]  ;;  %v9303_v7 = vld [vmem:[%s13885_s10 + $0x390] sm:$0xf0]  ;;  %v11706_v9 = vor.u32 %v13414_v1, %v11703_v2 }
 0x1ee   : > { %v9685_v20 = vld [vmem:[%s13885_s10 + $0x630] sm:$0xf]  ;;  %5660 = vmatpush.bf16.msra.mxu3 %v11414_v6  ;;  %v8918_v34 = vor.u32 %v12730_v15, %v8917_v14  ;;  %5635 = vmatpush.bf16.msra.mxu1 %v9782_v18  ;;  %v12814_v6 = vld [vmem:[%s13885_s10 + $0x334] sm:$0xf]  ;;  %v5417_v18 = vpop.f32.mrf.mxu0 }
 0x1ef   : > { %v12922_v21 = vld [vmem:[%s13885_s10 + $0x68c] sm:$0xf0]  ;;  %v13006_v8 = vld [vmem:[%s13885_s10 + $0x934] sm:$0xf]  ;;  %v9306_v15 = vor.u32 %v12814_v6, %v9303_v7 }
 0x1f0   : > { %v10453_v22 = vld [vmem:[%s13885_s10 + $0xc30] sm:$0xf]  ;;  %5648 = vmatpush.bf16.msra.mxu2 %v10550_v19  ;;  %v9686_v38 = vor.u32 %v12922_v21, %v9685_v20  ;;  %5623 = vmatpush.bf16.msra.mxu0 %v8918_v34  ;;  %v13198_v11 = vld [vmem:[%s13885_s10 + $0xf34] sm:$0xf]  ;;  %v10074_v19 = vor.u32 %v13006_v8, %v10071_v10 }
 0x1f1   : > { %v13114_v25 = vld [vmem:[%s13885_s10 + $0xc8c] sm:$0xf0]  ;;  %v10839_v12 = vld [vmem:[%s13885_s10 + $0xf90] sm:$0xf0] }
 0x1f2   : > { %v11221_v26 = vld [vmem:[%s13885_s10 + $0x1230] sm:$0xf]  ;;  %v10454_v39 = vor.u32 %v13114_v25, %v10453_v22  ;;  %5661 = vmatpush.bf16.msra.mxu3 %v11318_v24  ;;  %5636 = vmatpush.bf16.msra.mxu1 %v9686_v38  ;;  %v13390_v13 = vld [vmem:[%s13885_s10 + $0x1534] sm:$0xf]  ;;  %v10842_v20 = vor.u32 %v13198_v11, %v10839_v12  ;;  %v5430_v24 = vpop.f32.mrf.mxu1 }
 0x1f3   : > { %v13306_v27 = vld [vmem:[%s13885_s10 + $0x128c] sm:$0xf0]  ;;  %5624 = vmatmul.bf16.vlgmr.msra.gmra.mxu0 %v13997_v31  ;;  %v11607_v14 = vld [vmem:[%s13885_s10 + $0x1590] sm:$0xf0]  ;;  %v5431_v29 = vadd.f32 %v5430_v24, %v5417_v18  ;;  %v9597_v18 = vld [vmem:[%s13885_s10 + $0x578] sm:$0xf] }
 0x1f4   : > { %v11222_v42 = vor.u32 %v13306_v27, %v11221_v26  ;;  %5649 = vmatpush.bf16.msra.mxu2 %v10454_v39  ;;  %5668 = vmatpush.bf16.msrb.mxu0 %v9594_v43  ;;  %v12790_v21 = vld [vmem:[%s13885_s10 + $0x274] sm:$0xf]  ;;  %v11610_v25 = vor.u32 %v13390_v13, %v11607_v14  ;;  %v5443_v40 = vpop.f32.mrf.mxu2  ;;  %v13283_v24 = vld [vmem:[%s13885_s10 + $0x11d4] sm:$0xf0] }
 0x1f5   : > { %5637 = vmatmul.bf16.vlgmr.msra.gmra.mxu1 %v13999_v32  ;;  %v9207_v22 = vld [vmem:[%s13885_s10 + $0x2d0] sm:$0xf0] }
 0x1f6   : > { %5662 = vmatpush.bf16.msra.mxu3 %v11222_v42  ;;  %5681 = vmatpush.bf16.msrb.mxu1 %v10362_v44  ;;  %v12982_v23 = vld [vmem:[%s13885_s10 + $0x874] sm:$0xf]  ;;  %v9210_v34 = vor.u32 %v12790_v21, %v9207_v22  ;;  %v5456_v46 = vpop.f32.mrf.mxu3  ;;  %v5419_v52 = vpop.f32.mrf.mxu0  ;;  %v13091_v22 = vld [vmem:[%s13885_s10 + $0xbd4] sm:$0xf0] }
 0x1f7   : > { %5650 = vmatmul.bf16.vlgmr.msra.gmra.mxu2 %v13985_v16  ;;  %v9975_v26 = vld [vmem:[%s13885_s10 + $0x8d0] sm:$0xf0]  ;;  %v10941_v52 = vld [vmem:[%s13885_s10 + $0xff8] sm:$0xf] }
 0x1f8   : > { %5694 = vmatpush.bf16.msrb.mxu2 %v11130_v45  ;;  %5669 = vmatpush.bf16.msrb.mxu0 %v9498_v55  ;;  %v13174_v27 = vld [vmem:[%s13885_s10 + $0xe74] sm:$0xf]  ;;  %v9978_v35 = vor.u32 %v12982_v23, %v9975_v26  ;;  %v5444_v45 = vadd.f32 %v5443_v40, %v5431_v29  ;;  %v11133_v23 = vld [vmem:[%s13885_s10 + $0x1178] sm:$0xf] }
 0x1f9   : > { %5663 = vmatmul.bf16.vlgmr.msra.gmra.mxu3 %v13987_v17  ;;  %v10743_v28 = vld [vmem:[%s13885_s10 + $0xed0] sm:$0xf0]  ;;  %v11037_v40 = vld [vmem:[%s13885_s10 + $0x10b8] sm:$0xf] }
 0x1fa   : > { %5707 = vmatpush.bf16.msrb.mxu3 %v11898_v49  ;;  %5682 = vmatpush.bf16.msrb.mxu1 %v10266_v56  ;;  %v13366_v30 = vld [vmem:[%s13885_s10 + $0x1474] sm:$0xf]  ;;  %v10746_v36 = vor.u32 %v13174_v27, %v10743_v28  ;;  %v352_v49 = vld [vmem:[#allocation2 + $0x88] sm:$0xff]  ;;  %v5457_v51 = vadd.f32 %v5456_v46, %v5444_v45  ;;  %v5432_v58 = vpop.f32.mrf.mxu1  ;;  %v11901_v27 = vld [vmem:[%s13885_s10 + $0x1778] sm:$0xf] }
 0x1fb   : > { %v11511_v33 = vld [vmem:[%s13885_s10 + $0x14d0] sm:$0xf0]  ;;  %v13475_v28 = vld [vmem:[%s13885_s10 + $0x17d4] sm:$0xf0] }
 0x1fc   : > { %5695 = vmatpush.bf16.msrb.mxu2 %v11034_v57  ;;  %5670 = vmatpush.bf16.msrb.mxu0 %v9402_v3  ;;  %v12766_v37 = vld [vmem:[%s13885_s10 + $0x1b4] sm:$0xf]  ;;  %v11514_v41 = vor.u32 %v13366_v30, %v11511_v33  ;;  %v6248_v63 = vadd.f32 %v5457_v51, %v352_v49  ;;  %v5445_v10 = vpop.f32.mrf.mxu2  ;;  %v10173_v49 = vld [vmem:[%s13885_s10 + $0x9f8] sm:$0xf] }
 0x1fd   : > { %v9111_v38 = vld [vmem:[%s13885_s10 + $0x210] sm:$0xf0]  ;;  %v13043_v51 = vld [vmem:[%s13885_s10 + $0xa54] sm:$0xf0] }
 0x1fe   : > { %5708 = vmatpush.bf16.msrb.mxu3 %v11802_v61  ;;  %5683 = vmatpush.bf16.msrb.mxu1 %v10170_v4  ;;  %v12958_v39 = vld [vmem:[%s13885_s10 + $0x7b4] sm:$0xf]  ;;  %v9114_v50 = vor.u32 %v12766_v37, %v9111_v38  ;;  %6272 = vst [vmem:[#allocation2 + $0x88] sm:$0xff] %v6248_v63  ;;  %v10269_v37 = vld [vmem:[%s13885_s10 + $0xab8] sm:$0xf]  ;;  %v11902_v38 = vor.u32 %v13475_v28, %v11901_v27 }
 0x1ff   : > { %v9879_v42 = vld [vmem:[%s13885_s10 + $0x810] sm:$0xf0]  ;;  %v13019_v63 = vld [vmem:[%s13885_s10 + $0x994] sm:$0xf0] }
 0x200   : > { %5696 = vmatpush.bf16.msrb.mxu2 %v10938_v5  ;;  %5671 = vmatpush.bf16.msrb.mxu0 %v9306_v15  ;;  %v13150_v43 = vld [vmem:[%s13885_s10 + $0xdb4] sm:$0xf]  ;;  %v9882_v53 = vor.u32 %v12958_v39, %v9879_v42  ;;  %v5458_v15 = vpop.f32.mrf.mxu3  ;;  %v13067_v39 = vld [vmem:[%s13885_s10 + $0xb14] sm:$0xf0] }
 0x201   : > { %v10647_v44 = vld [vmem:[%s13885_s10 + $0xe10] sm:$0xf0]  ;;  %v11805_v42 = vld [vmem:[%s13885_s10 + $0x16b8] sm:$0xf]  ;;  %v10270_v45 = vor.u32 %v13067_v39, %v10269_v37 }
 0x202   : > { %5709 = vmatpush.bf16.msrb.mxu3 %v11706_v9  ;;  %5684 = vmatpush.bf16.msrb.mxu1 %v10074_v19  ;;  %v13342_v47 = vld [vmem:[%s13885_s10 + $0x13b4] sm:$0xf]  ;;  %v10650_v54 = vor.u32 %v13150_v43, %v10647_v44  ;;  %v12899_v19 = vld [vmem:[%s13885_s10 + $0x5d4] sm:$0xf0] }
 0x203   : > { %v11415_v48 = vld [vmem:[%s13885_s10 + $0x1410] sm:$0xf0]  ;;  %v9598_v30 = vor.u32 %v12899_v19, %v9597_v18  ;;  %v13451_v43 = vld [vmem:[%s13885_s10 + $0x1714] sm:$0xf0] }
 0x204   : > { %5697 = vmatpush.bf16.msrb.mxu2 %v10842_v20  ;;  %5672 = vmatpush.bf16.msrb.mxu0 %v9210_v34  ;;  %v12742_v55 = vld [vmem:[%s13885_s10 + $0xf4] sm:$0xf]  ;;  %v11418_v59 = vor.u32 %v13342_v47, %v11415_v48  ;;  %v10365_v20 = vld [vmem:[%s13885_s10 + $0xb78] sm:$0xf]  ;;  %v11134_v34 = vor.u32 %v13283_v24, %v11133_v23 }
 0x205   : > { %v9015_v56 = vld [vmem:[%s13885_s10 + $0x150] sm:$0xf0]  ;;  %v10366_v33 = vor.u32 %v13091_v22, %v10365_v20  ;;  %v9405_v47 = vld [vmem:[%s13885_s10 + $0x3f8] sm:$0xf] }
 0x206   : > { %5710 = vmatpush.bf16.msrb.mxu3 %v11610_v25  ;;  %5685 = vmatpush.bf16.msrb.mxu1 %v9978_v35  ;;  %v12934_v57 = vld [vmem:[%s13885_s10 + $0x6f4] sm:$0xf]  ;;  %v9018_v2 = vor.u32 %v12742_v55, %v9015_v56  ;;  %v9501_v35 = vld [vmem:[%s13885_s10 + $0x4b8] sm:$0xf] }
 0x207   : > { %v9783_v60 = vld [vmem:[%s13885_s10 + $0x750] sm:$0xf0]  ;;  %v12851_v48 = vld [vmem:[%s13885_s10 + $0x454] sm:$0xf0] }
 0x208   : > { %5698 = vmatpush.bf16.msrb.mxu2 %v10746_v36  ;;  %v13126_v61 = vld [vmem:[%s13885_s10 + $0xcf4] sm:$0xf]  ;;  %5673 = vmatpush.bf16.msrb.mxu0 %v9114_v50  ;;  %v9786_v5 = vor.u32 %v12934_v57, %v9783_v60  ;;  %v12875_v36 = vld [vmem:[%s13885_s10 + $0x514] sm:$0xf0]  ;;  %v11806_v50 = vor.u32 %v13451_v43, %v11805_v42  ;;  %v9406_v56 = vor.u32 %v12851_v48, %v9405_v47 }
 0x209   : > { %v10551_v62 = vld [vmem:[%s13885_s10 + $0xd50] sm:$0xf0]  ;;  %v9502_v44 = vor.u32 %v12875_v36, %v9501_v35  ;;  %v13427_v55 = vld [vmem:[%s13885_s10 + $0x1654] sm:$0xf0]  ;;  %v10174_v57 = vor.u32 %v13043_v51, %v10173_v49 }
 0x20a   : > { %5711 = vmatpush.bf16.msrb.mxu3 %v11514_v41  ;;  %v13318_v0 = vld [vmem:[%s13885_s10 + $0x12f4] sm:$0xf]  ;;  %5686 = vmatpush.bf16.msrb.mxu1 %v9882_v53  ;;  %v10554_v6 = vor.u32 %v13126_v61, %v10551_v62  ;;  %v13259_v41 = vld [vmem:[%s13885_s10 + $0x1114] sm:$0xf0] }
 0x20b   : > { %v11319_v1 = vld [vmem:[%s13885_s10 + $0x1350] sm:$0xf0]  ;;  %v11038_v46 = vor.u32 %v13259_v41, %v11037_v40  ;;  %v13235_v53 = vld [vmem:[%s13885_s10 + $0x1054] sm:$0xf0] }
 0x20c   : > { %v12718_v3 = vld [vmem:[%s13885_s10 + $0x34] sm:$0xf]  ;;  %5699 = vmatpush.bf16.msrb.mxu2 %v10650_v54  ;;  %v11322_v11 = vor.u32 %v13318_v0, %v11319_v1  ;;  %5674 = vmatpush.bf16.msrb.mxu0 %v9018_v2  ;;  %v11709_v54 = vld [vmem:[%s13885_s10 + $0x15f8] sm:$0xf]  ;;  %v10942_v58 = vor.u32 %v13235_v53, %v10941_v52 }
 0x20d   : > { %v8919_v4 = vld [vmem:[%s13885_s10 + $0x90] sm:$0xf0]  ;;  %v12827_v60 = vld [vmem:[%s13885_s10 + $0x394] sm:$0xf0]  ;;  %v11710_v62 = vor.u32 %v13427_v55, %v11709_v54 }
 0x20e   : > { %v12910_v7 = vld [vmem:[%s13885_s10 + $0x634] sm:$0xf]  ;;  %5712 = vmatpush.bf16.msrb.mxu3 %v11418_v59  ;;  %v8922_v21 = vor.u32 %v12718_v3, %v8919_v4  ;;  %5687 = vmatpush.bf16.msrb.mxu1 %v9786_v5  ;;  %v9309_v59 = vld [vmem:[%s13885_s10 + $0x338] sm:$0xf]  ;;  %v5469_v5 = vpop.f32.mrf.mxu0 }
 0x20f   : > { %v9687_v8 = vld [vmem:[%s13885_s10 + $0x690] sm:$0xf0]  ;;  %v10077_v61 = vld [vmem:[%s13885_s10 + $0x938] sm:$0xf]  ;;  %v9310_v4 = vor.u32 %v12827_v60, %v9309_v59 }
 0x210   : > { %v13102_v9 = vld [vmem:[%s13885_s10 + $0xc34] sm:$0xf]  ;;  %5700 = vmatpush.bf16.msrb.mxu2 %v10554_v6  ;;  %v9690_v25 = vor.u32 %v12910_v7, %v9687_v8  ;;  %5675 = vmatpush.bf16.msrb.mxu0 %v8922_v21  ;;  %v10845_v0 = vld [vmem:[%s13885_s10 + $0xf38] sm:$0xf]  ;;  %v10078_v6 = vor.u32 %v13019_v63, %v10077_v61 }
 0x211   : > { %v10455_v12 = vld [vmem:[%s13885_s10 + $0xc90] sm:$0xf0]  ;;  %v13211_v1 = vld [vmem:[%s13885_s10 + $0xf94] sm:$0xf0] }
 0x212   : > { %v13294_v13 = vld [vmem:[%s13885_s10 + $0x1234] sm:$0xf]  ;;  %v10458_v26 = vor.u32 %v13102_v9, %v10455_v12  ;;  %5713 = vmatpush.bf16.msrb.mxu3 %v11322_v11  ;;  %5688 = vmatpush.bf16.msrb.mxu1 %v9690_v25  ;;  %v11613_v2 = vld [vmem:[%s13885_s10 + $0x1538] sm:$0xf]  ;;  %v10846_v7 = vor.u32 %v13211_v1, %v10845_v0  ;;  %v5482_v11 = vpop.f32.mrf.mxu1 }
 0x213   : > { %v11223_v14 = vld [vmem:[%s13885_s10 + $0x1290] sm:$0xf0]  ;;  %5676 = vmatmul.bf16.vlgmr.msrb.gmra.mxu0 %v13997_v31  ;;  %v13403_v3 = vld [vmem:[%s13885_s10 + $0x1594] sm:$0xf0]  ;;  %v5483_v18 = vadd.f32 %v5482_v11, %v5469_v5  ;;  %v12887_v5 = vld [vmem:[%s13885_s10 + $0x57c] sm:$0xf] }
 0x214   : > { %v11226_v29 = vor.u32 %v13294_v13, %v11223_v14  ;;  %5701 = vmatpush.bf16.msrb.mxu2 %v10458_v26  ;;  %5720 = vmatpush.bf16.msra.mxu0 %v9598_v30  ;;  %v9213_v8 = vld [vmem:[%s13885_s10 + $0x278] sm:$0xf]  ;;  %v11614_v12 = vor.u32 %v13403_v3, %v11613_v2  ;;  %v11135_v11 = vld [vmem:[%s13885_s10 + $0x11d8] sm:$0xf0] }
 0x215   : > { %5689 = vmatmul.bf16.vlgmr.msrb.gmra.mxu1 %v13999_v32  ;;  %v12803_v9 = vld [vmem:[%s13885_s10 + $0x2d4] sm:$0xf0] }
 0x216   : > { %5714 = vmatpush.bf16.msrb.mxu3 %v11226_v29  ;;  %5733 = vmatpush.bf16.msra.mxu1 %v10366_v33  ;;  %v9981_v10 = vld [vmem:[%s13885_s10 + $0x878] sm:$0xf]  ;;  %v9214_v21 = vor.u32 %v12803_v9, %v9213_v8  ;;  %v5495_v27 = vpop.f32.mrf.mxu2  ;;  %v5471_v41 = vpop.f32.mrf.mxu0  ;;  %v10367_v9 = vld [vmem:[%s13885_s10 + $0xbd8] sm:$0xf0] }
 0x217   : > { %5702 = vmatmul.bf16.vlgmr.msrb.gmra.mxu2 %v13985_v16  ;;  %v12995_v13 = vld [vmem:[%s13885_s10 + $0x8d4] sm:$0xf0]  ;;  %v13223_v41 = vld [vmem:[%s13885_s10 + $0xffc] sm:$0xf] }
 0x218   : > { %5746 = vmatpush.bf16.msra.mxu2 %v11134_v34  ;;  %5721 = vmatpush.bf16.msra.mxu0 %v9502_v44  ;;  %v10749_v14 = vld [vmem:[%s13885_s10 + $0xe78] sm:$0xf]  ;;  %v9982_v22 = vor.u32 %v12995_v13, %v9981_v10  ;;  %v5496_v34 = vadd.f32 %v5495_v27, %v5483_v18  ;;  %v5508_v35 = vpop.f32.mrf.mxu3  ;;  %v13271_v10 = vld [vmem:[%s13885_s10 + $0x117c] sm:$0xf] }
 0x219   : > { %5715 = vmatmul.bf16.vlgmr.msrb.gmra.mxu3 %v13987_v17  ;;  %v13187_v15 = vld [vmem:[%s13885_s10 + $0xed4] sm:$0xf0]  ;;  %v13247_v27 = vld [vmem:[%s13885_s10 + $0x10bc] sm:$0xf] }
 0x21a   : > { %5759 = vmatpush.bf16.msra.mxu3 %v11902_v38  ;;  %5734 = vmatpush.bf16.msra.mxu1 %v10270_v45  ;;  %v11517_v19 = vld [vmem:[%s13885_s10 + $0x1478] sm:$0xf]  ;;  %v10750_v23 = vor.u32 %v13187_v15, %v10749_v14  ;;  %v353_v38 = vld [vmem:[#allocation2 + $0x90] sm:$0xff]  ;;  %v5509_v40 = vadd.f32 %v5508_v35, %v5496_v34  ;;  %v5484_v47 = vpop.f32.mrf.mxu1  ;;  %v13463_v14 = vld [vmem:[%s13885_s10 + $0x177c] sm:$0xf] }
 0x21b   : > { %v13379_v20 = vld [vmem:[%s13885_s10 + $0x14d4] sm:$0xf0]  ;;  %v11903_v15 = vld [vmem:[%s13885_s10 + $0x17d8] sm:$0xf0] }
 0x21c   : > { %5747 = vmatpush.bf16.msra.mxu2 %v11038_v46  ;;  %5722 = vmatpush.bf16.msra.mxu0 %v9406_v56  ;;  %v9117_v24 = vld [vmem:[%s13885_s10 + $0x1b8] sm:$0xf]  ;;  %v11518_v28 = vor.u32 %v13379_v20, %v11517_v19  ;;  %v6249_v52 = vadd.f32 %v5509_v40, %v353_v38  ;;  %v13031_v38 = vld [vmem:[%s13885_s10 + $0x9fc] sm:$0xf] }
 0x21d   : > { %v12779_v25 = vld [vmem:[%s13885_s10 + $0x214] sm:$0xf0]  ;;  %v10175_v40 = vld [vmem:[%s13885_s10 + $0xa58] sm:$0xf0] }
 0x21e   : > { %5760 = vmatpush.bf16.msra.mxu3 %v11806_v50  ;;  %5735 = vmatpush.bf16.msra.mxu1 %v10174_v57  ;;  %v9885_v26 = vld [vmem:[%s13885_s10 + $0x7b8] sm:$0xf]  ;;  %v9118_v39 = vor.u32 %v12779_v25, %v9117_v24  ;;  %6273 = vst [vmem:[#allocation2 + $0x90] sm:$0xff] %v6249_v52  ;;  %v5497_v63 = vpop.f32.mrf.mxu2  ;;  %v13055_v24 = vld [vmem:[%s13885_s10 + $0xabc] sm:$0xf]  ;;  %v11906_v25 = vor.u32 %v13463_v14, %v11903_v15 }
 0x21f   : > { %v12971_v29 = vld [vmem:[%s13885_s10 + $0x814] sm:$0xf0]  ;;  %v10079_v52 = vld [vmem:[%s13885_s10 + $0x998] sm:$0xf0] }
 0x220   : > { %5748 = vmatpush.bf16.msra.mxu2 %v10942_v58  ;;  %5723 = vmatpush.bf16.msra.mxu0 %v9310_v4  ;;  %v10653_v30 = vld [vmem:[%s13885_s10 + $0xdb8] sm:$0xf]  ;;  %v9886_v42 = vor.u32 %v12971_v29, %v9885_v26  ;;  %v5510_v4 = vpop.f32.mrf.mxu3  ;;  %v10271_v26 = vld [vmem:[%s13885_s10 + $0xb18] sm:$0xf0] }
 0x221   : > { %v13163_v33 = vld [vmem:[%s13885_s10 + $0xe14] sm:$0xf0]  ;;  %v13439_v29 = vld [vmem:[%s13885_s10 + $0x16bc] sm:$0xf]  ;;  %v10274_v34 = vor.u32 %v13055_v24, %v10271_v26 }
 0x222   : > { %5761 = vmatpush.bf16.msra.mxu3 %v11710_v62  ;;  %5736 = vmatpush.bf16.msra.mxu1 %v10078_v6  ;;  %v11421_v36 = vld [vmem:[%s13885_s10 + $0x13b8] sm:$0xf]  ;;  %v10654_v43 = vor.u32 %v13163_v33, %v10653_v30  ;;  %v9599_v6 = vld [vmem:[%s13885_s10 + $0x5d8] sm:$0xf0] }
 0x223   : > { %v13355_v37 = vld [vmem:[%s13885_s10 + $0x1414] sm:$0xf0]  ;;  %v9602_v19 = vor.u32 %v12887_v5, %v9599_v6  ;;  %v11807_v30 = vld [vmem:[%s13885_s10 + $0x1718] sm:$0xf0] }
 0x224   : > { %5749 = vmatpush.bf16.msra.mxu2 %v10846_v7  ;;  %5724 = vmatpush.bf16.msra.mxu0 %v9214_v21  ;;  %v9021_v44 = vld [vmem:[%s13885_s10 + $0xf8] sm:$0xf]  ;;  %v11422_v48 = vor.u32 %v13355_v37, %v11421_v36  ;;  %v13079_v7 = vld [vmem:[%s13885_s10 + $0xb7c] sm:$0xf]  ;;  %v11138_v21 = vor.u32 %v13271_v10, %v11135_v11 }
 0x225   : > { %v12755_v45 = vld [vmem:[%s13885_s10 + $0x154] sm:$0xf0]  ;;  %v10370_v20 = vor.u32 %v13079_v7, %v10367_v9  ;;  %v12839_v36 = vld [vmem:[%s13885_s10 + $0x3fc] sm:$0xf] }
 0x226   : > { %5762 = vmatpush.bf16.msra.mxu3 %v11614_v12  ;;  %5737 = vmatpush.bf16.msra.mxu1 %v9982_v22  ;;  %v9789_v46 = vld [vmem:[%s13885_s10 + $0x6f8] sm:$0xf]  ;;  %v9022_v55 = vor.u32 %v12755_v45, %v9021_v44  ;;  %v12863_v22 = vld [vmem:[%s13885_s10 + $0x4bc] sm:$0xf] }
 0x227   : > { %v12947_v49 = vld [vmem:[%s13885_s10 + $0x754] sm:$0xf0]  ;;  %v9407_v37 = vld [vmem:[%s13885_s10 + $0x458] sm:$0xf0] }
 0x228   : > { %5750 = vmatpush.bf16.msra.mxu2 %v10750_v23  ;;  %v10557_v50 = vld [vmem:[%s13885_s10 + $0xcf8] sm:$0xf]  ;;  %5725 = vmatpush.bf16.msra.mxu0 %v9118_v39  ;;  %v9790_v58 = vor.u32 %v12947_v49, %v9789_v46  ;;  %v9503_v23 = vld [vmem:[%s13885_s10 + $0x518] sm:$0xf0]  ;;  %v11810_v39 = vor.u32 %v13439_v29, %v11807_v30  ;;  %v9410_v45 = vor.u32 %v12839_v36, %v9407_v37 }
 0x229   : > { %v13139_v51 = vld [vmem:[%s13885_s10 + $0xd54] sm:$0xf0]  ;;  %v9506_v33 = vor.u32 %v12863_v22, %v9503_v23  ;;  %v11711_v44 = vld [vmem:[%s13885_s10 + $0x1658] sm:$0xf0]  ;;  %v10178_v46 = vor.u32 %v13031_v38, %v10175_v40 }
 0x22a   : > { %5763 = vmatpush.bf16.msra.mxu3 %v11518_v28  ;;  %v11325_v53 = vld [vmem:[%s13885_s10 + $0x12f8] sm:$0xf]  ;;  %5738 = vmatpush.bf16.msra.mxu1 %v9886_v42  ;;  %v10558_v59 = vor.u32 %v13139_v51, %v10557_v50  ;;  %v11039_v28 = vld [vmem:[%s13885_s10 + $0x1118] sm:$0xf0] }
 0x22b   : > { %v13331_v54 = vld [vmem:[%s13885_s10 + $0x1354] sm:$0xf0]  ;;  %v11042_v35 = vor.u32 %v13247_v27, %v11039_v28  ;;  %v10943_v42 = vld [vmem:[%s13885_s10 + $0x1058] sm:$0xf0] }
 0x22c   : > { %v8925_v56 = vld [vmem:[%s13885_s10 + $0x38] sm:$0xf]  ;;  %5751 = vmatpush.bf16.msra.mxu2 %v10654_v43  ;;  %v11326_v0 = vor.u32 %v13331_v54, %v11325_v53  ;;  %5726 = vmatpush.bf16.msra.mxu0 %v9022_v55  ;;  %v13415_v43 = vld [vmem:[%s13885_s10 + $0x15fc] sm:$0xf]  ;;  %v10946_v47 = vor.u32 %v13223_v41, %v10943_v42 }
 0x22d   : > { %v12731_v57 = vld [vmem:[%s13885_s10 + $0x94] sm:$0xf0]  ;;  %v9311_v49 = vld [vmem:[%s13885_s10 + $0x398] sm:$0xf0]  ;;  %v11714_v51 = vor.u32 %v13415_v43, %v11711_v44 }
 0x22e   : > { %v9693_v60 = vld [vmem:[%s13885_s10 + $0x638] sm:$0xf]  ;;  %5764 = vmatpush.bf16.msra.mxu3 %v11422_v48  ;;  %v8926_v8 = vor.u32 %v12731_v57, %v8925_v56  ;;  %5739 = vmatpush.bf16.msra.mxu1 %v9790_v58  ;;  %v12815_v48 = vld [vmem:[%s13885_s10 + $0x33c] sm:$0xf] }
 0x22f   : > { %v12923_v61 = vld [vmem:[%s13885_s10 + $0x694] sm:$0xf0]  ;;  %v13007_v50 = vld [vmem:[%s13885_s10 + $0x93c] sm:$0xf]  ;;  %v9314_v57 = vor.u32 %v12815_v48, %v9311_v49  ;;  %v5521_v58 = vpop.f32.mrf.mxu0 }
 0x230   : > { %v10461_v62 = vld [vmem:[%s13885_s10 + $0xc38] sm:$0xf]  ;;  %5752 = vmatpush.bf16.msra.mxu2 %v10558_v59  ;;  %v9694_v12 = vor.u32 %v12923_v61, %v9693_v60  ;;  %5727 = vmatpush.bf16.msra.mxu0 %v8926_v8  ;;  %v13199_v53 = vld [vmem:[%s13885_s10 + $0xf3c] sm:$0xf]  ;;  %v10082_v59 = vor.u32 %v13007_v50, %v10079_v52 }
 0x231   : > { %v13115_v1 = vld [vmem:[%s13885_s10 + $0xc94] sm:$0xf0]  ;;  %v10847_v54 = vld [vmem:[%s13885_s10 + $0xf98] sm:$0xf0] }
 0x232   : > { %v11229_v2 = vld [vmem:[%s13885_s10 + $0x1238] sm:$0xf]  ;;  %v10462_v13 = vor.u32 %v13115_v1, %v10461_v62  ;;  %5765 = vmatpush.bf16.msra.mxu3 %v11326_v0  ;;  %5740 = vmatpush.bf16.msra.mxu1 %v9694_v12  ;;  %v13391_v55 = vld [vmem:[%s13885_s10 + $0x153c] sm:$0xf]  ;;  %v10850_v60 = vor.u32 %v13199_v53, %v10847_v54  ;;  %v5534_v0 = vpop.f32.mrf.mxu1 }
 0x233   : > { %v13307_v3 = vld [vmem:[%s13885_s10 + $0x1294] sm:$0xf0]  ;;  %5728 = vmatmul.bf16.vlgmr.msra.gmra.mxu0 %v13997_v31  ;;  %v11615_v56 = vld [vmem:[%s13885_s10 + $0x1598] sm:$0xf0]  ;;  %v5535_v5 = vadd.f32 %v5534_v0, %v5521_v58  ;;  %v9605_v58 = vld [vmem:[%s13885_s10 + $0x580] sm:$0xf] }
 0x234   : > { %v11230_v18 = vor.u32 %v13307_v3, %v11229_v2  ;;  %5753 = vmatpush.bf16.msra.mxu2 %v10462_v13  ;;  %5772 = vmatpush.bf16.msrb.mxu0 %v9602_v19  ;;  %v12791_v61 = vld [vmem:[%s13885_s10 + $0x27c] sm:$0xf]  ;;  %v11618_v1 = vor.u32 %v13391_v55, %v11615_v56  ;;  %v13284_v0 = vld [vmem:[%s13885_s10 + $0x11dc] sm:$0xf0] }
 0x235   : > { %5741 = vmatmul.bf16.vlgmr.msra.gmra.mxu1 %v13999_v32  ;;  %v9215_v62 = vld [vmem:[%s13885_s10 + $0x2d8] sm:$0xf0] }
 0x236   : > { %5766 = vmatpush.bf16.msra.mxu3 %v11230_v18  ;;  %5785 = vmatpush.bf16.msrb.mxu1 %v10370_v20  ;;  %v12983_v63 = vld [vmem:[%s13885_s10 + $0x87c] sm:$0xf]  ;;  %v9218_v8 = vor.u32 %v12791_v61, %v9215_v62  ;;  %v13092_v62 = vld [vmem:[%s13885_s10 + $0xbdc] sm:$0xf0] }
 0x237   : > { %5754 = vmatmul.bf16.vlgmr.msra.gmra.mxu2 %v13985_v16  ;;  %v9983_v2 = vld [vmem:[%s13885_s10 + $0x8d8] sm:$0xf0]  ;;  %v5523_v28 = vpop.f32.mrf.mxu0 }
 0x238   : > { %5798 = vmatpush.bf16.msrb.mxu2 %v11138_v21  ;;  %5773 = vmatpush.bf16.msrb.mxu0 %v9506_v33  ;;  %v13175_v3 = vld [vmem:[%s13885_s10 + $0xe7c] sm:$0xf]  ;;  %v9986_v9 = vor.u32 %v12983_v63, %v9983_v2  ;;  %v11141_v63 = vld [vmem:[%s13885_s10 + $0x1180] sm:$0xf] }
 0x239   : > { %5767 = vmatmul.bf16.vlgmr.msra.gmra.mxu3 %v13987_v17  ;;  %v10751_v4 = vld [vmem:[%s13885_s10 + $0xed8] sm:$0xf0]  ;;  %v5547_v14 = vpop.f32.mrf.mxu2  ;;  %v10949_v28 = vld [vmem:[%s13885_s10 + $0x1000] sm:$0xf] }
 0x23a   : > { %5811 = vmatpush.bf16.msrb.mxu3 %v11906_v25  ;;  %5786 = vmatpush.bf16.msrb.mxu1 %v10274_v34  ;;  %v13367_v6 = vld [vmem:[%s13885_s10 + $0x147c] sm:$0xf]  ;;  %v10754_v10 = vor.u32 %v13175_v3, %v10751_v4  ;;  %v5548_v21 = vadd.f32 %v5547_v14, %v5535_v5  ;;  %v5536_v36 = vpop.f32.mrf.mxu1  ;;  %v11909_v3 = vld [vmem:[%s13885_s10 + $0x1780] sm:$0xf] }
 0x23b   : > { %v11519_v7 = vld [vmem:[%s13885_s10 + $0x14d8] sm:$0xf0]  ;;  %v5560_v22 = vpop.f32.mrf.mxu3  ;;  %v13476_v4 = vld [vmem:[%s13885_s10 + $0x17dc] sm:$0xf0] }
 0x23c   : > { %5799 = vmatpush.bf16.msrb.mxu2 %v11042_v35  ;;  %5774 = vmatpush.bf16.msrb.mxu0 %v9410_v45  ;;  %v12767_v11 = vld [vmem:[%s13885_s10 + $0x1bc] sm:$0xf]  ;;  %v11522_v15 = vor.u32 %v13367_v6, %v11519_v7  ;;  %v5561_v27 = vadd.f32 %v5560_v22, %v5548_v21  ;;  %v11045_v14 = vld [vmem:[%s13885_s10 + $0x10c0] sm:$0xf] }
 0x23d   : > { %v9119_v12 = vld [vmem:[%s13885_s10 + $0x218] sm:$0xf0] }
 0x23e   : > { %5812 = vmatpush.bf16.msrb.mxu3 %v11810_v39  ;;  %5787 = vmatpush.bf16.msrb.mxu1 %v10178_v46  ;;  %v12959_v13 = vld [vmem:[%s13885_s10 + $0x7bc] sm:$0xf]  ;;  %v9122_v26 = vor.u32 %v12767_v11, %v9119_v12  ;;  %v10277_v11 = vld [vmem:[%s13885_s10 + $0xac0] sm:$0xf]  ;;  %v11910_v12 = vor.u32 %v13476_v4, %v11909_v3 }
 0x23f   : > { %v9887_v18 = vld [vmem:[%s13885_s10 + $0x818] sm:$0xf0] }
 0x240   : > { %5800 = vmatpush.bf16.msrb.mxu2 %v10946_v47  ;;  %5775 = vmatpush.bf16.msrb.mxu0 %v9314_v57  ;;  %v13151_v19 = vld [vmem:[%s13885_s10 + $0xdbc] sm:$0xf]  ;;  %v9890_v29 = vor.u32 %v12959_v13, %v9887_v18  ;;  %v13068_v13 = vld [vmem:[%s13885_s10 + $0xb1c] sm:$0xf0] }
 0x241   : > { %v10655_v20 = vld [vmem:[%s13885_s10 + $0xe18] sm:$0xf0]  ;;  %v5549_v52 = vpop.f32.mrf.mxu2  ;;  %v11813_v18 = vld [vmem:[%s13885_s10 + $0x16c0] sm:$0xf]  ;;  %v10278_v21 = vor.u32 %v13068_v13, %v10277_v11 }
 0x242   : > { %5813 = vmatpush.bf16.msrb.mxu3 %v11714_v51  ;;  %5788 = vmatpush.bf16.msrb.mxu1 %v10082_v59  ;;  %v13343_v23 = vld [vmem:[%s13885_s10 + $0x13bc] sm:$0xf]  ;;  %v10658_v30 = vor.u32 %v13151_v19, %v10655_v20  ;;  %v12900_v59 = vld [vmem:[%s13885_s10 + $0x5dc] sm:$0xf0] }
 0x243   : > { %v11423_v24 = vld [vmem:[%s13885_s10 + $0x1418] sm:$0xf0]  ;;  %v5562_v57 = vpop.f32.mrf.mxu3  ;;  %v9606_v6 = vor.u32 %v12900_v59, %v9605_v58  ;;  %v13452_v19 = vld [vmem:[%s13885_s10 + $0x171c] sm:$0xf0] }
 0x244   : > { %5801 = vmatpush.bf16.msrb.mxu2 %v10850_v60  ;;  %v354_v25 = vld [vmem:[#allocation2 + $0x18] sm:$0xff]  ;;  %5776 = vmatpush.bf16.msrb.mxu0 %v9218_v8  ;;  %v11426_v37 = vor.u32 %v13343_v23, %v11423_v24  ;;  %v10373_v60 = vld [vmem:[%s13885_s10 + $0xb80] sm:$0xf]  ;;  %v11142_v8 = vor.u32 %v13284_v0, %v11141_v63 }
 0x245   : > { %v12743_v33 = vld [vmem:[%s13885_s10 + $0xfc] sm:$0xf]  ;;  %v6250_v41 = vadd.f32 %v5561_v27, %v354_v25  ;;  %v10374_v7 = vor.u32 %v13092_v62, %v10373_v60  ;;  %v9413_v23 = vld [vmem:[%s13885_s10 + $0x400] sm:$0xf] }
 0x246   : > { %5814 = vmatpush.bf16.msrb.mxu3 %v11618_v1  ;;  %5789 = vmatpush.bf16.msrb.mxu1 %v9986_v9  ;;  %v9023_v34 = vld [vmem:[%s13885_s10 + $0x158] sm:$0xf0]  ;;  %v9509_v9 = vld [vmem:[%s13885_s10 + $0x4c0] sm:$0xf] }
 0x247   : > { %v12935_v35 = vld [vmem:[%s13885_s10 + $0x6fc] sm:$0xf]  ;;  %v9026_v44 = vor.u32 %v12743_v33, %v9023_v34  ;;  %6274 = vst [vmem:[#allocation2 + $0x18] sm:$0xff] %v6250_v41  ;;  %v12852_v24 = vld [vmem:[%s13885_s10 + $0x45c] sm:$0xf0] }
 0x248   : > { %5802 = vmatpush.bf16.msrb.mxu2 %v10754_v10  ;;  %v9791_v38 = vld [vmem:[%s13885_s10 + $0x758] sm:$0xf0]  ;;  %5777 = vmatpush.bf16.msrb.mxu0 %v9122_v26  ;;  %v12876_v10 = vld [vmem:[%s13885_s10 + $0x51c] sm:$0xf0]  ;;  %v11814_v26 = vor.u32 %v13452_v19, %v11813_v18  ;;  %v9414_v34 = vor.u32 %v12852_v24, %v9413_v23 }
 0x249   : > { %v13127_v39 = vld [vmem:[%s13885_s10 + $0xcfc] sm:$0xf]  ;;  %v9794_v47 = vor.u32 %v12935_v35, %v9791_v38  ;;  %v9510_v20 = vor.u32 %v12876_v10, %v9509_v9  ;;  %v10181_v25 = vld [vmem:[%s13885_s10 + $0xa00] sm:$0xf] }
 0x24a   : > { %5815 = vmatpush.bf16.msrb.mxu3 %v11522_v15  ;;  %v10559_v40 = vld [vmem:[%s13885_s10 + $0xd58] sm:$0xf0]  ;;  %5790 = vmatpush.bf16.msrb.mxu1 %v9890_v29  ;;  %v13260_v15 = vld [vmem:[%s13885_s10 + $0x111c] sm:$0xf0] }
 0x24b   : > { %v13319_v42 = vld [vmem:[%s13885_s10 + $0x12fc] sm:$0xf]  ;;  %v10562_v48 = vor.u32 %v13127_v39, %v10559_v40  ;;  %v11046_v22 = vor.u32 %v13260_v15, %v11045_v14  ;;  %v13044_v27 = vld [vmem:[%s13885_s10 + $0xa5c] sm:$0xf0] }
 0x24c   : > { %v11327_v43 = vld [vmem:[%s13885_s10 + $0x1358] sm:$0xf0]  ;;  %5803 = vmatpush.bf16.msrb.mxu2 %v10658_v30  ;;  %5778 = vmatpush.bf16.msrb.mxu0 %v9026_v44  ;;  %v13236_v29 = vld [vmem:[%s13885_s10 + $0x105c] sm:$0xf0]  ;;  %v10182_v35 = vor.u32 %v13044_v27, %v10181_v25 }
 0x24d   : > { %v12719_v45 = vld [vmem:[%s13885_s10 + $0x3c] sm:$0xf]  ;;  %v11330_v53 = vor.u32 %v13319_v42, %v11327_v43  ;;  %v11717_v30 = vld [vmem:[%s13885_s10 + $0x1600] sm:$0xf]  ;;  %v10950_v36 = vor.u32 %v13236_v29, %v10949_v28 }
 0x24e   : > { %v8927_v46 = vld [vmem:[%s13885_s10 + $0x98] sm:$0xf0]  ;;  %5816 = vmatpush.bf16.msrb.mxu3 %v11426_v37  ;;  %5791 = vmatpush.bf16.msrb.mxu1 %v9794_v47  ;;  %v13428_v33 = vld [vmem:[%s13885_s10 + $0x165c] sm:$0xf0] }
 0x24f   : > { %v12911_v49 = vld [vmem:[%s13885_s10 + $0x63c] sm:$0xf]  ;;  %v8930_v61 = vor.u32 %v12719_v45, %v8927_v46  ;;  %v9317_v37 = vld [vmem:[%s13885_s10 + $0x340] sm:$0xf]  ;;  %v11718_v40 = vor.u32 %v13428_v33, %v11717_v30 }
 0x250   : > { %v9695_v50 = vld [vmem:[%s13885_s10 + $0x698] sm:$0xf0]  ;;  %5804 = vmatpush.bf16.msrb.mxu2 %v10562_v48  ;;  %v12828_v38 = vld [vmem:[%s13885_s10 + $0x39c] sm:$0xf0]  ;;  %v5573_v47 = vpop.f32.mrf.mxu0 }
 0x251   : > { %v13103_v51 = vld [vmem:[%s13885_s10 + $0xc3c] sm:$0xf]  ;;  %v9698_v1 = vor.u32 %v12911_v49, %v9695_v50  ;;  %5779 = vmatpush.bf16.msrb.mxu0 %v8930_v61  ;;  %v10085_v39 = vld [vmem:[%s13885_s10 + $0x940] sm:$0xf]  ;;  %v9318_v46 = vor.u32 %v12828_v38, %v9317_v37 }
 0x252   : > { %v10463_v54 = vld [vmem:[%s13885_s10 + $0xc98] sm:$0xf0]  ;;  %5817 = vmatpush.bf16.msrb.mxu3 %v11330_v53  ;;  %v13020_v41 = vld [vmem:[%s13885_s10 + $0x99c] sm:$0xf0]  ;;  %v5586_v53 = vpop.f32.mrf.mxu1 }
 0x253   : > { %v13295_v55 = vld [vmem:[%s13885_s10 + $0x123c] sm:$0xf]  ;;  %v10466_v2 = vor.u32 %v13103_v51, %v10463_v54  ;;  %5792 = vmatpush.bf16.msrb.mxu1 %v9698_v1  ;;  %v10853_v42 = vld [vmem:[%s13885_s10 + $0xf40] sm:$0xf]  ;;  %v10086_v48 = vor.u32 %v13020_v41, %v10085_v39  ;;  %v5587_v58 = vadd.f32 %v5586_v53, %v5573_v47  ;;  %v12888_v47 = vld [vmem:[%s13885_s10 + $0x584] sm:$0xf] }
 0x254   : > { %v11231_v56 = vld [vmem:[%s13885_s10 + $0x1298] sm:$0xf0]  ;;  %5780 = vmatmul.bf16.vlgmr.msrb.gmra.mxu0 %v13997_v31  ;;  %v13212_v43 = vld [vmem:[%s13885_s10 + $0xf9c] sm:$0xf0]  ;;  %v11143_v53 = vld [vmem:[%s13885_s10 + $0x11e0] sm:$0xf0] }
 0x255   : > { %v11234_v5 = vor.u32 %v13295_v55, %v11231_v56  ;;  %5805 = vmatpush.bf16.msrb.mxu2 %v10466_v2  ;;  %5824 = vmatpush.bf16.msra.mxu0 %v9606_v6  ;;  %v11621_v44 = vld [vmem:[%s13885_s10 + $0x1540] sm:$0xf]  ;;  %v10854_v49 = vor.u32 %v13212_v43, %v10853_v42 }
 0x256   : > { %5793 = vmatmul.bf16.vlgmr.msrb.gmra.mxu1 %v13999_v32  ;;  %v13404_v45 = vld [vmem:[%s13885_s10 + $0x159c] sm:$0xf0] }
 0x257   : > { %5818 = vmatpush.bf16.msrb.mxu3 %v11234_v5  ;;  %5837 = vmatpush.bf16.msra.mxu1 %v10374_v7  ;;  %v9221_v50 = vld [vmem:[%s13885_s10 + $0x280] sm:$0xf]  ;;  %v11622_v54 = vor.u32 %v13404_v45, %v11621_v44 }
 0x258   : > { %5806 = vmatmul.bf16.vlgmr.msrb.gmra.mxu2 %v13985_v16  ;;  %v12804_v51 = vld [vmem:[%s13885_s10 + $0x2dc] sm:$0xf0]  ;;  %v5575_v15 = vpop.f32.mrf.mxu0 }
 0x259   : > { %5850 = vmatpush.bf16.msra.mxu2 %v11142_v8  ;;  %5825 = vmatpush.bf16.msra.mxu0 %v9510_v20  ;;  %v9989_v52 = vld [vmem:[%s13885_s10 + $0x880] sm:$0xf]  ;;  %v9222_v61 = vor.u32 %v12804_v51, %v9221_v50  ;;  %v10375_v51 = vld [vmem:[%s13885_s10 + $0xbe0] sm:$0xf0] }
 0x25a   : > { %5819 = vmatmul.bf16.vlgmr.msrb.gmra.mxu3 %v13987_v17  ;;  %v12996_v55 = vld [vmem:[%s13885_s10 + $0x8dc] sm:$0xf0]  ;;  %v5599_v3 = vpop.f32.mrf.mxu2  ;;  %v5588_v23 = vpop.f32.mrf.mxu1  ;;  %v13224_v15 = vld [vmem:[%s13885_s10 + $0x1004] sm:$0xf] }
 0x25b   : > { %5863 = vmatpush.bf16.msra.mxu3 %v11910_v12  ;;  %5838 = vmatpush.bf16.msra.mxu1 %v10278_v21  ;;  %v10757_v56 = vld [vmem:[%s13885_s10 + $0xe80] sm:$0xf]  ;;  %v9990_v62 = vor.u32 %v12996_v55, %v9989_v52  ;;  %v5600_v8 = vadd.f32 %v5599_v3, %v5587_v58  ;;  %v355_v12 = vld [vmem:[#allocation2 + $0x98] sm:$0xff]  ;;  %v13272_v52 = vld [vmem:[%s13885_s10 + $0x1184] sm:$0xf] }
 0x25c   : > { %v13188_v57 = vld [vmem:[%s13885_s10 + $0xedc] sm:$0xf0]  ;;  %v5612_v9 = vpop.f32.mrf.mxu3  ;;  %v13248_v3 = vld [vmem:[%s13885_s10 + $0x10c4] sm:$0xf] }
 0x25d   : > { %5851 = vmatpush.bf16.msra.mxu2 %v11046_v22  ;;  %5826 = vmatpush.bf16.msra.mxu0 %v9414_v34  ;;  %v11525_v59 = vld [vmem:[%s13885_s10 + $0x1480] sm:$0xf]  ;;  %v10758_v63 = vor.u32 %v13188_v57, %v10757_v56  ;;  %v5613_v14 = vadd.f32 %v5612_v9, %v5600_v8  ;;  %v13464_v56 = vld [vmem:[%s13885_s10 + $0x1784] sm:$0xf] }
 0x25e   : > { %v13380_v60 = vld [vmem:[%s13885_s10 + $0x14dc] sm:$0xf0]  ;;  %v11911_v57 = vld [vmem:[%s13885_s10 + $0x17e0] sm:$0xf0] }
 0x25f   : > { %5864 = vmatpush.bf16.msra.mxu3 %v11814_v26  ;;  %5839 = vmatpush.bf16.msra.mxu1 %v10182_v35  ;;  %v9125_v0 = vld [vmem:[%s13885_s10 + $0x1c0] sm:$0xf]  ;;  %v11526_v4 = vor.u32 %v13380_v60, %v11525_v59  ;;  %v6251_v28 = vadd.f32 %v5613_v14, %v355_v12  ;;  %v13032_v12 = vld [vmem:[%s13885_s10 + $0xa04] sm:$0xf] }
 0x260   : > { %v12780_v1 = vld [vmem:[%s13885_s10 + $0x21c] sm:$0xf0]  ;;  %v10183_v14 = vld [vmem:[%s13885_s10 + $0xa60] sm:$0xf0] }
 0x261   : > { %5852 = vmatpush.bf16.msra.mxu2 %v10950_v36  ;;  %5827 = vmatpush.bf16.msra.mxu0 %v9318_v46  ;;  %v9893_v2 = vld [vmem:[%s13885_s10 + $0x7c0] sm:$0xf]  ;;  %v9126_v13 = vor.u32 %v12780_v1, %v9125_v0  ;;  %6275 = vst [vmem:[#allocation2 + $0x98] sm:$0xff] %v6251_v28  ;;  %v13056_v0 = vld [vmem:[%s13885_s10 + $0xac4] sm:$0xf]  ;;  %v11914_v1 = vor.u32 %v13464_v56, %v11911_v57 }
 0x262   : > { %v12972_v5 = vld [vmem:[%s13885_s10 + $0x81c] sm:$0xf0]  ;;  %v5601_v41 = vpop.f32.mrf.mxu2  ;;  %v10087_v28 = vld [vmem:[%s13885_s10 + $0x9a0] sm:$0xf0] }
 0x263   : > { %5865 = vmatpush.bf16.msra.mxu3 %v11718_v40  ;;  %5840 = vmatpush.bf16.msra.mxu1 %v10086_v48  ;;  %v10661_v6 = vld [vmem:[%s13885_s10 + $0xdc0] sm:$0xf]  ;;  %v9894_v18 = vor.u32 %v12972_v5, %v9893_v2  ;;  %v9607_v48 = vld [vmem:[%s13885_s10 + $0x5e0] sm:$0xf0] }
 0x264   : > { %v13164_v7 = vld [vmem:[%s13885_s10 + $0xe1c] sm:$0xf0]  ;;  %v5614_v46 = vpop.f32.mrf.mxu3  ;;  %v9610_v59 = vor.u32 %v12888_v47, %v9607_v48  ;;  %v10279_v2 = vld [vmem:[%s13885_s10 + $0xb20] sm:$0xf0] }
 0x265   : > { %5853 = vmatpush.bf16.msra.mxu2 %v10854_v49  ;;  %v11429_v10 = vld [vmem:[%s13885_s10 + $0x13c0] sm:$0xf]  ;;  %5828 = vmatpush.bf16.msra.mxu0 %v9222_v61  ;;  %v10662_v19 = vor.u32 %v13164_v7, %v10661_v6  ;;  %v13080_v49 = vld [vmem:[%s13885_s10 + $0xb84] sm:$0xf]  ;;  %v11146_v61 = vor.u32 %v13272_v52, %v11143_v53  ;;  %v10282_v8 = vor.u32 %v13056_v0, %v10279_v2 }
 0x266   : > { %v13356_v11 = vld [vmem:[%s13885_s10 + $0x141c] sm:$0xf0]  ;;  %v10378_v60 = vor.u32 %v13080_v49, %v10375_v51  ;;  %v13440_v5 = vld [vmem:[%s13885_s10 + $0x16c4] sm:$0xf] }
 0x267   : > { %5866 = vmatpush.bf16.msra.mxu3 %v11622_v54  ;;  %5841 = vmatpush.bf16.msra.mxu1 %v9990_v62  ;;  %v9029_v20 = vld [vmem:[%s13885_s10 + $0x100] sm:$0xf]  ;;  %v11430_v24 = vor.u32 %v13356_v11, %v11429_v10  ;;  %v12864_v62 = vld [vmem:[%s13885_s10 + $0x4c4] sm:$0xf] }
 0x268   : > { %v12756_v21 = vld [vmem:[%s13885_s10 + $0x15c] sm:$0xf0]  ;;  %v11815_v6 = vld [vmem:[%s13885_s10 + $0x1720] sm:$0xf0] }
 0x269   : > { %5854 = vmatpush.bf16.msra.mxu2 %v10758_v63  ;;  %v9797_v22 = vld [vmem:[%s13885_s10 + $0x700] sm:$0xf]  ;;  %5829 = vmatpush.bf16.msra.mxu0 %v9126_v13  ;;  %v9030_v33 = vor.u32 %v12756_v21, %v9029_v20  ;;  %v9511_v63 = vld [vmem:[%s13885_s10 + $0x520] sm:$0xf0]  ;;  %v11818_v13 = vor.u32 %v13440_v5, %v11815_v6 }
 0x26a   : > { %v12948_v25 = vld [vmem:[%s13885_s10 + $0x75c] sm:$0xf0]  ;;  %v9514_v7 = vor.u32 %v12864_v62, %v9511_v63  ;;  %v12840_v10 = vld [vmem:[%s13885_s10 + $0x404] sm:$0xf] }
 0x26b   : > { %5867 = vmatpush.bf16.msra.mxu3 %v11526_v4  ;;  %v10565_v26 = vld [vmem:[%s13885_s10 + $0xd00] sm:$0xf]  ;;  %5842 = vmatpush.bf16.msra.mxu1 %v9894_v18  ;;  %v9798_v36 = vor.u32 %v12948_v25, %v9797_v22  ;;  %v11047_v4 = vld [vmem:[%s13885_s10 + $0x1120] sm:$0xf0]  ;;  %v10186_v22 = vor.u32 %v13032_v12, %v10183_v14 }
 0x26c   : > { %v13140_v27 = vld [vmem:[%s13885_s10 + $0xd5c] sm:$0xf0]  ;;  %v11050_v9 = vor.u32 %v13248_v3, %v11047_v4  ;;  %v9415_v11 = vld [vmem:[%s13885_s10 + $0x460] sm:$0xf0] }
 0x26d   : > { %v11333_v29 = vld [vmem:[%s13885_s10 + $0x1300] sm:$0xf]  ;;  %5855 = vmatpush.bf16.msra.mxu2 %v10662_v19  ;;  %v10566_v37 = vor.u32 %v13140_v27, %v10565_v26  ;;  %5830 = vmatpush.bf16.msra.mxu0 %v9030_v33  ;;  %v10951_v18 = vld [vmem:[%s13885_s10 + $0x1060] sm:$0xf0]  ;;  %v9418_v21 = vor.u32 %v12840_v10, %v9415_v11 }
 0x26e   : > { %v13332_v30 = vld [vmem:[%s13885_s10 + $0x135c] sm:$0xf0]  ;;  %v13416_v19 = vld [vmem:[%s13885_s10 + $0x1604] sm:$0xf]  ;;  %v10954_v23 = vor.u32 %v13224_v15, %v10951_v18 }
 0x26f   : > { %v8933_v34 = vld [vmem:[%s13885_s10 + $0x40] sm:$0xf]  ;;  %5868 = vmatpush.bf16.msra.mxu3 %v11430_v24  ;;  %v11334_v42 = vor.u32 %v13332_v30, %v11333_v29  ;;  %5843 = vmatpush.bf16.msra.mxu1 %v9798_v36  ;;  %v11719_v20 = vld [vmem:[%s13885_s10 + $0x1660] sm:$0xf0] }
 0x270   : > { %v12732_v35 = vld [vmem:[%s13885_s10 + $0x9c] sm:$0xf0]  ;;  %v12816_v24 = vld [vmem:[%s13885_s10 + $0x344] sm:$0xf]  ;;  %v11722_v27 = vor.u32 %v13416_v19, %v11719_v20  ;;  %v5625_v36 = vpop.f32.mrf.mxu0 }
 0x271   : > { %v9701_v38 = vld [vmem:[%s13885_s10 + $0x640] sm:$0xf]  ;;  %v8934_v50 = vor.u32 %v12732_v35, %v8933_v34  ;;  %5856 = vmatpush.bf16.msra.mxu2 %v10566_v37  ;;  %v9319_v25 = vld [vmem:[%s13885_s10 + $0x3a0] sm:$0xf0] }
 0x272   : > { %v12924_v39 = vld [vmem:[%s13885_s10 + $0x69c] sm:$0xf0]  ;;  %v13008_v26 = vld [vmem:[%s13885_s10 + $0x944] sm:$0xf]  ;;  %v9322_v35 = vor.u32 %v12816_v24, %v9319_v25 }
 0x273   : > { %v10469_v40 = vld [vmem:[%s13885_s10 + $0xc40] sm:$0xf]  ;;  %v9702_v54 = vor.u32 %v12924_v39, %v9701_v38  ;;  %5869 = vmatpush.bf16.msra.mxu3 %v11334_v42  ;;  %5831 = vmatpush.bf16.msra.mxu0 %v8934_v50  ;;  %v13200_v29 = vld [vmem:[%s13885_s10 + $0xf44] sm:$0xf]  ;;  %v10090_v37 = vor.u32 %v13008_v26, %v10087_v28  ;;  %v5638_v42 = vpop.f32.mrf.mxu1 }
 0x274   : > { %v13116_v43 = vld [vmem:[%s13885_s10 + $0xc9c] sm:$0xf0]  ;;  %v10855_v30 = vld [vmem:[%s13885_s10 + $0xfa0] sm:$0xf0]  ;;  %v5639_v47 = vadd.f32 %v5638_v42, %v5625_v36  ;;  %v9613_v36 = vld [vmem:[%s13885_s10 + $0x588] sm:$0xf] }
 0x275   : > { %v11237_v44 = vld [vmem:[%s13885_s10 + $0x1240] sm:$0xf]  ;;  %v10470_v55 = vor.u32 %v13116_v43, %v10469_v40  ;;  %5844 = vmatpush.bf16.msra.mxu1 %v9702_v54  ;;  %v13392_v33 = vld [vmem:[%s13885_s10 + $0x1544] sm:$0xf]  ;;  %v10858_v38 = vor.u32 %v13200_v29, %v10855_v30  ;;  %v13285_v42 = vld [vmem:[%s13885_s10 + $0x11e4] sm:$0xf0] }
 0x276   : > { %v13308_v45 = vld [vmem:[%s13885_s10 + $0x129c] sm:$0xf0]  ;;  %5832 = vmatmul.bf16.vlgmr.msra.gmra.mxu0 %v13997_v31  ;;  %v11623_v34 = vld [vmem:[%s13885_s10 + $0x15a0] sm:$0xf0] }
 0x277   : > { %v11238_v58 = vor.u32 %v13308_v45, %v11237_v44  ;;  %5857 = vmatpush.bf16.msra.mxu2 %v10470_v55  ;;  %5876 = vmatpush.bf16.msrb.mxu0 %v9610_v59  ;;  %v12792_v39 = vld [vmem:[%s13885_s10 + $0x284] sm:$0xf]  ;;  %v11626_v43 = vor.u32 %v13392_v33, %v11623_v34 }
 0x278   : > { %5845 = vmatmul.bf16.vlgmr.msra.gmra.mxu1 %v13999_v32  ;;  %v9223_v40 = vld [vmem:[%s13885_s10 + $0x2e0] sm:$0xf0]  ;;  %v5627_v4 = vpop.f32.mrf.mxu0 }
 0x279   : > { %5870 = vmatpush.bf16.msra.mxu3 %v11238_v58  ;;  %5889 = vmatpush.bf16.msrb.mxu1 %v10378_v60  ;;  %v12984_v41 = vld [vmem:[%s13885_s10 + $0x884] sm:$0xf]  ;;  %v9226_v50 = vor.u32 %v12792_v39, %v9223_v40  ;;  %v13093_v40 = vld [vmem:[%s13885_s10 + $0xbe4] sm:$0xf0] }
 0x27a   : > { %5858 = vmatmul.bf16.vlgmr.msra.gmra.mxu2 %v13985_v16  ;;  %v9991_v44 = vld [vmem:[%s13885_s10 + $0x8e0] sm:$0xf0]  ;;  %v5651_v56 = vpop.f32.mrf.mxu2  ;;  %v10957_v4 = vld [vmem:[%s13885_s10 + $0x1008] sm:$0xf] }
 0x27b   : > { %5902 = vmatpush.bf16.msrb.mxu2 %v11146_v61  ;;  %5877 = vmatpush.bf16.msrb.mxu0 %v9514_v7  ;;  %v13176_v45 = vld [vmem:[%s13885_s10 + $0xe84] sm:$0xf]  ;;  %v9994_v51 = vor.u32 %v12984_v41, %v9991_v44  ;;  %v5652_v61 = vadd.f32 %v5651_v56, %v5639_v47  ;;  %v5640_v10 = vpop.f32.mrf.mxu1  ;;  %v11149_v41 = vld [vmem:[%s13885_s10 + $0x1188] sm:$0xf] }
 0x27c   : > { %5871 = vmatmul.bf16.vlgmr.msra.gmra.mxu3 %v13987_v17  ;;  %v10759_v46 = vld [vmem:[%s13885_s10 + $0xee0] sm:$0xf0]  ;;  %v5664_v62 = vpop.f32.mrf.mxu3  ;;  %v11053_v56 = vld [vmem:[%s13885_s10 + $0x10c8] sm:$0xf] }
 0x27d   : > { %5915 = vmatpush.bf16.msrb.mxu3 %v11914_v1  ;;  %5890 = vmatpush.bf16.msrb.mxu1 %v10282_v8  ;;  %v13368_v48 = vld [vmem:[%s13885_s10 + $0x1484] sm:$0xf]  ;;  %v10762_v52 = vor.u32 %v13176_v45, %v10759_v46  ;;  %v356_v1 = vld [vmem:[#allocation2 + $0x38] sm:$0xff]  ;;  %v5665_v3 = vadd.f32 %v5664_v62, %v5652_v61  ;;  %v11917_v45 = vld [vmem:[%s13885_s10 + $0x1788] sm:$0xf] }
 0x27e   : > { %v11527_v49 = vld [vmem:[%s13885_s10 + $0x14e0] sm:$0xf0]  ;;  %v13477_v46 = vld [vmem:[%s13885_s10 + $0x17e4] sm:$0xf0] }
 0x27f   : > { %5903 = vmatpush.bf16.msrb.mxu2 %v11050_v9  ;;  %5878 = vmatpush.bf16.msrb.mxu0 %v9418_v21  ;;  %v12768_v53 = vld [vmem:[%s13885_s10 + $0x1c4] sm:$0xf]  ;;  %v11530_v57 = vor.u32 %v13368_v48, %v11527_v49  ;;  %v6252_v15 = vadd.f32 %v5665_v3, %v356_v1  ;;  %v10189_v1 = vld [vmem:[%s13885_s10 + $0xa08] sm:$0xf] }
 0x280   : > { %v9127_v54 = vld [vmem:[%s13885_s10 + $0x220] sm:$0xf0]  ;;  %v13045_v3 = vld [vmem:[%s13885_s10 + $0xa64] sm:$0xf0] }
 0x281   : > { %5916 = vmatpush.bf16.msrb.mxu3 %v11818_v13  ;;  %5891 = vmatpush.bf16.msrb.mxu1 %v10186_v22  ;;  %v12960_v55 = vld [vmem:[%s13885_s10 + $0x7c4] sm:$0xf]  ;;  %v9130_v2 = vor.u32 %v12768_v53, %v9127_v54  ;;  %6276 = vst [vmem:[#allocation2 + $0x38] sm:$0xff] %v6252_v15  ;;  %v10285_v53 = vld [vmem:[%s13885_s10 + $0xac8] sm:$0xf]  ;;  %v11918_v54 = vor.u32 %v13477_v46, %v11917_v45 }
 0x282   : > { %v9895_v58 = vld [vmem:[%s13885_s10 + $0x820] sm:$0xf0]  ;;  %v5653_v28 = vpop.f32.mrf.mxu2  ;;  %v13021_v15 = vld [vmem:[%s13885_s10 + $0x9a4] sm:$0xf0] }
 0x283   : > { %5904 = vmatpush.bf16.msrb.mxu2 %v10954_v23  ;;  %5879 = vmatpush.bf16.msrb.mxu0 %v9322_v35  ;;  %v13152_v59 = vld [vmem:[%s13885_s10 + $0xdc4] sm:$0xf]  ;;  %v9898_v5 = vor.u32 %v12960_v55, %v9895_v58  ;;  %v13069_v55 = vld [vmem:[%s13885_s10 + $0xb24] sm:$0xf0] }
 0x284   : > { %v10663_v60 = vld [vmem:[%s13885_s10 + $0xe20] sm:$0xf0]  ;;  %v5666_v35 = vpop.f32.mrf.mxu3  ;;  %v11821_v58 = vld [vmem:[%s13885_s10 + $0x16c8] sm:$0xf]  ;;  %v10286_v61 = vor.u32 %v13069_v55, %v10285_v53 }
 0x285   : > { %5917 = vmatpush.bf16.msrb.mxu3 %v11722_v27  ;;  %5892 = vmatpush.bf16.msrb.mxu1 %v10090_v37  ;;  %v13344_v63 = vld [vmem:[%s13885_s10 + $0x13c4] sm:$0xf]  ;;  %v10666_v6 = vor.u32 %v13152_v59, %v10663_v60  ;;  %v12901_v37 = vld [vmem:[%s13885_s10 + $0x5e4] sm:$0xf0] }
 0x286   : > { %v11431_v0 = vld [vmem:[%s13885_s10 + $0x1420] sm:$0xf0]  ;;  %v9614_v48 = vor.u32 %v12901_v37, %v9613_v36  ;;  %v13453_v59 = vld [vmem:[%s13885_s10 + $0x1724] sm:$0xf0] }
 0x287   : > { %5905 = vmatpush.bf16.msrb.mxu2 %v10858_v38  ;;  %5880 = vmatpush.bf16.msrb.mxu0 %v9226_v50  ;;  %v12744_v7 = vld [vmem:[%s13885_s10 + $0x104] sm:$0xf]  ;;  %v11434_v11 = vor.u32 %v13344_v63, %v11431_v0  ;;  %v10381_v38 = vld [vmem:[%s13885_s10 + $0xb88] sm:$0xf]  ;;  %v11150_v50 = vor.u32 %v13285_v42, %v11149_v41 }
 0x288   : > { %v9031_v8 = vld [vmem:[%s13885_s10 + $0x160] sm:$0xf0]  ;;  %v10382_v49 = vor.u32 %v13093_v40, %v10381_v38  ;;  %v9421_v63 = vld [vmem:[%s13885_s10 + $0x408] sm:$0xf] }
 0x289   : > { %5918 = vmatpush.bf16.msrb.mxu3 %v11626_v43  ;;  %5893 = vmatpush.bf16.msrb.mxu1 %v9994_v51  ;;  %v12936_v9 = vld [vmem:[%s13885_s10 + $0x704] sm:$0xf]  ;;  %v9034_v20 = vor.u32 %v12744_v7, %v9031_v8  ;;  %v9517_v51 = vld [vmem:[%s13885_s10 + $0x4c8] sm:$0xf] }
 0x28a   : > { %v9799_v12 = vld [vmem:[%s13885_s10 + $0x760] sm:$0xf0]  ;;  %v12853_v0 = vld [vmem:[%s13885_s10 + $0x464] sm:$0xf0] }
 0x28b   : > { %5906 = vmatpush.bf16.msrb.mxu2 %v10762_v52  ;;  %v13128_v13 = vld [vmem:[%s13885_s10 + $0xd04] sm:$0xf]  ;;  %5881 = vmatpush.bf16.msrb.mxu0 %v9130_v2  ;;  %v9802_v23 = vor.u32 %v12936_v9, %v9799_v12  ;;  %v12877_v52 = vld [vmem:[%s13885_s10 + $0x524] sm:$0xf0]  ;;  %v11822_v2 = vor.u32 %v13453_v59, %v11821_v58  ;;  %v9422_v8 = vor.u32 %v12853_v0, %v9421_v63 }
 0x28c   : > { %v10567_v14 = vld [vmem:[%s13885_s10 + $0xd60] sm:$0xf0]  ;;  %v9518_v60 = vor.u32 %v12877_v52, %v9517_v51  ;;  %v13429_v7 = vld [vmem:[%s13885_s10 + $0x1664] sm:$0xf0]  ;;  %v10190_v9 = vor.u32 %v13045_v3, %v10189_v1 }
 0x28d   : > { %5919 = vmatpush.bf16.msrb.mxu3 %v11530_v57  ;;  %v13320_v18 = vld [vmem:[%s13885_s10 + $0x1304] sm:$0xf]  ;;  %5894 = vmatpush.bf16.msrb.mxu1 %v9898_v5  ;;  %v10570_v24 = vor.u32 %v13128_v13, %v10567_v14  ;;  %v13261_v57 = vld [vmem:[%s13885_s10 + $0x1124] sm:$0xf0] }
 0x28e   : > { %v11335_v19 = vld [vmem:[%s13885_s10 + $0x1360] sm:$0xf0]  ;;  %v11054_v62 = vor.u32 %v13261_v57, %v11053_v56  ;;  %v13237_v5 = vld [vmem:[%s13885_s10 + $0x1064] sm:$0xf0] }
 0x28f   : > { %v12720_v21 = vld [vmem:[%s13885_s10 + $0x44] sm:$0xf]  ;;  %5907 = vmatpush.bf16.msrb.mxu2 %v10666_v6  ;;  %v11338_v29 = vor.u32 %v13320_v18, %v11335_v19  ;;  %5882 = vmatpush.bf16.msrb.mxu0 %v9034_v20  ;;  %v11725_v6 = vld [vmem:[%s13885_s10 + $0x1608] sm:$0xf]  ;;  %v10958_v10 = vor.u32 %v13237_v5, %v10957_v4 }
 0x290   : > { %v8935_v22 = vld [vmem:[%s13885_s10 + $0xa0] sm:$0xf0]  ;;  %v12829_v12 = vld [vmem:[%s13885_s10 + $0x3a4] sm:$0xf0]  ;;  %v11726_v14 = vor.u32 %v13429_v7, %v11725_v6 }
 0x291   : > { %v12912_v25 = vld [vmem:[%s13885_s10 + $0x644] sm:$0xf]  ;;  %5920 = vmatpush.bf16.msrb.mxu3 %v11434_v11  ;;  %v8938_v39 = vor.u32 %v12720_v21, %v8935_v22  ;;  %5895 = vmatpush.bf16.msrb.mxu1 %v9802_v23  ;;  %v9325_v11 = vld [vmem:[%s13885_s10 + $0x348] sm:$0xf]  ;;  %v5677_v23 = vpop.f32.mrf.mxu0 }
 0x292   : > { %v9703_v26 = vld [vmem:[%s13885_s10 + $0x6a0] sm:$0xf0]  ;;  %v10093_v13 = vld [vmem:[%s13885_s10 + $0x948] sm:$0xf]  ;;  %v9326_v22 = vor.u32 %v12829_v12, %v9325_v11 }
 0x293   : > { %v13104_v27 = vld [vmem:[%s13885_s10 + $0xc44] sm:$0xf]  ;;  %5908 = vmatpush.bf16.msrb.mxu2 %v10570_v24  ;;  %v9706_v43 = vor.u32 %v12912_v25, %v9703_v26  ;;  %5883 = vmatpush.bf16.msrb.mxu0 %v8938_v39  ;;  %v10861_v18 = vld [vmem:[%s13885_s10 + $0xf48] sm:$0xf]  ;;  %v10094_v24 = vor.u32 %v13021_v15, %v10093_v13 }
 0x294   : > { %v10471_v30 = vld [vmem:[%s13885_s10 + $0xca0] sm:$0xf0]  ;;  %v13213_v19 = vld [vmem:[%s13885_s10 + $0xfa4] sm:$0xf0] }
 0x295   : > { %v13296_v33 = vld [vmem:[%s13885_s10 + $0x1244] sm:$0xf]  ;;  %v10474_v44 = vor.u32 %v13104_v27, %v10471_v30  ;;  %5921 = vmatpush.bf16.msrb.mxu3 %v11338_v29  ;;  %5896 = vmatpush.bf16.msrb.mxu1 %v9706_v43  ;;  %v11629_v20 = vld [vmem:[%s13885_s10 + $0x1548] sm:$0xf]  ;;  %v10862_v25 = vor.u32 %v13213_v19, %v10861_v18  ;;  %v5690_v29 = vpop.f32.mrf.mxu1 }
 0x296   : > { %v11239_v34 = vld [vmem:[%s13885_s10 + $0x12a0] sm:$0xf0]  ;;  %5884 = vmatmul.bf16.vlgmr.msrb.gmra.mxu0 %v13997_v31  ;;  %v13405_v21 = vld [vmem:[%s13885_s10 + $0x15a4] sm:$0xf0]  ;;  %v5691_v36 = vadd.f32 %v5690_v29, %v5677_v23  ;;  %v12889_v23 = vld [vmem:[%s13885_s10 + $0x58c] sm:$0xf] }
 0x297   : > { %v11242_v47 = vor.u32 %v13296_v33, %v11239_v34  ;;  %5909 = vmatpush.bf16.msrb.mxu2 %v10474_v44  ;;  %5928 = vmatpush.bf16.msra.mxu0 %v9614_v48  ;;  %v9229_v26 = vld [vmem:[%s13885_s10 + $0x288] sm:$0xf]  ;;  %v11630_v30 = vor.u32 %v13405_v21, %v11629_v20  ;;  %v11151_v29 = vld [vmem:[%s13885_s10 + $0x11e8] sm:$0xf0] }
 0x298   : > { %5897 = vmatmul.bf16.vlgmr.msrb.gmra.mxu1 %v13999_v32  ;;  %v12805_v27 = vld [vmem:[%s13885_s10 + $0x2e4] sm:$0xf0] }
 0x299   : > { %5922 = vmatpush.bf16.msrb.mxu3 %v11242_v47  ;;  %5941 = vmatpush.bf16.msra.mxu1 %v10382_v49  ;;  %v9997_v28 = vld [vmem:[%s13885_s10 + $0x888] sm:$0xf]  ;;  %v9230_v39 = vor.u32 %v12805_v27, %v9229_v26  ;;  %v5679_v57 = vpop.f32.mrf.mxu0  ;;  %v10383_v27 = vld [vmem:[%s13885_s10 + $0xbe8] sm:$0xf0] }
 0x29a   : > { %5910 = vmatmul.bf16.vlgmr.msrb.gmra.mxu2 %v13985_v16  ;;  %v12997_v33 = vld [vmem:[%s13885_s10 + $0x8e4] sm:$0xf0]  ;;  %v5703_v45 = vpop.f32.mrf.mxu2  ;;  %v13225_v57 = vld [vmem:[%s13885_s10 + $0x100c] sm:$0xf] }
 0x29b   : > { %5954 = vmatpush.bf16.msra.mxu2 %v11150_v50  ;;  %5929 = vmatpush.bf16.msra.mxu0 %v9518_v60  ;;  %v10765_v34 = vld [vmem:[%s13885_s10 + $0xe88] sm:$0xf]  ;;  %v9998_v40 = vor.u32 %v12997_v33, %v9997_v28  ;;  %v5704_v50 = vadd.f32 %v5703_v45, %v5691_v36  ;;  %v13273_v28 = vld [vmem:[%s13885_s10 + $0x118c] sm:$0xf] }
 0x29c   : > { %5923 = vmatmul.bf16.vlgmr.msrb.gmra.mxu3 %v13987_v17  ;;  %v13189_v35 = vld [vmem:[%s13885_s10 + $0xee4] sm:$0xf0]  ;;  %v5716_v51 = vpop.f32.mrf.mxu3  ;;  %v13249_v45 = vld [vmem:[%s13885_s10 + $0x10cc] sm:$0xf] }
 0x29d   : > { %5967 = vmatpush.bf16.msra.mxu3 %v11918_v54  ;;  %5942 = vmatpush.bf16.msra.mxu1 %v10286_v61  ;;  %v11533_v37 = vld [vmem:[%s13885_s10 + $0x1488] sm:$0xf]  ;;  %v10766_v41 = vor.u32 %v13189_v35, %v10765_v34  ;;  %v357_v54 = vld [vmem:[#allocation2 + $0x50] sm:$0xff]  ;;  %v5717_v56 = vadd.f32 %v5716_v51, %v5704_v50  ;;  %v5692_v63 = vpop.f32.mrf.mxu1  ;;  %v13465_v34 = vld [vmem:[%s13885_s10 + $0x178c] sm:$0xf] }
 0x29e   : > { %v13381_v38 = vld [vmem:[%s13885_s10 + $0x14e4] sm:$0xf0]  ;;  %v11919_v35 = vld [vmem:[%s13885_s10 + $0x17e8] sm:$0xf0] }
 0x29f   : > { %5955 = vmatpush.bf16.msra.mxu2 %v11054_v62  ;;  %5930 = vmatpush.bf16.msra.mxu0 %v9422_v8  ;;  %v9133_v42 = vld [vmem:[%s13885_s10 + $0x1c8] sm:$0xf]  ;;  %v11534_v46 = vor.u32 %v13381_v38, %v11533_v37  ;;  %v6253_v4 = vadd.f32 %v5717_v56, %v357_v54  ;;  %v13033_v54 = vld [vmem:[%s13885_s10 + $0xa0c] sm:$0xf] }
 0x2a0   : > { %v12781_v43 = vld [vmem:[%s13885_s10 + $0x224] sm:$0xf0]  ;;  %v10191_v56 = vld [vmem:[%s13885_s10 + $0xa68] sm:$0xf0] }
 0x2a1   : > { %5968 = vmatpush.bf16.msra.mxu3 %v11822_v2  ;;  %5943 = vmatpush.bf16.msra.mxu1 %v10190_v9  ;;  %v9901_v44 = vld [vmem:[%s13885_s10 + $0x7c8] sm:$0xf]  ;;  %v9134_v55 = vor.u32 %v12781_v43, %v9133_v42  ;;  %6277 = vst [vmem:[#allocation2 + $0x50] sm:$0xff] %v6253_v4  ;;  %v13057_v42 = vld [vmem:[%s13885_s10 + $0xacc] sm:$0xf]  ;;  %v11922_v43 = vor.u32 %v13465_v34, %v11919_v35 }
 0x2a2   : > { %v12973_v47 = vld [vmem:[%s13885_s10 + $0x824] sm:$0xf0]  ;;  %v5705_v15 = vpop.f32.mrf.mxu2  ;;  %v10095_v4 = vld [vmem:[%s13885_s10 + $0x9a8] sm:$0xf0] }
 0x2a3   : > { %5956 = vmatpush.bf16.msra.mxu2 %v10958_v10  ;;  %5931 = vmatpush.bf16.msra.mxu0 %v9326_v22  ;;  %v10669_v48 = vld [vmem:[%s13885_s10 + $0xdc8] sm:$0xf]  ;;  %v9902_v58 = vor.u32 %v12973_v47, %v9901_v44  ;;  %v10287_v44 = vld [vmem:[%s13885_s10 + $0xb28] sm:$0xf0] }
 0x2a4   : > { %v13165_v49 = vld [vmem:[%s13885_s10 + $0xe24] sm:$0xf0]  ;;  %v5718_v22 = vpop.f32.mrf.mxu3  ;;  %v13441_v47 = vld [vmem:[%s13885_s10 + $0x16cc] sm:$0xf]  ;;  %v10290_v50 = vor.u32 %v13057_v42, %v10287_v44 }
 0x2a5   : > { %5969 = vmatpush.bf16.msra.mxu3 %v11726_v14  ;;  %5944 = vmatpush.bf16.msra.mxu1 %v10094_v24  ;;  %v11437_v52 = vld [vmem:[%s13885_s10 + $0x13c8] sm:$0xf]  ;;  %v10670_v59 = vor.u32 %v13165_v49, %v10669_v48  ;;  %v9615_v24 = vld [vmem:[%s13885_s10 + $0x5e8] sm:$0xf0] }
 0x2a6   : > { %v13357_v53 = vld [vmem:[%s13885_s10 + $0x1424] sm:$0xf0]  ;;  %v9618_v37 = vor.u32 %v12889_v23, %v9615_v24  ;;  %v11823_v48 = vld [vmem:[%s13885_s10 + $0x1728] sm:$0xf0] }
 0x2a7   : > { %5957 = vmatpush.bf16.msra.mxu2 %v10862_v25  ;;  %5932 = vmatpush.bf16.msra.mxu0 %v9230_v39  ;;  %v9037_v60 = vld [vmem:[%s13885_s10 + $0x108] sm:$0xf]  ;;  %v11438_v0 = vor.u32 %v13357_v53, %v11437_v52  ;;  %v13081_v25 = vld [vmem:[%s13885_s10 + $0xb8c] sm:$0xf]  ;;  %v11154_v39 = vor.u32 %v13273_v28, %v11151_v29 }
 0x2a8   : > { %v12757_v61 = vld [vmem:[%s13885_s10 + $0x164] sm:$0xf0]  ;;  %v10386_v38 = vor.u32 %v13081_v25, %v10383_v27  ;;  %v12841_v52 = vld [vmem:[%s13885_s10 + $0x40c] sm:$0xf] }
 0x2a9   : > { %5970 = vmatpush.bf16.msra.mxu3 %v11630_v30  ;;  %5945 = vmatpush.bf16.msra.mxu1 %v9998_v40  ;;  %v9805_v62 = vld [vmem:[%s13885_s10 + $0x708] sm:$0xf]  ;;  %v9038_v7 = vor.u32 %v12757_v61, %v9037_v60  ;;  %v12865_v40 = vld [vmem:[%s13885_s10 + $0x4cc] sm:$0xf] }
 0x2aa   : > { %v12949_v1 = vld [vmem:[%s13885_s10 + $0x764] sm:$0xf0]  ;;  %v9423_v53 = vld [vmem:[%s13885_s10 + $0x468] sm:$0xf0] }
 0x2ab   : > { %5958 = vmatpush.bf16.msra.mxu2 %v10766_v41  ;;  %v10573_v2 = vld [vmem:[%s13885_s10 + $0xd08] sm:$0xf]  ;;  %5933 = vmatpush.bf16.msra.mxu0 %v9134_v55  ;;  %v9806_v10 = vor.u32 %v12949_v1, %v9805_v62  ;;  %v9519_v41 = vld [vmem:[%s13885_s10 + $0x528] sm:$0xf0]  ;;  %v11826_v55 = vor.u32 %v13441_v47, %v11823_v48  ;;  %v9426_v61 = vor.u32 %v12841_v52, %v9423_v53 }
 0x2ac   : > { %v13141_v3 = vld [vmem:[%s13885_s10 + $0xd64] sm:$0xf0]  ;;  %v9522_v49 = vor.u32 %v12865_v40, %v9519_v41  ;;  %v11727_v60 = vld [vmem:[%s13885_s10 + $0x1668] sm:$0xf0]  ;;  %v10194_v62 = vor.u32 %v13033_v54, %v10191_v56 }
 0x2ad   : > { %5971 = vmatpush.bf16.msra.mxu3 %v11534_v46  ;;  %v11341_v5 = vld [vmem:[%s13885_s10 + $0x1308] sm:$0xf]  ;;  %5946 = vmatpush.bf16.msra.mxu1 %v9902_v58  ;;  %v10574_v11 = vor.u32 %v13141_v3, %v10573_v2  ;;  %v11055_v46 = vld [vmem:[%s13885_s10 + $0x1128] sm:$0xf0] }
 0x2ae   : > { %v13333_v6 = vld [vmem:[%s13885_s10 + $0x1364] sm:$0xf0]  ;;  %v11058_v51 = vor.u32 %v13249_v45, %v11055_v46  ;;  %v10959_v58 = vld [vmem:[%s13885_s10 + $0x1068] sm:$0xf0] }
 0x2af   : > { %v8941_v8 = vld [vmem:[%s13885_s10 + $0x48] sm:$0xf]  ;;  %5959 = vmatpush.bf16.msra.mxu2 %v10670_v59  ;;  %v11342_v18 = vor.u32 %v13333_v6, %v11341_v5  ;;  %5934 = vmatpush.bf16.msra.mxu0 %v9038_v7  ;;  %v13417_v59 = vld [vmem:[%s13885_s10 + $0x160c] sm:$0xf]  ;;  %v10962_v63 = vor.u32 %v13225_v57, %v10959_v58 }
 0x2b0   : > { %v12733_v9 = vld [vmem:[%s13885_s10 + $0xa4] sm:$0xf0]  ;;  %v9327_v1 = vld [vmem:[%s13885_s10 + $0x3a8] sm:$0xf0]  ;;  %v11730_v3 = vor.u32 %v13417_v59, %v11727_v60 }
 0x2b1   : > { %v9709_v12 = vld [vmem:[%s13885_s10 + $0x648] sm:$0xf]  ;;  %5972 = vmatpush.bf16.msra.mxu3 %v11438_v0  ;;  %v8942_v26 = vor.u32 %v12733_v9, %v8941_v8  ;;  %5947 = vmatpush.bf16.msra.mxu1 %v9806_v10  ;;  %v12817_v0 = vld [vmem:[%s13885_s10 + $0x34c] sm:$0xf]  ;;  %v5729_v10 = vpop.f32.mrf.mxu0 }
 0x2b2   : > { %v12925_v13 = vld [vmem:[%s13885_s10 + $0x6a4] sm:$0xf0]  ;;  %v13009_v2 = vld [vmem:[%s13885_s10 + $0x94c] sm:$0xf]  ;;  %v9330_v9 = vor.u32 %v12817_v0, %v9327_v1 }
 0x2b3   : > { %v10477_v14 = vld [vmem:[%s13885_s10 + $0xc48] sm:$0xf]  ;;  %5960 = vmatpush.bf16.msra.mxu2 %v10574_v11  ;;  %v9710_v30 = vor.u32 %v12925_v13, %v9709_v12  ;;  %5935 = vmatpush.bf16.msra.mxu0 %v8942_v26  ;;  %v13201_v5 = vld [vmem:[%s13885_s10 + $0xf4c] sm:$0xf]  ;;  %v10098_v11 = vor.u32 %v13009_v2, %v10095_v4 }
 0x2b4   : > { %v13117_v19 = vld [vmem:[%s13885_s10 + $0xca4] sm:$0xf0]  ;;  %v10863_v6 = vld [vmem:[%s13885_s10 + $0xfa8] sm:$0xf0] }
 0x2b5   : > { %v11245_v20 = vld [vmem:[%s13885_s10 + $0x1248] sm:$0xf]  ;;  %v10478_v33 = vor.u32 %v13117_v19, %v10477_v14  ;;  %5973 = vmatpush.bf16.msra.mxu3 %v11342_v18  ;;  %5948 = vmatpush.bf16.msra.mxu1 %v9710_v30  ;;  %v13393_v7 = vld [vmem:[%s13885_s10 + $0x154c] sm:$0xf]  ;;  %v10866_v12 = vor.u32 %v13201_v5, %v10863_v6  ;;  %v5742_v18 = vpop.f32.mrf.mxu1 }
 0x2b6   : > { %v13309_v21 = vld [vmem:[%s13885_s10 + $0x12a4] sm:$0xf0]  ;;  %5936 = vmatmul.bf16.vlgmr.msra.gmra.mxu0 %v13997_v31  ;;  %v11631_v8 = vld [vmem:[%s13885_s10 + $0x15a8] sm:$0xf0]  ;;  %v5743_v23 = vadd.f32 %v5742_v18, %v5729_v10  ;;  %v9621_v10 = vld [vmem:[%s13885_s10 + $0x590] sm:$0xf] }
 0x2b7   : > { %v11246_v36 = vor.u32 %v13309_v21, %v11245_v20  ;;  %5961 = vmatpush.bf16.msra.mxu2 %v10478_v33  ;;  %5980 = vmatpush.bf16.msrb.mxu0 %v9618_v37  ;;  %v12793_v13 = vld [vmem:[%s13885_s10 + $0x28c] sm:$0xf]  ;;  %v11634_v19 = vor.u32 %v13393_v7, %v11631_v8  ;;  %v13286_v18 = vld [vmem:[%s13885_s10 + $0x11ec] sm:$0xf0] }
 0x2b8   : > { %5949 = vmatmul.bf16.vlgmr.msra.gmra.mxu1 %v13999_v32  ;;  %v9231_v14 = vld [vmem:[%s13885_s10 + $0x2e8] sm:$0xf0] }
 0x2b9   : > { %5974 = vmatpush.bf16.msra.mxu3 %v11246_v36  ;;  %5993 = vmatpush.bf16.msrb.mxu1 %v10386_v38  ;;  %v12985_v15 = vld [vmem:[%s13885_s10 + $0x88c] sm:$0xf]  ;;  %v9234_v26 = vor.u32 %v12793_v13, %v9231_v14  ;;  %v5731_v46 = vpop.f32.mrf.mxu0  ;;  %v13094_v14 = vld [vmem:[%s13885_s10 + $0xbec] sm:$0xf0] }
 0x2ba   : > { %5962 = vmatmul.bf16.vlgmr.msra.gmra.mxu2 %v13985_v16  ;;  %v9999_v20 = vld [vmem:[%s13885_s10 + $0x8e8] sm:$0xf0]  ;;  %v5755_v34 = vpop.f32.mrf.mxu2  ;;  %v10965_v46 = vld [vmem:[%s13885_s10 + $0x1010] sm:$0xf] }
 0x2bb   : > { %6006 = vmatpush.bf16.msrb.mxu2 %v11154_v39  ;;  %5981 = vmatpush.bf16.msrb.mxu0 %v9522_v49  ;;  %v13177_v21 = vld [vmem:[%s13885_s10 + $0xe8c] sm:$0xf]  ;;  %v10002_v27 = vor.u32 %v12985_v15, %v9999_v20  ;;  %v5756_v39 = vadd.f32 %v5755_v34, %v5743_v23  ;;  %v11157_v15 = vld [vmem:[%s13885_s10 + $0x1190] sm:$0xf] }
 0x2bc   : > { %5975 = vmatmul.bf16.vlgmr.msra.gmra.mxu3 %v13987_v17  ;;  %v10767_v22 = vld [vmem:[%s13885_s10 + $0xee8] sm:$0xf0]  ;;  %v5768_v40 = vpop.f32.mrf.mxu3  ;;  %v11061_v34 = vld [vmem:[%s13885_s10 + $0x10d0] sm:$0xf] }
 0x2bd   : > { %6019 = vmatpush.bf16.msrb.mxu3 %v11922_v43  ;;  %5994 = vmatpush.bf16.msrb.mxu1 %v10290_v50  ;;  %v13369_v24 = vld [vmem:[%s13885_s10 + $0x148c] sm:$0xf]  ;;  %v10770_v28 = vor.u32 %v13177_v21, %v10767_v22  ;;  %v358_v43 = vld [vmem:[#allocation2 + $0x70] sm:$0xff]  ;;  %v5769_v45 = vadd.f32 %v5768_v40, %v5756_v39  ;;  %v5744_v52 = vpop.f32.mrf.mxu1 }
 0x2be   : > { %v11535_v25 = vld [vmem:[%s13885_s10 + $0x14e8] sm:$0xf0]  ;;  %v11925_v21 = vld [vmem:[%s13885_s10 + $0x1790] sm:$0xf] }
 0x2bf   : > { %6007 = vmatpush.bf16.msrb.mxu2 %v11058_v51  ;;  %5982 = vmatpush.bf16.msrb.mxu0 %v9426_v61  ;;  %v12769_v29 = vld [vmem:[%s13885_s10 + $0x1cc] sm:$0xf]  ;;  %v11538_v35 = vor.u32 %v13369_v24, %v11535_v25  ;;  %v6254_v57 = vadd.f32 %v5769_v45, %v358_v43  ;;  %v13478_v22 = vld [vmem:[%s13885_s10 + $0x17ec] sm:$0xf0] }
 0x2c0   : > { %v9135_v30 = vld [vmem:[%s13885_s10 + $0x228] sm:$0xf0]  ;;  %v10197_v43 = vld [vmem:[%s13885_s10 + $0xa10] sm:$0xf] }
 0x2c1   : > { %6020 = vmatpush.bf16.msrb.mxu3 %v11826_v55  ;;  %5995 = vmatpush.bf16.msrb.mxu1 %v10194_v62  ;;  %v12961_v33 = vld [vmem:[%s13885_s10 + $0x7cc] sm:$0xf]  ;;  %v9138_v44 = vor.u32 %v12769_v29, %v9135_v30  ;;  %6278 = vst [vmem:[#allocation2 + $0x70] sm:$0xff] %v6254_v57  ;;  %v10293_v29 = vld [vmem:[%s13885_s10 + $0xad0] sm:$0xf]  ;;  %v11926_v30 = vor.u32 %v13478_v22, %v11925_v21 }
 0x2c2   : > { %v9903_v36 = vld [vmem:[%s13885_s10 + $0x828] sm:$0xf0]  ;;  %v5757_v4 = vpop.f32.mrf.mxu2  ;;  %v13046_v45 = vld [vmem:[%s13885_s10 + $0xa6c] sm:$0xf0] }
 0x2c3   : > { %6008 = vmatpush.bf16.msrb.mxu2 %v10962_v63  ;;  %5983 = vmatpush.bf16.msrb.mxu0 %v9330_v9  ;;  %v13153_v37 = vld [vmem:[%s13885_s10 + $0xdcc] sm:$0xf]  ;;  %v9906_v47 = vor.u32 %v12961_v33, %v9903_v36  ;;  %v13070_v33 = vld [vmem:[%s13885_s10 + $0xb2c] sm:$0xf0] }
 0x2c4   : > { %v10671_v38 = vld [vmem:[%s13885_s10 + $0xe28] sm:$0xf0]  ;;  %v5770_v9 = vpop.f32.mrf.mxu3  ;;  %v11829_v36 = vld [vmem:[%s13885_s10 + $0x16d0] sm:$0xf]  ;;  %v10294_v39 = vor.u32 %v13070_v33, %v10293_v29 }
 0x2c5   : > { %6021 = vmatpush.bf16.msrb.mxu3 %v11730_v3  ;;  %5996 = vmatpush.bf16.msrb.mxu1 %v10098_v11  ;;  %v13345_v41 = vld [vmem:[%s13885_s10 + $0x13cc] sm:$0xf]  ;;  %v10674_v48 = vor.u32 %v13153_v37, %v10671_v38  ;;  %v12902_v11 = vld [vmem:[%s13885_s10 + $0x5ec] sm:$0xf0] }
 0x2c6   : > { %v11439_v42 = vld [vmem:[%s13885_s10 + $0x1428] sm:$0xf0]  ;;  %v9622_v24 = vor.u32 %v12902_v11, %v9621_v10  ;;  %v13454_v37 = vld [vmem:[%s13885_s10 + $0x172c] sm:$0xf0] }
 0x2c7   : > { %6009 = vmatpush.bf16.msrb.mxu2 %v10866_v12  ;;  %5984 = vmatpush.bf16.msrb.mxu0 %v9234_v26  ;;  %v12745_v49 = vld [vmem:[%s13885_s10 + $0x10c] sm:$0xf]  ;;  %v11442_v53 = vor.u32 %v13345_v41, %v11439_v42  ;;  %v10389_v12 = vld [vmem:[%s13885_s10 + $0xb90] sm:$0xf]  ;;  %v11158_v26 = vor.u32 %v13286_v18, %v11157_v15 }
 0x2c8   : > { %v9039_v50 = vld [vmem:[%s13885_s10 + $0x168] sm:$0xf0]  ;;  %v10390_v25 = vor.u32 %v13094_v14, %v10389_v12  ;;  %v9429_v41 = vld [vmem:[%s13885_s10 + $0x410] sm:$0xf] }
 0x2c9   : > { %6022 = vmatpush.bf16.msrb.mxu3 %v11634_v19  ;;  %5997 = vmatpush.bf16.msrb.mxu1 %v10002_v27  ;;  %v12937_v51 = vld [vmem:[%s13885_s10 + $0x70c] sm:$0xf]  ;;  %v9042_v60 = vor.u32 %v12745_v49, %v9039_v50  ;;  %v9525_v27 = vld [vmem:[%s13885_s10 + $0x4d0] sm:$0xf] }
 0x2ca   : > { %v9807_v54 = vld [vmem:[%s13885_s10 + $0x768] sm:$0xf0]  ;;  %v12854_v42 = vld [vmem:[%s13885_s10 + $0x46c] sm:$0xf0] }
 0x2cb   : > { %6010 = vmatpush.bf16.msrb.mxu2 %v10770_v28  ;;  %v13129_v55 = vld [vmem:[%s13885_s10 + $0xd0c] sm:$0xf]  ;;  %5985 = vmatpush.bf16.msrb.mxu0 %v9138_v44  ;;  %v9810_v63 = vor.u32 %v12937_v51, %v9807_v54  ;;  %v12878_v28 = vld [vmem:[%s13885_s10 + $0x52c] sm:$0xf0]  ;;  %v11830_v44 = vor.u32 %v13454_v37, %v11829_v36  ;;  %v9430_v50 = vor.u32 %v12854_v42, %v9429_v41 }
 0x2cc   : > { %v10575_v56 = vld [vmem:[%s13885_s10 + $0xd68] sm:$0xf0]  ;;  %v9526_v38 = vor.u32 %v12878_v28, %v9525_v27  ;;  %v13430_v49 = vld [vmem:[%s13885_s10 + $0x166c] sm:$0xf0]  ;;  %v10198_v51 = vor.u32 %v13046_v45, %v10197_v43 }
 0x2cd   : > { %6023 = vmatpush.bf16.msrb.mxu3 %v11538_v35  ;;  %v13321_v58 = vld [vmem:[%s13885_s10 + $0x130c] sm:$0xf]  ;;  %5998 = vmatpush.bf16.msrb.mxu1 %v9906_v47  ;;  %v10578_v0 = vor.u32 %v13129_v55, %v10575_v56  ;;  %v13262_v35 = vld [vmem:[%s13885_s10 + $0x112c] sm:$0xf0] }
 0x2ce   : > { %v11343_v59 = vld [vmem:[%s13885_s10 + $0x1368] sm:$0xf0]  ;;  %v11062_v40 = vor.u32 %v13262_v35, %v11061_v34  ;;  %v13238_v47 = vld [vmem:[%s13885_s10 + $0x106c] sm:$0xf0] }
 0x2cf   : > { %v12721_v61 = vld [vmem:[%s13885_s10 + $0x4c] sm:$0xf]  ;;  %6011 = vmatpush.bf16.msrb.mxu2 %v10674_v48  ;;  %v11346_v5 = vor.u32 %v13321_v58, %v11343_v59  ;;  %5986 = vmatpush.bf16.msrb.mxu0 %v9042_v60  ;;  %v11733_v48 = vld [vmem:[%s13885_s10 + $0x1610] sm:$0xf]  ;;  %v10966_v52 = vor.u32 %v13238_v47, %v10965_v46 }
 0x2d0   : > { %v8943_v62 = vld [vmem:[%s13885_s10 + $0xa8] sm:$0xf0]  ;;  %v12830_v54 = vld [vmem:[%s13885_s10 + $0x3ac] sm:$0xf0]  ;;  %v11734_v56 = vor.u32 %v13430_v49, %v11733_v48 }
 0x2d1   : > { %v12913_v1 = vld [vmem:[%s13885_s10 + $0x64c] sm:$0xf]  ;;  %6024 = vmatpush.bf16.msrb.mxu3 %v11442_v53  ;;  %v8946_v13 = vor.u32 %v12721_v61, %v8943_v62  ;;  %5999 = vmatpush.bf16.msrb.mxu1 %v9810_v63  ;;  %v9333_v53 = vld [vmem:[%s13885_s10 + $0x350] sm:$0xf]  ;;  %v5781_v63 = vpop.f32.mrf.mxu0 }
 0x2d2   : > { %v9711_v2 = vld [vmem:[%s13885_s10 + $0x6a8] sm:$0xf0]  ;;  %v10101_v55 = vld [vmem:[%s13885_s10 + $0x950] sm:$0xf]  ;;  %v9334_v62 = vor.u32 %v12830_v54, %v9333_v53 }
 0x2d3   : > { %v13105_v3 = vld [vmem:[%s13885_s10 + $0xc4c] sm:$0xf]  ;;  %6012 = vmatpush.bf16.msrb.mxu2 %v10578_v0  ;;  %v9714_v19 = vor.u32 %v12913_v1, %v9711_v2  ;;  %5987 = vmatpush.bf16.msrb.mxu0 %v8946_v13  ;;  %v13022_v57 = vld [vmem:[%s13885_s10 + $0x9ac] sm:$0xf0] }
 0x2d4   : > { %v10479_v6 = vld [vmem:[%s13885_s10 + $0xca8] sm:$0xf0]  ;;  %v10869_v58 = vld [vmem:[%s13885_s10 + $0xf50] sm:$0xf]  ;;  %v10102_v0 = vor.u32 %v13022_v57, %v10101_v55 }
 0x2d5   : > { %v13297_v7 = vld [vmem:[%s13885_s10 + $0x124c] sm:$0xf]  ;;  %v10482_v20 = vor.u32 %v13105_v3, %v10479_v6  ;;  %6025 = vmatpush.bf16.msrb.mxu3 %v11346_v5  ;;  %6000 = vmatpush.bf16.msrb.mxu1 %v9714_v19  ;;  %v13214_v59 = vld [vmem:[%s13885_s10 + $0xfac] sm:$0xf0]  ;;  %v5794_v5 = vpop.f32.mrf.mxu1 }
 0x2d6   : > { %v11247_v8 = vld [vmem:[%s13885_s10 + $0x12a8] sm:$0xf0]  ;;  %5988 = vmatmul.bf16.vlgmr.msrb.gmra.mxu0 %v13997_v31  ;;  %v11637_v60 = vld [vmem:[%s13885_s10 + $0x1550] sm:$0xf]  ;;  %v10870_v1 = vor.u32 %v13214_v59, %v10869_v58  ;;  %v5795_v10 = vadd.f32 %v5794_v5, %v5781_v63  ;;  %v12890_v63 = vld [vmem:[%s13885_s10 + $0x594] sm:$0xf] }
 0x2d7   : > { %v11250_v23 = vor.u32 %v13297_v7, %v11247_v8  ;;  %6013 = vmatpush.bf16.msrb.mxu2 %v10482_v20  ;;  %6032 = vmatpush.bf16.msra.mxu0 %v9622_v24  ;;  %v13406_v61 = vld [vmem:[%s13885_s10 + $0x15ac] sm:$0xf0]  ;;  %v11159_v5 = vld [vmem:[%s13885_s10 + $0x11f0] sm:$0xf0] }
 0x2d8   : > { %6001 = vmatmul.bf16.vlgmr.msrb.gmra.mxu1 %v13999_v32  ;;  %v9237_v2 = vld [vmem:[%s13885_s10 + $0x290] sm:$0xf]  ;;  %v11638_v6 = vor.u32 %v13406_v61, %v11637_v60 }
 0x2d9   : > { %6026 = vmatpush.bf16.msrb.mxu3 %v11250_v23  ;;  %6045 = vmatpush.bf16.msra.mxu1 %v10390_v25  ;;  %v12806_v3 = vld [vmem:[%s13885_s10 + $0x2ec] sm:$0xf0]  ;;  %v5783_v35 = vpop.f32.mrf.mxu0 }
 0x2da   : > { %6014 = vmatmul.bf16.vlgmr.msrb.gmra.mxu2 %v13985_v16  ;;  %v10005_v4 = vld [vmem:[%s13885_s10 + $0x890] sm:$0xf]  ;;  %v9238_v13 = vor.u32 %v12806_v3, %v9237_v2  ;;  %v10391_v3 = vld [vmem:[%s13885_s10 + $0xbf0] sm:$0xf0] }
 0x2db   : > { %6058 = vmatpush.bf16.msra.mxu2 %v11158_v26  ;;  %6033 = vmatpush.bf16.msra.mxu0 %v9526_v38  ;;  %v12998_v7 = vld [vmem:[%s13885_s10 + $0x8ec] sm:$0xf0]  ;;  %v5807_v21 = vpop.f32.mrf.mxu2  ;;  %v13226_v35 = vld [vmem:[%s13885_s10 + $0x1014] sm:$0xf] }
 0x2dc   : > { %6027 = vmatmul.bf16.vlgmr.msrb.gmra.mxu3 %v13987_v17  ;;  %v10773_v8 = vld [vmem:[%s13885_s10 + $0xe90] sm:$0xf]  ;;  %v10006_v14 = vor.u32 %v12998_v7, %v10005_v4  ;;  %v5808_v26 = vadd.f32 %v5807_v21, %v5795_v10  ;;  %v13274_v4 = vld [vmem:[%s13885_s10 + $0x1194] sm:$0xf] }
 0x2dd   : > { %6071 = vmatpush.bf16.msra.mxu3 %v11926_v30  ;;  %6046 = vmatpush.bf16.msra.mxu1 %v10294_v39  ;;  %v13190_v9 = vld [vmem:[%s13885_s10 + $0xeec] sm:$0xf0]  ;;  %v5820_v27 = vpop.f32.mrf.mxu3  ;;  %v359_v30 = vld [vmem:[#allocation2 + $0xa0] sm:$0xff]  ;;  %v5796_v41 = vpop.f32.mrf.mxu1  ;;  %v13250_v21 = vld [vmem:[%s13885_s10 + $0x10d4] sm:$0xf] }
 0x2de   : > { %v11541_v11 = vld [vmem:[%s13885_s10 + $0x1490] sm:$0xf]  ;;  %v10774_v15 = vor.u32 %v13190_v9, %v10773_v8  ;;  %v5821_v34 = vadd.f32 %v5820_v27, %v5808_v26  ;;  %v13466_v8 = vld [vmem:[%s13885_s10 + $0x1794] sm:$0xf] }
 0x2df   : > { %6059 = vmatpush.bf16.msra.mxu2 %v11062_v40  ;;  %6034 = vmatpush.bf16.msra.mxu0 %v9430_v50  ;;  %v13382_v12 = vld [vmem:[%s13885_s10 + $0x14ec] sm:$0xf0]  ;;  %v11927_v9 = vld [vmem:[%s13885_s10 + $0x17f0] sm:$0xf0] }
 0x2e0   : > { %v9141_v18 = vld [vmem:[%s13885_s10 + $0x1d0] sm:$0xf]  ;;  %v11542_v22 = vor.u32 %v13382_v12, %v11541_v11  ;;  %v6255_v46 = vadd.f32 %v5821_v34, %v359_v30  ;;  %v13034_v30 = vld [vmem:[%s13885_s10 + $0xa14] sm:$0xf] }
 0x2e1   : > { %6072 = vmatpush.bf16.msra.mxu3 %v11830_v44  ;;  %6047 = vmatpush.bf16.msra.mxu1 %v10198_v51  ;;  %v12782_v19 = vld [vmem:[%s13885_s10 + $0x22c] sm:$0xf0]  ;;  %v10199_v34 = vld [vmem:[%s13885_s10 + $0xa70] sm:$0xf0] }
 0x2e2   : > { %v9909_v20 = vld [vmem:[%s13885_s10 + $0x7d0] sm:$0xf]  ;;  %v9142_v33 = vor.u32 %v12782_v19, %v9141_v18  ;;  %6279 = vst [vmem:[#allocation2 + $0xa0] sm:$0xff] %v6255_v46  ;;  %v13058_v18 = vld [vmem:[%s13885_s10 + $0xad4] sm:$0xf]  ;;  %v11930_v19 = vor.u32 %v13466_v8, %v11927_v9 }
 0x2e3   : > { %6060 = vmatpush.bf16.msra.mxu2 %v10966_v52  ;;  %6035 = vmatpush.bf16.msra.mxu0 %v9334_v62  ;;  %v12974_v23 = vld [vmem:[%s13885_s10 + $0x82c] sm:$0xf0]  ;;  %v5809_v57 = vpop.f32.mrf.mxu2  ;;  %v10103_v46 = vld [vmem:[%s13885_s10 + $0x9b0] sm:$0xf0] }
 0x2e4   : > { %v10677_v24 = vld [vmem:[%s13885_s10 + $0xdd0] sm:$0xf]  ;;  %v9910_v36 = vor.u32 %v12974_v23, %v9909_v20  ;;  %v10295_v20 = vld [vmem:[%s13885_s10 + $0xb30] sm:$0xf0] }
 0x2e5   : > { %6073 = vmatpush.bf16.msra.mxu3 %v11734_v56  ;;  %6048 = vmatpush.bf16.msra.mxu1 %v10102_v0  ;;  %v13166_v25 = vld [vmem:[%s13885_s10 + $0xe2c] sm:$0xf0]  ;;  %v5822_v62 = vpop.f32.mrf.mxu3  ;;  %v9623_v0 = vld [vmem:[%s13885_s10 + $0x5f0] sm:$0xf0]  ;;  %v10298_v26 = vor.u32 %v13058_v18, %v10295_v20 }
 0x2e6   : > { %v11445_v28 = vld [vmem:[%s13885_s10 + $0x13d0] sm:$0xf]  ;;  %v10678_v37 = vor.u32 %v13166_v25, %v10677_v24  ;;  %v9626_v11 = vor.u32 %v12890_v63, %v9623_v0  ;;  %v13442_v23 = vld [vmem:[%s13885_s10 + $0x16d4] sm:$0xf] }
 0x2e7   : > { %6061 = vmatpush.bf16.msra.mxu2 %v10870_v1  ;;  %v13358_v29 = vld [vmem:[%s13885_s10 + $0x142c] sm:$0xf0]  ;;  %6036 = vmatpush.bf16.msra.mxu0 %v9238_v13  ;;  %v13082_v1 = vld [vmem:[%s13885_s10 + $0xb94] sm:$0xf]  ;;  %v11162_v13 = vor.u32 %v13274_v4, %v11159_v5 }
 0x2e8   : > { %v9045_v38 = vld [vmem:[%s13885_s10 + $0x110] sm:$0xf]  ;;  %v11446_v42 = vor.u32 %v13358_v29, %v11445_v28  ;;  %v10394_v12 = vor.u32 %v13082_v1, %v10391_v3  ;;  %v11831_v24 = vld [vmem:[%s13885_s10 + $0x1730] sm:$0xf0] }
 0x2e9   : > { %6074 = vmatpush.bf16.msra.mxu3 %v11638_v6  ;;  %6049 = vmatpush.bf16.msra.mxu1 %v10006_v14  ;;  %v12758_v39 = vld [vmem:[%s13885_s10 + $0x16c] sm:$0xf0]  ;;  %v12866_v14 = vld [vmem:[%s13885_s10 + $0x4d4] sm:$0xf] }
 0x2ea   : > { %v9813_v40 = vld [vmem:[%s13885_s10 + $0x710] sm:$0xf]  ;;  %v9046_v49 = vor.u32 %v12758_v39, %v9045_v38  ;;  %v12842_v28 = vld [vmem:[%s13885_s10 + $0x414] sm:$0xf] }
 0x2eb   : > { %6062 = vmatpush.bf16.msra.mxu2 %v10774_v15  ;;  %v12950_v43 = vld [vmem:[%s13885_s10 + $0x76c] sm:$0xf0]  ;;  %6037 = vmatpush.bf16.msra.mxu0 %v9142_v33  ;;  %v9527_v15 = vld [vmem:[%s13885_s10 + $0x530] sm:$0xf0]  ;;  %v11834_v33 = vor.u32 %v13442_v23, %v11831_v24 }
 0x2ec   : > { %v10581_v44 = vld [vmem:[%s13885_s10 + $0xd10] sm:$0xf]  ;;  %v9814_v52 = vor.u32 %v12950_v43, %v9813_v40  ;;  %v9530_v25 = vor.u32 %v12866_v14, %v9527_v15  ;;  %v9431_v29 = vld [vmem:[%s13885_s10 + $0x470] sm:$0xf0]  ;;  %v10202_v40 = vor.u32 %v13034_v30, %v10199_v34 }
 0x2ed   : > { %6075 = vmatpush.bf16.msra.mxu3 %v11542_v22  ;;  %v13142_v45 = vld [vmem:[%s13885_s10 + $0xd6c] sm:$0xf0]  ;;  %6050 = vmatpush.bf16.msra.mxu1 %v9910_v36  ;;  %v11063_v22 = vld [vmem:[%s13885_s10 + $0x1130] sm:$0xf0]  ;;  %v9434_v39 = vor.u32 %v12842_v28, %v9431_v29 }
 0x2ee   : > { %v11349_v47 = vld [vmem:[%s13885_s10 + $0x1310] sm:$0xf]  ;;  %v10582_v53 = vor.u32 %v13142_v45, %v10581_v44  ;;  %v11066_v27 = vor.u32 %v13250_v21, %v11063_v22  ;;  %v10967_v36 = vld [vmem:[%s13885_s10 + $0x1070] sm:$0xf0] }
 0x2ef   : > { %v13334_v48 = vld [vmem:[%s13885_s10 + $0x136c] sm:$0xf0]  ;;  %6063 = vmatpush.bf16.msra.mxu2 %v10678_v37  ;;  %6038 = vmatpush.bf16.msra.mxu0 %v9046_v49  ;;  %v13418_v37 = vld [vmem:[%s13885_s10 + $0x1614] sm:$0xf]  ;;  %v10970_v41 = vor.u32 %v13226_v35, %v10967_v36 }
 0x2f0   : > { %v8949_v50 = vld [vmem:[%s13885_s10 + $0x50] sm:$0xf]  ;;  %v11350_v58 = vor.u32 %v13334_v48, %v11349_v47  ;;  %v11735_v38 = vld [vmem:[%s13885_s10 + $0x1670] sm:$0xf0] }
 0x2f1   : > { %v12734_v51 = vld [vmem:[%s13885_s10 + $0xac] sm:$0xf0]  ;;  %6076 = vmatpush.bf16.msra.mxu3 %v11446_v42  ;;  %6051 = vmatpush.bf16.msra.mxu1 %v9814_v52  ;;  %v12818_v42 = vld [vmem:[%s13885_s10 + $0x354] sm:$0xf]  ;;  %v11738_v45 = vor.u32 %v13418_v37, %v11735_v38 }
 0x2f2   : > { %v9717_v54 = vld [vmem:[%s13885_s10 + $0x650] sm:$0xf]  ;;  %v8950_v2 = vor.u32 %v12734_v51, %v8949_v50  ;;  %v9335_v43 = vld [vmem:[%s13885_s10 + $0x3b0] sm:$0xf0] }
 0x2f3   : > { %v12926_v55 = vld [vmem:[%s13885_s10 + $0x6ac] sm:$0xf0]  ;;  %6064 = vmatpush.bf16.msra.mxu2 %v10582_v53  ;;  %v13010_v44 = vld [vmem:[%s13885_s10 + $0x954] sm:$0xf]  ;;  %v9338_v51 = vor.u32 %v12818_v42, %v9335_v43  ;;  %v5833_v52 = vpop.f32.mrf.mxu0 }
 0x2f4   : > { %v10485_v56 = vld [vmem:[%s13885_s10 + $0xc50] sm:$0xf]  ;;  %v9718_v6 = vor.u32 %v12926_v55, %v9717_v54  ;;  %6039 = vmatpush.bf16.msra.mxu0 %v8950_v2  ;;  %v13202_v47 = vld [vmem:[%s13885_s10 + $0xf54] sm:$0xf]  ;;  %v10106_v53 = vor.u32 %v13010_v44, %v10103_v46 }
 0x2f5   : > { %v13118_v59 = vld [vmem:[%s13885_s10 + $0xcac] sm:$0xf0]  ;;  %6077 = vmatpush.bf16.msra.mxu3 %v11350_v58  ;;  %v10871_v48 = vld [vmem:[%s13885_s10 + $0xfb0] sm:$0xf0]  ;;  %v5846_v58 = vpop.f32.mrf.mxu1 }
 0x2f6   : > { %v11253_v60 = vld [vmem:[%s13885_s10 + $0x1250] sm:$0xf]  ;;  %v10486_v7 = vor.u32 %v13118_v59, %v10485_v56  ;;  %6052 = vmatpush.bf16.msra.mxu1 %v9718_v6  ;;  %v13394_v49 = vld [vmem:[%s13885_s10 + $0x1554] sm:$0xf]  ;;  %v10874_v54 = vor.u32 %v13202_v47, %v10871_v48  ;;  %v5847_v63 = vadd.f32 %v5846_v58, %v5833_v52  ;;  %v9629_v52 = vld [vmem:[%s13885_s10 + $0x598] sm:$0xf] }
 0x2f7   : > { %v13310_v61 = vld [vmem:[%s13885_s10 + $0x12ac] sm:$0xf0]  ;;  %6040 = vmatmul.bf16.vlgmr.msra.gmra.mxu0 %v13997_v31  ;;  %v11639_v50 = vld [vmem:[%s13885_s10 + $0x15b0] sm:$0xf0]  ;;  %v13287_v58 = vld [vmem:[%s13885_s10 + $0x11f4] sm:$0xf0] }
 0x2f8   : > { %v11254_v10 = vor.u32 %v13310_v61, %v11253_v60  ;;  %6065 = vmatpush.bf16.msra.mxu2 %v10486_v7  ;;  %6084 = vmatpush.bf16.msrb.mxu0 %v9626_v11  ;;  %v12794_v55 = vld [vmem:[%s13885_s10 + $0x294] sm:$0xf]  ;;  %v11642_v59 = vor.u32 %v13394_v49, %v11639_v50 }
 0x2f9   : > { %6053 = vmatmul.bf16.vlgmr.msra.gmra.mxu1 %v13999_v32  ;;  %v9239_v56 = vld [vmem:[%s13885_s10 + $0x2f0] sm:$0xf0] }
 0x2fa   : > { %6078 = vmatpush.bf16.msra.mxu3 %v11254_v10  ;;  %6097 = vmatpush.bf16.msrb.mxu1 %v10394_v12  ;;  %v12986_v57 = vld [vmem:[%s13885_s10 + $0x894] sm:$0xf]  ;;  %v9242_v2 = vor.u32 %v12794_v55, %v9239_v56  ;;  %v13095_v56 = vld [vmem:[%s13885_s10 + $0xbf4] sm:$0xf0] }
 0x2fb   : > { %6066 = vmatmul.bf16.vlgmr.msra.gmra.mxu2 %v13985_v16  ;;  %v10007_v60 = vld [vmem:[%s13885_s10 + $0x8f0] sm:$0xf0]  ;;  %v5835_v22 = vpop.f32.mrf.mxu0 }
 0x2fc   : > { %6110 = vmatpush.bf16.msrb.mxu2 %v11162_v13  ;;  %6085 = vmatpush.bf16.msrb.mxu0 %v9530_v25  ;;  %v13178_v61 = vld [vmem:[%s13885_s10 + $0xe94] sm:$0xf]  ;;  %v10010_v3 = vor.u32 %v12986_v57, %v10007_v60  ;;  %v11165_v57 = vld [vmem:[%s13885_s10 + $0x1198] sm:$0xf] }
 0x2fd   : > { %6079 = vmatmul.bf16.vlgmr.msra.gmra.mxu3 %v13987_v17  ;;  %v10775_v62 = vld [vmem:[%s13885_s10 + $0xef0] sm:$0xf0]  ;;  %v5859_v8 = vpop.f32.mrf.mxu2  ;;  %v5848_v28 = vpop.f32.mrf.mxu1  ;;  %v10973_v22 = vld [vmem:[%s13885_s10 + $0x1018] sm:$0xf] }
 0x2fe   : > { %6123 = vmatpush.bf16.msrb.mxu3 %v11930_v19  ;;  %6098 = vmatpush.bf16.msrb.mxu1 %v10298_v26  ;;  %v13370_v0 = vld [vmem:[%s13885_s10 + $0x1494] sm:$0xf]  ;;  %v10778_v4 = vor.u32 %v13178_v61, %v10775_v62  ;;  %v5860_v13 = vadd.f32 %v5859_v8, %v5847_v63  ;;  %v360_v19 = vld [vmem:[#allocation2 + $0xa8] sm:$0xff]  ;;  %v11933_v61 = vld [vmem:[%s13885_s10 + $0x1798] sm:$0xf] }
 0x2ff   : > { %v11543_v1 = vld [vmem:[%s13885_s10 + $0x14f0] sm:$0xf0]  ;;  %v5872_v14 = vpop.f32.mrf.mxu3  ;;  %v13479_v62 = vld [vmem:[%s13885_s10 + $0x17f4] sm:$0xf0] }
 0x300   : > { %6111 = vmatpush.bf16.msrb.mxu2 %v11066_v27  ;;  %6086 = vmatpush.bf16.msrb.mxu0 %v9434_v39  ;;  %v12770_v5 = vld [vmem:[%s13885_s10 + $0x1d4] sm:$0xf]  ;;  %v11546_v9 = vor.u32 %v13370_v0, %v11543_v1  ;;  %v5873_v21 = vadd.f32 %v5872_v14, %v5860_v13  ;;  %v11069_v8 = vld [vmem:[%s13885_s10 + $0x10d8] sm:$0xf] }
 0x301   : > { %v9143_v6 = vld [vmem:[%s13885_s10 + $0x230] sm:$0xf0] }
 0x302   : > { %6124 = vmatpush.bf16.msrb.mxu3 %v11834_v33  ;;  %6099 = vmatpush.bf16.msrb.mxu1 %v10202_v40  ;;  %v12962_v7 = vld [vmem:[%s13885_s10 + $0x7d4] sm:$0xf]  ;;  %v9146_v20 = vor.u32 %v12770_v5, %v9143_v6  ;;  %v6256_v35 = vadd.f32 %v5873_v21, %v360_v19  ;;  %v10301_v5 = vld [vmem:[%s13885_s10 + $0xad8] sm:$0xf]  ;;  %v11934_v6 = vor.u32 %v13479_v62, %v11933_v61 }
 0x303   : > { %v9911_v10 = vld [vmem:[%s13885_s10 + $0x830] sm:$0xf0]  ;;  %v10205_v19 = vld [vmem:[%s13885_s10 + $0xa18] sm:$0xf] }
 0x304   : > { %6112 = vmatpush.bf16.msrb.mxu2 %v10970_v41  ;;  %6087 = vmatpush.bf16.msrb.mxu0 %v9338_v51  ;;  %v13154_v11 = vld [vmem:[%s13885_s10 + $0xdd4] sm:$0xf]  ;;  %v9914_v23 = vor.u32 %v12962_v7, %v9911_v10  ;;  %6280 = vst [vmem:[#allocation2 + $0xa8] sm:$0xff] %v6256_v35  ;;  %v13071_v7 = vld [vmem:[%s13885_s10 + $0xb34] sm:$0xf0] }
 0x305   : > { %v10679_v12 = vld [vmem:[%s13885_s10 + $0xe30] sm:$0xf0]  ;;  %v5861_v46 = vpop.f32.mrf.mxu2  ;;  %v11837_v10 = vld [vmem:[%s13885_s10 + $0x16d8] sm:$0xf]  ;;  %v10302_v13 = vor.u32 %v13071_v7, %v10301_v5 }
 0x306   : > { %6125 = vmatpush.bf16.msrb.mxu3 %v11738_v45  ;;  %6100 = vmatpush.bf16.msrb.mxu1 %v10106_v53  ;;  %v13346_v15 = vld [vmem:[%s13885_s10 + $0x13d4] sm:$0xf]  ;;  %v10682_v24 = vor.u32 %v13154_v11, %v10679_v12  ;;  %v12903_v53 = vld [vmem:[%s13885_s10 + $0x5f4] sm:$0xf0] }
 0x307   : > { %v11447_v18 = vld [vmem:[%s13885_s10 + $0x1430] sm:$0xf0]  ;;  %v5874_v51 = vpop.f32.mrf.mxu3  ;;  %v9630_v0 = vor.u32 %v12903_v53, %v9629_v52  ;;  %v13455_v11 = vld [vmem:[%s13885_s10 + $0x1734] sm:$0xf0] }
 0x308   : > { %6113 = vmatpush.bf16.msrb.mxu2 %v10874_v54  ;;  %6088 = vmatpush.bf16.msrb.mxu0 %v9242_v2  ;;  %v12746_v25 = vld [vmem:[%s13885_s10 + $0x114] sm:$0xf]  ;;  %v11450_v29 = vor.u32 %v13346_v15, %v11447_v18  ;;  %v10397_v54 = vld [vmem:[%s13885_s10 + $0xb98] sm:$0xf]  ;;  %v11166_v2 = vor.u32 %v13287_v58, %v11165_v57 }
 0x309   : > { %v9047_v26 = vld [vmem:[%s13885_s10 + $0x170] sm:$0xf0]  ;;  %v10398_v1 = vor.u32 %v13095_v56, %v10397_v54  ;;  %v9437_v15 = vld [vmem:[%s13885_s10 + $0x418] sm:$0xf] }
 0x30a   : > { %6126 = vmatpush.bf16.msrb.mxu3 %v11642_v59  ;;  %6101 = vmatpush.bf16.msrb.mxu1 %v10010_v3  ;;  %v12938_v27 = vld [vmem:[%s13885_s10 + $0x714] sm:$0xf]  ;;  %v9050_v38 = vor.u32 %v12746_v25, %v9047_v26  ;;  %v9533_v3 = vld [vmem:[%s13885_s10 + $0x4d8] sm:$0xf] }
 0x30b   : > { %v9815_v30 = vld [vmem:[%s13885_s10 + $0x770] sm:$0xf0]  ;;  %v12855_v18 = vld [vmem:[%s13885_s10 + $0x474] sm:$0xf0] }
 0x30c   : > { %6114 = vmatpush.bf16.msrb.mxu2 %v10778_v4  ;;  %v13130_v33 = vld [vmem:[%s13885_s10 + $0xd14] sm:$0xf]  ;;  %6089 = vmatpush.bf16.msrb.mxu0 %v9146_v20  ;;  %v9818_v41 = vor.u32 %v12938_v27, %v9815_v30  ;;  %v12879_v4 = vld [vmem:[%s13885_s10 + $0x534] sm:$0xf0]  ;;  %v11838_v20 = vor.u32 %v13455_v11, %v11837_v10  ;;  %v9438_v26 = vor.u32 %v12855_v18, %v9437_v15 }
 0x30d   : > { %v10583_v34 = vld [vmem:[%s13885_s10 + $0xd70] sm:$0xf0]  ;;  %v9534_v12 = vor.u32 %v12879_v4, %v9533_v3  ;;  %v13047_v21 = vld [vmem:[%s13885_s10 + $0xa74] sm:$0xf0] }
 0x30e   : > { %6127 = vmatpush.bf16.msrb.mxu3 %v11546_v9  ;;  %v13322_v36 = vld [vmem:[%s13885_s10 + $0x1314] sm:$0xf]  ;;  %6102 = vmatpush.bf16.msrb.mxu1 %v9914_v23  ;;  %v10586_v42 = vor.u32 %v13130_v33, %v10583_v34  ;;  %v13263_v9 = vld [vmem:[%s13885_s10 + $0x1134] sm:$0xf0]  ;;  %v10206_v27 = vor.u32 %v13047_v21, %v10205_v19 }
 0x30f   : > { %v11351_v37 = vld [vmem:[%s13885_s10 + $0x1370] sm:$0xf0]  ;;  %v11070_v14 = vor.u32 %v13263_v9, %v11069_v8  ;;  %v13239_v23 = vld [vmem:[%s13885_s10 + $0x1074] sm:$0xf0] }
 0x310   : > { %v12722_v39 = vld [vmem:[%s13885_s10 + $0x54] sm:$0xf]  ;;  %6115 = vmatpush.bf16.msrb.mxu2 %v10682_v24  ;;  %v11354_v47 = vor.u32 %v13322_v36, %v11351_v37  ;;  %6090 = vmatpush.bf16.msrb.mxu0 %v9050_v38  ;;  %v11741_v24 = vld [vmem:[%s13885_s10 + $0x1618] sm:$0xf]  ;;  %v10974_v28 = vor.u32 %v13239_v23, %v10973_v22 }
 0x311   : > { %v8951_v40 = vld [vmem:[%s13885_s10 + $0xb0] sm:$0xf0]  ;;  %v13431_v25 = vld [vmem:[%s13885_s10 + $0x1674] sm:$0xf0] }
 0x312   : > { %v12914_v43 = vld [vmem:[%s13885_s10 + $0x654] sm:$0xf]  ;;  %6128 = vmatpush.bf16.msrb.mxu3 %v11450_v29  ;;  %v8954_v55 = vor.u32 %v12722_v39, %v8951_v40  ;;  %6103 = vmatpush.bf16.msrb.mxu1 %v9818_v41  ;;  %v9341_v29 = vld [vmem:[%s13885_s10 + $0x358] sm:$0xf]  ;;  %v11742_v34 = vor.u32 %v13431_v25, %v11741_v24 }
 0x313   : > { %v9719_v44 = vld [vmem:[%s13885_s10 + $0x6b0] sm:$0xf0]  ;;  %v12831_v30 = vld [vmem:[%s13885_s10 + $0x3b4] sm:$0xf0]  ;;  %v5885_v41 = vpop.f32.mrf.mxu0 }
 0x314   : > { %v13106_v45 = vld [vmem:[%s13885_s10 + $0xc54] sm:$0xf]  ;;  %6116 = vmatpush.bf16.msrb.mxu2 %v10586_v42  ;;  %v9722_v59 = vor.u32 %v12914_v43, %v9719_v44  ;;  %6091 = vmatpush.bf16.msrb.mxu0 %v8954_v55  ;;  %v10109_v33 = vld [vmem:[%s13885_s10 + $0x958] sm:$0xf]  ;;  %v9342_v40 = vor.u32 %v12831_v30, %v9341_v29 }
 0x315   : > { %v10487_v48 = vld [vmem:[%s13885_s10 + $0xcb0] sm:$0xf0]  ;;  %v13023_v35 = vld [vmem:[%s13885_s10 + $0x9b4] sm:$0xf0] }
 0x316   : > { %v13298_v49 = vld [vmem:[%s13885_s10 + $0x1254] sm:$0xf]  ;;  %v10490_v60 = vor.u32 %v13106_v45, %v10487_v48  ;;  %6129 = vmatpush.bf16.msrb.mxu3 %v11354_v47  ;;  %6104 = vmatpush.bf16.msrb.mxu1 %v9722_v59  ;;  %v10877_v36 = vld [vmem:[%s13885_s10 + $0xf58] sm:$0xf]  ;;  %v10110_v42 = vor.u32 %v13023_v35, %v10109_v33  ;;  %v5898_v47 = vpop.f32.mrf.mxu1 }
 0x317   : > { %v11255_v50 = vld [vmem:[%s13885_s10 + $0x12b0] sm:$0xf0]  ;;  %6092 = vmatmul.bf16.vlgmr.msrb.gmra.mxu0 %v13997_v31  ;;  %v13215_v37 = vld [vmem:[%s13885_s10 + $0xfb4] sm:$0xf0]  ;;  %v5899_v52 = vadd.f32 %v5898_v47, %v5885_v41  ;;  %v12891_v41 = vld [vmem:[%s13885_s10 + $0x59c] sm:$0xf] }
 0x318   : > { %v11258_v63 = vor.u32 %v13298_v49, %v11255_v50  ;;  %6117 = vmatpush.bf16.msrb.mxu2 %v10490_v60  ;;  %6136 = vmatpush.bf16.msra.mxu0 %v9630_v0  ;;  %v11645_v38 = vld [vmem:[%s13885_s10 + $0x1558] sm:$0xf]  ;;  %v10878_v43 = vor.u32 %v13215_v37, %v10877_v36  ;;  %v11167_v47 = vld [vmem:[%s13885_s10 + $0x11f8] sm:$0xf0] }
 0x319   : > { %6105 = vmatmul.bf16.vlgmr.msrb.gmra.mxu1 %v13999_v32  ;;  %v13407_v39 = vld [vmem:[%s13885_s10 + $0x15b4] sm:$0xf0] }
 0x31a   : > { %6130 = vmatpush.bf16.msrb.mxu3 %v11258_v63  ;;  %6149 = vmatpush.bf16.msra.mxu1 %v10398_v1  ;;  %v9245_v44 = vld [vmem:[%s13885_s10 + $0x298] sm:$0xf]  ;;  %v11646_v48 = vor.u32 %v13407_v39, %v11645_v38 }
 0x31b   : > { %6118 = vmatmul.bf16.vlgmr.msrb.gmra.mxu2 %v13985_v16  ;;  %v12807_v45 = vld [vmem:[%s13885_s10 + $0x2f4] sm:$0xf0]  ;;  %v5887_v9 = vpop.f32.mrf.mxu0 }
 0x31c   : > { %6162 = vmatpush.bf16.msra.mxu2 %v11166_v2  ;;  %6137 = vmatpush.bf16.msra.mxu0 %v9534_v12  ;;  %v10013_v46 = vld [vmem:[%s13885_s10 + $0x898] sm:$0xf]  ;;  %v9246_v55 = vor.u32 %v12807_v45, %v9245_v44  ;;  %v10399_v45 = vld [vmem:[%s13885_s10 + $0xbf8] sm:$0xf0] }
 0x31d   : > { %6131 = vmatmul.bf16.vlgmr.msrb.gmra.mxu3 %v13987_v17  ;;  %v12999_v49 = vld [vmem:[%s13885_s10 + $0x8f4] sm:$0xf0]  ;;  %v5911_v61 = vpop.f32.mrf.mxu2  ;;  %v13227_v9 = vld [vmem:[%s13885_s10 + $0x101c] sm:$0xf] }
 0x31e   : > { %6175 = vmatpush.bf16.msra.mxu3 %v11934_v6  ;;  %6150 = vmatpush.bf16.msra.mxu1 %v10302_v13  ;;  %v10781_v50 = vld [vmem:[%s13885_s10 + $0xe98] sm:$0xf]  ;;  %v10014_v56 = vor.u32 %v12999_v49, %v10013_v46  ;;  %v5912_v2 = vadd.f32 %v5911_v61, %v5899_v52  ;;  %v361_v6 = vld [vmem:[#allocation2 + $0x68] sm:$0xff]  ;;  %v5900_v15 = vpop.f32.mrf.mxu1  ;;  %v13275_v46 = vld [vmem:[%s13885_s10 + $0x119c] sm:$0xf] }
 0x31f   : > { %v13191_v51 = vld [vmem:[%s13885_s10 + $0xef4] sm:$0xf0]  ;;  %v5924_v3 = vpop.f32.mrf.mxu3  ;;  %v13251_v61 = vld [vmem:[%s13885_s10 + $0x10dc] sm:$0xf] }
 0x320   : > { %6163 = vmatpush.bf16.msra.mxu2 %v11070_v14  ;;  %6138 = vmatpush.bf16.msra.mxu0 %v9438_v26  ;;  %v11549_v53 = vld [vmem:[%s13885_s10 + $0x1498] sm:$0xf]  ;;  %v10782_v57 = vor.u32 %v13191_v51, %v10781_v50  ;;  %v5925_v8 = vadd.f32 %v5924_v3, %v5912_v2  ;;  %v13467_v50 = vld [vmem:[%s13885_s10 + $0x179c] sm:$0xf] }
 0x321   : > { %v13383_v54 = vld [vmem:[%s13885_s10 + $0x14f4] sm:$0xf0]  ;;  %v11935_v51 = vld [vmem:[%s13885_s10 + $0x17f8] sm:$0xf0] }
 0x322   : > { %6176 = vmatpush.bf16.msra.mxu3 %v11838_v20  ;;  %6151 = vmatpush.bf16.msra.mxu1 %v10206_v27  ;;  %v9149_v58 = vld [vmem:[%s13885_s10 + $0x1d8] sm:$0xf]  ;;  %v11550_v62 = vor.u32 %v13383_v54, %v11549_v53  ;;  %v6257_v22 = vadd.f32 %v5925_v8, %v361_v6  ;;  %v13035_v6 = vld [vmem:[%s13885_s10 + $0xa1c] sm:$0xf] }
 0x323   : > { %v12783_v59 = vld [vmem:[%s13885_s10 + $0x234] sm:$0xf0]  ;;  %v10207_v8 = vld [vmem:[%s13885_s10 + $0xa78] sm:$0xf0] }
 0x324   : > { %6164 = vmatpush.bf16.msra.mxu2 %v10974_v28  ;;  %6139 = vmatpush.bf16.msra.mxu0 %v9342_v40  ;;  %v9917_v60 = vld [vmem:[%s13885_s10 + $0x7d8] sm:$0xf]  ;;  %v9150_v7 = vor.u32 %v12783_v59, %v9149_v58  ;;  %6281 = vst [vmem:[#allocation2 + $0x68] sm:$0xff] %v6257_v22  ;;  %v13059_v58 = vld [vmem:[%s13885_s10 + $0xadc] sm:$0xf]  ;;  %v11938_v59 = vor.u32 %v13467_v50, %v11935_v51 }
 0x325   : > { %v12975_v63 = vld [vmem:[%s13885_s10 + $0x834] sm:$0xf0]  ;;  %v5913_v35 = vpop.f32.mrf.mxu2  ;;  %v10111_v22 = vld [vmem:[%s13885_s10 + $0x9b8] sm:$0xf0] }
 0x326   : > { %6177 = vmatpush.bf16.msra.mxu3 %v11742_v34  ;;  %6152 = vmatpush.bf16.msra.mxu1 %v10110_v42  ;;  %v10685_v0 = vld [vmem:[%s13885_s10 + $0xdd8] sm:$0xf]  ;;  %v9918_v10 = vor.u32 %v12975_v63, %v9917_v60  ;;  %v9631_v42 = vld [vmem:[%s13885_s10 + $0x5f8] sm:$0xf0] }
 0x327   : > { %v13167_v1 = vld [vmem:[%s13885_s10 + $0xe34] sm:$0xf0]  ;;  %v5926_v40 = vpop.f32.mrf.mxu3  ;;  %v9634_v53 = vor.u32 %v12891_v41, %v9631_v42  ;;  %v10303_v60 = vld [vmem:[%s13885_s10 + $0xb38] sm:$0xf0] }
 0x328   : > { %6165 = vmatpush.bf16.msra.mxu2 %v10878_v43  ;;  %v11453_v4 = vld [vmem:[%s13885_s10 + $0x13d8] sm:$0xf]  ;;  %6140 = vmatpush.bf16.msra.mxu0 %v9246_v55  ;;  %v10686_v11 = vor.u32 %v13167_v1, %v10685_v0  ;;  %v13083_v43 = vld [vmem:[%s13885_s10 + $0xb9c] sm:$0xf]  ;;  %v11170_v55 = vor.u32 %v13275_v46, %v11167_v47  ;;  %v10306_v2 = vor.u32 %v13059_v58, %v10303_v60 }
 0x329   : > { %v13359_v5 = vld [vmem:[%s13885_s10 + $0x1434] sm:$0xf0]  ;;  %v10402_v54 = vor.u32 %v13083_v43, %v10399_v45  ;;  %v13443_v63 = vld [vmem:[%s13885_s10 + $0x16dc] sm:$0xf] }
 0x32a   : > { %6178 = vmatpush.bf16.msra.mxu3 %v11646_v48  ;;  %6153 = vmatpush.bf16.msra.mxu1 %v10014_v56  ;;  %v9053_v12 = vld [vmem:[%s13885_s10 + $0x118] sm:$0xf]  ;;  %v11454_v18 = vor.u32 %v13359_v5, %v11453_v4  ;;  %v12867_v56 = vld [vmem:[%s13885_s10 + $0x4dc] sm:$0xf] }
 0x32b   : > { %v12759_v13 = vld [vmem:[%s13885_s10 + $0x174] sm:$0xf0]  ;;  %v11839_v0 = vld [vmem:[%s13885_s10 + $0x1738] sm:$0xf0] }
 0x32c   : > { %6166 = vmatpush.bf16.msra.mxu2 %v10782_v57  ;;  %v9821_v14 = vld [vmem:[%s13885_s10 + $0x718] sm:$0xf]  ;;  %6141 = vmatpush.bf16.msra.mxu0 %v9150_v7  ;;  %v9054_v25 = vor.u32 %v12759_v13, %v9053_v12  ;;  %v9535_v57 = vld [vmem:[%s13885_s10 + $0x538] sm:$0xf0]  ;;  %v11842_v7 = vor.u32 %v13443_v63, %v11839_v0 }
 0x32d   : > { %v12951_v19 = vld [vmem:[%s13885_s10 + $0x774] sm:$0xf0]  ;;  %v9538_v1 = vor.u32 %v12867_v56, %v9535_v57  ;;  %v12843_v4 = vld [vmem:[%s13885_s10 + $0x41c] sm:$0xf] }
 0x32e   : > { %6179 = vmatpush.bf16.msra.mxu3 %v11550_v62  ;;  %v10589_v20 = vld [vmem:[%s13885_s10 + $0xd18] sm:$0xf]  ;;  %6154 = vmatpush.bf16.msra.mxu1 %v9918_v10  ;;  %v9822_v28 = vor.u32 %v12951_v19, %v9821_v14  ;;  %v11071_v62 = vld [vmem:[%s13885_s10 + $0x1138] sm:$0xf0]  ;;  %v10210_v14 = vor.u32 %v13035_v6, %v10207_v8 }
 0x32f   : > { %v13143_v21 = vld [vmem:[%s13885_s10 + $0xd74] sm:$0xf0]  ;;  %v11074_v3 = vor.u32 %v13251_v61, %v11071_v62  ;;  %v9439_v5 = vld [vmem:[%s13885_s10 + $0x478] sm:$0xf0] }
 0x330   : > { %v11357_v23 = vld [vmem:[%s13885_s10 + $0x1318] sm:$0xf]  ;;  %6167 = vmatpush.bf16.msra.mxu2 %v10686_v11  ;;  %v10590_v29 = vor.u32 %v13143_v21, %v10589_v20  ;;  %6142 = vmatpush.bf16.msra.mxu0 %v9054_v25  ;;  %v10975_v10 = vld [vmem:[%s13885_s10 + $0x1078] sm:$0xf0]  ;;  %v9442_v13 = vor.u32 %v12843_v4, %v9439_v5 }
 0x331   : > { %v13335_v24 = vld [vmem:[%s13885_s10 + $0x1374] sm:$0xf0]  ;;  %v13419_v11 = vld [vmem:[%s13885_s10 + $0x161c] sm:$0xf]  ;;  %v10978_v15 = vor.u32 %v13227_v9, %v10975_v10 }
 0x332   : > { %v8957_v26 = vld [vmem:[%s13885_s10 + $0x58] sm:$0xf]  ;;  %6180 = vmatpush.bf16.msra.mxu3 %v11454_v18  ;;  %v11358_v36 = vor.u32 %v13335_v24, %v11357_v23  ;;  %6155 = vmatpush.bf16.msra.mxu1 %v9822_v28  ;;  %v11743_v12 = vld [vmem:[%s13885_s10 + $0x1678] sm:$0xf0] }
 0x333   : > { %v12735_v27 = vld [vmem:[%s13885_s10 + $0xb4] sm:$0xf0]  ;;  %v12819_v18 = vld [vmem:[%s13885_s10 + $0x35c] sm:$0xf]  ;;  %v11746_v21 = vor.u32 %v13419_v11, %v11743_v12  ;;  %v5937_v28 = vpop.f32.mrf.mxu0 }
 0x334   : > { %v9725_v30 = vld [vmem:[%s13885_s10 + $0x658] sm:$0xf]  ;;  %v8958_v44 = vor.u32 %v12735_v27, %v8957_v26  ;;  %6168 = vmatpush.bf16.msra.mxu2 %v10590_v29  ;;  %v9343_v19 = vld [vmem:[%s13885_s10 + $0x3b8] sm:$0xf0] }
 0x335   : > { %v12927_v33 = vld [vmem:[%s13885_s10 + $0x6b4] sm:$0xf0]  ;;  %v13011_v20 = vld [vmem:[%s13885_s10 + $0x95c] sm:$0xf]  ;;  %v9346_v27 = vor.u32 %v12819_v18, %v9343_v19 }
 0x336   : > { %v10493_v34 = vld [vmem:[%s13885_s10 + $0xc58] sm:$0xf]  ;;  %v9726_v48 = vor.u32 %v12927_v33, %v9725_v30  ;;  %6181 = vmatpush.bf16.msra.mxu3 %v11358_v36  ;;  %6143 = vmatpush.bf16.msra.mxu0 %v8958_v44  ;;  %v13203_v23 = vld [vmem:[%s13885_s10 + $0xf5c] sm:$0xf]  ;;  %v10114_v29 = vor.u32 %v13011_v20, %v10111_v22  ;;  %v5950_v36 = vpop.f32.mrf.mxu1 }
 0x337   : > { %v13119_v37 = vld [vmem:[%s13885_s10 + $0xcb4] sm:$0xf0]  ;;  %v10879_v24 = vld [vmem:[%s13885_s10 + $0xfb8] sm:$0xf0]  ;;  %v5951_v41 = vadd.f32 %v5950_v36, %v5937_v28 }
 0x338   : > { %v11261_v38 = vld [vmem:[%s13885_s10 + $0x1258] sm:$0xf]  ;;  %v10494_v49 = vor.u32 %v13119_v37, %v10493_v34  ;;  %6156 = vmatpush.bf16.msra.mxu1 %v9726_v48  ;;  %v13395_v25 = vld [vmem:[%s13885_s10 + $0x155c] sm:$0xf]  ;;  %v10882_v30 = vor.u32 %v13203_v23, %v10879_v24 }
 0x339   : > { %v13311_v39 = vld [vmem:[%s13885_s10 + $0x12b4] sm:$0xf0]  ;;  %6144 = vmatmul.bf16.vlgmr.msra.gmra.mxu0 %v13997_v31  ;;  %v11647_v26 = vld [vmem:[%s13885_s10 + $0x15b8] sm:$0xf0] }
 0x33a   : > { %v11262_v52 = vor.u32 %v13311_v39, %v11261_v38  ;;  %6169 = vmatpush.bf16.msra.mxu2 %v10494_v49  ;;  %6188 = vmatpush.bf16.msrb.mxu0 %v9634_v53  ;;  %v12795_v33 = vld [vmem:[%s13885_s10 + $0x29c] sm:$0xf]  ;;  %v11650_v37 = vor.u32 %v13395_v25, %v11647_v26 }
 0x33b   : > { %6157 = vmatmul.bf16.vlgmr.msra.gmra.mxu1 %v13999_v32  ;;  %v9247_v34 = vld [vmem:[%s13885_s10 + $0x2f8] sm:$0xf0]  ;;  %v5939_v62 = vpop.f32.mrf.mxu0 }
 0x33c   : > { %6182 = vmatpush.bf16.msra.mxu3 %v11262_v52  ;;  %6201 = vmatpush.bf16.msrb.mxu1 %v10402_v54  ;;  %v12987_v35 = vld [vmem:[%s13885_s10 + $0x89c] sm:$0xf]  ;;  %v9250_v44 = vor.u32 %v12795_v33, %v9247_v34 }
 0x33d   : > { %6170 = vmatmul.bf16.vlgmr.msra.gmra.mxu2 %v13985_v16  ;;  %v10015_v38 = vld [vmem:[%s13885_s10 + $0x8f8] sm:$0xf0]  ;;  %v5963_v50 = vpop.f32.mrf.mxu2 }
 0x33e   : > { %6214 = vmatpush.bf16.msrb.mxu2 %v11170_v55  ;;  %6189 = vmatpush.bf16.msrb.mxu0 %v9538_v1  ;;  %v13179_v39 = vld [vmem:[%s13885_s10 + $0xe9c] sm:$0xf]  ;;  %v10018_v45 = vor.u32 %v12987_v35, %v10015_v38  ;;  %v5964_v55 = vadd.f32 %v5963_v50, %v5951_v41  ;;  %v5952_v4 = vpop.f32.mrf.mxu1 }
 0x33f   : > { %6183 = vmatmul.bf16.vlgmr.msra.gmra.mxu3 %v13987_v17  ;;  %v10783_v40 = vld [vmem:[%s13885_s10 + $0xef8] sm:$0xf0]  ;;  %v5976_v56 = vpop.f32.mrf.mxu3 }
 0x340   : > { %6227 = vmatpush.bf16.msrb.mxu3 %v11938_v59  ;;  %6202 = vmatpush.bf16.msrb.mxu1 %v10306_v2  ;;  %v13371_v42 = vld [vmem:[%s13885_s10 + $0x149c] sm:$0xf]  ;;  %v10786_v46 = vor.u32 %v13179_v39, %v10783_v40  ;;  %v362_v59 = vld [vmem:[#allocation2 + $0x30] sm:$0xff]  ;;  %v5977_v61 = vadd.f32 %v5976_v56, %v5964_v55 }
 0x341   : > { %v11551_v43 = vld [vmem:[%s13885_s10 + $0x14f8] sm:$0xf0] }
 0x342   : > { %6215 = vmatpush.bf16.msrb.mxu2 %v11074_v3  ;;  %6190 = vmatpush.bf16.msrb.mxu0 %v9442_v13  ;;  %v12771_v47 = vld [vmem:[%s13885_s10 + $0x1dc] sm:$0xf]  ;;  %v11554_v51 = vor.u32 %v13371_v42, %v11551_v43  ;;  %v6258_v9 = vadd.f32 %v5977_v61, %v362_v59 }
 0x343   : > { %v9151_v48 = vld [vmem:[%s13885_s10 + $0x238] sm:$0xf0] }
 0x344   : > { %6228 = vmatpush.bf16.msrb.mxu3 %v11842_v7  ;;  %6203 = vmatpush.bf16.msrb.mxu1 %v10210_v14  ;;  %v12963_v49 = vld [vmem:[%s13885_s10 + $0x7dc] sm:$0xf]  ;;  %v9154_v60 = vor.u32 %v12771_v47, %v9151_v48  ;;  %6282 = vst [vmem:[#allocation2 + $0x30] sm:$0xff] %v6258_v9 }
 0x345   : > { %v9919_v52 = vld [vmem:[%s13885_s10 + $0x838] sm:$0xf0]  ;;  %v5965_v20 = vpop.f32.mrf.mxu2 }
 0x346   : > { %6216 = vmatpush.bf16.msrb.mxu2 %v10978_v15  ;;  %6191 = vmatpush.bf16.msrb.mxu0 %v9346_v27  ;;  %v13155_v53 = vld [vmem:[%s13885_s10 + $0xddc] sm:$0xf]  ;;  %v9922_v63 = vor.u32 %v12963_v49, %v9919_v52  ;;  %v364_v49 = vld [vmem:[#allocation2 + $0x80] sm:$0xff] }
 0x347   : > { %v10687_v54 = vld [vmem:[%s13885_s10 + $0xe38] sm:$0xf0]  ;;  %v5978_v25 = vpop.f32.mrf.mxu3 }
 0x348   : > { %6229 = vmatpush.bf16.msrb.mxu3 %v11746_v21  ;;  %6204 = vmatpush.bf16.msrb.mxu1 %v10114_v29  ;;  %v13347_v57 = vld [vmem:[%s13885_s10 + $0x13dc] sm:$0xf]  ;;  %v10690_v0 = vor.u32 %v13155_v53, %v10687_v54 }
 0x349   : > { %v11455_v58 = vld [vmem:[%s13885_s10 + $0x1438] sm:$0xf0] }
 0x34a   : > { %6217 = vmatpush.bf16.msrb.mxu2 %v10882_v30  ;;  %6192 = vmatpush.bf16.msrb.mxu0 %v9250_v44  ;;  %v12747_v1 = vld [vmem:[%s13885_s10 + $0x11c] sm:$0xf]  ;;  %v11458_v5 = vor.u32 %v13347_v57, %v11455_v58 }
 0x34b   : > { %v9055_v2 = vld [vmem:[%s13885_s10 + $0x178] sm:$0xf0] }
 0x34c   : > { %6230 = vmatpush.bf16.msrb.mxu3 %v11650_v37  ;;  %6205 = vmatpush.bf16.msrb.mxu1 %v10018_v45  ;;  %v12939_v3 = vld [vmem:[%s13885_s10 + $0x71c] sm:$0xf]  ;;  %v9058_v12 = vor.u32 %v12747_v1, %v9055_v2 }
 0x34d   : > { %v9823_v6 = vld [vmem:[%s13885_s10 + $0x778] sm:$0xf0] }
 0x34e   : > { %6218 = vmatpush.bf16.msrb.mxu2 %v10786_v46  ;;  %v13131_v7 = vld [vmem:[%s13885_s10 + $0xd1c] sm:$0xf]  ;;  %6193 = vmatpush.bf16.msrb.mxu0 %v9154_v60  ;;  %v9826_v13 = vor.u32 %v12939_v3, %v9823_v6 }
 0x34f   : > { %v10591_v8 = vld [vmem:[%s13885_s10 + $0xd78] sm:$0xf0] }
 0x350   : > { %6231 = vmatpush.bf16.msrb.mxu3 %v11554_v51  ;;  %v13323_v10 = vld [vmem:[%s13885_s10 + $0x131c] sm:$0xf]  ;;  %6206 = vmatpush.bf16.msrb.mxu1 %v9922_v63  ;;  %v10594_v14 = vor.u32 %v13131_v7, %v10591_v8 }
 0x351   : > { %v11359_v11 = vld [vmem:[%s13885_s10 + $0x1378] sm:$0xf0] }
 0x352   : > { %6219 = vmatpush.bf16.msrb.mxu2 %v10690_v0  ;;  %v12723_v15 = vld [vmem:[%s13885_s10 + $0x5c] sm:$0xf]  ;;  %v11362_v21 = vor.u32 %v13323_v10, %v11359_v11  ;;  %6194 = vmatpush.bf16.msrb.mxu0 %v9058_v12  ;;  %v366_v11 = vld [vmem:[#allocation2 + $0x20] sm:$0xff] }
 0x353   : > { %v8959_v18 = vld [vmem:[%s13885_s10 + $0xb8] sm:$0xf0]  ;;  %v5989_v34 = vpop.f32.mrf.mxu0 }
 0x354   : > { %v12915_v19 = vld [vmem:[%s13885_s10 + $0x65c] sm:$0xf]  ;;  %6232 = vmatpush.bf16.msrb.mxu3 %v11458_v5  ;;  %v8962_v28 = vor.u32 %v12723_v15, %v8959_v18  ;;  %6207 = vmatpush.bf16.msrb.mxu1 %v9826_v13 }
 0x355   : > { %v9727_v22 = vld [vmem:[%s13885_s10 + $0x6b8] sm:$0xf0]  ;;  %v6002_v35 = vpop.f32.mrf.mxu1 }
 0x356   : > { %v13107_v23 = vld [vmem:[%s13885_s10 + $0xc5c] sm:$0xf]  ;;  %6220 = vmatpush.bf16.msrb.mxu2 %v10594_v14  ;;  %v9730_v29 = vor.u32 %v12915_v19, %v9727_v22  ;;  %6195 = vmatpush.bf16.msrb.mxu0 %v8962_v28  ;;  %v6003_v36 = vadd.f32 %v6002_v35, %v5989_v34 }
 0x357   : > { %v10495_v24 = vld [vmem:[%s13885_s10 + $0xcb8] sm:$0xf0] }
 0x358   : > { %v13299_v26 = vld [vmem:[%s13885_s10 + $0x125c] sm:$0xf]  ;;  %v10498_v30 = vor.u32 %v13107_v23, %v10495_v24  ;;  %6233 = vmatpush.bf16.msrb.mxu3 %v11362_v21  ;;  %6208 = vmatpush.bf16.msrb.mxu1 %v9730_v29 }
 0x359   : > { %v11263_v27 = vld [vmem:[%s13885_s10 + $0x12b8] sm:$0xf0]  ;;  %6196 = vmatmul.bf16.vlgmr.msrb.gmra.mxu0 %v13997_v31 }
 0x35a   : > { %v11266_v33 = vor.u32 %v13299_v26, %v11263_v27  ;;  %6221 = vmatpush.bf16.msrb.mxu2 %v10498_v30  ;;  %v363_v40 = vld [vmem:[#allocation2 + $0x58] sm:$0xff]  ;;  %v367_v27 = vld [vmem:[#allocation2 + $0x8] sm:$0xff] }
 0x35b   : > { %6209 = vmatmul.bf16.vlgmr.msrb.gmra.mxu1 %v13999_v32  ;;  %v5991_v42 = vpop.f32.mrf.mxu0  ;;  %v365_v62 = vld [vmem:[#allocation2 + $0xb8] sm:$0xff] }
 0x35c   : > { %6234 = vmatpush.bf16.msrb.mxu3 %v11266_v33 }
 0x35d   : > { %6222 = vmatmul.bf16.vlgmr.msrb.gmra.mxu2 %v13985_v16  ;;  %v6015_v37 = vpop.f32.mrf.mxu2  ;;  %v6004_v43 = vpop.f32.mrf.mxu1 }
 0x35e   : > { %v6016_v38 = vadd.f32 %v6015_v37, %v6003_v36 }
 0x35f   : > { %6235 = vmatmul.bf16.vlgmr.msrb.gmra.mxu3 %v13987_v17  ;;  %v6028_v39 = vpop.f32.mrf.mxu3 }
 0x360   : > { %v6029_v41 = vadd.f32 %v6028_v39, %v6016_v38 }
 0x362   : > { %v6259_v44 = vadd.f32 %v6029_v41, %v363_v40 }
 0x364   : > { %6283 = vst [vmem:[#allocation2 + $0x58] sm:$0xff] %v6259_v44 }
 0x365   : > { %v6017_v45 = vpop.f32.mrf.mxu2 }
 0x367   : > { %v6030_v31 = vpop.f32.mrf.mxu3 }
 0x374   : > { %v6041_v46 = vpop.f32.mrf.mxu0 }
 0x376   : > { %v6054_v32 = vpop.f32.mrf.mxu1 }
 0x377   : > { %v6055_v47 = vadd.f32 %v6054_v32, %v6041_v46 }
 0x37c   : > { %v6043_v51 = vpop.f32.mrf.mxu0 }
 0x37e   : > { %v6067_v16 = vpop.f32.mrf.mxu2  ;;  %v6056_v52 = vpop.f32.mrf.mxu1 }
 0x37f   : > { %v6068_v48 = vadd.f32 %v6067_v16, %v6055_v47 }
 0x380   : > { %v6080_v17 = vpop.f32.mrf.mxu3 }
 0x381   : > { %v6081_v50 = vadd.f32 %v6080_v17, %v6068_v48 }
 0x383   : > { %v6260_v53 = vadd.f32 %v6081_v50, %v364_v49 }
 0x385   : > { %6284 = vst [vmem:[#allocation2 + $0x80] sm:$0xff] %v6260_v53 }
 0x386   : > { %v6069_v54 = vpop.f32.mrf.mxu2 }
 0x388   : > { %v6082_v55 = vpop.f32.mrf.mxu3 }
 0x394   : > { %v6093_v56 = vpop.f32.mrf.mxu0 }
 0x396   : > { %v6106_v57 = vpop.f32.mrf.mxu1 }
 0x397   : > { %v6107_v58 = vadd.f32 %v6106_v57, %v6093_v56 }
 0x39c   : > { %v6095_v0 = vpop.f32.mrf.mxu0 }
 0x39e   : > { %v6119_v59 = vpop.f32.mrf.mxu2  ;;  %v6108_v1 = vpop.f32.mrf.mxu1 }
 0x39f   : > { %v6120_v60 = vadd.f32 %v6119_v59, %v6107_v58 }
 0x3a0   : > { %v6132_v61 = vpop.f32.mrf.mxu3 }
 0x3a1   : > { %v6133_v63 = vadd.f32 %v6132_v61, %v6120_v60 }
 0x3a3   : > { %v6261_v2 = vadd.f32 %v6133_v63, %v365_v62 }
 0x3a5   : > { %6285 = vst [vmem:[#allocation2 + $0xb8] sm:$0xff] %v6261_v2 }
 0x3a6   : > { %v6121_v3 = vpop.f32.mrf.mxu2 }
 0x3a8   : > { %v6134_v4 = vpop.f32.mrf.mxu3 }
 0x3b6   : > { %v6145_v5 = vpop.f32.mrf.mxu0 }
 0x3b8   : > { %v6158_v6 = vpop.f32.mrf.mxu1 }
 0x3b9   : > { %v6159_v7 = vadd.f32 %v6158_v6, %v6145_v5 }
 0x3be   : > { %v6147_v13 = vpop.f32.mrf.mxu0 }
 0x3c0   : > { %v6171_v8 = vpop.f32.mrf.mxu2  ;;  %v6160_v14 = vpop.f32.mrf.mxu1 }
 0x3c1   : > { %v6172_v9 = vadd.f32 %v6171_v8, %v6159_v7 }
 0x3c2   : > { %v6184_v10 = vpop.f32.mrf.mxu3 }
 0x3c3   : > { %v6185_v12 = vadd.f32 %v6184_v10, %v6172_v9 }
 0x3c5   : > { %v6262_v15 = vadd.f32 %v6185_v12, %v366_v11 }
 0x3c7   : > { %6286 = vst [vmem:[#allocation2 + $0x20] sm:$0xff] %v6262_v15 }
 0x3c8   : > { %v6173_v18 = vpop.f32.mrf.mxu2 }
 0x3ca   : > { %v6186_v19 = vpop.f32.mrf.mxu3 }
 0x3d6   : > { %v6197_v20 = vpop.f32.mrf.mxu0 }
 0x3d8   : > { %v6210_v21 = vpop.f32.mrf.mxu1 }
 0x3d9   : > { %v6211_v22 = vadd.f32 %v6210_v21, %v6197_v20 }
 0x3de   : > { %v6199_v26 = vpop.f32.mrf.mxu0 }
 0x3e0   : > { %v6223_v23 = vpop.f32.mrf.mxu2  ;;  %v6212_v28 = vpop.f32.mrf.mxu1 }
 0x3e1   : > { %v6224_v24 = vadd.f32 %v6223_v23, %v6211_v22 }
 0x3e2   : > { %v6236_v25 = vpop.f32.mrf.mxu3 }
 0x3e3   : > { %v6237_v29 = vadd.f32 %v6236_v25, %v6224_v24 }
 0x3e5   : > { %v6263_v30 = vadd.f32 %v6237_v29, %v367_v27 }
 0x3e6   : > { %6291 = sbr.rel (%p11939_p7) target bundleno = 1338 (0x53a), region = 48 }
 0x3e7   : > { %6287 = vst [vmem:[#allocation2 + $0x8] sm:$0xff] %v6263_v30 }
 0x3e8   : > { %v6225_v33 = vpop.f32.mrf.mxu2 }
 0x3ea   : > { %v6238_v34 = vpop.f32.mrf.mxu3 }
 0x3eb   : > { %v13487_v35 = vld [vmem:[%s17037_s3 + $0x38] sm:$0xff]  ;;  %v13486_v39 = vld [vmem:[%s17037_s3 + $0x30] sm:$0xff]  ;;  %v13485_v43 = vld [vmem:[%s17037_s3 + $0x28] sm:$0xff] }
 0x3ec   : > { %v13495_v36 = vld [vmem:[%s17037_s3 + $0x78] sm:$0xff]  ;;  %8438 = vmatpush.bf16.msra.mxu0 %v13487_v35  ;;  %v13494_v40 = vld [vmem:[%s17037_s3 + $0x70] sm:$0xff]  ;;  %v13493_v44 = vld [vmem:[%s17037_s3 + $0x68] sm:$0xff] }
 0x3ed   : > { %v13503_v37 = vld [vmem:[%s17037_s3 + $0xb8] sm:$0xff]  ;;  %8451 = vmatpush.bf16.msra.mxu1 %v13495_v36  ;;  %v13502_v41 = vld [vmem:[%s17037_s3 + $0xb0] sm:$0xff]  ;;  %v13501_v45 = vld [vmem:[%s17037_s3 + $0xa8] sm:$0xff] }
 0x3ee   : > { %v13511_v38 = vld [vmem:[%s17037_s3 + $0xf8] sm:$0xff]  ;;  %8464 = vmatpush.bf16.msra.mxu2 %v13503_v37  ;;  %v13510_v42 = vld [vmem:[%s17037_s3 + $0xf0] sm:$0xff]  ;;  %v13509_v31 = vld [vmem:[%s17037_s3 + $0xe8] sm:$0xff] }
 0x3ef   : > { %8477 = vmatpush.bf16.msra.mxu3 %v13511_v38  ;;  %v13484_v46 = vld [vmem:[%s17037_s3 + $0x20] sm:$0xff]  ;;  %v13483_v48 = vld [vmem:[%s17037_s3 + $0x18] sm:$0xff]  ;;  %v13482_v51 = vld [vmem:[%s17037_s3 + $0x10] sm:$0xff] }
 0x3f0   : > { %8439 = vmatpush.bf16.msra.mxu0 %v13486_v39  ;;  %v13492_v32 = vld [vmem:[%s17037_s3 + $0x60] sm:$0xff]  ;;  %v13491_v17 = vld [vmem:[%s17037_s3 + $0x58] sm:$0xff]  ;;  %v13490_v52 = vld [vmem:[%s17037_s3 + $0x50] sm:$0xff] }
 0x3f1   : > { %8452 = vmatpush.bf16.msra.mxu1 %v13494_v40  ;;  %v13500_v47 = vld [vmem:[%s17037_s3 + $0xa0] sm:$0xff]  ;;  %v13499_v49 = vld [vmem:[%s17037_s3 + $0x98] sm:$0xff]  ;;  %v13498_v53 = vld [vmem:[%s17037_s3 + $0x90] sm:$0xff] }
 0x3f2   : > { %8465 = vmatpush.bf16.msra.mxu2 %v13502_v41  ;;  %v13508_v16 = vld [vmem:[%s17037_s3 + $0xe0] sm:$0xff]  ;;  %v13507_v50 = vld [vmem:[%s17037_s3 + $0xd8] sm:$0xff]  ;;  %v13506_v54 = vld [vmem:[%s17037_s3 + $0xd0] sm:$0xff] }
 0x3f3   : > { %8478 = vmatpush.bf16.msra.mxu3 %v13510_v42  ;;  %v6294_v55 = vld [vmem:[#allocation2 + $0x10] sm:$0xff]  ;;  %v6316_v56 = vld [vmem:[%s17036_s2] sm:$0xff]  ;;  %v6295_v60 = vld [vmem:[#allocation2 + $0x48] sm:$0xff] }
 0x3f4   : > { %8440 = vmatpush.bf16.msra.mxu0 %v13485_v43  ;;  %v6324_v57 = vperm.slane %v6316_v56, 2  ;;  %v6292_v58 = vld [vmem:[#allocation2 + $0xb0] sm:$0xff]  ;;  %v6322_v59 = vperm.slane %v6316_v56, 0  ;;  %v6325_v61 = vperm.slane %v6316_v56, 3  ;;  %v6293_v62 = vld [vmem:[#allocation2] sm:$0xff]  ;;  %v6323_v63 = vperm.slane %v6316_v56, 1 }
 0x3f5   : > { %8453 = vmatpush.bf16.msra.mxu1 %v13493_v44  ;;  %v6298_v0 = vld [vmem:[#allocation2 + $0x40] sm:$0xff]  ;;  %v6328_v1 = vperm.slane %v6316_v56, 6  ;;  %v6326_v3 = vperm.slane %v6316_v56, 4  ;;  %v6299_v4 = vld [vmem:[#allocation2 + $0x78] sm:$0xff]  ;;  %v6329_v8 = vperm.slane %v6316_v56, 7  ;;  %v6297_v9 = vld [vmem:[#allocation2 + $0x28] sm:$0xff] }
 0x3f6   : > { %8466 = vmatpush.bf16.msra.mxu2 %v13501_v45  ;;  %v6296_v2 = vld [vmem:[#allocation2 + $0x60] sm:$0xff]  ;;  %v6372_v5 = vadd.f32 %v6324_v57, %v6294_v55  ;;  %v6370_v6 = vadd.f32 %v6322_v59, %v6292_v58  ;;  %v6373_v7 = vadd.f32 %v6325_v61, %v6295_v60  ;;  %v6371_v10 = vadd.f32 %v6323_v63, %v6293_v62  ;;  %v13481_v14 = vld [vmem:[%s17037_s3 + $0x8] sm:$0xff]  ;;  %v13519_v42 = vld [vmem:[%s17037_s3 + $0x138] sm:$0xff] }
 0x3f7   : > { %8479 = vmatpush.bf16.msra.mxu3 %v13509_v31  ;;  %v6376_v11 = vadd.f32 %v6328_v1, %v6298_v0  ;;  %v6374_v12 = vadd.f32 %v6326_v3, %v6296_v2  ;;  %v6327_v13 = vperm.slane %v6316_v56, 5  ;;  %v13489_v15 = vld [vmem:[%s17037_s3 + $0x48] sm:$0xff]  ;;  %v6377_v21 = vadd.f32 %v6329_v8, %v6299_v4  ;;  %v13480_v34 = vld [vmem:[%s17037_s3] sm:$0xff]  ;;  %v13527_v43 = vld [vmem:[%s17037_s3 + $0x178] sm:$0xff] }
 0x3f8   : > { %8441 = vmatpush.bf16.msra.mxu0 %v13484_v46  ;;  %v6396_v18 = vsub.f32 0.0, %v6372_v5  ;;  %v6394_v19 = vsub.f32 0.0, %v6370_v6  ;;  %v6397_v20 = vsub.f32 0.0, %v6373_v7  ;;  %v13497_v22 = vld [vmem:[%s17037_s3 + $0x88] sm:$0xff]  ;;  %v6395_v24 = vsub.f32 0.0, %v6371_v10  ;;  %v13488_v35 = vld [vmem:[%s17037_s3 + $0x40] sm:$0xff] }
 0x3f9   : > { %8454 = vmatpush.bf16.msra.mxu1 %v13492_v32  ;;  %v13505_v23 = vld [vmem:[%s17037_s3 + $0xc8] sm:$0xff]  ;;  %v6400_v25 = vsub.f32 0.0, %v6376_v11  ;;  %v6398_v26 = vsub.f32 0.0, %v6374_v12  ;;  %v6375_v27 = vadd.f32 %v6327_v13, %v6297_v9  ;;  %v6401_v37 = vsub.f32 0.0, %v6377_v21  ;;  %v13496_v39 = vld [vmem:[%s17037_s3 + $0x80] sm:$0xff]  ;;  %v13535_v44 = vld [vmem:[%s17037_s3 + $0x1b8] sm:$0xff] }
 0x3fa   : > { %8467 = vmatpush.bf16.msra.mxu2 %v13500_v47  ;;  %v6422_v28 = vmul.f32 1.442695, %v6396_v18  ;;  %v6418_v29 = vmul.f32 1.442695, %v6394_v19  ;;  %v6424_v30 = vmul.f32 1.442695, %v6397_v20 }
 0x3fb   : > { %8480 = vmatpush.bf16.msra.mxu3 %v13508_v16  ;;  %v6420_v33 = vmul.f32 1.442695, %v6395_v24  ;;  %v6430_v36 = vmul.f32 1.442695, %v6400_v25  ;;  %v6399_v38 = vsub.f32 0.0, %v6375_v27  ;;  %v13504_v40 = vld [vmem:[%s17037_s3 + $0xc0] sm:$0xff] }
 0x3fc   : > { %8442 = vmatpush.bf16.msra.mxu0 %v13483_v48  ;;  %13699 = vpow2.f32 %v6422_v28  ;;  %v6426_v41 = vmul.f32 1.442695, %v6398_v26  ;;  %v13543_v45 = vld [vmem:[%s17037_s3 + $0x1f8] sm:$0xff]  ;;  %v6432_v31 = vmul.f32 1.442695, %v6401_v37  ;;  %v15645_v32 = vld [vmem:[%s17036_s2 + $0x8] sm:$0xff] }
 0x3fd   : > { %8455 = vmatpush.bf16.msra.mxu1 %v13491_v17  ;;  %13701 = vpow2.f32 %v6418_v29  ;;  %v6428_v46 = vmul.f32 1.442695, %v6399_v38  ;;  %v13518_v16 = vld [vmem:[%s17037_s3 + $0x130] sm:$0xff]  ;;  %v6300_v55 = vld [vmem:[#allocation2 + $0x88] sm:$0xff]  ;;  %v6332_v56 = vperm.slane %v15645_v32, 2  ;;  %v6331_v57 = vperm.slane %v15645_v32, 1 }
 0x3fe   : > { %8468 = vmatpush.bf16.msra.mxu2 %v13499_v49  ;;  %13703 = vpow2.f32 %v6424_v30  ;;  %v13526_v48 = vld [vmem:[%s17037_s3 + $0x170] sm:$0xff]  ;;  %v6302_v59 = vld [vmem:[#allocation2 + $0x18] sm:$0xff]  ;;  %v13517_v62 = vld [vmem:[%s17037_s3 + $0x128] sm:$0xff]  ;;  %v6333_v2 = vperm.slane %v15645_v32, 3 }
 0x3ff   : > { %8481 = vmatpush.bf16.msra.mxu3 %v13507_v50  ;;  %13705 = vpow2.f32 %v6420_v33  ;;  %v13534_v49 = vld [vmem:[%s17037_s3 + $0x1b0] sm:$0xff]  ;;  %v13525_v63 = vld [vmem:[%s17037_s3 + $0x168] sm:$0xff]  ;;  %v15693_v12 = vadd.f32 %v6332_v56, %v6302_v59  ;;  %v13516_v19 = vld [vmem:[%s17037_s3 + $0x120] sm:$0xff] }
 0x400   : > { %8443 = vmatpush.bf16.msra.mxu0 %v13482_v51  ;;  %13707 = vpow2.f32 %v6430_v36  ;;  %v13542_v50 = vld [vmem:[%s17037_s3 + $0x1f0] sm:$0xff]  ;;  %v13533_v4 = vld [vmem:[%s17037_s3 + $0x1a8] sm:$0xff]  ;;  %v13524_v20 = vld [vmem:[%s17037_s3 + $0x160] sm:$0xff] }
 0x401   : > { %8456 = vmatpush.bf16.msra.mxu1 %v13490_v52  ;;  %13709 = vpow2.f32 %v6426_v41  ;;  %v6330_v52 = vperm.slane %v15645_v32, 0  ;;  %v6301_v60 = vld [vmem:[#allocation2 + $0x90] sm:$0xff]  ;;  %v13541_v5 = vld [vmem:[%s17037_s3 + $0x1e8] sm:$0xff]  ;;  %v13532_v26 = vld [vmem:[%s17037_s3 + $0x1a0] sm:$0xff] }
 0x402   : > { %8469 = vmatpush.bf16.msra.mxu2 %v13498_v53  ;;  %v13700_v47 = vpop.eup %13699  ;;  %13711 = vpow2.f32 %v6432_v31  ;;  %v15695_v13 = vadd.f32 %v6331_v57, %v6301_v60  ;;  %v13540_v27 = vld [vmem:[%s17037_s3 + $0x1e0] sm:$0xff]  ;;  %v13523_v41 = vld [vmem:[%s17037_s3 + $0x158] sm:$0xff]  ;;  %v13514_v60 = vld [vmem:[%s17037_s3 + $0x110] sm:$0xff] }
 0x403   : > { %8482 = vmatpush.bf16.msra.mxu3 %v13506_v54  ;;  %v13702_v17 = vpop.eup %13701  ;;  %v15659_v51 = vadd.f32 1.0, %v13700_v47  ;;  %13713 = vpow2.f32 %v6428_v46  ;;  %v15688_v9 = vadd.f32 %v6330_v52, %v6300_v55  ;;  %v13539_v31 = vld [vmem:[%s17037_s3 + $0x1d8] sm:$0xff]  ;;  %v13528_v47 = vld [vmem:[%s17037_s3 + $0x180] sm:$0xff] }
 0x404   : > { %8444 = vmatpush.bf16.msra.mxu0 %v13481_v14  ;;  %v13704_v53 = vpop.eup %13703  ;;  %v15662_v54 = vadd.f32 1.0, %v13702_v17 }
 0x405   : > { %8457 = vmatpush.bf16.msra.mxu1 %v13489_v15  ;;  %v13706_v58 = vpop.eup %13705  ;;  %13715 = vrcp.f32 %v15659_v51  ;;  %v6529_v0 = vand.u32 2147483647, %v15659_v51  ;;  %v6531_v1 = vand.u32 2147483648, %v15659_v51  ;;  %v15684_v7 = vadd.f32 1.0, %v13704_v53 }
 0x406   : > { %8470 = vmatpush.bf16.msra.mxu2 %v13497_v22  ;;  %v13708_v61 = vpop.eup %13707  ;;  %13717 = vrcp.f32 %v15662_v54  ;;  %v6499_v6 = vand.u32 2147483647, %v15662_v54  ;;  %v15686_v8 = vadd.f32 1.0, %v13706_v58  ;;  %v6501_v10 = vand.u32 2147483648, %v15662_v54 }
 0x407   : > { %8483 = vmatpush.bf16.msra.mxu3 %v13505_v23  ;;  %v13710_v3 = vpop.eup %13709  ;;  %v15691_v11 = vadd.f32 1.0, %v13708_v61  ;;  %vm6525_vm0 = vweird.f32 %v15659_v51  ;;  %vm6495_vm1 = vweird.f32 %v15662_v54  ;;  %13719 = vrcp.f32 %v15684_v7  ;;  %v13522_v61 = vld [vmem:[%s17037_s3 + $0x150] sm:$0xff] }
 0x408   : > { %8445 = vmatpush.bf16.msra.mxu0 %v13480_v34  ;;  %v15697_v14 = vpop.eup %13711  ;;  %v6546_v15 = vand.u32 2147483648, %v15684_v7  ;;  %vm15711_vm2 = vcmp.eq.f32.partialorder %v6529_v0, 8.507059e+37  ;;  %v15715_v22 = vor.u32 1.1754944e-38, %v6531_v1  ;;  %v6544_v23 = vand.u32 2147483647, %v15684_v7 }
 0x409   : > { %8458 = vmatpush.bf16.msra.mxu1 %v13488_v35  ;;  %v15703_v18 = vpop.eup %13713  ;;  %13721 = vrcp.f32 %v15686_v8  ;;  %v15719_v24 = vadd.f32 1.0, %v13710_v3  ;;  %vm15729_vm3 = vcmp.eq.f32.partialorder %v6499_v6, 8.507059e+37  ;;  %v6514_v29 = vand.u32 2147483647, %v15686_v8  ;;  %v13530_v3 = vld [vmem:[%s17037_s3 + $0x190] sm:$0xff] }
 0x40a   : > { %8471 = vmatpush.bf16.msra.mxu2 %v13496_v39  ;;  %v6516_v30 = vand.u32 2147483648, %v15686_v8  ;;  %13723 = vrcp.f32 %v15691_v11  ;;  %v15740_v35 = vor.u32 1.1754944e-38, %v6501_v10  ;;  %vm6540_vm4 = vweird.f32 %v15684_v7 }
 0x40b   : > { %8484 = vmatpush.bf16.msra.mxu3 %v13504_v40  ;;  %v15721_v25 = vpop.eup %13715  ;;  %vm6510_vm5 = vweird.f32 %v15686_v8  ;;  %v15746_v37 = vor.u32 1.1754944e-38, %v6546_v15  ;;  %v6589_v38 = vand.u32 2147483647, %v15691_v11  ;;  %v6591_v39 = vand.u32 2147483648, %v15691_v11  ;;  %v13515_v40 = vld [vmem:[%s17037_s3 + $0x118] sm:$0xff] }
 0x40c   : > { %8490 = vmatpush.bf16.msrb.mxu0 %v13519_v42  ;;  %v15736_v33 = vpop.eup %13717  ;;  %v6521_v34 = vmul.f32 %v15721_v25, %v15659_v51  ;;  %vm6526_vm6 = vweird.f32 %v15721_v25  ;;  %vm15757_vm7 = vcmp.eq.f32.partialorder %v6544_v23, 8.507059e+37  ;;  %vm6585_vm8 = vweird.f32 %v15691_v11 }
 0x40d   : > { %8503 = vmatpush.bf16.msrb.mxu1 %v13527_v43  ;;  %v6491_v36 = vmul.f32 %v15736_v33, %v15662_v54  ;;  %13725 = vrcp.f32 %v15719_v24  ;;  %vm6496_vm9 = vweird.f32 %v15736_v33  ;;  %vm15772_vm10 = vcmp.eq.f32.partialorder %v6514_v29, 8.507059e+37  ;;  %vm15794_vm12 = vmor %vm6525_vm0, %vm6526_vm6  ;;  %v13538_v54 = vld [vmem:[%s17037_s3 + $0x1d0] sm:$0xff]  ;;  %v13520_v43 = vld [vmem:[%s17037_s3 + $0x140] sm:$0xff] }
 0x40e   : > { %8516 = vmatpush.bf16.msrb.mxu2 %v13535_v44  ;;  %v6522_v42 = vsub.f32 1.0, %v6521_v34  ;;  %v15763_v44 = vpop.eup %13719  ;;  %v15784_v52 = vor.u32 1.1754944e-38, %v6591_v39  ;;  %vm6555_vm11 = vweird.f32 %v15719_v24  ;;  %v6559_v53 = vand.u32 2147483647, %v15719_v24  ;;  %vm15818_vm0 = vmor %vm6495_vm1, %vm6496_vm9  ;;  %v13529_v34 = vld [vmem:[%s17037_s3 + $0x188] sm:$0xff] }
 0x40f   : > { %8529 = vmatpush.bf16.msrb.mxu3 %v13543_v45  ;;  %v13531_v45 = vld [vmem:[%s17037_s3 + $0x198] sm:$0xff]  ;;  %v6492_v46 = vsub.f32 1.0, %v6491_v36  ;;  %v15779_v17 = vpop.eup %13721  ;;  %vm6541_vm13 = vweird.f32 %v15763_v44  ;;  %vm15803_vm15 = vcmp.eq.f32.partialorder %v6589_v38, 8.507059e+37  ;;  %v15835_v6 = vadd.f32 1.0, %v15697_v14 }
 0x410   : > { %8491 = vmatpush.bf16.msrb.mxu0 %v13518_v16  ;;  %v15776_v16 = vor.u32 1.1754944e-38, %v6516_v30  ;;  %v15788_v55 = vpop.eup %13723  ;;  %v6506_v58 = vmul.f32 %v15779_v17, %v15686_v8  ;;  %vm6511_vm14 = vweird.f32 %v15779_v17  ;;  %v15844_v23 = vadd.f32 1.0, %v15703_v18  ;;  %vm15856_vm6 = vmor %vm6540_vm4, %vm6541_vm13  ;;  %v13513_v30 = vld [vmem:[%s17037_s3 + $0x108] sm:$0xff] }
 0x411   : > { %8504 = vmatpush.bf16.msrb.mxu1 %v13526_v48  ;;  %v6561_v48 = vand.u32 2147483648, %v15719_v24  ;;  %v6493_v57 = vmul.f32 %v15736_v33, %v6492_v46  ;;  %v6581_v0 = vmul.f32 %v15788_v55, %v15691_v11  ;;  %vm6586_vm1 = vweird.f32 %v15788_v55  ;;  %v6303_v46 = vld [vmem:[#allocation2 + $0x98] sm:$0xff] }
 0x412   : > { %8517 = vmatpush.bf16.msrb.mxu2 %v13534_v49  ;;  %v6523_v49 = vmul.f32 %v15721_v25, %v6522_v42  ;;  %13727 = vrcp.f32 %v15835_v6  ;;  %v6606_v56 = vand.u32 2147483648, %v15835_v6  ;;  %vm6570_vm9 = vweird.f32 %v15844_v23 }
 0x413   : > { %8530 = vmatpush.bf16.msrb.mxu3 %v13542_v50  ;;  %v6536_v50 = vmul.f32 %v15763_v44, %v15684_v7  ;;  %v15824_v1 = vor.u32 1.1754944e-38, %v6561_v48  ;;  %v15837_v10 = vpop.eup %13725  ;;  %13729 = vrcp.f32 %v15844_v23 }
 0x414   : > { %8492 = vmatpush.bf16.msrb.mxu0 %v13517_v62  ;;  %v6524_v51 = vadd.f32 %v15721_v25, %v6523_v49  ;;  %v6551_v18 = vmul.f32 %v15837_v10, %v15719_v24  ;;  %vm6556_vm4 = vweird.f32 %v15837_v10 }
 0x415   : > { %8505 = vmatpush.bf16.msrb.mxu1 %v13525_v63  ;;  %v6537_v63 = vsub.f32 1.0, %v6536_v50  ;;  %v6604_v50 = vand.u32 2147483647, %v15835_v6 }
 0x416   : > { %8518 = vmatpush.bf16.msrb.mxu2 %v13533_v4  ;;  %v6494_v4 = vadd.f32 %v15736_v33, %v6493_v57  ;;  %v6528_v15 = vsel %vm15794_vm12, %v15721_v25, %v6524_v51  ;;  %v13551_v57 = vld [vmem:[%s17037_s3 + $0x238] sm:$0xff]  ;;  %v6403_v25 = vsub.f32 0.0, %v15695_v13 }
 0x417   : > { %8531 = vmatpush.bf16.msrb.mxu3 %v13541_v5  ;;  %v6507_v5 = vsub.f32 1.0, %v6506_v58 }
 0x418   : > { %8493 = vmatpush.bf16.msrb.mxu0 %v13516_v19  ;;  %v6538_v19 = vmul.f32 %v15763_v44, %v6537_v63  ;;  %v6498_v14 = vsel %vm15818_vm0, %v15736_v33, %v6494_v4  ;;  %v13521_v33 = vld [vmem:[%s17037_s3 + $0x148] sm:$0xff]  ;;  %v15986_v59 = vpop.eup %13727 }
 0x419   : > { %8506 = vmatpush.bf16.msrb.mxu1 %v13524_v20  ;;  %v6582_v20 = vsub.f32 1.0, %v6581_v0  ;;  %v6503_v7 = vsel %vm15729_vm3, %v15740_v35, %v6498_v14  ;;  %v13537_v35 = vld [vmem:[%s17037_s3 + $0x1c8] sm:$0xff]  ;;  %vm15902_vm3 = vmor %vm6585_vm8, %vm6586_vm1  ;;  %vm6600_vm8 = vweird.f32 %v15835_v6  ;;  %v15995_v0 = vor.u32 1.1754944e-38, %v6606_v56 }
 0x41a   : > { %8519 = vmatpush.bf16.msrb.mxu2 %v13532_v26  ;;  %v6533_v26 = vsel %vm15711_vm2, %v15715_v22, %v6528_v15  ;;  %v6539_v22 = vadd.f32 %v15763_v44, %v6538_v19  ;;  %vm15874_vm2 = vmor %vm6510_vm5, %vm6511_vm14  ;;  %6850 = vst [vmem:[%s17040_s6] sm:$0xff] %v6503_v7  ;;  %v6874_v28 = vpack.c.bf16 %v6503_v7, %v6503_v7  ;;  %v13558_v15 = vld [vmem:[%s17037_s3 + $0x270] sm:$0xff] }
 0x41b   : > { %8532 = vmatpush.bf16.msrb.mxu3 %v13540_v27  ;;  %v6508_v27 = vmul.f32 %v15779_v17, %v6507_v5  ;;  %6852 = vst [vmem:[%s17040_s6 + $0x10] sm:$0xff] %v6533_v26  ;;  %v6876_v21 = vpack.c.bf16 %v6533_v26, %v6533_v26  ;;  %v6583_v36 = vmul.f32 %v15788_v55, %v6582_v20  ;;  %vm15945_vm5 = vmor %vm6555_vm11, %vm6556_vm4  ;;  %v6574_v5 = vand.u32 2147483647, %v15844_v23  ;;  %v13566_v19 = vld [vmem:[%s17037_s3 + $0x2b0] sm:$0xff] }
 0x41c   : > { %8494 = vmatpush.bf16.msrb.mxu0 %v13515_v40  ;;  %v6543_v38 = vsel %vm15856_vm6, %v15763_v44, %v6539_v22  ;;  %v6552_v40 = vsub.f32 1.0, %v6551_v18  ;;  %v6402_v44 = vsub.f32 0.0, %v15688_v9  ;;  %v6596_v4 = vmul.f32 %v15986_v59, %v15835_v6  ;;  %v6304_v18 = vld [vmem:[#allocation2 + $0x38] sm:$0xff]  ;;  %v6306_v7 = vld [vmem:[#allocation2 + $0x70] sm:$0xff]  ;;  %v16028_v22 = vpop.eup %13729  ;;  %v13557_v6 = vld [vmem:[%s17037_s3 + $0x268] sm:$0xff] }
 0x41d   : > { %8507 = vmatpush.bf16.msrb.mxu1 %v13523_v41  ;;  %v6509_v8 = vadd.f32 %v15779_v17, %v6508_v27  ;;  %8472 = vmatmul.bf16.vlgmr.msra.gmra.mxu2 %v6876_v21  ;;  %v6548_v41 = vsel %vm15757_vm7, %v15746_v37, %v6543_v38  ;;  %v6584_v11 = vadd.f32 %v15788_v55, %v6583_v36  ;;  %v13512_v37 = vld [vmem:[%s17037_s3 + $0x100] sm:$0xff]  ;;  %vm15965_vm7 = vcmp.eq.f32.partialorder %v6559_v53, 8.507059e+37 }
 0x41e   : > { %8520 = vmatpush.bf16.msrb.mxu2 %v13531_v45  ;;  %8446 = vmatmul.bf16.vlgmr.msra.gmra.mxu0 %v6874_v28  ;;  %6853 = vst [vmem:[%s17040_s6 + $0x18] sm:$0xff] %v6548_v41  ;;  %v6877_v45 = vpack.c.bf16 %v6548_v41, %v6548_v41  ;;  %v6553_v9 = vmul.f32 %v15837_v10, %v6552_v40  ;;  %vm6601_vm11 = vweird.f32 %v15986_v59  ;;  %v6404_v26 = vsub.f32 0.0, %v15693_v12 }
 0x41f   : > { %8533 = vmatpush.bf16.msrb.mxu3 %v13539_v31  ;;  %v6513_v42 = vsel %vm15874_vm2, %v15779_v17, %v6509_v8  ;;  %v6588_v17 = vsel %vm15902_vm3, %v15788_v55, %v6584_v11  ;;  %v13559_v55 = vld [vmem:[%s17037_s3 + $0x278] sm:$0xff]  ;;  %v6381_v53 = vadd.f32 %v6333_v2, %v6303_v46  ;;  %v13550_v2 = vld [vmem:[%s17037_s3 + $0x230] sm:$0xff]  ;;  %v6597_v14 = vsub.f32 1.0, %v6596_v4  ;;  %vm16041_vm13 = vmor %vm6600_vm8, %vm6601_vm11 }
 0x420   : > { %8495 = vmatpush.bf16.msrb.mxu0 %v13514_v60  ;;  %v6518_v31 = vsel %vm15772_vm10, %v15776_v16, %v6513_v42  ;;  %v13536_v16 = vld [vmem:[%s17037_s3 + $0x1c0] sm:$0xff]  ;;  %8485 = vmatmul.bf16.vlgmr.msra.gmra.mxu3 %v6877_v45  ;;  %v15960_v58 = vsel %vm15803_vm15, %v15784_v52, %v6588_v17  ;;  %v6554_v51 = vadd.f32 %v15837_v10, %v6553_v9  ;;  %v13575_v52 = vld [vmem:[%s17037_s3 + $0x2f8] sm:$0xff]  ;;  %vm15991_vm10 = vcmp.eq.f32.partialorder %v6604_v50, 8.507059e+37  ;;  %v13565_v45 = vld [vmem:[%s17037_s3 + $0x2a8] sm:$0xff] }
 0x421   : > { %8508 = vmatpush.bf16.msrb.mxu1 %v13522_v61  ;;  %6851 = vst [vmem:[%s17040_s6 + $0x8] sm:$0xff] %v6518_v31  ;;  %v6875_v48 = vpack.c.bf16 %v6518_v31, %v6518_v31  ;;  %v13567_v61 = vld [vmem:[%s17037_s3 + $0x2b8] sm:$0xff]  ;;  %v6880_v24 = vpack.c.bf16 %v15960_v58, %v15960_v58  ;;  %v6405_v27 = vsub.f32 0.0, %v6381_v53  ;;  %v6334_v21 = vperm.slane %v15645_v32, 4  ;;  %v6307_v11 = vld [vmem:[#allocation2 + $0xa0] sm:$0xff]  ;;  %v13573_v31 = vld [vmem:[%s17037_s3 + $0x2e8] sm:$0xff] }
 0x422   : > { %8521 = vmatpush.bf16.msrb.mxu2 %v13530_v3  ;;  %6856 = vst [vmem:[%s17040_s6 + $0x30] sm:$0xff] %v15960_v58  ;;  %v6558_v62 = vsel %vm15945_vm5, %v15837_v10, %v6554_v51  ;;  %v6434_v3 = vmul.f32 1.442695, %v6402_v44  ;;  %v6576_v10 = vand.u32 2147483648, %v15844_v23  ;;  %v6438_v29 = vmul.f32 1.442695, %v6404_v26 }
 0x423   : > { %8534 = vmatpush.bf16.msrb.mxu3 %v13538_v54  ;;  %8459 = vmatmul.bf16.vlgmr.msra.gmra.mxu1 %v6875_v48  ;;  %v16003_v54 = vsel %vm15965_vm7, %v15824_v1, %v6558_v62  ;;  %v13574_v1 = vld [vmem:[%s17037_s3 + $0x2f0] sm:$0xff]  ;;  %v6335_v28 = vperm.slane %v15645_v32, 5  ;;  %v6337_v12 = vperm.slane %v15645_v32, 7  ;;  %v6598_v8 = vmul.f32 %v15986_v59, %v6597_v14  ;;  %v13548_v50 = vld [vmem:[%s17037_s3 + $0x220] sm:$0xff] }
 0x424   : > { %8496 = vmatpush.bf16.msrb.mxu0 %v13513_v30  ;;  %6854 = vst [vmem:[%s17040_s6 + $0x20] sm:$0xff] %v16003_v54  ;;  %v6878_v20 = vpack.c.bf16 %v16003_v54, %v16003_v54  ;;  %13731 = vpow2.f32 %v6434_v3  ;;  %v6336_v30 = vperm.slane %v15645_v32, 6  ;;  %v6566_v13 = vmul.f32 %v16028_v22, %v15844_v23  ;;  %v13549_v32 = vld [vmem:[%s17037_s3 + $0x228] sm:$0xff]  ;;  %v13572_v23 = vld [vmem:[%s17037_s3 + $0x2e0] sm:$0xff] }
 0x425   : > { %8509 = vmatpush.bf16.msrb.mxu1 %v13521_v33  ;;  %v6305_v33 = vld [vmem:[#allocation2 + $0x50] sm:$0xff]  ;;  %vm6571_vm12 = vweird.f32 %v16028_v22  ;;  %13733 = vpow2.f32 %v6438_v29  ;;  %v6440_v36 = vmul.f32 1.442695, %v6405_v27  ;;  %v6382_v38 = vadd.f32 %v6334_v21, %v6304_v18 }
 0x426   : > { %8522 = vmatpush.bf16.msrb.mxu2 %v13529_v34  ;;  %v6436_v34 = vmul.f32 1.442695, %v6403_v25  ;;  %v6384_v39 = vadd.f32 %v6336_v30, %v6306_v7  ;;  %v6599_v40 = vadd.f32 %v15986_v59, %v6598_v8  ;;  %v6567_v41 = vsub.f32 1.0, %v6566_v13  ;;  %vm16074_vm14 = vmor %vm6570_vm9, %vm6571_vm12  ;;  %v13546_v7 = vld [vmem:[%s17037_s3 + $0x210] sm:$0xff] }
 0x427   : > { %8535 = vmatpush.bf16.msrb.mxu3 %v13537_v35  ;;  %v6383_v42 = vadd.f32 %v6335_v28, %v6305_v33  ;;  %vm16087_vm15 = vcmp.eq.f32.partialorder %v6574_v5, 8.507059e+37  ;;  %v13562_v13 = vld [vmem:[%s17037_s3 + $0x290] sm:$0xff] }
 0x428   : > { %8497 = vmatpush.bf16.msrb.mxu0 %v13512_v37  ;;  %13735 = vpow2.f32 %v6436_v34  ;;  %v6577_v37 = vor.u32 1.1754944e-38, %v6576_v10  ;;  %v6408_v9 = vsub.f32 0.0, %v6384_v39  ;;  %v6603_v46 = vsel %vm16041_vm13, %v15986_v59, %v6599_v40  ;;  %v13570_v34 = vld [vmem:[%s17037_s3 + $0x2d0] sm:$0xff] }
 0x429   : > { %8510 = vmatpush.bf16.msrb.mxu1 %v13520_v43  ;;  %13737 = vpow2.f32 %v6440_v36  ;;  %v6406_v43 = vsub.f32 0.0, %v6382_v38  ;;  %v6568_v48 = vmul.f32 %v16028_v22, %v6567_v41  ;;  %v6608_v17 = vsel %vm15991_vm10, %v15995_v0, %v6603_v46  ;;  %v13598_v39 = vld [vmem:[%s17037_s3 + $0x3b0] sm:$0xff] }
 0x42a   : > { %8523 = vmatpush.bf16.msrb.mxu2 %v13528_v47  ;;  %v13732_v44 = vpop.eup %13731  ;;  %6857 = vst [vmem:[%s17040_s6 + $0x38] sm:$0xff] %v6608_v17  ;;  %v6881_v58 = vpack.c.bf16 %v6608_v17, %v6608_v17 }
 0x42b   : > { %8536 = vmatpush.bf16.msrb.mxu3 %v13536_v16  ;;  %v16062_v47 = vadd.f32 1.0, %v13732_v44  ;;  %v6407_v16 = vsub.f32 0.0, %v6383_v42  ;;  %v6442_v56 = vmul.f32 1.442695, %v6406_v43  ;;  %v6569_v51 = vadd.f32 %v16028_v22, %v6568_v48 }
 0x42c   : > { %8542 = vmatpush.bf16.msra.mxu0 %v13551_v57  ;;  %v6446_v57 = vmul.f32 1.442695, %v6408_v9  ;;  %v13553_v9 = vld [vmem:[%s17037_s3 + $0x248] sm:$0xff] }
 0x42d   : > { %8555 = vmatpush.bf16.msra.mxu1 %v13559_v55  ;;  %8524 = vmatmul.bf16.vlgmr.msrb.gmra.mxu2 %v6880_v24  ;;  %v6385_v55 = vadd.f32 %v6337_v12, %v6307_v11  ;;  %13739 = vrcp.f32 %v16062_v47  ;;  %v13564_v24 = vld [vmem:[%s17037_s3 + $0x2a0] sm:$0xff]  ;;  %v6573_v59 = vsel %vm16074_vm14, %v16028_v22, %v6569_v51  ;;  %v6444_v63 = vmul.f32 1.442695, %v6407_v16  ;;  %v13554_v12 = vld [vmem:[%s17037_s3 + $0x250] sm:$0xff]  ;;  %v13545_v11 = vld [vmem:[%s17037_s3 + $0x208] sm:$0xff] }
 0x42e   : > { %8568 = vmatpush.bf16.msra.mxu2 %v13567_v61  ;;  %8498 = vmatmul.bf16.vlgmr.msrb.gmra.mxu0 %v6878_v20  ;;  %v13556_v61 = vld [vmem:[%s17037_s3 + $0x260] sm:$0xff]  ;;  %13741 = vpow2.f32 %v6442_v56  ;;  %v6578_v3 = vsel %vm16087_vm15, %v6577_v37, %v6573_v59  ;;  %v6619_v54 = vand.u32 2147483647, %v16062_v47  ;;  %v13571_v20 = vld [vmem:[%s17037_s3 + $0x2d8] sm:$0xff]  ;;  %vm6615_vm0 = vweird.f32 %v16062_v47  ;;  %v13561_v16 = vld [vmem:[%s17037_s3 + $0x288] sm:$0xff] }
 0x42f   : > { %8581 = vmatpush.bf16.msra.mxu3 %v13575_v52  ;;  %v13734_v52 = vpop.eup %13733  ;;  %13743 = vpow2.f32 %v6446_v57  ;;  %v6409_v5 = vsub.f32 0.0, %v6385_v55  ;;  %6855 = vst [vmem:[%s17040_s6 + $0x28] sm:$0xff] %v6578_v3  ;;  %v6879_v10 = vpack.c.bf16 %v6578_v3, %v6578_v3 }
 0x430   : > { %8543 = vmatpush.bf16.msra.mxu0 %v13550_v2  ;;  %v13736_v53 = vpop.eup %13735  ;;  %v16104_v62 = vadd.f32 1.0, %v13734_v52  ;;  %8537 = vmatmul.bf16.vlgmr.msrb.gmra.mxu3 %v6881_v58  ;;  %v13547_v2 = vld [vmem:[%s17037_s3 + $0x218] sm:$0xff]  ;;  %vm16142_vm1 = vcmp.eq.f32.partialorder %v6619_v54, 8.507059e+37  ;;  %v13544_v58 = vld [vmem:[%s17037_s3 + $0x200] sm:$0xff] }
 0x431   : > { %8556 = vmatpush.bf16.msra.mxu1 %v13558_v15  ;;  %v13738_v0 = vpop.eup %13737  ;;  %v16112_v4 = vadd.f32 1.0, %v13736_v53  ;;  %v13555_v15 = vld [vmem:[%s17037_s3 + $0x258] sm:$0xff]  ;;  %v6448_v33 = vmul.f32 1.442695, %v6409_v5 }
 0x432   : > { %8569 = vmatpush.bf16.msra.mxu2 %v13566_v19  ;;  %v6621_v19 = vand.u32 2147483648, %v16062_v47  ;;  %13745 = vrcp.f32 %v16104_v62  ;;  %v6649_v26 = vand.u32 2147483647, %v16104_v62  ;;  %v6651_v25 = vand.u32 2147483648, %v16104_v62 }
 0x433   : > { %8582 = vmatpush.bf16.msra.mxu3 %v13574_v1  ;;  %v13563_v1 = vld [vmem:[%s17037_s3 + $0x298] sm:$0xff]  ;;  %13747 = vrcp.f32 %v16112_v4  ;;  %v16131_v14 = vpop.eup %13739  ;;  %8511 = vmatmul.bf16.vlgmr.msrb.gmra.mxu1 %v6879_v10  ;;  %v6634_v27 = vand.u32 2147483647, %v16112_v4  ;;  %v16135_v18 = vadd.f32 1.0, %v13738_v0  ;;  %v6636_v30 = vand.u32 2147483648, %v16112_v4  ;;  %v13560_v0 = vld [vmem:[%s17037_s3 + $0x280] sm:$0xff] }
 0x434   : > { %8544 = vmatpush.bf16.msra.mxu0 %v13549_v32  ;;  %13749 = vpow2.f32 %v6444_v63  ;;  %v13742_v21 = vpop.eup %13741  ;;  %v6611_v22 = vmul.f32 %v16131_v14, %v16062_v47  ;;  %v6622_v8 = vor.u32 1.1754944e-38, %v6621_v19  ;;  %vm6645_vm6 = vweird.f32 %v16104_v62  ;;  %v13569_v47 = vld [vmem:[%s17037_s3 + $0x2c8] sm:$0xff]  ;;  %v13591_v19 = vld [vmem:[%s17037_s3 + $0x378] sm:$0xff] }
 0x435   : > { %8557 = vmatpush.bf16.msra.mxu1 %v13557_v6  ;;  %v13744_v28 = vpop.eup %13743  ;;  %vm6630_vm2 = vweird.f32 %v16112_v4  ;;  %13751 = vrcp.f32 %v16135_v18  ;;  %vm6616_vm3 = vweird.f32 %v16131_v14  ;;  %v16160_v32 = vadd.f32 1.0, %v13742_v21 }
 0x436   : > { %8570 = vmatpush.bf16.msra.mxu2 %v13565_v45  ;;  %v6612_v35 = vsub.f32 1.0, %v6611_v22  ;;  %v16162_v36 = vadd.f32 1.0, %v13744_v28  ;;  %vm16166_vm4 = vcmp.eq.f32.partialorder %v6649_v26, 8.507059e+37  ;;  %v16170_v40 = vor.u32 1.1754944e-38, %v6651_v25  ;;  %vm16195_vm7 = vmor %vm6615_vm0, %vm6616_vm3 }
 0x437   : > { %8583 = vmatpush.bf16.msra.mxu3 %v13573_v31  ;;  %vm16172_vm5 = vcmp.eq.f32.partialorder %v6634_v27, 8.507059e+37  ;;  %v6664_v41 = vand.u32 2147483647, %v16135_v18  ;;  %v16185_v31 = vor.u32 1.1754944e-38, %v6636_v30  ;;  %v6666_v37 = vand.u32 2147483648, %v16135_v18  ;;  %v13587_v30 = vld [vmem:[%s17037_s3 + $0x358] sm:$0xff] }
 0x438   : > { %8545 = vmatpush.bf16.msra.mxu0 %v13548_v50  ;;  %v16164_v38 = vpop.eup %13745  ;;  %v6613_v44 = vmul.f32 %v16131_v14, %v6612_v35  ;;  %vm6660_vm9 = vweird.f32 %v16135_v18  ;;  %13753 = vrcp.f32 %v16160_v32  ;;  %v6681_v10 = vand.u32 2147483648, %v16160_v32 }
 0x439   : > { %8558 = vmatpush.bf16.msra.mxu1 %v13556_v61  ;;  %v16177_v42 = vpop.eup %13747  ;;  %v6641_v45 = vmul.f32 %v16164_v38, %v16104_v62  ;;  %vm6646_vm8 = vweird.f32 %v16164_v38  ;;  %13755 = vrcp.f32 %v16162_v36  ;;  %vm16217_vm11 = vcmp.eq.f32.partialorder %v6664_v41, 8.507059e+37  ;;  %v13568_v62 = vld [vmem:[%s17037_s3 + $0x2c0] sm:$0xff] }
 0x43a   : > { %8571 = vmatpush.bf16.msra.mxu2 %v13564_v24  ;;  %v13750_v43 = vpop.eup %13749  ;;  %v6626_v48 = vmul.f32 %v16177_v42, %v16112_v4  ;;  %v6614_v17 = vadd.f32 %v16131_v14, %v6613_v44  ;;  %vm6631_vm10 = vweird.f32 %v16177_v42  ;;  %13757 = vpow2.f32 %v6448_v33  ;;  %v13552_v24 = vld [vmem:[%s17037_s3 + $0x240] sm:$0xff]  ;;  %vm16244_vm12 = vmor %vm6645_vm6, %vm6646_vm8  ;;  %v13595_v33 = vld [vmem:[%s17037_s3 + $0x398] sm:$0xff] }
 0x43b   : > { %8584 = vmatpush.bf16.msra.mxu3 %v13572_v23  ;;  %v6642_v49 = vsub.f32 1.0, %v6641_v45  ;;  %v16212_v50 = vadd.f32 1.0, %v13750_v43  ;;  %v16214_v56 = vpop.eup %13751  ;;  %v16230_v52 = vor.u32 1.1754944e-38, %v6666_v37  ;;  %v13583_v23 = vld [vmem:[%s17037_s3 + $0x338] sm:$0xff]  ;;  %vm16265_vm14 = vmor %vm6630_vm2, %vm6631_vm10  ;;  %vm6675_vm15 = vweird.f32 %v16160_v32 }
 0x43c   : > { %8546 = vmatpush.bf16.msra.mxu0 %v13547_v2  ;;  %v6627_v57 = vsub.f32 1.0, %v6626_v48  ;;  %v6618_v51 = vsel %vm16195_vm7, %v16131_v14, %v6614_v17  ;;  %v6656_v61 = vmul.f32 %v16214_v56, %v16135_v18  ;;  %vm6661_vm13 = vweird.f32 %v16214_v56  ;;  %v13607_v14 = vld [vmem:[%s17037_s3 + $0x3f8] sm:$0xff]  ;;  %v13581_v48 = vld [vmem:[%s17037_s3 + $0x328] sm:$0xff] }
 0x43d   : > { %8559 = vmatpush.bf16.msra.mxu1 %v13555_v15  ;;  %v6643_v60 = vmul.f32 %v16164_v38, %v6642_v49  ;;  %v6623_v53 = vsel %vm16142_vm1, %v6622_v8, %v6618_v51  ;;  %13759 = vrcp.f32 %v16212_v50  ;;  %v6679_v4 = vand.u32 2147483647, %v16160_v32  ;;  %vm16304_vm6 = vmor %vm6660_vm9, %vm6661_vm13 }
 0x43e   : > { %8572 = vmatpush.bf16.msra.mxu2 %v13563_v1  ;;  %v6628_v63 = vmul.f32 %v16177_v42, %v6627_v57  ;;  %6858 = vst [vmem:[%s17040_s6 + $0x40] sm:$0xff] %v6623_v53  ;;  %v6882_v3 = vpack.c.bf16 %v6623_v53, %v6623_v53  ;;  %v6657_v5 = vsub.f32 1.0, %v6656_v61  ;;  %v16270_v15 = vpop.eup %13753  ;;  %v13599_v1 = vld [vmem:[%s17037_s3 + $0x3b8] sm:$0xff]  ;;  %vm6705_vm0 = vweird.f32 %v16162_v36 }
 0x43f   : > { %8585 = vmatpush.bf16.msra.mxu3 %v13571_v20  ;;  %v6644_v2 = vadd.f32 %v16164_v38, %v6643_v60  ;;  %v16282_v26 = vpop.eup %13755  ;;  %v6671_v21 = vmul.f32 %v16270_v15, %v16160_v32  ;;  %vm6676_vm1 = vweird.f32 %v16270_v15  ;;  %vm16308_vm2 = vcmp.eq.f32.partialorder %v6679_v4, 8.507059e+37  ;;  %v13597_v32 = vld [vmem:[%s17037_s3 + $0x3a8] sm:$0xff] }
 0x440   : > { %8547 = vmatpush.bf16.msra.mxu0 %v13546_v7  ;;  %v6629_v20 = vadd.f32 %v16177_v42, %v6628_v63  ;;  %v6658_v27 = vmul.f32 %v16214_v56, %v6657_v5  ;;  %v13758_v7 = vpop.eup %13757  ;;  %v16312_v28 = vor.u32 1.1754944e-38, %v6681_v10  ;;  %v6701_v6 = vmul.f32 %v16282_v26, %v16162_v36  ;;  %v6310_v5 = vld [vmem:[#allocation2 + $0x30] sm:$0xff]  ;;  %v13588_v10 = vld [vmem:[%s17037_s3 + $0x360] sm:$0xff] }
 0x441   : > { %8560 = vmatpush.bf16.msra.mxu1 %v13554_v12  ;;  %v6648_v25 = vsel %vm16244_vm12, %v16164_v38, %v6644_v2  ;;  %v13590_v38 = vld [vmem:[%s17037_s3 + $0x370] sm:$0xff]  ;;  %vm6706_vm3 = vweird.f32 %v16282_v26  ;;  %v6696_v61 = vand.u32 2147483648, %v16212_v50 }
 0x442   : > { %8573 = vmatpush.bf16.msra.mxu2 %v13562_v13  ;;  %v6653_v22 = vsel %vm16166_vm4, %v16170_v40, %v6648_v25  ;;  %v6633_v29 = vsel %vm16265_vm14, %v16177_v42, %v6629_v20  ;;  %v6659_v8 = vadd.f32 %v16214_v56, %v6658_v27  ;;  %v13582_v13 = vld [vmem:[%s17037_s3 + $0x330] sm:$0xff]  ;;  %v6672_v40 = vsub.f32 1.0, %v6671_v21  ;;  %vm16390_vm9 = vmor %vm6705_vm0, %vm6706_vm3  ;;  %v6309_v27 = vld [vmem:[#allocation2 + $0x68] sm:$0xff] }
 0x443   : > { %8586 = vmatpush.bf16.msra.mxu3 %v13570_v34  ;;  %6860 = vst [vmem:[%s17040_s6 + $0x50] sm:$0xff] %v6653_v22  ;;  %v6884_v12 = vpack.c.bf16 %v6653_v22, %v6653_v22  ;;  %v6638_v18 = vsel %vm16172_vm5, %v16185_v31, %v6633_v29  ;;  %v16324_v34 = vpop.eup %13759  ;;  %v6709_v42 = vand.u32 2147483647, %v16162_v36  ;;  %v13606_v31 = vld [vmem:[%s17037_s3 + $0x3f0] sm:$0xff]  ;;  %v6702_v43 = vsub.f32 1.0, %v6701_v6  ;;  %vm16368_vm5 = vmor %vm6675_vm15, %vm6676_vm1  ;;  %v13579_v21 = vld [vmem:[%s17037_s3 + $0x318] sm:$0xff] }
 0x444   : > { %8548 = vmatpush.bf16.msra.mxu0 %v13545_v11  ;;  %6859 = vst [vmem:[%s17040_s6 + $0x48] sm:$0xff] %v6638_v18  ;;  %v6883_v35 = vpack.c.bf16 %v6638_v18, %v6638_v18  ;;  %v6663_v41 = vsel %vm16304_vm6, %v16214_v56, %v6659_v8  ;;  %v6711_v11 = vand.u32 2147483648, %v16162_v36  ;;  %v6686_v44 = vmul.f32 %v16324_v34, %v16212_v50  ;;  %v13589_v56 = vld [vmem:[%s17037_s3 + $0x368] sm:$0xff]  ;;  %v6311_v29 = vld [vmem:[#allocation2 + $0x58] sm:$0xff] }
 0x445   : > { %8561 = vmatpush.bf16.msra.mxu1 %v13553_v9  ;;  %v6668_v45 = vsel %vm16217_vm11, %v16230_v52, %v6663_v41  ;;  %v6673_v37 = vmul.f32 %v16270_v15, %v6672_v40  ;;  %vm6690_vm4 = vweird.f32 %v16212_v50  ;;  %v16356_v9 = vld [vmem:[%s17036_s2 + $0x10] sm:$0xff]  ;;  %vm16372_vm7 = vcmp.eq.f32.partialorder %v6709_v42, 8.507059e+37 }
 0x446   : > { %8574 = vmatpush.bf16.msra.mxu2 %v13561_v16  ;;  %6861 = vst [vmem:[%s17040_s6 + $0x58] sm:$0xff] %v6668_v45  ;;  %v6885_v46 = vpack.c.bf16 %v6668_v45, %v6668_v45  ;;  %v6712_v17 = vor.u32 1.1754944e-38, %v6711_v11  ;;  %v6687_v49 = vsub.f32 1.0, %v6686_v44  ;;  %v6703_v55 = vmul.f32 %v16282_v26, %v6702_v43  ;;  %v13578_v40 = vld [vmem:[%s17037_s3 + $0x310] sm:$0xff]  ;;  %v13577_v16 = vld [vmem:[%s17037_s3 + $0x308] sm:$0xff] }
 0x447   : > { %8587 = vmatpush.bf16.msra.mxu3 %v13569_v47  ;;  %v6674_v57 = vadd.f32 %v16270_v15, %v6673_v37  ;;  %vm6691_vm8 = vweird.f32 %v16324_v34  ;;  %v16396_v52 = vadd.f32 1.0, %v13758_v7  ;;  %v6697_v54 = vor.u32 1.1754944e-38, %v6696_v61  ;;  %v13586_v11 = vld [vmem:[%s17037_s3 + $0x350] sm:$0xff]  ;;  %v13576_v61 = vld [vmem:[%s17037_s3 + $0x300] sm:$0xff] }
 0x448   : > { %8549 = vmatpush.bf16.msra.mxu0 %v13544_v58  ;;  %v6694_v58 = vand.u32 2147483647, %v16212_v50  ;;  %v6688_v60 = vmul.f32 %v16324_v34, %v6687_v49  ;;  %v6704_v53 = vadd.f32 %v16282_v26, %v6703_v55  ;;  %vm16408_vm10 = vmor %vm6690_vm4, %vm6691_vm8  ;;  %v6339_v22 = vperm.slane %v16356_v9, 1  ;;  %v13594_v44 = vld [vmem:[%s17037_s3 + $0x390] sm:$0xff]  ;;  %v13585_v49 = vld [vmem:[%s17037_s3 + $0x348] sm:$0xff] }
 0x449   : > { %8562 = vmatpush.bf16.msra.mxu1 %v13552_v24  ;;  %v6338_v24 = vperm.slane %v16356_v9, 0  ;;  %v6678_v36 = vsel %vm16368_vm5, %v16270_v15, %v6674_v57  ;;  %13761 = vrcp.f32 %v16396_v52  ;;  %v13596_v15 = vld [vmem:[%s17037_s3 + $0x3a0] sm:$0xff]  ;;  %vm6720_vm12 = vweird.f32 %v16396_v52  ;;  %v13602_v43 = vld [vmem:[%s17037_s3 + $0x3d0] sm:$0xff] }
 0x44a   : > { %8575 = vmatpush.bf16.msra.mxu2 %v13560_v0  ;;  %vm16412_vm11 = vcmp.eq.f32.partialorder %v6694_v58, 8.507059e+37  ;;  %v6308_v0 = vld [vmem:[#allocation2 + $0xa8] sm:$0xff]  ;;  %v16423_v50 = vsel %vm16308_vm2, %v16312_v28, %v6678_v36  ;;  %v6689_v2 = vadd.f32 %v16324_v34, %v6688_v60  ;;  %v6724_v6 = vand.u32 2147483647, %v16396_v52  ;;  %v13592_v36 = vld [vmem:[%s17037_s3 + $0x380] sm:$0xff] }
 0x44b   : > { %8588 = vmatpush.bf16.msra.mxu3 %v13568_v62  ;;  %8550 = vmatmul.bf16.vlgmr.msra.gmra.mxu0 %v6882_v3  ;;  %v6340_v62 = vperm.slane %v16356_v9, 2  ;;  %v13580_v3 = vld [vmem:[%s17037_s3 + $0x320] sm:$0xff]  ;;  %6862 = vst [vmem:[%s17040_s6 + $0x60] sm:$0xff] %v16423_v50  ;;  %v6386_v4 = vadd.f32 %v6338_v24, %v6308_v0  ;;  %v6726_v41 = vand.u32 2147483648, %v16396_v52  ;;  %v13601_v58 = vld [vmem:[%s17037_s3 + $0x3c8] sm:$0xff]  ;;  %v6342_v59 = vperm.slane %v16356_v9, 4 }
 0x44c   : > { %8594 = vmatpush.bf16.msrb.mxu0 %v13583_v23  ;;  %8563 = vmatmul.bf16.vlgmr.msra.gmra.mxu1 %v6883_v35  ;;  %v13605_v23 = vld [vmem:[%s17037_s3 + $0x3e8] sm:$0xff]  ;;  %v6693_v20 = vsel %vm16408_vm10, %v16324_v34, %v6689_v2  ;;  %v13603_v34 = vld [vmem:[%s17037_s3 + $0x3d8] sm:$0xff]  ;;  %vm6725_vm15 = vcmp.eq.f32.partialorder %v6724_v6, 8.507059e+37  ;;  %v6312_v2 = vld [vmem:[#allocation2 + $0x80] sm:$0xff] }
 0x44d   : > { %8607 = vmatpush.bf16.msrb.mxu1 %v13591_v19  ;;  %8576 = vmatmul.bf16.vlgmr.msra.gmra.mxu2 %v6884_v12  ;;  %v6708_v19 = vsel %vm16390_vm9, %v16282_v26, %v6704_v53  ;;  %v16456_v26 = vsel %vm16412_vm11, %v6697_v54, %v6693_v20  ;;  %v6388_v25 = vadd.f32 %v6340_v62, %v6310_v5  ;;  %v6410_v7 = vsub.f32 0.0, %v6386_v4  ;;  %v13600_v53 = vld [vmem:[%s17037_s3 + $0x3c0] sm:$0xff]  ;;  %v13615_v0 = vld [vmem:[%s17037_s3 + $0x438] sm:$0xff] }
 0x44e   : > { %8620 = vmatpush.bf16.msrb.mxu2 %v13599_v1  ;;  %8589 = vmatmul.bf16.vlgmr.msra.gmra.mxu3 %v6885_v46  ;;  %v16442_v1 = vsel %vm16372_vm7, %v6712_v17, %v6708_v19  ;;  %6863 = vst [vmem:[%s17040_s6 + $0x68] sm:$0xff] %v16456_v26  ;;  %v6341_v12 = vperm.slane %v16356_v9, 3  ;;  %v6727_v17 = vor.u32 1.1754944e-38, %v6726_v41  ;;  %v13623_v62 = vld [vmem:[%s17037_s3 + $0x478] sm:$0xff]  ;;  %v6390_v20 = vadd.f32 %v6342_v59, %v6312_v2 }
 0x44f   : > { %8633 = vmatpush.bf16.msrb.mxu3 %v13607_v14  ;;  %v13604_v14 = vld [vmem:[%s17037_s3 + $0x3e0] sm:$0xff]  ;;  %6864 = vst [vmem:[%s17040_s6 + $0x70] sm:$0xff] %v16442_v1  ;;  %v6412_v28 = vsub.f32 0.0, %v6388_v25  ;;  %v13762_v18 = vpop.eup %13761  ;;  %v6450_v8 = vmul.f32 1.442695, %v6410_v7  ;;  %v13631_v5 = vld [vmem:[%s17037_s3 + $0x4b8] sm:$0xff]  ;;  %v6888_v25 = vpack.c.bf16 %v16442_v1, %v16442_v1  ;;  %v6887_v7 = vpack.c.bf16 %v16456_v26, %v16456_v26 }
 0x450   : > { %8595 = vmatpush.bf16.msrb.mxu0 %v13582_v13  ;;  %v6387_v13 = vadd.f32 %v6339_v22, %v6309_v27  ;;  %v6716_v35 = vmul.f32 %v13762_v18, %v16396_v52  ;;  %vm6721_vm13 = vweird.f32 %v13762_v18  ;;  %v13639_v4 = vld [vmem:[%s17037_s3 + $0x4f8] sm:$0xff]  ;;  %v6343_v26 = vperm.slane %v16356_v9, 5 }
 0x451   : > { %8608 = vmatpush.bf16.msrb.mxu1 %v13590_v38  ;;  %v6454_v38 = vmul.f32 1.442695, %v6412_v28  ;;  %13763 = vpow2.f32 %v6450_v8  ;;  %vm16497_vm14 = vmor %vm6720_vm12, %vm6721_vm13  ;;  %v13630_v28 = vld [vmem:[%s17037_s3 + $0x4b0] sm:$0xff] }
 0x452   : > { %8621 = vmatpush.bf16.msrb.mxu2 %v13598_v39  ;;  %v6389_v39 = vadd.f32 %v6341_v12, %v6311_v29  ;;  %v6411_v42 = vsub.f32 0.0, %v6387_v13  ;;  %v6717_v45 = vsub.f32 1.0, %v6716_v35  ;;  %v6414_v29 = vsub.f32 0.0, %v6390_v20  ;;  %v6313_v13 = vld [vmem:[#allocation2 + $0xb8] sm:$0xff]  ;;  %v13638_v35 = vld [vmem:[%s17037_s3 + $0x4f0] sm:$0xff] }
 0x453   : > { %8634 = vmatpush.bf16.msrb.mxu3 %v13606_v31  ;;  %13765 = vpow2.f32 %v6454_v38 }
 0x454   : > { %8596 = vmatpush.bf16.msrb.mxu0 %v13581_v48  ;;  %v6413_v31 = vsub.f32 0.0, %v6389_v39  ;;  %v6452_v37 = vmul.f32 1.442695, %v6411_v42  ;;  %v6718_v46 = vmul.f32 %v13762_v18, %v6717_v45  ;;  %v6314_v42 = vld [vmem:[#allocation2 + $0x20] sm:$0xff]  ;;  %v6458_v45 = vmul.f32 1.442695, %v6414_v29 }
 0x455   : > { %8609 = vmatpush.bf16.msrb.mxu1 %v13589_v56  ;;  %v13593_v56 = vld [vmem:[%s17037_s3 + $0x388] sm:$0xff] }
 0x456   : > { %8622 = vmatpush.bf16.msrb.mxu2 %v13597_v32  ;;  %v6456_v48 = vmul.f32 1.442695, %v6413_v31  ;;  %13767 = vpow2.f32 %v6452_v37  ;;  %v6719_v32 = vadd.f32 %v13762_v18, %v6718_v46  ;;  %v6391_v31 = vadd.f32 %v6343_v26, %v6313_v13  ;;  %v13621_v46 = vld [vmem:[%s17037_s3 + $0x468] sm:$0xff] }
 0x457   : > { %8635 = vmatpush.bf16.msrb.mxu3 %v13605_v23  ;;  %v13764_v57 = vpop.eup %13763  ;;  %v13584_v23 = vld [vmem:[%s17037_s3 + $0x340] sm:$0xff]  ;;  %v6344_v37 = vperm.slane %v16356_v9, 6 }
 0x458   : > { %8597 = vmatpush.bf16.msrb.mxu0 %v13580_v3  ;;  %13769 = vpow2.f32 %v6456_v48  ;;  %v6723_v51 = vsel %vm16497_vm14, %v13762_v18, %v6719_v32  ;;  %v16512_v60 = vadd.f32 1.0, %v13764_v57  ;;  %v13629_v48 = vld [vmem:[%s17037_s3 + $0x4a8] sm:$0xff]  ;;  %v6415_v57 = vsub.f32 0.0, %v6391_v31 }
 0x459   : > { %8610 = vmatpush.bf16.msrb.mxu1 %v13588_v10  ;;  %v13766_v55 = vpop.eup %13765  ;;  %v16517_v52 = vsel %vm6725_vm15, %v6727_v17, %v6723_v51  ;;  %v6345_v17 = vperm.slane %v16356_v9, 7  ;;  %v13609_v31 = vld [vmem:[%s17037_s3 + $0x408] sm:$0xff] }
 0x45a   : > { %8623 = vmatpush.bf16.msrb.mxu2 %v13596_v15  ;;  %v16519_v24 = vadd.f32 1.0, %v13766_v55  ;;  %6865 = vst [vmem:[%s17040_s6 + $0x78] sm:$0xff] %v16517_v52  ;;  %13771 = vrcp.f32 %v16512_v60  ;;  %v6741_v3 = vand.u32 2147483648, %v16512_v60  ;;  %v6739_v10 = vand.u32 2147483647, %v16512_v60 }
 0x45b   : > { %8636 = vmatpush.bf16.msrb.mxu3 %v13604_v14  ;;  %v6886_v14 = vpack.c.bf16 %v16423_v50, %v16423_v50  ;;  %v6889_v22 = vpack.c.bf16 %v16517_v52, %v16517_v52  ;;  %vm6735_vm0 = vweird.f32 %v16512_v60  ;;  %v13614_v50 = vld [vmem:[%s17037_s3 + $0x430] sm:$0xff]  ;;  %v6392_v55 = vadd.f32 %v6344_v37, %v6314_v42 }
 0x45c   : > { %8598 = vmatpush.bf16.msrb.mxu0 %v13579_v21  ;;  %v13768_v63 = vpop.eup %13767  ;;  %13773 = vrcp.f32 %v16519_v24  ;;  %v6769_v15 = vand.u32 2147483647, %v16519_v24  ;;  %v6771_v19 = vand.u32 2147483648, %v16519_v24  ;;  %vm6765_vm1 = vweird.f32 %v16519_v24 }
 0x45d   : > { %8611 = vmatpush.bf16.msrb.mxu1 %v13587_v30  ;;  %v16557_v27 = vadd.f32 1.0, %v13768_v63  ;;  %v16570_v1 = vor.u32 1.1754944e-38, %v6741_v3  ;;  %vm16582_vm6 = vcmp.eq.f32.partialorder %v6739_v10, 8.507059e+37  ;;  %v6460_v63 = vmul.f32 1.442695, %v6415_v57 }
 0x45e   : > { %8624 = vmatpush.bf16.msrb.mxu2 %v13595_v33  ;;  %v13770_v54 = vpop.eup %13769  ;;  %v13622_v33 = vld [vmem:[%s17037_s3 + $0x470] sm:$0xff]  ;;  %vm16586_vm2 = vcmp.eq.f32.partialorder %v6769_v15, 8.507059e+37  ;;  %v16590_v8 = vor.u32 1.1754944e-38, %v6771_v19  ;;  %v6416_v2 = vsub.f32 0.0, %v6392_v55 }
 0x45f   : > { %8637 = vmatpush.bf16.msrb.mxu3 %v13603_v34  ;;  %v16559_v21 = vadd.f32 1.0, %v13770_v54  ;;  %13775 = vrcp.f32 %v16557_v27  ;;  %vm6750_vm3 = vweird.f32 %v16557_v27  ;;  %v6754_v39 = vand.u32 2147483647, %v16557_v27 }
 0x460   : > { %8599 = vmatpush.bf16.msrb.mxu0 %v13578_v40  ;;  %v16574_v30 = vpop.eup %13771  ;;  %v6756_v40 = vand.u32 2147483648, %v16557_v27 }
 0x461   : > { %8612 = vmatpush.bf16.msrb.mxu1 %v13586_v11  ;;  %13777 = vrcp.f32 %v16559_v21  ;;  %v6731_v38 = vmul.f32 %v16574_v30, %v16512_v60  ;;  %vm6736_vm4 = vweird.f32 %v16574_v30  ;;  %vm6780_vm5 = vweird.f32 %v16559_v21  ;;  %v13613_v11 = vld [vmem:[%s17037_s3 + $0x428] sm:$0xff] }
 0x462   : > { %8625 = vmatpush.bf16.msrb.mxu2 %v13594_v44  ;;  %v16593_v34 = vpop.eup %13773  ;;  %v6784_v41 = vand.u32 2147483647, %v16559_v21  ;;  %v6786_v47 = vand.u32 2147483648, %v16559_v21  ;;  %13779 = vpow2.f32 %v6458_v45  ;;  %vm16633_vm8 = vmor %vm6735_vm0, %vm6736_vm4  ;;  %vm16640_vm9 = vcmp.eq.f32.partialorder %v6754_v39, 8.507059e+37 }
 0x463   : > { %8638 = vmatpush.bf16.msrb.mxu3 %v13602_v43  ;;  %v6761_v6 = vmul.f32 %v16593_v34, %v16519_v24  ;;  %v6732_v44 = vsub.f32 1.0, %v6731_v38  ;;  %v6315_v43 = vld [vmem:[#allocation2 + $0x8] sm:$0xff]  ;;  %vm6766_vm7 = vweird.f32 %v16593_v34  ;;  %v13628_v24 = vld [vmem:[%s17037_s3 + $0x4a0] sm:$0xff]  ;;  %13781 = vpow2.f32 %v6460_v63  ;;  %v13610_v38 = vld [vmem:[%s17037_s3 + $0x410] sm:$0xff] }
 0x464   : > { %8600 = vmatpush.bf16.msrb.mxu0 %v13577_v16  ;;  %vm16652_vm10 = vmor %vm6765_vm1, %vm6766_vm7  ;;  %v6787_v12 = vor.u32 1.1754944e-38, %v6786_v47  ;;  %vm6785_vm15 = vcmp.eq.f32.partialorder %v6784_v41, 8.507059e+37  ;;  %v13633_v47 = vld [vmem:[%s17037_s3 + $0x4c8] sm:$0xff] }
 0x465   : > { %8613 = vmatpush.bf16.msrb.mxu1 %v13585_v49  ;;  %v6762_v16 = vsub.f32 1.0, %v6761_v6  ;;  %v16621_v49 = vpop.eup %13775  ;;  %v6733_v32 = vmul.f32 %v16574_v30, %v6732_v44  ;;  %v13626_v6 = vld [vmem:[%s17037_s3 + $0x490] sm:$0xff] }
 0x466   : > { %8626 = vmatpush.bf16.msrb.mxu2 %v13593_v56  ;;  %v13637_v56 = vld [vmem:[%s17037_s3 + $0x4e8] sm:$0xff]  ;;  %vm6751_vm11 = vweird.f32 %v16621_v49 }
 0x467   : > { %8639 = vmatpush.bf16.msrb.mxu3 %v13601_v58  ;;  %v16627_v58 = vpop.eup %13777  ;;  %v6763_v51 = vmul.f32 %v16593_v34, %v6762_v16  ;;  %v6734_v60 = vadd.f32 %v16574_v30, %v6733_v32  ;;  %vm16698_vm13 = vmor %vm6750_vm3, %vm6751_vm11 }
 0x468   : > { %8601 = vmatpush.bf16.msrb.mxu0 %v13576_v61  ;;  %v6746_v61 = vmul.f32 %v16621_v49, %v16557_v27  ;;  %v6776_v59 = vmul.f32 %v16627_v58, %v16559_v21  ;;  %vm6781_vm12 = vweird.f32 %v16627_v58 }
 0x469   : > { %8614 = vmatpush.bf16.msrb.mxu1 %v13584_v23  ;;  %v6393_v23 = vadd.f32 %v6345_v17, %v6315_v43  ;;  %v6738_v10 = vsel %vm16633_vm8, %v16574_v30, %v6734_v60  ;;  %v13619_v30 = vld [vmem:[%s17037_s3 + $0x458] sm:$0xff]  ;;  %vm16720_vm14 = vmor %vm6780_vm5, %vm6781_vm12 }
 0x46a   : > { %8627 = vmatpush.bf16.msrb.mxu2 %v13592_v36  ;;  %v13612_v36 = vld [vmem:[%s17037_s3 + $0x420] sm:$0xff]  ;;  %v6747_v3 = vsub.f32 1.0, %v6746_v61  ;;  %v6777_v15 = vsub.f32 1.0, %v6776_v59  ;;  %v16676_v19 = vsel %vm16582_vm6, %v16570_v1, %v6738_v10  ;;  %v6757_v1 = vor.u32 1.1754944e-38, %v6756_v40  ;;  %v13618_v40 = vld [vmem:[%s17037_s3 + $0x450] sm:$0xff]  ;;  %v13647_v60 = vld [vmem:[%s17037_s3 + $0x538] sm:$0xff] }
 0x46b   : > { %8640 = vmatpush.bf16.msrb.mxu3 %v13600_v53  ;;  %8602 = vmatmul.bf16.vlgmr.msrb.gmra.mxu0 %v6886_v14  ;;  %v6417_v54 = vsub.f32 0.0, %v6393_v23  ;;  %v6462_v14 = vmul.f32 1.442695, %v6416_v2  ;;  %6866 = vst [vmem:[%s17040_s6 + $0x80] sm:$0xff] %v16676_v19  ;;  %v13624_v61 = vld [vmem:[%s17037_s3 + $0x480] sm:$0xff]  ;;  %v13671_v10 = vld [vmem:[%s17037_s3 + $0x5f8] sm:$0xff] }
 0x46c   : > { %8646 = vmatpush.bf16.msra.mxu0 %v13615_v0  ;;  %8615 = vmatmul.bf16.vlgmr.msrb.gmra.mxu1 %v6887_v7  ;;  %v13620_v0 = vld [vmem:[%s17037_s3 + $0x460] sm:$0xff]  ;;  %v13611_v7 = vld [vmem:[%s17037_s3 + $0x418] sm:$0xff]  ;;  %v6778_v29 = vmul.f32 %v16627_v58, %v6777_v15 }
 0x46d   : > { %8659 = vmatpush.bf16.msra.mxu1 %v13623_v62  ;;  %8628 = vmatmul.bf16.vlgmr.msrb.gmra.mxu2 %v6888_v25  ;;  %v6764_v62 = vadd.f32 %v16593_v34, %v6763_v51  ;;  %v13780_v25 = vpop.eup %13779  ;;  %v6464_v26 = vmul.f32 1.442695, %v6417_v54  ;;  %13783 = vpow2.f32 %v6462_v14  ;;  %v13616_v51 = vld [vmem:[%s17037_s3 + $0x440] sm:$0xff] }
 0x46e   : > { %8672 = vmatpush.bf16.msra.mxu2 %v13631_v5  ;;  %8641 = vmatmul.bf16.vlgmr.msrb.gmra.mxu3 %v6889_v22  ;;  %v13636_v5 = vld [vmem:[%s17037_s3 + $0x4e0] sm:$0xff]  ;;  %v16724_v18 = vadd.f32 1.0, %v13780_v25  ;;  %v6779_v13 = vadd.f32 %v16627_v58, %v6778_v29 }
 0x46f   : > { %8685 = vmatpush.bf16.msra.mxu3 %v13639_v4  ;;  %v6768_v20 = vsel %vm16652_vm10, %v16593_v34, %v6764_v62  ;;  %v6748_v4 = vmul.f32 %v16621_v49, %v6747_v3  ;;  %13785 = vpow2.f32 %v6464_v26  ;;  %v13663_v62 = vld [vmem:[%s17037_s3 + $0x5b8] sm:$0xff]  ;;  %v13698_v3 = vld [vmem:[%s17038_s4] ss:$0 sm:$0xff] }
 0x470   : > { %8647 = vmatpush.bf16.msra.mxu0 %v13614_v50  ;;  %v16692_v22 = vsel %vm16586_vm2, %v16590_v8, %v6768_v20  ;;  %v13635_v8 = vld [vmem:[%s17037_s3 + $0x4d8] sm:$0xff]  ;;  %13787 = vrcp.f32 %v16724_v18  ;;  %v6783_v21 = vsel %vm16720_vm14, %v16627_v58, %v6779_v13  ;;  %v6801_v55 = vand.u32 2147483648, %v16724_v18 }
 0x471   : > { %8660 = vmatpush.bf16.msra.mxu1 %v13622_v33  ;;  %v13627_v33 = vld [vmem:[%s17037_s3 + $0x498] sm:$0xff]  ;;  %6868 = vst [vmem:[%s17040_s6 + $0x90] sm:$0xff] %v16692_v22  ;;  %v6749_v27 = vadd.f32 %v16621_v49, %v6748_v4  ;;  %v16756_v41 = vsel %vm6785_vm15, %v6787_v12, %v6783_v21  ;;  %v6892_v32 = vpack.c.bf16 %v16692_v22, %v16692_v22  ;;  %vm6795_vm0 = vweird.f32 %v16724_v18  ;;  %v13645_v21 = vld [vmem:[%s17037_s3 + $0x528] sm:$0xff] }
 0x472   : > { %8673 = vmatpush.bf16.msra.mxu2 %v13630_v28  ;;  %6869 = vst [vmem:[%s17040_s6 + $0x98] sm:$0xff] %v16756_v41  ;;  %v6799_v23 = vand.u32 2147483647, %v16724_v18  ;;  %v6893_v53 = vpack.c.bf16 %v16756_v41, %v16756_v41  ;;  %v6802_v2 = vor.u32 1.1754944e-38, %v6801_v55  ;;  %v13643_v55 = vld [vmem:[%s17037_s3 + $0x518] sm:$0xff] }
 0x473   : > { %8686 = vmatpush.bf16.msra.mxu3 %v13638_v35  ;;  %v6753_v34 = vsel %vm16698_vm13, %v16621_v49, %v6749_v27  ;;  %v13782_v35 = vpop.eup %13781  ;;  %v6890_v49 = vpack.c.bf16 %v16676_v19, %v16676_v19  ;;  %v13662_v27 = vld [vmem:[%s17037_s3 + $0x5b0] sm:$0xff] }
 0x474   : > { %8648 = vmatpush.bf16.msra.mxu0 %v13613_v11  ;;  %v16741_v39 = vsel %vm16640_vm9, %v6757_v1, %v6753_v34  ;;  %v16758_v42 = vadd.f32 1.0, %v13782_v35  ;;  %v13634_v11 = vld [vmem:[%s17037_s3 + $0x4d0] sm:$0xff]  ;;  %v13784_v44 = vpop.eup %13783  ;;  %vm16843_vm4 = vcmp.eq.f32.partialorder %v6799_v23, 8.507059e+37 }
 0x475   : > { %8661 = vmatpush.bf16.msra.mxu1 %v13621_v46  ;;  %6867 = vst [vmem:[%s17040_s6 + $0x88] sm:$0xff] %v16741_v39  ;;  %v13786_v45 = vpop.eup %13785  ;;  %v16771_v37 = vadd.f32 1.0, %v13784_v44  ;;  %v13617_v46 = vld [vmem:[%s17037_s3 + $0x448] sm:$0xff]  ;;  %v6891_v52 = vpack.c.bf16 %v16741_v39, %v16741_v39  ;;  %v13646_v1 = vld [vmem:[%s17037_s3 + $0x530] sm:$0xff] }
 0x476   : > { %8674 = vmatpush.bf16.msra.mxu2 %v13629_v48  ;;  %13789 = vrcp.f32 %v16758_v42  ;;  %v16773_v43 = vpop.eup %13787  ;;  %v13625_v48 = vld [vmem:[%s17037_s3 + $0x488] sm:$0xff]  ;;  %v16781_v16 = vadd.f32 1.0, %v13786_v45  ;;  %v6816_v58 = vand.u32 2147483648, %v16758_v42  ;;  %vm6810_vm2 = vweird.f32 %v16758_v42  ;;  %v13658_v23 = vld [vmem:[%s17037_s3 + $0x590] sm:$0xff] }
 0x477   : > { %8687 = vmatpush.bf16.msra.mxu3 %v13637_v56  ;;  %v6791_v17 = vmul.f32 %v16773_v43, %v16724_v18  ;;  %13791 = vrcp.f32 %v16771_v37  ;;  %v13608_v56 = vld [vmem:[%s17037_s3 + $0x400] sm:$0xff]  ;;  %vm6796_vm1 = vweird.f32 %v16773_v43  ;;  %v6814_v54 = vand.u32 2147483647, %v16758_v42 }
 0x478   : > { %8649 = vmatpush.bf16.msra.mxu0 %v13612_v36  ;;  %13793 = vrcp.f32 %v16781_v16  ;;  %v13632_v36 = vld [vmem:[%s17037_s3 + $0x4c0] sm:$0xff]  ;;  %vm16830_vm6 = vmor %vm6795_vm0, %vm6796_vm1  ;;  %v6817_v4 = vor.u32 1.1754944e-38, %v6816_v58  ;;  %vm6825_vm7 = vweird.f32 %v16771_v37  ;;  %v6829_v50 = vand.u32 2147483647, %v16771_v37  ;;  %v13651_v58 = vld [vmem:[%s17037_s3 + $0x558] sm:$0xff] }
 0x479   : > { %8662 = vmatpush.bf16.msra.mxu1 %v13620_v0  ;;  %v6792_v57 = vsub.f32 1.0, %v6791_v17  ;;  %v6831_v0 = vand.u32 2147483648, %v16771_v37  ;;  %vm16849_vm5 = vcmp.eq.f32.partialorder %v6814_v54, 8.507059e+37  ;;  %vm6840_vm10 = vweird.f32 %v16781_v16 }
 0x47a   : > { %8675 = vmatpush.bf16.msra.mxu2 %v13628_v24  ;;  %v13655_v24 = vld [vmem:[%s17037_s3 + $0x578] sm:$0xff]  ;;  %v6844_v35 = vand.u32 2147483647, %v16781_v16  ;;  %vm6830_vm13 = vcmp.eq.f32.partialorder %v6829_v50, 8.507059e+37 }
 0x47b   : > { %8688 = vmatpush.bf16.msra.mxu3 %v13636_v5  ;;  %v6793_v59 = vmul.f32 %v16773_v43, %v6792_v57  ;;  %v13668_v57 = vld [vmem:[%s17037_s3 + $0x5e0] sm:$0xff] }
 0x47c   : > { %8650 = vmatpush.bf16.msra.mxu0 %v13611_v7  ;;  %v16799_v9 = vpop.eup %13789  ;;  %vm6845_vm15 = vcmp.eq.f32.partialorder %v6844_v35, 8.507059e+37 }
 0x47d   : > { %8663 = vmatpush.bf16.msra.mxu1 %v13619_v30  ;;  %v6806_v63 = vmul.f32 %v16799_v9, %v16758_v42  ;;  %vm6811_vm3 = vweird.f32 %v16799_v9  ;;  %v16837_v5 = vpop.eup %13791  ;;  %v6794_v15 = vadd.f32 %v16773_v43, %v6793_v59  ;;  %v13653_v42 = vld [vmem:[%s17037_s3 + $0x568] sm:$0xff] }
 0x47e   : > { %8676 = vmatpush.bf16.msra.mxu2 %v13627_v33  ;;  %v16847_v14 = vpop.eup %13793  ;;  %v6821_v7 = vmul.f32 %v16837_v5, %v16771_v37  ;;  %vm6826_vm8 = vweird.f32 %v16837_v5  ;;  %v13654_v33 = vld [vmem:[%s17037_s3 + $0x570] sm:$0xff]  ;;  %vm16881_vm9 = vmor %vm6810_vm2, %vm6811_vm3  ;;  %v13657_v59 = vld [vmem:[%s17037_s3 + $0x588] sm:$0xff] }
 0x47f   : > { %8689 = vmatpush.bf16.msra.mxu3 %v13635_v8  ;;  %v6807_v20 = vsub.f32 1.0, %v6806_v63  ;;  %v6798_v29 = vsel %vm16830_vm6, %v16773_v43, %v6794_v15  ;;  %v6836_v30 = vmul.f32 %v16847_v14, %v16781_v16  ;;  %vm6841_vm11 = vweird.f32 %v16847_v14  ;;  %v13670_v8 = vld [vmem:[%s17037_s3 + $0x5f0] sm:$0xff]  ;;  %vm16911_vm12 = vmor %vm6825_vm7, %vm6826_vm8  ;;  %v13669_v43 = vld [vmem:[%s17037_s3 + $0x5e8] sm:$0xff] }
 0x480   : > { %8651 = vmatpush.bf16.msra.mxu0 %v13610_v38  ;;  %v16875_v28 = vsel %vm16843_vm4, %v6802_v2, %v6798_v29  ;;  %v6822_v18 = vsub.f32 1.0, %v6821_v7  ;;  %v6846_v38 = vand.u32 2147483648, %v16781_v16  ;;  %vm16931_vm14 = vmor %vm6840_vm10, %vm6841_vm11  ;;  %v13644_v16 = vld [vmem:[%s17037_s3 + $0x520] sm:$0xff]  ;;  %v13665_v63 = vld [vmem:[%s17037_s3 + $0x5c8] sm:$0xff] }
 0x481   : > { %8664 = vmatpush.bf16.msra.mxu1 %v13618_v40  ;;  %v6808_v26 = vmul.f32 %v16799_v9, %v6807_v20  ;;  %6870 = vst [vmem:[%s17040_s6 + $0xa0] sm:$0xff] %v16875_v28  ;;  %v6837_v34 = vsub.f32 1.0, %v6836_v30  ;;  %v13664_v2 = vld [vmem:[%s17037_s3 + $0x5c0] sm:$0xff]  ;;  %v6894_v54 = vpack.c.bf16 %v16875_v28, %v16875_v28 }
 0x482   : > { %8677 = vmatpush.bf16.msra.mxu2 %v13626_v6  ;;  %v6823_v39 = vmul.f32 %v16837_v5, %v6822_v18  ;;  %v6832_v6 = vor.u32 1.1754944e-38, %v6831_v0  ;;  %v6847_v37 = vor.u32 1.1754944e-38, %v6846_v38  ;;  %v13640_v0 = vld [vmem:[%s17037_s3 + $0x500] sm:$0xff] }
 0x483   : > { %8690 = vmatpush.bf16.msra.mxu3 %v13634_v11  ;;  %v6809_v13 = vadd.f32 %v16799_v9, %v6808_v26  ;;  %v6838_v41 = vmul.f32 %v16847_v14, %v6837_v34  ;;  %v13661_v11 = vld [vmem:[%s17037_s3 + $0x5a8] sm:$0xff] }
 0x484   : > { %8652 = vmatpush.bf16.msra.mxu0 %v13609_v31  ;;  %v6824_v45 = vadd.f32 %v16837_v5, %v6823_v39 }
 0x485   : > { %8665 = vmatpush.bf16.msra.mxu1 %v13617_v46  ;;  %v6813_v40 = vsel %vm16881_vm9, %v16799_v9, %v6809_v13  ;;  %v6839_v46 = vadd.f32 %v16847_v14, %v6838_v41  ;;  %v13659_v9 = vld [vmem:[%s17037_s3 + $0x598] sm:$0xff] }
 0x486   : > { %8678 = vmatpush.bf16.msra.mxu2 %v13625_v48  ;;  %v16924_v44 = vsel %vm16849_vm5, %v6817_v4, %v6813_v40  ;;  %v6828_v48 = vsel %vm16911_vm12, %v16837_v5, %v6824_v45 }
 0x487   : > { %8691 = vmatpush.bf16.msra.mxu3 %v13633_v47  ;;  %6871 = vst [vmem:[%s17040_s6 + $0xa8] sm:$0xff] %v16924_v44  ;;  %v6833_v47 = vsel %vm6830_vm13, %v6832_v6, %v6828_v48  ;;  %v6843_v17 = vsel %vm16931_vm14, %v16847_v14, %v6839_v46 }
 0x488   : > { %8653 = vmatpush.bf16.msra.mxu0 %v13608_v56  ;;  %v13660_v56 = vld [vmem:[%s17037_s3 + $0x5a0] sm:$0xff]  ;;  %6872 = vst [vmem:[%s17040_s6 + $0xb0] sm:$0xff] %v6833_v47  ;;  %v6896_v15 = vpack.c.bf16 %v6833_v47, %v6833_v47 }
 0x489   : > { %8666 = vmatpush.bf16.msra.mxu1 %v13616_v51  ;;  %v13667_v51 = vld [vmem:[%s17037_s3 + $0x5d8] sm:$0xff] }
 0x48a   : > { %8679 = vmatpush.bf16.msra.mxu2 %v13624_v61  ;;  %v13642_v61 = vld [vmem:[%s17037_s3 + $0x510] sm:$0xff] }
 0x48b   : > { %8692 = vmatpush.bf16.msra.mxu3 %v13632_v36  ;;  %8654 = vmatmul.bf16.vlgmr.msra.gmra.mxu0 %v6890_v49  ;;  %v13652_v49 = vld [vmem:[%s17037_s3 + $0x560] sm:$0xff]  ;;  %v13666_v36 = vld [vmem:[%s17037_s3 + $0x5d0] sm:$0xff] }
 0x48c   : > { %8698 = vmatpush.bf16.msrb.mxu0 %v13647_v60  ;;  %8667 = vmatmul.bf16.vlgmr.msra.gmra.mxu1 %v6891_v52  ;;  %v13650_v52 = vld [vmem:[%s17037_s3 + $0x550] sm:$0xff]  ;;  %v13641_v60 = vld [vmem:[%s17037_s3 + $0x508] sm:$0xff] }
 0x48d   : > { %8711 = vmatpush.bf16.msrb.mxu1 %v13655_v24  ;;  %8680 = vmatmul.bf16.vlgmr.msra.gmra.mxu2 %v6892_v32  ;;  %v6848_v32 = vsel %vm6845_vm15, %v6847_v37, %v6843_v17  ;;  %v13648_v24 = vld [vmem:[%s17037_s3 + $0x540] sm:$0xff] }
 0x48e   : > { %8724 = vmatpush.bf16.msrb.mxu2 %v13663_v62  ;;  %8693 = vmatmul.bf16.vlgmr.msra.gmra.mxu3 %v6893_v53  ;;  %6873 = vst [vmem:[%s17040_s6 + $0xb8] sm:$0xff] %v6848_v32  ;;  %v13649_v53 = vld [vmem:[%s17037_s3 + $0x548] sm:$0xff]  ;;  %v13656_v62 = vld [vmem:[%s17037_s3 + $0x580] sm:$0xff]  ;;  %v6897_v20 = vpack.c.bf16 %v6848_v32, %v6848_v32 }
 0x48f   : > { %8737 = vmatpush.bf16.msrb.mxu3 %v13671_v10  ;;  %v6895_v10 = vpack.c.bf16 %v16924_v44, %v16924_v44 }
 0x490   : > { %8699 = vmatpush.bf16.msrb.mxu0 %v13646_v1 }
 0x491   : > { %8712 = vmatpush.bf16.msrb.mxu1 %v13654_v33 }
 0x492   : > { %8725 = vmatpush.bf16.msrb.mxu2 %v13662_v27 }
 0x493   : > { %8738 = vmatpush.bf16.msrb.mxu3 %v13670_v8 }
 0x494   : > { %8700 = vmatpush.bf16.msrb.mxu0 %v13645_v21 }
 0x495   : > { %8713 = vmatpush.bf16.msrb.mxu1 %v13653_v42 }
 0x496   : > { %8726 = vmatpush.bf16.msrb.mxu2 %v13661_v11 }
 0x497   : > { %8739 = vmatpush.bf16.msrb.mxu3 %v13669_v43 }
 0x498   : > { %8701 = vmatpush.bf16.msrb.mxu0 %v13644_v16 }
 0x499   : > { %8714 = vmatpush.bf16.msrb.mxu1 %v13652_v49 }
 0x49a   : > { %8727 = vmatpush.bf16.msrb.mxu2 %v13660_v56 }
 0x49b   : > { %8740 = vmatpush.bf16.msrb.mxu3 %v13668_v57  ;;  %v8447_v5 = vpop.f32.mrf.mxu0 }
 0x49c   : > { %8702 = vmatpush.bf16.msrb.mxu0 %v13643_v55  ;;  %v8448_v19 = vadd.f32 %v13698_v3, %v8447_v5 }
 0x49d   : > { %8715 = vmatpush.bf16.msrb.mxu1 %v13651_v58 }
 0x49e   : > { %8728 = vmatpush.bf16.msrb.mxu2 %v13659_v9 }
 0x49f   : > { %8741 = vmatpush.bf16.msrb.mxu3 %v13667_v51 }
 0x4a0   : > { %8703 = vmatpush.bf16.msrb.mxu0 %v13642_v61  ;;  %v8460_v4 = vpop.f32.mrf.mxu1  ;;  %v8473_v25 = vpop.f32.mrf.mxu2 }
 0x4a1   : > { %8716 = vmatpush.bf16.msrb.mxu1 %v13650_v52  ;;  %v8461_v14 = vadd.f32 %v8460_v4, %v8448_v19 }
 0x4a2   : > { %8729 = vmatpush.bf16.msrb.mxu2 %v13658_v23 }
 0x4a3   : > { %8742 = vmatpush.bf16.msrb.mxu3 %v13666_v36  ;;  %v8474_v7 = vadd.f32 %v8473_v25, %v8461_v14  ;;  %v8449_v50 = vpop.f32.mrf.mxu0  ;;  %v8486_v1 = vpop.f32.mrf.mxu3 }
 0x4a4   : > { %8704 = vmatpush.bf16.msrb.mxu0 %v13641_v60 }
 0x4a5   : > { %8717 = vmatpush.bf16.msrb.mxu1 %v13649_v53  ;;  %v8487_v29 = vadd.f32 %v8486_v1, %v8474_v7 }
 0x4a6   : > { %8730 = vmatpush.bf16.msrb.mxu2 %v13657_v59 }
 0x4a7   : > { %8743 = vmatpush.bf16.msrb.mxu3 %v13665_v63 }
 0x4a8   : > { %8705 = vmatpush.bf16.msrb.mxu0 %v13640_v0  ;;  %v8462_v26 = vpop.f32.mrf.mxu1  ;;  %v8475_v30 = vpop.f32.mrf.mxu2 }
 0x4a9   : > { %8718 = vmatpush.bf16.msrb.mxu1 %v13648_v24 }
 0x4aa   : > { %8731 = vmatpush.bf16.msrb.mxu2 %v13656_v62 }
 0x4ab   : > { %8744 = vmatpush.bf16.msrb.mxu3 %v13664_v2  ;;  %8706 = vmatmul.bf16.vlgmr.msrb.gmra.mxu0 %v6894_v54  ;;  %v8499_v33 = vpop.f32.mrf.mxu0  ;;  %v8488_v27 = vpop.f32.mrf.mxu3 }
 0x4ac   : > { %8719 = vmatmul.bf16.vlgmr.msrb.gmra.mxu1 %v6895_v10  ;;  %v8500_v28 = vadd.f32 %v8499_v33, %v8487_v29 }
 0x4ad   : > { %8732 = vmatmul.bf16.vlgmr.msrb.gmra.mxu2 %v6896_v15 }
 0x4ae   : > { %8745 = vmatmul.bf16.vlgmr.msrb.gmra.mxu3 %v6897_v20 }
 0x4b0   : > { %v8525_v12 = vpop.f32.mrf.mxu2  ;;  %v8512_v18 = vpop.f32.mrf.mxu1 }
 0x4b1   : > { %v8513_v8 = vadd.f32 %v8512_v18, %v8500_v28 }
 0x4b3   : > { %v8501_v13 = vpop.f32.mrf.mxu0  ;;  %v8526_v34 = vadd.f32 %v8525_v12, %v8513_v8  ;;  %v8538_v35 = vpop.f32.mrf.mxu3 }
 0x4b5   : > { %v8539_v38 = vadd.f32 %v8538_v35, %v8526_v34 }
 0x4b8   : > { %v8527_v39 = vpop.f32.mrf.mxu2  ;;  %v8514_v21 = vpop.f32.mrf.mxu1 }
 0x4bb   : > { %v8540_v40 = vpop.f32.mrf.mxu3 }
 0x4c8   : > { %v8551_v22 = vpop.f32.mrf.mxu0 }
 0x4c9   : > { %v8552_v6 = vadd.f32 %v8551_v22, %v8539_v38  ;;  %v8564_v41 = vpop.f32.mrf.mxu1 }
 0x4cb   : > { %v8565_v42 = vadd.f32 %v8564_v41, %v8552_v6 }
 0x4d0   : > { %v8577_v11 = vpop.f32.mrf.mxu2  ;;  %v8553_v45 = vpop.f32.mrf.mxu0 }
 0x4d1   : > { %v8578_v44 = vadd.f32 %v8577_v11, %v8565_v42  ;;  %v8566_v31 = vpop.f32.mrf.mxu1  ;;  %v8590_v37 = vpop.f32.mrf.mxu3 }
 0x4d3   : > { %v8591_v43 = vadd.f32 %v8590_v37, %v8578_v44 }
 0x4d8   : > { %v8579_v46 = vpop.f32.mrf.mxu2 }
 0x4d9   : > { %v8592_v48 = vpop.f32.mrf.mxu3 }
 0x4e8   : > { %v8603_v16 = vpop.f32.mrf.mxu0 }
 0x4e9   : > { %v8616_v47 = vpop.f32.mrf.mxu1  ;;  %v8604_v51 = vadd.f32 %v8603_v16, %v8591_v43 }
 0x4eb   : > { %v8617_v60 = vadd.f32 %v8616_v47, %v8604_v51 }
 0x4f0   : > { %v8629_v17 = vpop.f32.mrf.mxu2  ;;  %v8605_v56 = vpop.f32.mrf.mxu0 }
 0x4f1   : > { %v8642_v49 = vpop.f32.mrf.mxu3  ;;  %v8618_v32 = vpop.f32.mrf.mxu1  ;;  %v8630_v53 = vadd.f32 %v8629_v17, %v8617_v60 }
 0x4f3   : > { %v8643_v0 = vadd.f32 %v8642_v49, %v8630_v53 }
 0x4f8   : > { %v8631_v57 = vpop.f32.mrf.mxu2 }
 0x4f9   : > { %v8644_v55 = vpop.f32.mrf.mxu3 }
 0x508   : > { %v8655_v58 = vpop.f32.mrf.mxu0 }
 0x509   : > { %v8668_v9 = vpop.f32.mrf.mxu1  ;;  %v8656_v24 = vadd.f32 %v8655_v58, %v8643_v0 }
 0x50b   : > { %v8669_v62 = vadd.f32 %v8668_v9, %v8656_v24 }
 0x510   : > { %v8681_v61 = vpop.f32.mrf.mxu2  ;;  %v8657_v23 = vpop.f32.mrf.mxu0 }
 0x511   : > { %v8694_v52 = vpop.f32.mrf.mxu3  ;;  %v8670_v36 = vpop.f32.mrf.mxu1  ;;  %v8682_v3 = vadd.f32 %v8681_v61, %v8669_v62 }
 0x513   : > { %v8695_v2 = vadd.f32 %v8694_v52, %v8682_v3 }
 0x518   : > { %v8683_v59 = vpop.f32.mrf.mxu2 }
 0x519   : > { %v8696_v63 = vpop.f32.mrf.mxu3 }
 0x528   : > { %v8707_v54 = vpop.f32.mrf.mxu0 }
 0x529   : > { %v8720_v5 = vpop.f32.mrf.mxu1  ;;  %v8708_v10 = vadd.f32 %v8707_v54, %v8695_v2 }
 0x52b   : > { %v8721_v15 = vadd.f32 %v8720_v5, %v8708_v10 }
 0x530   : > { %v8733_v19 = vpop.f32.mrf.mxu2  ;;  %v8709_v14 = vpop.f32.mrf.mxu0 }
 0x531   : > { %v8734_v20 = vadd.f32 %v8733_v19, %v8721_v15  ;;  %v8746_v4 = vpop.f32.mrf.mxu3  ;;  %v8722_v25 = vpop.f32.mrf.mxu1 }
 0x533   : > { %v8747_v7 = vadd.f32 %v8746_v4, %v8734_v20 }
 0x535   : > { %8750 = vst [vmem:[%s17039_s5] sm:$0xff] %v8747_v7 }
 0x538   : > { %v8735_v50 = vpop.f32.mrf.mxu2 }
 0x539   : > { %v8748_v1 = vpop.f32.mrf.mxu3 }
 0x53a PF: > { %s17_s23 = sadd.s32 1, %s13817_s23   ;;  %s17129_s21 = smov %s13813_s22 }
 0x53b   : > { %p14_p8 = scmp.ge.s32.totalorder %s17_s23, 4   ;;  %s17130_s22 = smov %s17132_s24 }
 0x53d   :  { %16 = sbr.rel (!%p14_p8) target bundleno = 2 (0x2), region = 93 }

</bundles_post_ra>
